<compile_context>
chip_gen: v7x
topology: tpu7x:2x2x1
jax: 0.10.0
libtpu: 0.0.40
codegen_flags: <defaults>
</compile_context>

<pallas_src>
import numpy as np
import jax
import jax.numpy as jnp
from jax.experimental import pallas as pl
from jax.experimental.pallas import tpu as pltpu

TILE_B = 32   # samples per grid step -> 256 sublane rows per tile


def _round_up(n, m):
    return (n + m - 1) // m * m


# --------------------------------------------------------------------------------------
# Host-side banded-weight builders (traceable: pure static-index gathers on the params).
#
# Conv1 LHS row (b, q) holds image rows 4q..4q+3 (112 lanes); its output row holds, in
# four aligned 256-lane blocks (one per 2x2-pool candidate (s, t)), the conv outputs for
# oh = 4q + 2u + s, ow = 2we + t at lane u*120 + we*10 + oc.  Max over the 4 blocks is
# the pooled output, already in conv2's paired-row layout (lane = u*120 + iw*10 + ic).
# Conv2 / fc1 repeat the same construction one level down.
# --------------------------------------------------------------------------------------

def _conv1_banded(w1):
    """w1 (10,1,5,5) torch OIHW -> (2, 112, 1024) banded matrices (f32)."""
    m, row, col = np.meshgrid(np.arange(2), np.arange(112), np.arange(1024), indexing="ij")
    r4, ix = row // 28, row % 28
    st, inner = col // 256, col % 256
    s, t = st // 2, st % 2
    u, we, oc = inner // 120, (inner % 120) // 10, inner % 10
    ky = 4 * m + r4 - 2 * u - s
    kx = ix - 2 * we - t
    valid = (inner < 240) & (ky >= 0) & (ky <= 4) & (kx >= 0) & (kx <= 4)
    flat = (oc * 5 + np.clip(ky, 0, 4)) * 5 + np.clip(kx, 0, 4)
    vals = jnp.reshape(w1[:, 0], (-1,))[flat]
    return jnp.where(jnp.asarray(valid), vals, 0.0)


def _conv2_banded(w2):
    """w2 (20,10,5,5) torch OIHW -> (3, 256, 512) banded matrices (f32)."""
    m, row, col = np.meshgrid(np.arange(3), np.arange(256), np.arange(512), indexing="ij")
    u, iw, ic = row // 120, (row % 120) // 10, row % 10
    st, inner = col // 128, col % 128
    s, t = st // 2, st % 2
    we, oc = inner // 20, inner % 20
    ky = 2 * m + u - s
    kx = iw - 2 * we - t
    valid = (row < 240) & (inner < 80) & (ky >= 0) & (ky <= 4) & (kx >= 0) & (kx <= 4)
    flat = ((oc * 10 + ic) * 5 + np.clip(ky, 0, 4)) * 5 + np.clip(kx, 0, 4)
    vals = jnp.reshape(w2, (-1,))[flat]
    return jnp.where(jnp.asarray(valid), vals, 0.0)


def _fc1_reordered(fc1_w):
    """fc1_w (50,320) -> (1024, 50): row = h2*128 + w2*20 + c2, torch (c,h,w) flatten folded in."""
    r = np.arange(1024)
    j, inner = r // 128, r % 128
    we, oc = inner // 20, inner % 20
    feat = oc * 16 + j * 4 + we
    valid = (j < 4) & (inner < 80)
    vals = fc1_w.T[np.clip(feat, 0, 319)]
    return jnp.where(jnp.asarray(valid)[:, None], vals, 0.0)


def _bias_cols(b, n_cols, block, n_valid, period):
    col = np.arange(n_cols)
    inner = col % block
    return jnp.where(jnp.asarray(inner < n_valid), b[inner % period], 0.0).reshape(1, n_cols)


# --------------------------------------------------------------------------------------
# Kernel
# --------------------------------------------------------------------------------------

def _net_kernel(x_ref, wp_ref, b1_ref, wq_ref, b2_ref,
                fw1_ref, fb1_ref, fw2_ref, fb2_ref, out_ref):
    f32, bf16 = jnp.float32, jnp.bfloat16
    R = x_ref.shape[0]                                   # TILE_B * 8 quad-rows

    # ---- Stage A: conv1 (banded quad-row matmuls) + bias + relu + 2x2 maxpool ----
    xf = x_ref[...]                                      # (R, 112) f32
    x0 = xf.astype(bf16)
    x1 = pltpu.roll(xf, shift=R - 1, axis=0).astype(bf16)    # row j -> quad-row j+1
    y1 = jnp.dot(x0, wp_ref[0], preferred_element_type=f32)
    y1 = y1 + jnp.dot(x1, wp_ref[1], preferred_element_type=f32)
    y1 = jnp.maximum(y1 + b1_ref[...], 0.0)              # (R, 1024)
    # relu/bias commute with the max-pool (monotone, per-channel bias)
    f1 = jnp.maximum(jnp.maximum(y1[:, 0:256], y1[:, 256:512]),
                     jnp.maximum(y1[:, 512:768], y1[:, 768:1024]))   # (R, 256) pooled, zeros in pad lanes

    # ---- Stage B: conv2 (+ Dropout2d: identity in eval) + bias + relu + 2x2 maxpool ----
    # TODO(synk): training-mode Dropout2d / F.dropout (stochastic masking) not implemented.
    f0 = f1.astype(bf16)
    g1 = pltpu.roll(f1, shift=R - 1, axis=0).astype(bf16)
    g2 = pltpu.roll(f1, shift=R - 2, axis=0).astype(bf16)
    y2 = jnp.dot(f0, wq_ref[0], preferred_element_type=f32)
    y2 = y2 + jnp.dot(g1, wq_ref[1], preferred_element_type=f32)
    y2 = y2 + jnp.dot(g2, wq_ref[2], preferred_element_type=f32)
    y2 = jnp.maximum(y2 + b2_ref[...], 0.0)              # (R, 512)
    f2 = jnp.maximum(jnp.maximum(y2[:, 0:128], y2[:, 128:256]),
                     jnp.maximum(y2[:, 256:384], y2[:, 384:512]))    # (R, 128) pooled

    # ---- Stage C: flatten + fc1 + relu + (dropout: identity) + fc2 + log_softmax ----
    # merge each sample's 8 rows (h2=0..3 valid, rest hit zero fw1 rows) into one 1024-lane row
    flat = f2.reshape(R // 8, 8 * 128).astype(bf16)      # (TILE_B, 1024)
    h1 = jnp.dot(flat, fw1_ref[...], preferred_element_type=f32) + fb1_ref[...]
    h1 = jnp.maximum(h1, 0.0).astype(bf16)               # (TILE_B, 50)
    logits = jnp.dot(h1, fw2_ref[...], preferred_element_type=f32) + fb2_ref[...]
    m = jnp.max(logits, axis=-1, keepdims=True)
    lse = m + jnp.log(jnp.sum(jnp.exp(logits - m), axis=-1, keepdims=True))
    out_ref[...] = (logits - lse).astype(out_ref.dtype)


# --------------------------------------------------------------------------------------
# Wrapper
# --------------------------------------------------------------------------------------

def net_forward(x_nchw, params, tile_b=TILE_B):
    """Fused forward pass. `params` is in PyTorch layout (see init_params)."""
    mxu, f32 = jnp.bfloat16, jnp.float32

    wp = _conv1_banded(params["conv1_w"].astype(f32)).astype(mxu)        # (2, 112, 1024)
    b1c = _bias_cols(params["conv1_b"].astype(f32), 1024, 256, 240, 10)  # (1, 1024)
    wq = _conv2_banded(params["conv2_w"].astype(f32)).astype(mxu)        # (3, 256, 512)
    b2c = _bias_cols(params["conv2_b"].astype(f32), 512, 128, 80, 20)    # (1, 512)
    fw1 = _fc1_reordered(params["fc1_w"].astype(f32)).astype(mxu)        # (1024, 50)
    fb1 = params["fc1_b"].reshape(1, 50).astype(f32)
    fw2 = params["fc2_w"].T.astype(mxu)                                  # (50, 10)
    fb2 = params["fc2_b"].reshape(1, 10).astype(f32)

    B = x_nchw.shape[0]
    x = x_nchw.reshape(B, 28, 28).astype(f32)
    Bp = _round_up(B, tile_b)
    if Bp != B:
        x = jnp.pad(x, ((0, Bp - B), (0, 0), (0, 0)))
    # pack 4 image rows per sublane row (112 lanes), 8 quad-rows per sample (last is zero pad)
    xq = jnp.pad(x.reshape(Bp, 7, 112), ((0, 0), (0, 1), (0, 0))).reshape(Bp * 8, 112)

    out = pl.pallas_call(
        _net_kernel,
        out_shape=jax.ShapeDtypeStruct((Bp, 10), jnp.float32),
        grid_spec=pltpu.PrefetchScalarGridSpec(
            num_scalar_prefetch=0,
            grid=(Bp // tile_b,),
            in_specs=[
                pl.BlockSpec((tile_b * 8, 112), lambda i: (i, 0)),        # packed input tile
                pl.BlockSpec((2, 112, 1024), lambda i: (0, 0, 0)),        # conv1 banded weights
                pl.BlockSpec((1, 1024), lambda i: (0, 0)),                # conv1 bias cols
                pl.BlockSpec((3, 256, 512), lambda i: (0, 0, 0)),         # conv2 banded weights
                pl.BlockSpec((1, 512), lambda i: (0, 0)),                 # conv2 bias cols
                pl.BlockSpec((1024, 50), lambda i: (0, 0)),               # fc1 weight (reordered)
                pl.BlockSpec((1, 50), lambda i: (0, 0)),                  # fc1 bias
                pl.BlockSpec((50, 10), lambda i: (0, 0)),                 # fc2 weight
                pl.BlockSpec((1, 10), lambda i: (0, 0)),                  # fc2 bias
            ],
            out_specs=pl.BlockSpec((tile_b, 10), lambda i: (i, 0)),
        ),
        compiler_params=pltpu.CompilerParams(
            dimension_semantics=("parallel",),
            vmem_limit_bytes=32 * 1024 * 1024,
        ),
    )(xq, wp, b1c, wq, b2c, fw1, fb1, fw2, fb2)
    return out[:B]


# --------------------------------------------------------------------------------------
# Plain-JAX reference (torch-layout params) for a self-check.
# --------------------------------------------------------------------------------------

def _net_reference(x, p):
    dn = ("NCHW", "OIHW", "NCHW")
    y = jax.lax.conv_general_dilated(x, p["conv1_w"], (1, 1), "VALID",
                                     dimension_numbers=dn) + p["conv1_b"].reshape(1, 10, 1, 1)
    y = jax.lax.reduce_window(y, -jnp.inf, jax.lax.max, (1, 1, 2, 2), (1, 1, 2, 2), "VALID")
    y = jnp.maximum(y, 0.0)
    y = jax.lax.conv_general_dilated(y, p["conv2_w"], (1, 1), "VALID",
                                     dimension_numbers=dn) + p["conv2_b"].reshape(1, 20, 1, 1)
    y = jax.lax.reduce_window(y, -jnp.inf, jax.lax.max, (1, 1, 2, 2), (1, 1, 2, 2), "VALID")
    y = jnp.maximum(y, 0.0)
    flat = y.reshape(x.shape[0], 320)
    h = jnp.maximum(flat @ p["fc1_w"].T + p["fc1_b"], 0.0)
    logits = h @ p["fc2_w"].T + p["fc2_b"]
    return jax.nn.log_softmax(logits, axis=-1)


def init_params(key):
    """Parameters in the PyTorch module's native layout."""
    ks = jax.random.split(key, 8)

    def u(k, shape, fan_in):
        bound = 1.0 / jnp.sqrt(float(fan_in))
        return jax.random.uniform(k, shape, jnp.float32, -bound, bound)

    return dict(
        conv1_w=u(ks[0], (10, 1, 5, 5), 25), conv1_b=u(ks[1], (10,), 25),
        conv2_w=u(ks[2], (20, 10, 5, 5), 250), conv2_b=u(ks[3], (20,), 250),
        fc1_w=u(ks[4], (50, 320), 320), fc1_b=u(ks[5], (50,), 320),
        fc2_w=u(ks[6], (10, 50), 50), fc2_b=u(ks[7], (10,), 50),
    )


if __name__ == "__main__":
    key = jax.random.PRNGKey(0)
    kx, kp = jax.random.split(key)
    # MNIST-style input implied by .view(-1, 320): 28x28 single-channel, NCHW.
    x = jax.random.normal(kx, (2, 1, 28, 28), jnp.float32)
    params = init_params(kp)

    out = jax.block_until_ready(jax.jit(net_forward)(x, params))

    assert out.shape == (2, 10) and out.dtype == jnp.float32
    # log_softmax rows must exponentiate-sum to 1
    assert bool(jnp.allclose(jnp.sum(jnp.exp(out), axis=-1), 1.0, atol=1e-4))
    # cross-check against a plain-JAX f32 reference (bf16 MXU operands in the kernel)
    ref = _net_reference(x, params)
    assert bool(jnp.allclose(out, ref, atol=0.08)), float(jnp.max(jnp.abs(out - ref)))
    assert bool(jnp.allclose(jnp.exp(out), jnp.exp(ref), atol=0.02))
    print("KERNEL_OK")
</pallas_src>

<mosaic_0001>
module attributes {stable_mosaic.version = 11 : i64} {
  func.func @_net_kernel(%arg0: i32, %arg1: memref<256x112xf32, #tpu.memory_space<vmem>>, %arg2: memref<2x112x1024xbf16, #tpu.memory_space<vmem>>, %arg3: memref<1x1024xf32, #tpu.memory_space<vmem>>, %arg4: memref<3x256x512xbf16, #tpu.memory_space<vmem>>, %arg5: memref<1x512xf32, #tpu.memory_space<vmem>>, %arg6: memref<1024x50xbf16, #tpu.memory_space<vmem>>, %arg7: memref<1x50xf32, #tpu.memory_space<vmem>>, %arg8: memref<50x10xbf16, #tpu.memory_space<vmem>>, %arg9: memref<1x10xf32, #tpu.memory_space<vmem>>, %arg10: memref<32x10xf32, #tpu.memory_space<vmem>>) attributes {dimension_semantics = [#tpu.dimension_semantics<parallel>], iteration_bounds = array<i64: 1>, scalar_prefetch = 0 : i64, scratch_operands = 0 : i64, tpu.core_type = #tpu.core_type<tc>, window_params = [{transform_indices = @transform_0, window_bounds = array<i64: 256, 112>}, {pipeline_mode = #tpu.pipeline_mode<synchronous>, transform_indices = @transform_1, window_bounds = array<i64: 2, 112, 1024>}, {pipeline_mode = #tpu.pipeline_mode<synchronous>, transform_indices = @transform_2, window_bounds = array<i64: 1, 1024>}, {pipeline_mode = #tpu.pipeline_mode<synchronous>, transform_indices = @transform_3, window_bounds = array<i64: 3, 256, 512>}, {pipeline_mode = #tpu.pipeline_mode<synchronous>, transform_indices = @transform_4, window_bounds = array<i64: 1, 512>}, {pipeline_mode = #tpu.pipeline_mode<synchronous>, transform_indices = @transform_5, window_bounds = array<i64: 1024, 50>}, {pipeline_mode = #tpu.pipeline_mode<synchronous>, transform_indices = @transform_6, window_bounds = array<i64: 1, 50>}, {pipeline_mode = #tpu.pipeline_mode<synchronous>, transform_indices = @transform_7, window_bounds = array<i64: 50, 10>}, {pipeline_mode = #tpu.pipeline_mode<synchronous>, transform_indices = @transform_8, window_bounds = array<i64: 1, 10>}, {transform_indices = @transform_9, window_bounds = array<i64: 32, 10>}]} {
    %c0 = arith.constant 0 : index
    %c0_0 = arith.constant 0 : index
    %0 = vector.load %arg1[%c0, %c0_0] : memref<256x112xf32, #tpu.memory_space<vmem>>, vector<256x112xf32>
    %1 = arith.truncf %0 : vector<256x112xf32> to vector<256x112xbf16>
    %c255_i32 = arith.constant 255 : i32
    %2 = tpu.dynamic_rotate %0 by %c255_i32 dim 0 : vector<256x112xf32>, i32 -> vector<256x112xf32>
    %3 = arith.truncf %2 : vector<256x112xf32> to vector<256x112xbf16>
    %c0_1 = arith.constant 0 : index
    %c0_2 = arith.constant 0 : index
    %c0_3 = arith.constant 0 : index
    %4 = vector.load %arg2[%c0_1, %c0_2, %c0_3] : memref<2x112x1024xbf16, #tpu.memory_space<vmem>>, vector<1x112x1024xbf16>
    %5 = vector.shape_cast %4 : vector<1x112x1024xbf16> to vector<112x1024xbf16>
    %cst = arith.constant dense<0.000000e+00> : vector<256x1024xf32>
    %6 = tpu.matmul %1, %5, %cst {dimension_numbers = #tpu.dot_dimension_numbers<[1], [0], [0], [1], [0, 0, 1, 1], [], []>} : vector<256x112xbf16>, vector<112x1024xbf16>, vector<256x1024xf32> -> vector<256x1024xf32>
    %c1 = arith.constant 1 : index
    %c0_4 = arith.constant 0 : index
    %c0_5 = arith.constant 0 : index
    %7 = vector.load %arg2[%c1, %c0_4, %c0_5] : memref<2x112x1024xbf16, #tpu.memory_space<vmem>>, vector<1x112x1024xbf16>
    %8 = vector.shape_cast %7 : vector<1x112x1024xbf16> to vector<112x1024xbf16>
    %cst_6 = arith.constant dense<0.000000e+00> : vector<256x1024xf32>
    %9 = tpu.matmul %3, %8, %cst_6 {dimension_numbers = #tpu.dot_dimension_numbers<[1], [0], [0], [1], [0, 0, 1, 1], [], []>} : vector<256x112xbf16>, vector<112x1024xbf16>, vector<256x1024xf32> -> vector<256x1024xf32>
    %10 = arith.addf %6, %9 : vector<256x1024xf32>
    %c0_7 = arith.constant 0 : index
    %c0_8 = arith.constant 0 : index
    %11 = vector.load %arg3[%c0_7, %c0_8] : memref<1x1024xf32, #tpu.memory_space<vmem>>, vector<1x1024xf32>
    %12 = vector.broadcast %11 : vector<1x1024xf32> to vector<256x1024xf32>
    %13 = arith.addf %10, %12 : vector<256x1024xf32>
    %cst_9 = arith.constant 0.000000e+00 : f32
    %14 = vector.broadcast %cst_9 : f32 to vector<256x1024xf32>
    %15 = arith.maximumf %13, %14 : vector<256x1024xf32>
    %16 = vector.extract_strided_slice %15 {offsets = [0, 0], sizes = [256, 256], strides = [1, 1]} : vector<256x1024xf32> to vector<256x256xf32>
    %17 = vector.extract_strided_slice %15 {offsets = [0, 256], sizes = [256, 256], strides = [1, 1]} : vector<256x1024xf32> to vector<256x256xf32>
    %18 = arith.maximumf %16, %17 : vector<256x256xf32>
    %19 = vector.extract_strided_slice %15 {offsets = [0, 512], sizes = [256, 256], strides = [1, 1]} : vector<256x1024xf32> to vector<256x256xf32>
    %20 = vector.extract_strided_slice %15 {offsets = [0, 768], sizes = [256, 256], strides = [1, 1]} : vector<256x1024xf32> to vector<256x256xf32>
    %21 = arith.maximumf %19, %20 : vector<256x256xf32>
    %22 = arith.maximumf %18, %21 : vector<256x256xf32>
    %23 = arith.truncf %22 : vector<256x256xf32> to vector<256x256xbf16>
    %c255_i32_10 = arith.constant 255 : i32
    %24 = tpu.dynamic_rotate %22 by %c255_i32_10 dim 0 : vector<256x256xf32>, i32 -> vector<256x256xf32>
    %25 = arith.truncf %24 : vector<256x256xf32> to vector<256x256xbf16>
    %c254_i32 = arith.constant 254 : i32
    %26 = tpu.dynamic_rotate %22 by %c254_i32 dim 0 : vector<256x256xf32>, i32 -> vector<256x256xf32>
    %27 = arith.truncf %26 : vector<256x256xf32> to vector<256x256xbf16>
    %c0_11 = arith.constant 0 : index
    %c0_12 = arith.constant 0 : index
    %c0_13 = arith.constant 0 : index
    %28 = vector.load %arg4[%c0_11, %c0_12, %c0_13] : memref<3x256x512xbf16, #tpu.memory_space<vmem>>, vector<1x256x512xbf16>
    %29 = vector.shape_cast %28 : vector<1x256x512xbf16> to vector<256x512xbf16>
    %cst_14 = arith.constant dense<0.000000e+00> : vector<256x512xf32>
    %30 = tpu.matmul %23, %29, %cst_14 {dimension_numbers = #tpu.dot_dimension_numbers<[1], [0], [0], [1], [0, 0, 1, 1], [], []>} : vector<256x256xbf16>, vector<256x512xbf16>, vector<256x512xf32> -> vector<256x512xf32>
    %c1_15 = arith.constant 1 : index
    %c0_16 = arith.constant 0 : index
    %c0_17 = arith.constant 0 : index
    %31 = vector.load %arg4[%c1_15, %c0_16, %c0_17] : memref<3x256x512xbf16, #tpu.memory_space<vmem>>, vector<1x256x512xbf16>
    %32 = vector.shape_cast %31 : vector<1x256x512xbf16> to vector<256x512xbf16>
    %cst_18 = arith.constant dense<0.000000e+00> : vector<256x512xf32>
    %33 = tpu.matmul %25, %32, %cst_18 {dimension_numbers = #tpu.dot_dimension_numbers<[1], [0], [0], [1], [0, 0, 1, 1], [], []>} : vector<256x256xbf16>, vector<256x512xbf16>, vector<256x512xf32> -> vector<256x512xf32>
    %34 = arith.addf %30, %33 : vector<256x512xf32>
    %c2 = arith.constant 2 : index
    %c0_19 = arith.constant 0 : index
    %c0_20 = arith.constant 0 : index
    %35 = vector.load %arg4[%c2, %c0_19, %c0_20] : memref<3x256x512xbf16, #tpu.memory_space<vmem>>, vector<1x256x512xbf16>
    %36 = vector.shape_cast %35 : vector<1x256x512xbf16> to vector<256x512xbf16>
    %cst_21 = arith.constant dense<0.000000e+00> : vector<256x512xf32>
    %37 = tpu.matmul %27, %36, %cst_21 {dimension_numbers = #tpu.dot_dimension_numbers<[1], [0], [0], [1], [0, 0, 1, 1], [], []>} : vector<256x256xbf16>, vector<256x512xbf16>, vector<256x512xf32> -> vector<256x512xf32>
    %38 = arith.addf %34, %37 : vector<256x512xf32>
    %c0_22 = arith.constant 0 : index
    %c0_23 = arith.constant 0 : index
    %39 = vector.load %arg5[%c0_22, %c0_23] : memref<1x512xf32, #tpu.memory_space<vmem>>, vector<1x512xf32>
    %40 = vector.broadcast %39 : vector<1x512xf32> to vector<256x512xf32>
    %41 = arith.addf %38, %40 : vector<256x512xf32>
    %cst_24 = arith.constant 0.000000e+00 : f32
    %42 = vector.broadcast %cst_24 : f32 to vector<256x512xf32>
    %43 = arith.maximumf %41, %42 : vector<256x512xf32>
    %44 = vector.extract_strided_slice %43 {offsets = [0, 0], sizes = [256, 128], strides = [1, 1]} : vector<256x512xf32> to vector<256x128xf32>
    %45 = vector.extract_strided_slice %43 {offsets = [0, 128], sizes = [256, 128], strides = [1, 1]} : vector<256x512xf32> to vector<256x128xf32>
    %46 = arith.maximumf %44, %45 : vector<256x128xf32>
    %47 = vector.extract_strided_slice %43 {offsets = [0, 256], sizes = [256, 128], strides = [1, 1]} : vector<256x512xf32> to vector<256x128xf32>
    %48 = vector.extract_strided_slice %43 {offsets = [0, 384], sizes = [256, 128], strides = [1, 1]} : vector<256x512xf32> to vector<256x128xf32>
    %49 = arith.maximumf %47, %48 : vector<256x128xf32>
    %50 = arith.maximumf %46, %49 : vector<256x128xf32>
    %51 = vector.shape_cast %50 : vector<256x128xf32> to vector<32x1024xf32>
    %52 = arith.truncf %51 : vector<32x1024xf32> to vector<32x1024xbf16>
    %c0_25 = arith.constant 0 : index
    %c0_26 = arith.constant 0 : index
    %53 = vector.load %arg6[%c0_25, %c0_26] : memref<1024x50xbf16, #tpu.memory_space<vmem>>, vector<1024x50xbf16>
    %cst_27 = arith.constant dense<0.000000e+00> : vector<32x50xf32>
    %54 = tpu.matmul %52, %53, %cst_27 {dimension_numbers = #tpu.dot_dimension_numbers<[1], [0], [0], [1], [0, 0, 1, 1], [], []>} : vector<32x1024xbf16>, vector<1024x50xbf16>, vector<32x50xf32> -> vector<32x50xf32>
    %c0_28 = arith.constant 0 : index
    %c0_29 = arith.constant 0 : index
    %55 = vector.load %arg7[%c0_28, %c0_29] : memref<1x50xf32, #tpu.memory_space<vmem>>, vector<1x50xf32>
    %56 = vector.broadcast %55 : vector<1x50xf32> to vector<32x50xf32>
    %57 = arith.addf %54, %56 : vector<32x50xf32>
    %cst_30 = arith.constant 0.000000e+00 : f32
    %58 = vector.broadcast %cst_30 : f32 to vector<32x50xf32>
    %59 = arith.maximumf %57, %58 : vector<32x50xf32>
    %60 = arith.truncf %59 : vector<32x50xf32> to vector<32x50xbf16>
    %c0_31 = arith.constant 0 : index
    %c0_32 = arith.constant 0 : index
    %61 = vector.load %arg8[%c0_31, %c0_32] : memref<50x10xbf16, #tpu.memory_space<vmem>>, vector<50x10xbf16>
    %cst_33 = arith.constant dense<0.000000e+00> : vector<32x10xf32>
    %62 = tpu.matmul %60, %61, %cst_33 {dimension_numbers = #tpu.dot_dimension_numbers<[1], [0], [0], [1], [0, 0, 1, 1], [], []>} : vector<32x50xbf16>, vector<50x10xbf16>, vector<32x10xf32> -> vector<32x10xf32>
    %c0_34 = arith.constant 0 : index
    %c0_35 = arith.constant 0 : index
    %63 = vector.load %arg9[%c0_34, %c0_35] : memref<1x10xf32, #tpu.memory_space<vmem>>, vector<1x10xf32>
    %64 = vector.broadcast %63 : vector<1x10xf32> to vector<32x10xf32>
    %65 = arith.addf %62, %64 : vector<32x10xf32>
    %cst_36 = arith.constant dense<0xFF800000> : vector<32xf32>
    %66 = vector.multi_reduction <maximumf>, %65, %cst_36 [1] : vector<32x10xf32> to vector<32xf32>
    %67 = vector.shape_cast %66 : vector<32xf32> to vector<32x1xf32>
    %68 = vector.broadcast %67 : vector<32x1xf32> to vector<32x10xf32>
    %69 = arith.subf %65, %68 : vector<32x10xf32>
    %70 = math.exp %69 : vector<32x10xf32>
    %cst_37 = arith.constant dense<0.000000e+00> : vector<32xf32>
    %71 = vector.multi_reduction <add>, %70, %cst_37 [1] : vector<32x10xf32> to vector<32xf32>
    %72 = vector.shape_cast %71 : vector<32xf32> to vector<32x1xf32>
    %73 = math.log %72 : vector<32x1xf32>
    %74 = arith.addf %67, %73 : vector<32x1xf32>
    %75 = vector.broadcast %74 : vector<32x1xf32> to vector<32x10xf32>
    %76 = arith.subf %65, %75 : vector<32x10xf32>
    %c0_38 = arith.constant 0 : index
    %c0_39 = arith.constant 0 : index
    %77 = vector.load %arg10[%c0_38, %c0_39] : memref<32x10xf32, #tpu.memory_space<vmem>>, vector<32x10xf32>
    tpu.vector_store %arg10[%c0_38, %c0_39], %76 {strides = array<i32>} : memref<32x10xf32, #tpu.memory_space<vmem>>, vector<32x10xf32>,
    return
  }
  func.func @transform_0(%arg0: i32) -> (i32, i32) {
    %c0_i32 = arith.constant 0 : i32
    %c0_i32_0 = arith.constant 0 : i32
    return %arg0, %c0_i32 : i32, i32
  }
  func.func @transform_1(%arg0: i32) -> (i32, i32, i32) {
    %c0_i32 = arith.constant 0 : i32
    %c0_i32_0 = arith.constant 0 : i32
    %c0_i32_1 = arith.constant 0 : i32
    %c0_i32_2 = arith.constant 0 : i32
    return %c0_i32, %c0_i32_0, %c0_i32_1 : i32, i32, i32
  }
  func.func @transform_2(%arg0: i32) -> (i32, i32) {
    %c0_i32 = arith.constant 0 : i32
    %c0_i32_0 = arith.constant 0 : i32
    %c0_i32_1 = arith.constant 0 : i32
    return %c0_i32, %c0_i32_0 : i32, i32
  }
  func.func @transform_3(%arg0: i32) -> (i32, i32, i32) {
    %c0_i32 = arith.constant 0 : i32
    %c0_i32_0 = arith.constant 0 : i32
    %c0_i32_1 = arith.constant 0 : i32
    %c0_i32_2 = arith.constant 0 : i32
    return %c0_i32, %c0_i32_0, %c0_i32_1 : i32, i32, i32
  }
  func.func @transform_4(%arg0: i32) -> (i32, i32) {
    %c0_i32 = arith.constant 0 : i32
    %c0_i32_0 = arith.constant 0 : i32
    %c0_i32_1 = arith.constant 0 : i32
    return %c0_i32, %c0_i32_0 : i32, i32
  }
  func.func @transform_5(%arg0: i32) -> (i32, i32) {
    %c0_i32 = arith.constant 0 : i32
    %c0_i32_0 = arith.constant 0 : i32
    %c0_i32_1 = arith.constant 0 : i32
    return %c0_i32, %c0_i32_0 : i32, i32
  }
  func.func @transform_6(%arg0: i32) -> (i32, i32) {
    %c0_i32 = arith.constant 0 : i32
    %c0_i32_0 = arith.constant 0 : i32
    %c0_i32_1 = arith.constant 0 : i32
    return %c0_i32, %c0_i32_0 : i32, i32
  }
  func.func @transform_7(%arg0: i32) -> (i32, i32) {
    %c0_i32 = arith.constant 0 : i32
    %c0_i32_0 = arith.constant 0 : i32
    %c0_i32_1 = arith.constant 0 : i32
    return %c0_i32, %c0_i32_0 : i32, i32
  }
  func.func @transform_8(%arg0: i32) -> (i32, i32) {
    %c0_i32 = arith.constant 0 : i32
    %c0_i32_0 = arith.constant 0 : i32
    %c0_i32_1 = arith.constant 0 : i32
    return %c0_i32, %c0_i32_0 : i32, i32
  }
  func.func @transform_9(%arg0: i32) -> (i32, i32) {
    %c0_i32 = arith.constant 0 : i32
    %c0_i32_0 = arith.constant 0 : i32
    return %arg0, %c0_i32 : i32, i32
  }
}

</mosaic_0001>

<bundles_post_ra>
// kernel: squeeze.1
= control target key start
LH: loop header
LB: loop body
LE: loop exit
PB: predicated region body
PF: predicated region fallthrough
CT: control target
= control target key end

     0   :  { %s589_s16 = smov 117   ;;  %s590_s17 = smov 112   ;;  %vm168_vm0 = vcmask 23552   ;;  %vm162_vm1 = vcmask 39936   ;;  %vm172_vm2 = vcmask 15360   ;;  %vm175_vm3 = vcmask 1048552   ;;  %s666_s0 = inlined_call_operand.vmem [shape: bf16[10,1,5,5], index: 0, kind: input, shape index: {}]   ;;  %s667_s1 = inlined_call_operand.vmem [shape: bf16[250], index: 1, kind: output, shape index: {}]  }
   0x1   :  { %v536_v0 = vld [vmem:[%s666_s0 + $0x10] sm:$0xff]   ;;  %v534_v1 = vld [vmem:[%s666_s0 + $0x20] sm:$0xff]   ;;  %v537_v2 = vld [vmem:[%s666_s0 + $0x8] sm:$0xff]   ;;  %s591_s18 = smov 115   ;;  %s592_s19 = smov 107   ;;  %vm181_vm4 = vcmask 1023936  }
   0x2   :  { %v524_v3 = vunpack.c.l.bf16 %v536_v0  ;;  %v517_v4 = vunpack.c.h.bf16 %v534_v1  ;;  %v525_v5 = vunpack.c.h.bf16 %v536_v0  ;;  %v529_v6 = vunpack.c.h.bf16 %v537_v2  ;;  %v535_v7 = vld [vmem:[%s666_s0 + $0x18] sm:$0xff]   ;;  %v531_v8 = vld [vmem:[%s666_s0] sm:$0xff]   ;;  %s588_s0 = smov 120   ;;  %s593_s20 = smov 110  }
   0x3   :  { %v516_v9 = vunpack.c.l.bf16 %v534_v1  ;;  %v528_v10 = vunpack.c.l.bf16 %v537_v2  ;;  %v521_v11 = vunpack.c.h.bf16 %v535_v7  ;;  %v533_v12 = vunpack.c.h.bf16 %v531_v8  ;;  %s594_s21 = smov 125   ;;  %s595_s22 = smov 105  }
   0x4   :  { %100 = vst [vmem:[#allocation1 + $0x20] sm:$0xff] %v524_v3  ;;  %20 = vst [vmem:[#allocation1 + $0x48] sm:$0xff] %v517_v4  ;;  %v520_v13 = vunpack.c.l.bf16 %v535_v7  ;;  %v532_v14 = vunpack.c.l.bf16 %v531_v8  ;;  %s596_s23 = smov 102   ;;  %s597_s24 = smov 100   ;;  %vm187_vm5 = vcmask 999336   ;;  %vm200_vm6 = vcmask 958336  }
   0x5   :  { %84 = vst [vmem:[#allocation1 + $0x28] sm:$0xff] %v525_v5  ;;  %116 = vst [vmem:[#allocation1 + $0x18] sm:$0xff] %v529_v6  ;;  %s598_s25 = smov 97   ;;  %s599_s26 = smov 95   ;;  %vm194_vm7 = vcmask 982936   ;;  %vm213_vm8 = vcmask 917336  }
   0x6   :  { %36 = vst [vmem:[#allocation1 + $0x40] sm:$0xff] %v516_v9  ;;  %132 = vst [vmem:[#allocation1 + $0x10] sm:$0xff] %v528_v10  ;;  %s600_s27 = smov 92   ;;  %s601_s28 = smov 90   ;;  %vm207_vm9 = vcmask 941936   ;;  %vm226_vm10 = vcmask 876336  }
   0x7   :  { %52 = vst [vmem:[#allocation1 + $0x38] sm:$0xff] %v521_v11  ;;  %147 = vst [vmem:[#allocation1 + $0x8] sm:$0xff] %v533_v12  ;;  %s602_s29 = smov 87   ;;  %s603_s30 = smov 85   ;;  %vm220_vm11 = vcmask 900936   ;;  %vm233_vm12 = vcmask 859936  }
   0x8   :  { %68 = vst [vmem:[#allocation1 + $0x30] sm:$0xff] %v520_v13  ;;  %160 = vst [vmem:[#allocation1] sm:$0xff] %v532_v14  ;;  %s604_s2 = smov 82   ;;  %s605_s3 = smov 80   ;;  %vm239_vm13 = vcmask 835336   ;;  %vm246_vm14 = vcmask 818936  }
   0x9   :  { %s606_s4 = smov 77   ;;  %s607_s5 = smov 75   ;;  %vm252_vm15 = vcmask 794336  }
   0xa   :  { %s608_s6 = smov 72   ;;  %s609_s7 = smov 70  }
   0xb   :  { %v178_v15 = vld [vmem:[#allocation1 + $0x24] sm:$0x1]   ;;  %v184_v16 = vld [vmem:[#allocation1 + $0x4c] sm:$0x1]   ;;  %v197_v17 = vld [vmem:[#allocation1 + $0x4b] sm:$0x1]  }
   0xc   :  { %179 = vrot.lane.b32.xlu0 %v178_v15, %s588_s0  ;;  %185 = vrot.lane.b32.xlu1 %v184_v16, %s589_s16  ;;  %v191_v18 = vld [vmem:[#allocation1 + $0x23] sm:$0x1]   ;;  %v210_v19 = vld [vmem:[#allocation1 + $0x4a] sm:$0x1]   ;;  %v204_v20 = vld [vmem:[#allocation1 + $0x22] sm:$0x1]  }
   0xd   :  { %v165_v21 = vld [vmem:[#allocation1 + $0x28] sm:$0x1]   ;;  %v217_v24 = vld [vmem:[#allocation1 + $0x21] sm:$0x1]   ;;  %v223_v25 = vld [vmem:[#allocation1 + $0x49] sm:$0x1]  }
   0xe   :  { %v167_v22 = vld [vmem:[#allocation1 + $0x28] sm:$0x1]   ;;  %v230_v26 = vld [vmem:[#allocation1 + $0x20] sm:$0x1]   ;;  %v243_v28 = vld [vmem:[#allocation1 + $0x1c] sm:$0x1]  }
   0xf   :  { %v169_v23 = vsel %vm168_vm0, %v167_v22, %v165_v21  ;;  %v236_v27 = vld [vmem:[#allocation1 + $0x48] sm:$0x1]   ;;  %v161_v29 = vld [vmem:[#allocation1] sm:$0x1]   ;;  %v249_v30 = vld [vmem:[#allocation1 + $0x44] sm:$0x1]  }
  0x10   :  { %198 = vrot.lane.b32.xlu0 %v197_v17, %s590_s17  ;;  %192 = vrot.lane.b32.xlu1 %v191_v18, %s591_s18  ;;  %v256_v31 = vld [vmem:[#allocation1 + $0x1b] sm:$0x1]   ;;  %163 = vst.msk [vmem:[#allocation0] sm:$0x1] %vm162_vm1, %v161_v29   ;;  %v262_v32 = vld [vmem:[#allocation1 + $0x43] sm:$0x1]  }
  0x11   :  { %v269_v33 = vld [vmem:[#allocation1 + $0x1a] sm:$0x1]   ;;  %v275_v34 = vld [vmem:[#allocation1 + $0x42] sm:$0x1]   ;;  %v282_v35 = vld [vmem:[#allocation1 + $0x19] sm:$0x1]  }
  0x12   :  { %v288_v36 = vld [vmem:[#allocation1 + $0x41] sm:$0x1]   ;;  %v295_v37 = vld [vmem:[#allocation1 + $0x18] sm:$0x1]   ;;  %v301_v38 = vld [vmem:[#allocation1 + $0x40] sm:$0x1]  }
  0x13   :  { %v308_v39 = vld [vmem:[#allocation1 + $0x14] sm:$0x1]   ;;  %v314_v40 = vld [vmem:[#allocation1 + $0x3c] sm:$0x1]   ;;  %v321_v41 = vld [vmem:[#allocation1 + $0x13] sm:$0x1]  }
  0x14   :  { %211 = vrot.lane.b32.xlu0 %v210_v19, %s592_s19  ;;  %205 = vrot.lane.b32.xlu1 %v204_v20, %s593_s20  ;;  %s610_s8 = smov 67   ;;  %s611_s9 = smov 65   ;;  %v327_v42 = vld [vmem:[#allocation1 + $0x3b] sm:$0x1]   ;;  %v334_v43 = vld [vmem:[#allocation1 + $0x12] sm:$0x1]  }
  0x15   :  { %s612_s10 = smov 62   ;;  %s613_s11 = smov 60   ;;  %v340_v44 = vld [vmem:[#allocation1 + $0x3a] sm:$0x1]   ;;  %v347_v45 = vld [vmem:[#allocation1 + $0x11] sm:$0x1]  }
  0x16   :  { %s614_s12 = smov 57   ;;  %s615_s13 = smov 55   ;;  %v353_v46 = vld [vmem:[#allocation1 + $0x39] sm:$0x1]   ;;  %v360_v47 = vld [vmem:[#allocation1 + $0x10] sm:$0x1]  }
  0x17   :  { %s616_s14 = smov 52   ;;  %s617_s15 = smov 50   ;;  %v366_v48 = vld [vmem:[#allocation1 + $0x38] sm:$0x1]   ;;  %v373_v49 = vld [vmem:[#allocation1 + $0xc] sm:$0x1]  }
  0x18   :  { %170 = vrot.lane.b32.xlu0 %v169_v23, %s594_s21  ;;  %218 = vrot.lane.b32.xlu1 %v217_v24, %s595_s22  ;;  %s618_s0 = smov 47   ;;  %s619_s16 = smov 45   ;;  %v379_v50 = vld [vmem:[#allocation1 + $0x34] sm:$0x1]   ;;  %v386_v51 = vld [vmem:[#allocation1 + $0xb] sm:$0x1]  }
  0x19   :  { %s620_s17 = smov 42   ;;  %s621_s18 = smov 40   ;;  %v392_v52 = vld [vmem:[#allocation1 + $0x33] sm:$0x1]   ;;  %v399_v53 = vld [vmem:[#allocation1 + $0xa] sm:$0x1]  }
  0x1a   :  { %s622_s19 = smov 37   ;;  %s623_s20 = smov 35   ;;  %v405_v54 = vld [vmem:[#allocation1 + $0x32] sm:$0x1]   ;;  %v412_v55 = vld [vmem:[#allocation1 + $0x9] sm:$0x1]  }
  0x1b   :  { %s624_s21 = smov 32   ;;  %s625_s22 = smov 30   ;;  %v418_v56 = vld [vmem:[#allocation1 + $0x31] sm:$0x1]   ;;  %v425_v57 = vld [vmem:[#allocation1 + $0x8] sm:$0x1]  }
  0x1c   :  { %224 = vrot.lane.b32.xlu0 %v223_v25, %s596_s23  ;;  %231 = vrot.lane.b32.xlu1 %v230_v26, %s597_s24  ;;  %s626_s23 = smov 27   ;;  %s627_s24 = smov 25   ;;  %v431_v58 = vld [vmem:[#allocation1 + $0x30] sm:$0x1]   ;;  %v438_v59 = vld [vmem:[#allocation1 + $0x4] sm:$0x1]  }
  0x1d   :  { %v444_v60 = vld [vmem:[#allocation1 + $0x2c] sm:$0x1]   ;;  %v451_v61 = vld [vmem:[#allocation1 + $0x3] sm:$0x1]   ;;  %v457_v62 = vld [vmem:[#allocation1 + $0x2b] sm:$0x1]  }
  0x1e   :  { %v464_v63 = vld [vmem:[#allocation1 + $0x2] sm:$0x1]   ;;  %v470_v0 = vld [vmem:[#allocation1 + $0x2a] sm:$0x1]   ;;  %v477_v1 = vld [vmem:[#allocation1 + $0x1] sm:$0x1]  }
  0x1f   :  { %v483_v2 = vld [vmem:[#allocation1 + $0x29] sm:$0x1]   ;;  %vm259_vm0 = vcmask 777936   ;;  %vm265_vm1 = vcmask 753336  }
  0x20   :  { %237 = vrot.lane.b32.xlu0 %v236_v27, %s598_s25  ;;  %244 = vrot.lane.b32.xlu1 %v243_v28, %s599_s26  ;;  %s628_s25 = smov 22   ;;  %s629_s26 = smov 20  }
  0x24   :  { %250 = vrot.lane.b32.xlu0 %v249_v30, %s600_s27  ;;  %257 = vrot.lane.b32.xlu1 %v256_v31, %s601_s28  ;;  %s630_s27 = smov 17   ;;  %s631_s28 = smov 15  }
  0x28   :  { %263 = vrot.lane.b32.xlu0 %v262_v32, %s602_s29  ;;  %270 = vrot.lane.b32.xlu1 %v269_v33, %s603_s30  ;;  %s632_s29 = smov 12   ;;  %s633_s30 = smov 10  }
  0x2c   :  { %276 = vrot.lane.b32.xlu0 %v275_v34, %s604_s2  ;;  %283 = vrot.lane.b32.xlu1 %v282_v35, %s605_s3  ;;  %s634_s2 = smov 7   ;;  %s635_s3 = smov 5  }
  0x30   :  { %289 = vrot.lane.b32.xlu0 %v288_v36, %s606_s4  ;;  %296 = vrot.lane.b32.xlu1 %v295_v37, %s607_s5  ;;  %s636_s4 = smov 2  }
  0x34   :  { %302 = vrot.lane.b32.xlu0 %v301_v38, %s608_s6  ;;  %309 = vrot.lane.b32.xlu1 %v308_v39, %s609_s7 }
  0x38   :  { %315 = vrot.lane.b32.xlu0 %v314_v40, %s610_s8  ;;  %322 = vrot.lane.b32.xlu1 %v321_v41, %s611_s9 }
  0x3c   :  { %328 = vrot.lane.b32.xlu0 %v327_v42, %s612_s10  ;;  %335 = vrot.lane.b32.xlu1 %v334_v43, %s613_s11 }
  0x40   :  { %341 = vrot.lane.b32.xlu0 %v340_v44, %s614_s12  ;;  %348 = vrot.lane.b32.xlu1 %v347_v45, %s615_s13 }
  0x44   :  { %354 = vrot.lane.b32.xlu0 %v353_v46, %s616_s14  ;;  %361 = vrot.lane.b32.xlu1 %v360_v47, %s617_s15 }
  0x48   :  { %367 = vrot.lane.b32.xlu0 %v366_v48, %s618_s0  ;;  %374 = vrot.lane.b32.xlu1 %v373_v49, %s619_s16 }
  0x4c   :  { %380 = vrot.lane.b32.xlu0 %v379_v50, %s620_s17  ;;  %387 = vrot.lane.b32.xlu1 %v386_v51, %s621_s18 }
  0x50   :  { %393 = vrot.lane.b32.xlu0 %v392_v52, %s622_s19  ;;  %400 = vrot.lane.b32.xlu1 %v399_v53, %s623_s20  ;;  %v637_v53 = vmov 0.0  }
  0x54   :  { %406 = vrot.lane.b32.xlu0 %v405_v54, %s624_s21  ;;  %413 = vrot.lane.b32.xlu1 %v412_v55, %s625_s22 }
  0x58   :  { %419 = vrot.lane.b32.xlu0 %v418_v56, %s626_s23  ;;  %426 = vrot.lane.b32.xlu1 %v425_v57, %s627_s24 }
  0x5c   :  { %432 = vrot.lane.b32.xlu0 %v431_v58, %s628_s25  ;;  %439 = vrot.lane.b32.xlu1 %v438_v59, %s629_s26 }
  0x60   :  { %445 = vrot.lane.b32.xlu0 %v444_v60, %s630_s27  ;;  %452 = vrot.lane.b32.xlu1 %v451_v61, %s631_s28 }
  0x64   :  { %458 = vrot.lane.b32.xlu0 %v457_v62, %s632_s29  ;;  %465 = vrot.lane.b32.xlu1 %v464_v63, %s633_s30 }
  0x68   :  { %471 = vrot.lane.b32.xlu0 %v470_v0, %s634_s2  ;;  %478 = vrot.lane.b32.xlu1 %v477_v1, %s635_s3 }
  0x6c   :  { %484 = vrot.lane.b32.xlu0 %v483_v2, %s636_s4 }
  0x7e   :  { %v180_v3 = vpop.permute.xlu0 %179   ;;  %v186_v4 = vpop.permute.xlu1 %185  }
  0x82   :  { %v199_v5 = vpop.permute.xlu0 %198   ;;  %v193_v6 = vpop.permute.xlu1 %192  }
  0x86   :  { %v212_v7 = vpop.permute.xlu0 %211   ;;  %v206_v8 = vpop.permute.xlu1 %205  }
  0x8a   :  { %v171_v9 = vpop.permute.xlu0 %170   ;;  %v219_v10 = vpop.permute.xlu1 %218  }
  0x8b   :  { %174 = vst.msk [vmem:[#allocation0 + $0x1] sm:$0x1] %vm172_vm2, %v171_v9   ;;  %vm272_vm2 = vcmask 736936  }
  0x8c   :  { %176 = vst.msk [vmem:[#allocation0] sm:$0x1] %vm175_vm3, %v171_v9   ;;  %vm278_vm3 = vcmask 712336  }
  0x8d   :  { %182 = vst.msk [vmem:[#allocation0] sm:$0x1] %vm181_vm4, %v180_v3   ;;  %vm285_vm4 = vcmask 695936  }
  0x8e   :  { %189 = vst.msk [vmem:[#allocation0 + $0x1] sm:$0x1] %vm187_vm5, %v186_v4   ;;  %v225_v11 = vpop.permute.xlu0 %224   ;;  %v232_v12 = vpop.permute.xlu1 %231   ;;  %vm291_vm5 = vcmask 671336  }
  0x8f   :  { %195 = vst.msk [vmem:[#allocation0] sm:$0x1] %vm194_vm7, %v193_v6   ;;  %vm304_vm7 = vcmask 630336  }
  0x90   :  { %202 = vst.msk [vmem:[#allocation0 + $0x1] sm:$0x1] %vm200_vm6, %v199_v5   ;;  %vm298_vm6 = vcmask 654936  }
  0x91   :  { %208 = vst.msk [vmem:[#allocation0] sm:$0x1] %vm207_vm9, %v206_v8   ;;  %vm317_vm9 = vcmask 589336  }
  0x92   :  { %215 = vst.msk [vmem:[#allocation0 + $0x1] sm:$0x1] %vm213_vm8, %v212_v7   ;;  %v238_v13 = vpop.permute.xlu0 %237   ;;  %v245_v14 = vpop.permute.xlu1 %244   ;;  %vm311_vm8 = vcmask 613936  }
  0x93   :  { %228 = vst.msk [vmem:[#allocation0 + $0x1] sm:$0x1] %vm226_vm10, %v225_v11   ;;  %vm324_vm10 = vcmask 572936  }
  0x94   :  { %221 = vst.msk [vmem:[#allocation0] sm:$0x1] %vm220_vm11, %v219_v10   ;;  %vm330_vm11 = vcmask 548336  }
  0x95   :  { %234 = vst.msk [vmem:[#allocation0] sm:$0x1] %vm233_vm12, %v232_v12   ;;  %vm337_vm12 = vcmask 531936  }
  0x96   :  { %241 = vst.msk [vmem:[#allocation0 + $0x1] sm:$0x1] %vm239_vm13, %v238_v13   ;;  %v251_v15 = vpop.permute.xlu0 %250   ;;  %v258_v16 = vpop.permute.xlu1 %257   ;;  %vm343_vm13 = vcmask 507336  }
  0x97   :  { %247 = vst.msk [vmem:[#allocation0] sm:$0x1] %vm246_vm14, %v245_v14   ;;  %vm350_vm14 = vcmask 490936  }
  0x98   :  { %254 = vst.msk [vmem:[#allocation0 + $0x1] sm:$0x1] %vm252_vm15, %v251_v15   ;;  %vm356_vm15 = vcmask 466336  }
  0x99   :  { %260 = vst.msk [vmem:[#allocation0] sm:$0x1] %vm259_vm0, %v258_v16   ;;  %vm363_vm0 = vcmask 449936  }
  0x9a   :  { %v264_v17 = vpop.permute.xlu0 %263   ;;  %v271_v18 = vpop.permute.xlu1 %270  }
  0x9b   :  { %267 = vst.msk [vmem:[#allocation0 + $0x1] sm:$0x1] %vm265_vm1, %v264_v17   ;;  %vm369_vm1 = vcmask 425336  }
  0x9c   :  { %273 = vst.msk [vmem:[#allocation0] sm:$0x1] %vm272_vm2, %v271_v18   ;;  %vm376_vm2 = vcmask 408936  }
  0x9e   :  { %v277_v19 = vpop.permute.xlu0 %276   ;;  %v284_v20 = vpop.permute.xlu1 %283  }
  0x9f   :  { %280 = vst.msk [vmem:[#allocation0 + $0x1] sm:$0x1] %vm278_vm3, %v277_v19   ;;  %vm382_vm3 = vcmask 384336  }
  0xa0   :  { %286 = vst.msk [vmem:[#allocation0] sm:$0x1] %vm285_vm4, %v284_v20   ;;  %vm389_vm4 = vcmask 367936  }
  0xa2   :  { %v290_v21 = vpop.permute.xlu0 %289   ;;  %v297_v22 = vpop.permute.xlu1 %296  }
  0xa3   :  { %293 = vst.msk [vmem:[#allocation0 + $0x1] sm:$0x1] %vm291_vm5, %v290_v21   ;;  %vm395_vm5 = vcmask 343336  }
  0xa4   :  { %299 = vst.msk [vmem:[#allocation0] sm:$0x1] %vm298_vm6, %v297_v22   ;;  %vm402_vm6 = vcmask 326936  }
  0xa6   :  { %v303_v23 = vpop.permute.xlu0 %302   ;;  %v310_v24 = vpop.permute.xlu1 %309  }
  0xa7   :  { %306 = vst.msk [vmem:[#allocation0 + $0x1] sm:$0x1] %vm304_vm7, %v303_v23   ;;  %vm408_vm7 = vcmask 302336  }
  0xa8   :  { %312 = vst.msk [vmem:[#allocation0] sm:$0x1] %vm311_vm8, %v310_v24   ;;  %vm415_vm8 = vcmask 285936  }
  0xaa   :  { %v316_v25 = vpop.permute.xlu0 %315   ;;  %v323_v26 = vpop.permute.xlu1 %322  }
  0xab   :  { %319 = vst.msk [vmem:[#allocation0 + $0x1] sm:$0x1] %vm317_vm9, %v316_v25   ;;  %vm421_vm9 = vcmask 261336  }
  0xac   :  { %325 = vst.msk [vmem:[#allocation0] sm:$0x1] %vm324_vm10, %v323_v26   ;;  %vm428_vm10 = vcmask 244936  }
  0xae   :  { %v329_v27 = vpop.permute.xlu0 %328   ;;  %v336_v28 = vpop.permute.xlu1 %335  }
  0xaf   :  { %332 = vst.msk [vmem:[#allocation0 + $0x1] sm:$0x1] %vm330_vm11, %v329_v27   ;;  %vm434_vm11 = vcmask 220336  }
  0xb0   :  { %338 = vst.msk [vmem:[#allocation0] sm:$0x1] %vm337_vm12, %v336_v28   ;;  %vm441_vm12 = vcmask 203936  }
  0xb2   :  { %v342_v29 = vpop.permute.xlu0 %341   ;;  %v349_v30 = vpop.permute.xlu1 %348  }
  0xb3   :  { %345 = vst.msk [vmem:[#allocation0 + $0x1] sm:$0x1] %vm343_vm13, %v342_v29   ;;  %vm447_vm13 = vcmask 179336  }
  0xb4   :  { %351 = vst.msk [vmem:[#allocation0] sm:$0x1] %vm350_vm14, %v349_v30   ;;  %vm454_vm14 = vcmask 162936  }
  0xb6   :  { %v355_v31 = vpop.permute.xlu0 %354   ;;  %v362_v32 = vpop.permute.xlu1 %361  }
  0xb7   :  { %358 = vst.msk [vmem:[#allocation0 + $0x1] sm:$0x1] %vm356_vm15, %v355_v31   ;;  %vm460_vm15 = vcmask 138336  }
  0xb8   :  { %364 = vst.msk [vmem:[#allocation0] sm:$0x1] %vm363_vm0, %v362_v32   ;;  %vm467_vm0 = vcmask 121936  }
  0xba   :  { %v368_v33 = vpop.permute.xlu0 %367   ;;  %v375_v34 = vpop.permute.xlu1 %374  }
  0xbb   :  { %371 = vst.msk [vmem:[#allocation0 + $0x1] sm:$0x1] %vm369_vm1, %v368_v33   ;;  %vm473_vm1 = vcmask 97336  }
  0xbc   :  { %377 = vst.msk [vmem:[#allocation0] sm:$0x1] %vm376_vm2, %v375_v34   ;;  %vm480_vm2 = vcmask 80936  }
  0xbe   :  { %v381_v35 = vpop.permute.xlu0 %380   ;;  %v388_v36 = vpop.permute.xlu1 %387  }
  0xbf   :  { %384 = vst.msk [vmem:[#allocation0 + $0x1] sm:$0x1] %vm382_vm3, %v381_v35   ;;  %vm486_vm3 = vcmask 56336  }
  0xc0   :  { %390 = vst.msk [vmem:[#allocation0] sm:$0x1] %vm389_vm4, %v388_v36  }
  0xc2   :  { %v394_v37 = vpop.permute.xlu0 %393   ;;  %v401_v38 = vpop.permute.xlu1 %400  }
  0xc3   :  { %397 = vst.msk [vmem:[#allocation0 + $0x1] sm:$0x1] %vm395_vm5, %v394_v37  }
  0xc4   :  { %403 = vst.msk [vmem:[#allocation0] sm:$0x1] %vm402_vm6, %v401_v38  }
  0xc6   :  { %v407_v39 = vpop.permute.xlu0 %406   ;;  %v414_v40 = vpop.permute.xlu1 %413  }
  0xc7   :  { %410 = vst.msk [vmem:[#allocation0 + $0x1] sm:$0x1] %vm408_vm7, %v407_v39  }
  0xc8   :  { %416 = vst.msk [vmem:[#allocation0] sm:$0x1] %vm415_vm8, %v414_v40  }
  0xca   :  { %v420_v41 = vpop.permute.xlu0 %419   ;;  %v427_v42 = vpop.permute.xlu1 %426  }
  0xcb   :  { %423 = vst.msk [vmem:[#allocation0 + $0x1] sm:$0x1] %vm421_vm9, %v420_v41  }
  0xcc   :  { %429 = vst.msk [vmem:[#allocation0] sm:$0x1] %vm428_vm10, %v427_v42  }
  0xce   :  { %v433_v43 = vpop.permute.xlu0 %432   ;;  %v440_v44 = vpop.permute.xlu1 %439  }
  0xcf   :  { %436 = vst.msk [vmem:[#allocation0 + $0x1] sm:$0x1] %vm434_vm11, %v433_v43  }
  0xd0   :  { %442 = vst.msk [vmem:[#allocation0] sm:$0x1] %vm441_vm12, %v440_v44  }
  0xd2   :  { %v446_v45 = vpop.permute.xlu0 %445   ;;  %v453_v46 = vpop.permute.xlu1 %452  }
  0xd3   :  { %449 = vst.msk [vmem:[#allocation0 + $0x1] sm:$0x1] %vm447_vm13, %v446_v45  }
  0xd4   :  { %455 = vst.msk [vmem:[#allocation0] sm:$0x1] %vm454_vm14, %v453_v46  }
  0xd6   :  { %v459_v47 = vpop.permute.xlu0 %458   ;;  %v466_v48 = vpop.permute.xlu1 %465  }
  0xd7   :  { %462 = vst.msk [vmem:[#allocation0 + $0x1] sm:$0x1] %vm460_vm15, %v459_v47  }
  0xd8   :  { %468 = vst.msk [vmem:[#allocation0] sm:$0x1] %vm467_vm0, %v466_v48  }
  0xda   :  { %v472_v49 = vpop.permute.xlu0 %471   ;;  %v479_v50 = vpop.permute.xlu1 %478  }
  0xdb   :  { %475 = vst.msk [vmem:[#allocation0 + $0x1] sm:$0x1] %vm473_vm1, %v472_v49  }
  0xdc   :  { %481 = vst.msk [vmem:[#allocation0] sm:$0x1] %vm480_vm2, %v479_v50  }
  0xde   :  { %v485_v51 = vpop.permute.xlu0 %484  }
  0xdf   :  { %488 = vst.msk [vmem:[#allocation0 + $0x1] sm:$0x1] %vm486_vm3, %v485_v51  }
  0xe6   :  { %v493_v52 = vld [vmem:[#allocation0] sm:$0x3] }
  0xe7   :  { %v494_v54 = vpack.c.bf16 %v637_v53, %v493_v52 }
  0xe9   :  { %496 = vst [vmem:[%s667_s1] sm:$0x1] %v494_v54 }

// kernel: net_forward.1
= control target key start
LH: loop header
LB: loop body
LE: loop exit
PB: predicated region body
PF: predicated region fallthrough
CT: control target
= control target key end

     0   :  { %v13352_v3 = vmov 0   ;;  %v113_v41 = vlaneseq  ;;  %vm557_vm1 = vcmask 916480   ;;  %vm7778_vm3 = vcmask 1040384   ;;  %s13342_s1 = inlined_call_operand.vmem [shape: bf16[2,112,1024], index: 1, kind: input, shape index: {}]   ;;  %s13343_s0 = inlined_call_operand.vmem [shape: f32[256,112], index: 0, kind: input, shape index: {}]   ;;  %s13344_s3 = inlined_call_operand.vmem [shape: bf16[3,256,512], index: 3, kind: input, shape index: {}]   ;;  %s13345_s2 = inlined_call_operand.vmem [shape: f32[1,1024], index: 2, kind: input, shape index: {}]   ;;  %s13346_s5 = inlined_call_operand.vmem [shape: bf16[1024,50], index: 5, kind: input, shape index: {}]   ;;  %s13347_s4 = inlined_call_operand.vmem [shape: f32[1,512], index: 4, kind: input, shape index: {}]   ;;  %s13348_s7 = inlined_call_operand.vmem [shape: bf16[50,10], index: 7, kind: input, shape index: {}]   ;;  %s13349_s6 = inlined_call_operand.vmem [shape: f32[1,50], index: 6, kind: input, shape index: {}]   ;;  %s13350_s8 = inlined_call_operand.vmem [shape: f32[1,10], index: 8, kind: input, shape index: {}]   ;;  %s13351_s9 = inlined_call_operand.vmem [shape: f32[32,10], index: 9, kind: output, shape index: {}]  }
   0x1   :  { %v7892_v0 = vld [vmem:[%s13342_s1 + $0x1c0] sm:$0xff]  ;;  %v7893_v2 = vld [vmem:[%s13342_s1 + $0x1c8] sm:$0xff]  ;;  %638 = vmatprep.mubr.bf16.mxu0 %v13352_v3  ;;  %831 = vmatprep.mubr.bf16.mxu1 %v13352_v3  ;;  %v9738_v50 = vld [vmem:[%s13343_s0 + $0x10] sm:$0xff]  ;;  %vm7771_vm4 = vcmask 408576   ;;  %vm7831_vm5 = vcmask 80896  }
   0x2   :  { %v7896_v1 = vld [vmem:[%s13342_s1 + $0x1e0] sm:$0xff]  ;;  %v7897_v5 = vld [vmem:[%s13342_s1 + $0x1e8] sm:$0xff]  ;;  %v9740_v51 = vshrl.u32 %v113_v41, 7  ;;  %v83_v60 = vrot.slane %v9738_v50, 1 }
   0x3   :  { %v7949_v4 = vcombine.high %v7892_v0, %v7896_v1  ;;  %v7948_v6 = vcombine.low %v7892_v0, %v7896_v1  ;;  %v7900_v7 = vld [vmem:[%s13342_s1 + $0x200] sm:$0xff]  ;;  %v7951_v9 = vcombine.high %v7893_v2, %v7897_v5  ;;  %v7950_v10 = vcombine.low %v7893_v2, %v7897_v5  ;;  %v7901_v12 = vld [vmem:[%s13342_s1 + $0x208] sm:$0xff]  ;;  %v7894_v0 = vld [vmem:[%s13342_s1 + $0x1d0] sm:$0xff] }
   0x4   :  { %v7904_v8 = vld [vmem:[%s13342_s1 + $0x220] sm:$0xff]  ;;  %v7905_v13 = vld [vmem:[%s13342_s1 + $0x228] sm:$0xff]  ;;  %13450 = vst [vmem:[#allocation2_spill] sm:$0xff] %v9740_v51  ;;  %vm115_vm0 = vcmp.lt.s32.totalorder %v9740_v51, 7  ;;  %v7898_v1 = vld [vmem:[%s13342_s1 + $0x1f0] sm:$0xff] }
   0x5   :  { %v7957_v11 = vcombine.high %v7900_v7, %v7904_v8  ;;  %v7908_v14 = vld [vmem:[%s13342_s1 + $0x240] sm:$0xff]  ;;  %606 = vmatprep.subr.bf16.mxu0 %v7949_v4  ;;  %v7959_v15 = vcombine.high %v7901_v12, %v7905_v13  ;;  %v7909_v17 = vld [vmem:[%s13342_s1 + $0x248] sm:$0xff]  ;;  %799 = vmatprep.subr.bf16.mxu1 %v7951_v9  ;;  %v7956_v19 = vcombine.low %v7900_v7, %v7904_v8  ;;  %v7895_v2 = vld [vmem:[%s13342_s1 + $0x1d8] sm:$0xff] }
   0x6   :  { %v7912_v16 = vld [vmem:[%s13342_s1 + $0x260] sm:$0xff]  ;;  %v7913_v18 = vld [vmem:[%s13342_s1 + $0x268] sm:$0xff]  ;;  %607 = vmatpush1.bf16.msra.mxu0 %v7948_v6  ;;  %800 = vmatpush1.bf16.msra.mxu1 %v7950_v10  ;;  %v7958_v20 = vcombine.low %v7901_v12, %v7905_v13  ;;  %v7899_v4 = vld [vmem:[%s13342_s1 + $0x1f8] sm:$0xff]  ;;  %v7953_v9 = vcombine.high %v7894_v0, %v7898_v1 }
   0x7   :  { %608 = vmatprep.subr.bf16.mxu0 %v7957_v11  ;;  %v7965_v21 = vcombine.high %v7908_v14, %v7912_v16  ;;  %801 = vmatprep.subr.bf16.mxu1 %v7959_v15  ;;  %v7967_v22 = vcombine.high %v7909_v17, %v7913_v18  ;;  %v7916_v23 = vld [vmem:[%s13342_s1 + $0x280] sm:$0xff]  ;;  %v7917_v25 = vld [vmem:[%s13342_s1 + $0x288] sm:$0xff]  ;;  %v7964_v27 = vcombine.low %v7908_v14, %v7912_v16  ;;  %v9778_v10 = vld [vmem:[%s13343_s0 + $0x18] sm:$0xff] }
   0x8   :  { %v7920_v24 = vld [vmem:[%s13342_s1 + $0x2a0] sm:$0xff]  ;;  %v7921_v26 = vld [vmem:[%s13342_s1 + $0x2a8] sm:$0xff]  ;;  %v7966_v28 = vcombine.low %v7909_v17, %v7913_v18  ;;  %v7955_v12 = vcombine.high %v7895_v2, %v7899_v4  ;;  %v7902_v14 = vld [vmem:[%s13342_s1 + $0x210] sm:$0xff]  ;;  %v7952_v16 = vcombine.low %v7894_v0, %v7898_v1  ;;  %v84_v17 = vrot.slane %v9778_v10, 1 }
   0x9   :  { %v7973_v29 = vcombine.high %v7916_v23, %v7920_v24  ;;  %v9703_v30 = vld [vmem:[%s13343_s0] sm:$0xff]  ;;  %v34_v31 = vld [vmem:[%s13343_s0 + $0x8] sm:$0xff]  ;;  %v7975_v32 = vcombine.high %v7917_v25, %v7921_v26  ;;  %v7972_v38 = vcombine.low %v7916_v23, %v7920_v24  ;;  %v7974_v39 = vcombine.low %v7917_v25, %v7921_v26  ;;  %v7906_v15 = vld [vmem:[%s13342_s1 + $0x230] sm:$0xff] }
   0xa   :  { %609 = vmatpush1.bf16.msra.mxu0 %v7956_v19  ;;  %802 = vmatpush1.bf16.msra.mxu1 %v7958_v20  ;;  %v7924_v33 = vld [vmem:[%s13342_s1 + $0x2c0] sm:$0xff]  ;;  %v9715_v35 = vpack.c.bf16 %v34_v31, %v9703_v30  ;;  %v7925_v36 = vld [vmem:[%s13342_s1 + $0x2c8] sm:$0xff]  ;;  %v81_v58 = vrot.slane %v9703_v30, 1  ;;  %v82_v59 = vrot.slane %v34_v31, 1  ;;  %v7903_v19 = vld [vmem:[%s13342_s1 + $0x218] sm:$0xff] }
   0xb   :  { %610 = vmatprep.subr.bf16.mxu0 %v7965_v21  ;;  %803 = vmatprep.subr.bf16.mxu1 %v7967_v22  ;;  %v7928_v34 = vld [vmem:[%s13342_s1 + $0x2e0] sm:$0xff]  ;;  %v7929_v37 = vld [vmem:[%s13342_s1 + $0x2e8] sm:$0xff]  ;;  %v7907_v20 = vld [vmem:[%s13342_s1 + $0x238] sm:$0xff]  ;;  %v7954_v21 = vcombine.low %v7895_v2, %v7899_v4  ;;  %v7961_v22 = vcombine.high %v7902_v14, %v7906_v15 }
   0xc   :  { %v7981_v40 = vcombine.high %v7924_v33, %v7928_v34  ;;  %v7983_v42 = vcombine.high %v7925_v36, %v7929_v37  ;;  %v7932_v43 = vld [vmem:[%s13342_s1 + $0x300] sm:$0xff]  ;;  %v7933_v45 = vld [vmem:[%s13342_s1 + $0x308] sm:$0xff]  ;;  %v7980_v47 = vcombine.low %v7924_v33, %v7928_v34  ;;  %v7982_v48 = vcombine.low %v7925_v36, %v7929_v37  ;;  %v7910_v23 = vld [vmem:[%s13342_s1 + $0x250] sm:$0xff] }
   0xd   :  { %v7936_v44 = vld [vmem:[%s13342_s1 + $0x320] sm:$0xff]  ;;  %v7937_v46 = vld [vmem:[%s13342_s1 + $0x328] sm:$0xff]  ;;  %v145_v6 = vsel %vm115_vm0, %v82_v59, %v83_v60  ;;  %v146_v7 = vsel %vm115_vm0, %v81_v58, %v82_v59  ;;  %v7914_v24 = vld [vmem:[%s13342_s1 + $0x270] sm:$0xff]  ;;  %v7963_v25 = vcombine.high %v7903_v19, %v7907_v20  ;;  %v7962_v34 = vcombine.low %v7903_v19, %v7907_v20 }
   0xe   :  { %611 = vmatpush1.bf16.msra.mxu0 %v7964_v27  ;;  %804 = vmatpush1.bf16.msra.mxu1 %v7966_v28  ;;  %v7989_v49 = vcombine.high %v7932_v43, %v7936_v44  ;;  %v7991_v52 = vcombine.high %v7933_v45, %v7937_v46  ;;  %v7940_v53 = vld [vmem:[%s13342_s1 + $0x340] sm:$0xff]  ;;  %v7941_v55 = vld [vmem:[%s13342_s1 + $0x348] sm:$0xff]  ;;  %v7988_v57 = vcombine.low %v7932_v43, %v7936_v44  ;;  %v7911_v26 = vld [vmem:[%s13342_s1 + $0x258] sm:$0xff] }
   0xf   :  { %612 = vmatprep.subr.bf16.mxu0 %v7973_v29  ;;  %805 = vmatprep.subr.bf16.mxu1 %v7975_v32  ;;  %v7944_v54 = vld [vmem:[%s13342_s1 + $0x360] sm:$0xff]  ;;  %v7945_v56 = vld [vmem:[%s13342_s1 + $0x368] sm:$0xff]  ;;  %v7990_v61 = vcombine.low %v7933_v45, %v7937_v46  ;;  %v9785_v13 = vpack.c.bf16 %v145_v6, %v146_v7  ;;  %v7915_v27 = vld [vmem:[%s13342_s1 + $0x278] sm:$0xff]  ;;  %v144_v29 = vsel %vm115_vm0, %v83_v60, %v84_v17 }
  0x10   :  { %v7997_v62 = vcombine.high %v7940_v53, %v7944_v54  ;;  %v7999_v63 = vcombine.high %v7941_v55, %v7945_v56  ;;  %v7996_v5 = vcombine.low %v7940_v53, %v7944_v54  ;;  %v7998_v8 = vcombine.low %v7941_v55, %v7945_v56  ;;  %v9783_v11 = vld [vmem:[%s13343_s0 + $0x20] sm:$0xff]  ;;  %v9824_v31 = vld [vmem:[%s13343_s0 + $0x28] sm:$0xff]  ;;  %v9830_v33 = vld [vmem:[%s13343_s0 + $0x30] sm:$0xff] }
  0x11   :  { %v85_v18 = vrot.slane %v9783_v11, 1  ;;  %v7960_v32 = vcombine.low %v7902_v14, %v7906_v15  ;;  %v7969_v36 = vcombine.high %v7910_v23, %v7914_v24  ;;  %v9835_v37 = vld [vmem:[%s13342_s1] sm:$0xff]  ;;  %v9851_v41 = vld [vmem:[%s13342_s1 + $0x28] sm:$0xff]  ;;  %v7918_v43 = vld [vmem:[%s13342_s1 + $0x290] sm:$0xff]  ;;  %v86_v45 = vrot.slane %v9824_v31, 1 }
  0x12   :  { %613 = vmatpush1.bf16.msra.mxu0 %v7972_v38  ;;  %806 = vmatpush1.bf16.msra.mxu1 %v7974_v39  ;;  %v9840_v38 = vld [vmem:[%s13342_s1 + $0x20] sm:$0xff]  ;;  %v7971_v39 = vcombine.high %v7911_v26, %v7915_v27  ;;  %v7922_v44 = vld [vmem:[%s13342_s1 + $0x2b0] sm:$0xff]  ;;  %v87_v46 = vrot.slane %v9830_v33, 1  ;;  %v7970_v54 = vcombine.low %v7911_v26, %v7915_v27  ;;  %v9898_v0 = vld [vmem:[%s13343_s0 + $0x38] sm:$0xff] }
  0x13   :  { %614 = vmatprep.subr.bf16.mxu0 %v7981_v40  ;;  %807 = vmatprep.subr.bf16.mxu1 %v7983_v42  ;;  %v143_v28 = vsel %vm115_vm0, %v84_v17, %v85_v18  ;;  %v9846_v40 = vld [vmem:[%s13342_s1 + $0x8] sm:$0xff]  ;;  %v7977_v55 = vcombine.high %v7918_v43, %v7922_v44  ;;  %v7930_v59 = vld [vmem:[%s13342_s1 + $0x2f0] sm:$0xff]  ;;  %v9903_v1 = vld [vmem:[%s13343_s0 + $0x40] sm:$0xff]  ;;  %v7976_v2 = vcombine.low %v7918_v43, %v7922_v44 }
  0x14   :  { %v9853_v42 = vpack.c.bf16 %v143_v28, %v144_v29  ;;  %v141_v60 = vsel %vm115_vm0, %v86_v45, %v87_v46  ;;  %v89_v14 = vrot.slane %v9903_v1, 1  ;;  %v7935_v15 = vld [vmem:[%s13342_s1 + $0x318] sm:$0xff]  ;;  %v9946_v27 = vld [vmem:[%s13343_s0 + $0x48] sm:$0xff]  ;;  %v9951_v28 = vld [vmem:[%s13343_s0 + $0x50] sm:$0xff] }
  0x15   :  { %v7947_v26 = vld [vmem:[%s13342_s1 + $0x378] sm:$0xff]  ;;  %v90_v43 = vrot.slane %v9946_v27, 1  ;;  %v91_v44 = vrot.slane %v9951_v28, 1  ;;  %v172_v30 = vld [vmem:[%s13342_s1 + $0x40] sm:$0xff]  ;;  %v10273_v51 = vld [vmem:[%s13342_s1 + $0x10] sm:$0xff] }
  0x16   :  { %615 = vmatpush1.bf16.msra.mxu0 %v7980_v47  ;;  %808 = vmatpush1.bf16.msra.mxu1 %v7982_v48  ;;  %v7919_v47 = vld [vmem:[%s13342_s1 + $0x298] sm:$0xff] }
  0x17   :  { %616 = vmatprep.subr.bf16.mxu0 %v7989_v49  ;;  %809 = vmatprep.subr.bf16.mxu1 %v7991_v52  ;;  %v7923_v48 = vld [vmem:[%s13342_s1 + $0x2b8] sm:$0xff]  ;;  %v8068_v49 = vcombine.low %v9835_v37, %v9840_v38  ;;  %v7968_v52 = vcombine.low %v7910_v23, %v7914_v24 }
  0x18   :  { %v7979_v56 = vcombine.high %v7919_v47, %v7923_v48  ;;  %v7978_v4 = vcombine.low %v7919_v47, %v7923_v48  ;;  %v8069_v47 = vcombine.high %v9835_v37, %v9840_v38  ;;  %v8071_v48 = vcombine.high %v9846_v40, %v9851_v41 }
  0x19   :  { %v13457_v37 = vmov 0  }
  0x1a   :  { %617 = vmatpush1.bf16.msra.mxu0 %v7988_v57  ;;  %810 = vmatpush1.bf16.msra.mxu1 %v7990_v61  ;;  %v7926_v57 = vld [vmem:[%s13342_s1 + $0x2d0] sm:$0xff]  ;;  %v142_v61 = vsel %vm115_vm0, %v85_v18, %v86_v45 }
  0x1b   :  { %618 = vmatprep.subr.bf16.mxu0 %v7997_v62  ;;  %811 = vmatprep.subr.bf16.mxu1 %v7999_v63  ;;  %v7927_v62 = vld [vmem:[%s13342_s1 + $0x2d8] sm:$0xff]  ;;  %v9905_v6 = vpack.c.bf16 %v141_v60, %v142_v61  ;;  %v7984_v17 = vcombine.low %v7926_v57, %v7930_v59 }
  0x1c   :  { %v7931_v63 = vld [vmem:[%s13342_s1 + $0x2f8] sm:$0xff] }
  0x1d   :  { %v7987_v7 = vcombine.high %v7927_v62, %v7931_v63  ;;  %v7986_v18 = vcombine.low %v7927_v62, %v7931_v63  ;;  %v9998_v63 = vld [vmem:[%s13343_s0 + $0x68] sm:$0xff] }
  0x1e   :  { %619 = vmatpush1.bf16.msra.mxu0 %v7996_v5  ;;  %812 = vmatpush1.bf16.msra.mxu1 %v7998_v8  ;;  %v7985_v5 = vcombine.high %v7926_v57, %v7930_v59  ;;  %v7934_v8 = vld [vmem:[%s13342_s1 + $0x310] sm:$0xff] }
  0x1f   :  { %992 = vmatprep.subr.bf16.mxu0 %v7953_v9  ;;  %1185 = vmatprep.subr.bf16.mxu1 %v7955_v12  ;;  %v7938_v9 = vld [vmem:[%s13342_s1 + $0x330] sm:$0xff]  ;;  %v88_v12 = vrot.slane %v9898_v0, 1 }
  0x20   :  { %v7993_v19 = vcombine.high %v7934_v8, %v7938_v9  ;;  %v7992_v29 = vcombine.low %v7934_v8, %v7938_v9 }
  0x21   :  { %8004 = vmatmul.mubr.msk.bf16.vlgmr.msra.gmra.mrb[0].mxu0 %vm557_vm1, %v9785_v13  ;;  %8020 = vmatmul.mubr.msk.bf16.vlgmr.msra.gmra.mrb[0].mxu1 %vm557_vm1, %v9785_v13  ;;  %v139_v23 = vsel %vm115_vm0, %v88_v12, %v89_v14  ;;  %v140_v24 = vsel %vm115_vm0, %v87_v46, %v88_v12  ;;  %v10022_v12 = vld [vmem:[%s13343_s0 + $0x78] sm:$0xff] }
  0x22   :  { %993 = vmatpush1.bf16.msra.mxu0 %v7952_v16  ;;  %1186 = vmatpush1.bf16.msra.mxu1 %v7954_v21  ;;  %v7939_v16 = vld [vmem:[%s13342_s1 + $0x338] sm:$0xff]  ;;  %v7942_v21 = vld [vmem:[%s13342_s1 + $0x350] sm:$0xff] }
  0x23   :  { %648 = vmatprep.mubr.bf16.mxu0 %v13352_v3  ;;  %841 = vmatprep.mubr.bf16.mxu1 %v13352_v3  ;;  %v7995_v20 = vcombine.high %v7935_v15, %v7939_v16 }
  0x24   :  { %994 = vmatprep.subr.bf16.mxu0 %v7961_v22  ;;  %1187 = vmatprep.subr.bf16.mxu1 %v7963_v25  ;;  %v7946_v22 = vld [vmem:[%s13342_s1 + $0x370] sm:$0xff]  ;;  %v7943_v25 = vld [vmem:[%s13342_s1 + $0x358] sm:$0xff] }
  0x25   :  { %v8000_v45 = vcombine.low %v7942_v21, %v7946_v22  ;;  %v8002_v46 = vcombine.low %v7943_v25, %v7947_v26 }
  0x26   :  { %995 = vmatpush1.bf16.msra.mxu0 %v7960_v32  ;;  %1188 = vmatpush1.bf16.msra.mxu1 %v7962_v34  ;;  %v7994_v32 = vcombine.low %v7935_v15, %v7939_v16  ;;  %v8001_v34 = vcombine.high %v7942_v21, %v7946_v22  ;;  %v96_v16 = vrot.slane %v10022_v12, 1  ;;  %v10051_v21 = vld [vmem:[%s13343_s0 + $0x90] sm:$0xff] }
  0x27   :  { %996 = vmatprep.subr.bf16.mxu0 %v7969_v36  ;;  %1189 = vmatprep.subr.bf16.mxu1 %v7971_v39  ;;  %v9953_v36 = vpack.c.bf16 %v139_v23, %v140_v24  ;;  %v8003_v39 = vcombine.high %v7943_v25, %v7947_v26  ;;  %v99_v24 = vrot.slane %v10051_v21, 1 }
  0x29   :  { %8005 = vmatmul.mubr.msk.bf16.gmra.mrb[4].mxu0 %vm557_vm1, %v9853_v42  ;;  %8021 = vmatmul.mubr.msk.bf16.gmra.mrb[4].mxu1 %vm557_vm1, %v9853_v42 }
  0x2a   :  { %658 = vmatprep.mubr.bf16.mxu0 %v13352_v3  ;;  %851 = vmatprep.mubr.bf16.mxu1 %v13352_v3 }
  0x2b   :  { %997 = vmatpush1.bf16.msra.mxu0 %v7968_v52  ;;  %1190 = vmatpush1.bf16.msra.mxu1 %v7970_v54  ;;  %v137_v52 = vsel %vm115_vm0, %v90_v43, %v91_v44  ;;  %v138_v54 = vsel %vm115_vm0, %v89_v14, %v90_v43  ;;  %v10027_v14 = vld [vmem:[%s13343_s0 + $0x80] sm:$0xff] }
  0x2c   :  { %998 = vmatprep.subr.bf16.mxu0 %v7977_v55  ;;  %1191 = vmatprep.subr.bf16.mxu1 %v7979_v56  ;;  %v9974_v55 = vld [vmem:[%s13343_s0 + $0x58] sm:$0xff]  ;;  %v9979_v56 = vld [vmem:[%s13343_s0 + $0x60] sm:$0xff]  ;;  %v9981_v57 = vpack.c.bf16 %v137_v52, %v138_v54 }
  0x2d   :  { %v92_v59 = vrot.slane %v9974_v55, 1  ;;  %v93_v60 = vrot.slane %v9979_v56, 1 }
  0x2f   :  { %999 = vmatpush1.bf16.msra.mxu0 %v7976_v2  ;;  %1192 = vmatpush1.bf16.msra.mxu1 %v7978_v4  ;;  %v135_v61 = vsel %vm115_vm0, %v92_v59, %v93_v60  ;;  %v136_v62 = vsel %vm115_vm0, %v91_v44, %v92_v59  ;;  %v10003_v2 = vld [vmem:[%s13343_s0 + $0x70] sm:$0xff] }
  0x30   :  { %1000 = vmatprep.subr.bf16.mxu0 %v7985_v5  ;;  %1193 = vmatprep.subr.bf16.mxu1 %v7987_v7  ;;  %v10005_v4 = vpack.c.bf16 %v135_v61, %v136_v62  ;;  %v94_v5 = vrot.slane %v9998_v63, 1  ;;  %v95_v7 = vrot.slane %v10003_v2, 1  ;;  %v10118_v61 = vld [vmem:[%s13343_s0 + $0xb8] sm:$0xff]  ;;  %v10123_v62 = vld [vmem:[%s13343_s0 + $0xc0] sm:$0xff] }
  0x31   :  { %8006 = vmatmul.mubr.msk.bf16.gmra.mrb[8].mxu0 %vm557_vm1, %v9905_v6  ;;  %8022 = vmatmul.mubr.msk.bf16.gmra.mrb[8].mxu1 %vm557_vm1, %v9905_v6 }
  0x32   :  { %668 = vmatprep.mubr.bf16.mxu0 %v13352_v3  ;;  %861 = vmatprep.mubr.bf16.mxu1 %v13352_v3  ;;  %v133_v8 = vsel %vm115_vm0, %v94_v5, %v95_v7  ;;  %v134_v9 = vsel %vm115_vm0, %v93_v60, %v94_v5 }
  0x33   :  { %1001 = vmatpush1.bf16.msra.mxu0 %v7984_v17  ;;  %1194 = vmatpush1.bf16.msra.mxu1 %v7986_v18  ;;  %v10029_v15 = vpack.c.bf16 %v133_v8, %v134_v9  ;;  %v97_v17 = vrot.slane %v10027_v14, 1  ;;  %v105_v8 = vrot.slane %v10123_v62, 1 }
  0x34   :  { %1002 = vmatprep.subr.bf16.mxu0 %v7993_v19  ;;  %1195 = vmatprep.subr.bf16.mxu1 %v7995_v20  ;;  %v132_v19 = vsel %vm115_vm0, %v95_v7, %v96_v16  ;;  %v10046_v20 = vld [vmem:[%s13343_s0 + $0x88] sm:$0xff]  ;;  %v104_v7 = vrot.slane %v10118_v61, 1 }
  0x35   :  { %v131_v18 = vsel %vm115_vm0, %v96_v16, %v97_v17  ;;  %v98_v23 = vrot.slane %v10046_v20, 1 }
  0x36   :  { %v10053_v22 = vpack.c.bf16 %v131_v18, %v132_v19  ;;  %v123_v9 = vsel %vm115_vm0, %v104_v7, %v105_v8  ;;  %v10147_v18 = vld [vmem:[%s13343_s0 + $0xd0] sm:$0xff] }
  0x37   :  { %1003 = vmatpush1.bf16.msra.mxu0 %v7992_v29  ;;  %1196 = vmatpush1.bf16.msra.mxu1 %v7994_v32  ;;  %v129_v25 = vsel %vm115_vm0, %v98_v23, %v99_v24  ;;  %v130_v26 = vsel %vm115_vm0, %v97_v17, %v98_v23  ;;  %v10070_v29 = vld [vmem:[%s13343_s0 + $0x98] sm:$0xff]  ;;  %v10075_v32 = vld [vmem:[%s13343_s0 + $0xa0] sm:$0xff]  ;;  %v10142_v17 = vld [vmem:[%s13343_s0 + $0xc8] sm:$0xff] }
  0x38   :  { %1004 = vmatprep.subr.bf16.mxu0 %v8001_v34  ;;  %1197 = vmatprep.subr.bf16.mxu1 %v8003_v39  ;;  %v10077_v34 = vpack.c.bf16 %v129_v25, %v130_v26  ;;  %v100_v39 = vrot.slane %v10070_v29, 1  ;;  %v101_v43 = vrot.slane %v10075_v32, 1  ;;  %v106_v23 = vrot.slane %v10142_v17, 1 }
  0x39   :  { %8007 = vmatmul.mubr.msk.bf16.gmra.mrb[12].mxu0 %vm557_vm1, %v9953_v36  ;;  %8023 = vmatmul.mubr.msk.bf16.gmra.mrb[12].mxu1 %vm557_vm1, %v9953_v36 }
  0x3a   :  { %678 = vmatprep.mubr.bf16.mxu0 %v13352_v3  ;;  %871 = vmatprep.mubr.bf16.mxu1 %v13352_v3  ;;  %v127_v44 = vsel %vm115_vm0, %v100_v39, %v101_v43  ;;  %v122_v26 = vsel %vm115_vm0, %v105_v8, %v106_v23 }
  0x3b   :  { %1005 = vmatpush1.bf16.msra.mxu0 %v8000_v45  ;;  %1198 = vmatpush1.bf16.msra.mxu1 %v8002_v46  ;;  %v128_v45 = vsel %vm115_vm0, %v99_v24, %v100_v39  ;;  %v10094_v46 = vld [vmem:[%s13343_s0 + $0xa8] sm:$0xff]  ;;  %v107_v24 = vrot.slane %v10147_v18, 1  ;;  %v10166_v39 = vld [vmem:[%s13343_s0 + $0xd8] sm:$0xff] }
  0x3c   :  { %1706 = vmatprep.subr.bf16.mxu0 %v8069_v47  ;;  %1899 = vmatprep.subr.bf16.mxu1 %v8071_v48  ;;  %v10099_v47 = vld [vmem:[%s13343_s0 + $0xb0] sm:$0xff]  ;;  %v10101_v48 = vpack.c.bf16 %v127_v44, %v128_v45  ;;  %v102_v52 = vrot.slane %v10094_v46, 1  ;;  %13451 = vst [vmem:[#allocation3_spill] sm:$0xff] %v10166_v39  ;;  %v108_v45 = vrot.slane %v10166_v39, 1  ;;  %v205_v39 = vld [vmem:[%s13342_s1 + $0x148] sm:$0xff] }
  0x3d   :  { %v103_v54 = vrot.slane %v10099_v47, 1  ;;  %v121_v25 = vsel %vm115_vm0, %v106_v23, %v107_v24 }
  0x3e   :  { %v126_v60 = vsel %vm115_vm0, %v101_v43, %v102_v52  ;;  %v10171_v43 = vld [vmem:[%s13343_s0 + $0xe0] sm:$0xff]  ;;  %v10173_v44 = vpack.c.bf16 %v121_v25, %v122_v26  ;;  %v10214_v25 = vld [vmem:[%s13343_s0 + $0xf8] sm:$0xff] }
  0x3f   :  { %v125_v59 = vsel %vm115_vm0, %v102_v52, %v103_v54  ;;  %v124_v16 = vsel %vm115_vm0, %v103_v54, %v104_v7  ;;  %13452 = vst [vmem:[#allocation4_spill] sm:$0xff] %v10171_v43  ;;  %v109_v52 = vrot.slane %v10171_v43, 1  ;;  %v10195_v7 = vld [vmem:[%s13343_s0 + $0xf0] sm:$0xff]  ;;  %13455 = vst [vmem:[#allocation7_spill] sm:$0xff] %v10214_v25  ;;  %v200_v43 = vld [vmem:[%s13342_s1 + $0x120] sm:$0xff] }
  0x40   :  { %v10125_v5 = vpack.c.bf16 %v125_v59, %v126_v60  ;;  %v10149_v19 = vpack.c.bf16 %v123_v9, %v124_v16  ;;  %v120_v59 = vsel %vm115_vm0, %v107_v24, %v108_v45  ;;  %v10190_v60 = vld [vmem:[%s13343_s0 + $0xe8] sm:$0xff]  ;;  %13454 = vst [vmem:[#allocation6_spill] sm:$0xff] %v10195_v7  ;;  %v111_v16 = vrot.slane %v10195_v7, 1  ;;  %v10283_v7 = vld [vmem:[%s13342_s1 + $0x18] sm:$0xff] }
  0x41   :  { %8008 = vmatmul.mubr.msk.bf16.gmra.mrb[16].mxu0 %vm557_vm1, %v9981_v57  ;;  %8024 = vmatmul.mubr.msk.bf16.gmra.mrb[16].mxu1 %vm557_vm1, %v9981_v57  ;;  %v119_v54 = vsel %vm115_vm0, %v108_v45, %v109_v52  ;;  %13453 = vst [vmem:[#allocation5_spill] sm:$0xff] %v10190_v60  ;;  %v110_v9 = vrot.slane %v10190_v60, 1  ;;  %v112_v45 = vrot.slane %v10214_v25, 1  ;;  %v10278_v25 = vld [vmem:[%s13342_s1 + $0x30] sm:$0xff] }
  0x42   :  { %688 = vmatprep.mubr.bf16.mxu0 %v13352_v3  ;;  %881 = vmatprep.mubr.bf16.mxu1 %v13352_v3  ;;  %v10197_v8 = vpack.c.bf16 %v119_v54, %v120_v59 }
  0x43   :  { %v117_v23 = vsel %vm115_vm0, %v110_v9, %v111_v16  ;;  %v118_v24 = vsel %vm115_vm0, %v109_v52, %v110_v9  ;;  %v116_v52 = vsel %vm115_vm0, %v111_v16, %v112_v45  ;;  %v147_v54 = vsel %vm115_vm0, %v112_v45, %v81_v58  ;;  %v176_v58 = vld [vmem:[%s13342_s1 + $0x60] sm:$0xff]  ;;  %v173_v9 = vld [vmem:[%s13342_s1 + $0x48] sm:$0xff] }
  0x44   :  { %v10216_v26 = vpack.c.bf16 %v117_v23, %v118_v24  ;;  %v10231_v59 = vpack.c.bf16 %v147_v54, %v116_v52  ;;  %v177_v16 = vld [vmem:[%s13342_s1 + $0x68] sm:$0xff]  ;;  %v8077_v23 = vcombine.high %v172_v30, %v176_v58  ;;  %v180_v24 = vld [vmem:[%s13342_s1 + $0x80] sm:$0xff]  ;;  %v8076_v53 = vcombine.low %v172_v30, %v176_v58  ;;  %v10294_v58 = vld [vmem:[%s13342_s1 + $0x38] sm:$0xff] }
  0x45   :  { %v184_v45 = vld [vmem:[%s13342_s1 + $0xa0] sm:$0xff]  ;;  %v8079_v52 = vcombine.high %v173_v9, %v177_v16  ;;  %v181_v54 = vld [vmem:[%s13342_s1 + $0x88] sm:$0xff]  ;;  %v8078_v38 = vcombine.low %v173_v9, %v177_v16 }
  0x46   :  { %v192_v9 = vld [vmem:[%s13342_s1 + $0xe0] sm:$0xff]  ;;  %v189_v16 = vld [vmem:[%s13342_s1 + $0xc8] sm:$0xff] }
  0x49   :  { %8009 = vmatmul.mubr.msk.bf16.gmra.mrb[20].mxu0 %vm557_vm1, %v10005_v4  ;;  %8025 = vmatmul.mubr.msk.bf16.gmra.mrb[20].mxu1 %vm557_vm1, %v10005_v4 }
  0x4a   :  { %698 = vmatprep.mubr.bf16.mxu0 %v13352_v3  ;;  %891 = vmatprep.mubr.bf16.mxu1 %v13352_v3 }
  0x51   :  { %8010 = vmatmul.mubr.msk.bf16.gmra.mrb[24].mxu0 %vm557_vm1, %v10029_v15  ;;  %8026 = vmatmul.mubr.msk.bf16.gmra.mrb[24].mxu1 %vm557_vm1, %v10029_v15 }
  0x52   :  { %708 = vmatprep.mubr.bf16.mxu0 %v13352_v3  ;;  %901 = vmatprep.mubr.bf16.mxu1 %v13352_v3 }
  0x59   :  { %8011 = vmatmul.mubr.msk.bf16.gmra.mrb[28].mxu0 %vm557_vm1, %v10053_v22  ;;  %8027 = vmatmul.mubr.msk.bf16.gmra.mrb[28].mxu1 %vm557_vm1, %v10053_v22 }
  0x5a   :  { %718 = vmatprep.mubr.bf16.mxu0 %v13352_v3  ;;  %911 = vmatprep.mubr.bf16.mxu1 %v13352_v3 }
  0x61   :  { %8012 = vmatmul.mubr.msk.bf16.gmra.mrb[32].mxu0 %vm557_vm1, %v10077_v34  ;;  %8028 = vmatmul.mubr.msk.bf16.gmra.mrb[32].mxu1 %vm557_vm1, %v10077_v34 }
  0x62   :  { %728 = vmatprep.mubr.bf16.mxu0 %v13352_v3  ;;  %921 = vmatprep.mubr.bf16.mxu1 %v13352_v3 }
  0x69   :  { %8013 = vmatmul.mubr.msk.bf16.gmra.mrb[36].mxu0 %vm557_vm1, %v10101_v48  ;;  %8029 = vmatmul.mubr.msk.bf16.gmra.mrb[36].mxu1 %vm557_vm1, %v10101_v48 }
  0x6a   :  { %738 = vmatprep.mubr.bf16.mxu0 %v13352_v3  ;;  %931 = vmatprep.mubr.bf16.mxu1 %v13352_v3 }
  0x71   :  { %8014 = vmatmul.mubr.msk.bf16.gmra.mrb[40].mxu0 %vm557_vm1, %v10125_v5  ;;  %8030 = vmatmul.mubr.msk.bf16.gmra.mrb[40].mxu1 %vm557_vm1, %v10125_v5 }
  0x72   :  { %748 = vmatprep.mubr.bf16.mxu0 %v13352_v3  ;;  %941 = vmatprep.mubr.bf16.mxu1 %v13352_v3 }
  0x79   :  { %8015 = vmatmul.mubr.msk.bf16.gmra.mrb[44].mxu0 %vm557_vm1, %v10149_v19  ;;  %8031 = vmatmul.mubr.msk.bf16.gmra.mrb[44].mxu1 %vm557_vm1, %v10149_v19 }
  0x7a   :  { %758 = vmatprep.mubr.bf16.mxu0 %v13352_v3  ;;  %951 = vmatprep.mubr.bf16.mxu1 %v13352_v3 }
  0x81   :  { %8016 = vmatmul.mubr.msk.bf16.gmra.mrb[48].mxu0 %vm557_vm1, %v10173_v44  ;;  %8032 = vmatmul.mubr.msk.bf16.gmra.mrb[48].mxu1 %vm557_vm1, %v10173_v44 }
  0x82   :  { %768 = vmatprep.mubr.bf16.mxu0 %v13352_v3  ;;  %961 = vmatprep.mubr.bf16.mxu1 %v13352_v3 }
  0x89   :  { %8017 = vmatmul.mubr.msk.bf16.gmra.mrb[52].mxu0 %vm557_vm1, %v10197_v8  ;;  %8033 = vmatmul.mubr.msk.bf16.gmra.mrb[52].mxu1 %vm557_vm1, %v10197_v8 }
  0x8a   :  { %778 = vmatprep.mubr.bf16.mxu0 %v13352_v3  ;;  %971 = vmatprep.mubr.bf16.mxu1 %v13352_v3 }
  0x91   :  { %8018 = vmatmul.mubr.msk.bf16.gmra.mrb[56].mxu0 %vm557_vm1, %v10216_v26  ;;  %8034 = vmatmul.mubr.msk.bf16.gmra.mrb[56].mxu1 %vm557_vm1, %v10216_v26 }
  0x92   :  { %788 = vmatprep.mubr.bf16.mxu0 %v13352_v3  ;;  %981 = vmatprep.mubr.bf16.mxu1 %v13352_v3 }
  0x99   :  { %8019 = vmatmul.mubr.msk.bf16.gmra.mrb[60].mxu0 %vm557_vm1, %v10231_v59  ;;  %8035 = vmatmul.mubr.msk.bf16.gmra.mrb[60].mxu1 %vm557_vm1, %v10231_v59 }
  0x9a   :  { %1024 = vmatprep.mubr.bf16.mxu0 %v13352_v3  ;;  %1217 = vmatprep.mubr.bf16.mxu1 %v13352_v3  ;;  %v185_v3 = vld [vmem:[%s13342_s1 + $0xa8] sm:$0xff] }
  0x9b   :  { %v8087_v60 = vcombine.high %v181_v54, %v185_v3 }
  0xa1   :  { %8036 = vmatmul.mubr.msk.bf16.vlgmr.msra.gmra.mrb[64].mxu0 %vm557_vm1, %v9785_v13  ;;  %8052 = vmatmul.mubr.msk.bf16.vlgmr.msra.gmra.mrb[64].mxu1 %vm557_vm1, %v9785_v13  ;;  %v13456_v13 = vcombine.low %v9846_v40, %v9851_v41  ;;  %v188_v41 = vld [vmem:[%s13342_s1 + $0xc0] sm:$0xff] }
  0xa2   :  { %1707 = vmatpush1.bf16.msra.mxu0 %v8068_v49  ;;  %1034 = vmatprep.mubr.bf16.mxu0 %v13457_v37  ;;  %v8085_v49 = vcombine.high %v180_v24, %v184_v45  ;;  %v8093_v40 = vcombine.high %v188_v41, %v192_v9 }
  0xa3   :  { %1900 = vmatpush1.bf16.msra.mxu1 %v13456_v13  ;;  %1227 = vmatprep.mubr.bf16.mxu1 %v13457_v37  ;;  %v8084_v13 = vcombine.low %v180_v24, %v184_v45  ;;  %v8092_v24 = vcombine.low %v188_v41, %v192_v9 }
  0xa4   :  { %1708 = vmatprep.subr.bf16.mxu0 %v8077_v23  ;;  %1901 = vmatprep.subr.bf16.mxu1 %v8079_v52  ;;  %v193_v23 = vld [vmem:[%s13342_s1 + $0xe8] sm:$0xff]  ;;  %v8086_v52 = vcombine.low %v181_v54, %v185_v3 }
  0xa5   :  { %v8095_v30 = vcombine.high %v189_v16, %v193_v23  ;;  %v197_v3 = vld [vmem:[%s13342_s1 + $0x108] sm:$0xff]  ;;  %v8094_v45 = vcombine.low %v189_v16, %v193_v23  ;;  %v212_v23 = vld [vmem:[%s13342_s1 + $0x180] sm:$0xff] }
  0xa6   :  { %1709 = vmatpush1.bf16.msra.mxu0 %v8076_v53  ;;  %v196_v53 = vld [vmem:[%s13342_s1 + $0x100] sm:$0xff] }
  0xa7   :  { %1902 = vmatpush1.bf16.msra.mxu1 %v8078_v38  ;;  %1710 = vmatprep.subr.bf16.mxu0 %v8085_v49  ;;  %v8101_v54 = vcombine.high %v196_v53, %v200_v43  ;;  %v204_v38 = vld [vmem:[%s13342_s1 + $0x140] sm:$0xff]  ;;  %v8100_v41 = vcombine.low %v196_v53, %v200_v43  ;;  %v213_v43 = vld [vmem:[%s13342_s1 + $0x188] sm:$0xff] }
  0xa8   :  { %1903 = vmatprep.subr.bf16.mxu1 %v8087_v60  ;;  %v201_v60 = vld [vmem:[%s13342_s1 + $0x128] sm:$0xff]  ;;  %v208_v49 = vld [vmem:[%s13342_s1 + $0x160] sm:$0xff] }
  0xa9   :  { %8037 = vmatmul.mubr.msk.bf16.gmra.mrb[68].mxu0 %vm557_vm1, %v9853_v42  ;;  %8053 = vmatmul.mubr.msk.bf16.gmra.mrb[68].mxu1 %vm557_vm1, %v9853_v42  ;;  %v8103_v42 = vcombine.high %v197_v3, %v201_v60  ;;  %v8109_v9 = vcombine.high %v204_v38, %v208_v49  ;;  %v8108_v53 = vcombine.low %v204_v38, %v208_v49 }
  0xaa   :  { %1044 = vmatprep.mubr.bf16.mxu0 %v13457_v37  ;;  %1237 = vmatprep.mubr.bf16.mxu1 %v13457_v37 }
  0xab   :  { %1711 = vmatpush1.bf16.msra.mxu0 %v8084_v13  ;;  %1904 = vmatpush1.bf16.msra.mxu1 %v8086_v52  ;;  %v216_v13 = vld [vmem:[%s13342_s1 + $0x1a0] sm:$0xff]  ;;  %v217_v52 = vld [vmem:[%s13342_s1 + $0x1a8] sm:$0xff] }
  0xac   :  { %1712 = vmatprep.subr.bf16.mxu0 %v8093_v40  ;;  %1905 = vmatprep.subr.bf16.mxu1 %v8095_v30  ;;  %v209_v40 = vld [vmem:[%s13342_s1 + $0x168] sm:$0xff]  ;;  %v8102_v30 = vcombine.low %v197_v3, %v201_v60  ;;  %v8117_v60 = vcombine.high %v212_v23, %v216_v13 }
  0xad   :  { %v8111_v16 = vcombine.high %v205_v39, %v209_v40  ;;  %v8110_v3 = vcombine.low %v205_v39, %v209_v40  ;;  %v187_v39 = vld [vmem:[%s13342_s1 + $0xb8] sm:$0xff]  ;;  %v10479_v40 = vpack.c.bf16 %v9778_v10, %v9738_v50 }
  0xaf   :  { %1713 = vmatpush1.bf16.msra.mxu0 %v8092_v24  ;;  %1906 = vmatpush1.bf16.msra.mxu1 %v8094_v45  ;;  %v8116_v24 = vcombine.low %v212_v23, %v216_v13  ;;  %v8118_v45 = vcombine.low %v213_v43, %v217_v52  ;;  %v199_v23 = vld [vmem:[%s13342_s1 + $0x118] sm:$0xff] }
  0xb0   :  { %1714 = vmatprep.subr.bf16.mxu0 %v8101_v54  ;;  %1907 = vmatprep.subr.bf16.mxu1 %v8103_v42  ;;  %v8073_v54 = vcombine.high %v10273_v51, %v10278_v25  ;;  %v8075_v42 = vcombine.high %v10283_v7, %v10294_v58  ;;  %v203_v13 = vld [vmem:[%s13342_s1 + $0x138] sm:$0xff] }
  0xb1   :  { %8038 = vmatmul.mubr.msk.bf16.gmra.mrb[72].mxu0 %vm557_vm1, %v9905_v6  ;;  %8054 = vmatmul.mubr.msk.bf16.gmra.mrb[72].mxu1 %vm557_vm1, %v9905_v6  ;;  %v8119_v6 = vcombine.high %v213_v43, %v217_v52 }
  0xb2   :  { %1054 = vmatprep.mubr.bf16.mxu0 %v13457_v37  ;;  %1247 = vmatprep.mubr.bf16.mxu1 %v13457_v37 }
  0xb3   :  { %1715 = vmatpush1.bf16.msra.mxu0 %v8100_v41  ;;  %1908 = vmatpush1.bf16.msra.mxu1 %v8102_v30 }
  0xb4   :  { %1716 = vmatprep.subr.bf16.mxu0 %v8109_v9  ;;  %1909 = vmatprep.subr.bf16.mxu1 %v8111_v16  ;;  %v198_v9 = vld [vmem:[%s13342_s1 + $0x110] sm:$0xff] }
  0xb5   :  { %v202_v16 = vld [vmem:[%s13342_s1 + $0x130] sm:$0xff] }
  0xb7   :  { %1717 = vmatpush1.bf16.msra.mxu0 %v8108_v53  ;;  %1910 = vmatpush1.bf16.msra.mxu1 %v8110_v3  ;;  %v8105_v53 = vcombine.high %v198_v9, %v202_v16  ;;  %v10513_v3 = vpack.c.bf16 %v9824_v31, %v9783_v11  ;;  %v8104_v11 = vcombine.low %v198_v9, %v202_v16  ;;  %v9252_v9 = vld [vmem:[%s13344_s3 + $0x288] ss:$16 sps:$4 sm:$0xff]   ;;  %v9254_v16 = vld [vmem:[%s13344_s3 + $0x28c] ss:$16 sps:$4 sm:$0xff]  }
  0xb8   :  { %1718 = vmatprep.subr.bf16.mxu0 %v8117_v60  ;;  %1911 = vmatprep.subr.bf16.mxu1 %v8119_v6  ;;  %v8107_v60 = vcombine.high %v199_v23, %v203_v13  ;;  %v206_v6 = vld [vmem:[%s13342_s1 + $0x150] sm:$0xff]  ;;  %v8106_v31 = vcombine.low %v199_v23, %v203_v13 }
  0xb9   :  { %8039 = vmatmul.mubr.msk.bf16.gmra.mrb[76].mxu0 %vm557_vm1, %v9953_v36  ;;  %8055 = vmatmul.mubr.msk.bf16.gmra.mrb[76].mxu1 %vm557_vm1, %v9953_v36  ;;  %v174_v36 = vld [vmem:[%s13342_s1 + $0x50] sm:$0xff] }
  0xba   :  { %1064 = vmatprep.mubr.bf16.mxu0 %v13457_v37  ;;  %1257 = vmatprep.mubr.bf16.mxu1 %v13457_v37  ;;  %v9255_v23 = vld [vmem:[%s13344_s3 + $0x2a0] ss:$16 sps:$4 sm:$0xff]   ;;  %v9257_v13 = vld [vmem:[%s13344_s3 + $0x2a4] ss:$16 sps:$4 sm:$0xff]  }
  0xbb   :  { %1719 = vmatpush1.bf16.msra.mxu0 %v8116_v24  ;;  %1912 = vmatpush1.bf16.msra.mxu1 %v8118_v45  ;;  %v210_v24 = vld [vmem:[%s13342_s1 + $0x170] sm:$0xff]  ;;  %v207_v45 = vld [vmem:[%s13342_s1 + $0x158] sm:$0xff] }
  0xbc   :  { %2092 = vmatprep.subr.bf16.mxu0 %v8073_v54  ;;  %2285 = vmatprep.subr.bf16.mxu1 %v8075_v42  ;;  %v211_v54 = vld [vmem:[%s13342_s1 + $0x178] sm:$0xff]  ;;  %v8113_v42 = vcombine.high %v206_v6, %v210_v24 }
  0xc1   :  { %8040 = vmatmul.mubr.msk.bf16.gmra.mrb[80].mxu0 %vm557_vm1, %v9981_v57  ;;  %8056 = vmatmul.mubr.msk.bf16.gmra.mrb[80].mxu1 %vm557_vm1, %v9981_v57  ;;  %v178_v57 = vld [vmem:[%s13342_s1 + $0x70] sm:$0xff] }
  0xc2   :  { %1074 = vmatprep.mubr.bf16.mxu0 %v13457_v37  ;;  %1267 = vmatprep.mubr.bf16.mxu1 %v13457_v37 }
  0xc9   :  { %8041 = vmatmul.mubr.msk.bf16.gmra.mrb[84].mxu0 %vm557_vm1, %v10005_v4  ;;  %8057 = vmatmul.mubr.msk.bf16.gmra.mrb[84].mxu1 %vm557_vm1, %v10005_v4  ;;  %v175_v4 = vld [vmem:[%s13342_s1 + $0x58] sm:$0xff] }
  0xca   :  { %1084 = vmatprep.mubr.bf16.mxu0 %v13457_v37  ;;  %1277 = vmatprep.mubr.bf16.mxu1 %v13457_v37 }
  0xd1   :  { %8042 = vmatmul.mubr.msk.bf16.gmra.mrb[88].mxu0 %vm557_vm1, %v10029_v15  ;;  %8058 = vmatmul.mubr.msk.bf16.gmra.mrb[88].mxu1 %vm557_vm1, %v10029_v15  ;;  %v179_v15 = vld [vmem:[%s13342_s1 + $0x78] sm:$0xff] }
  0xd2   :  { %1094 = vmatprep.mubr.bf16.mxu0 %v13457_v37  ;;  %1287 = vmatprep.mubr.bf16.mxu1 %v13457_v37 }
  0xd9   :  { %8043 = vmatmul.mubr.msk.bf16.gmra.mrb[92].mxu0 %vm557_vm1, %v10053_v22  ;;  %8059 = vmatmul.mubr.msk.bf16.gmra.mrb[92].mxu1 %vm557_vm1, %v10053_v22  ;;  %v8081_v22 = vcombine.high %v174_v36, %v178_v57 }
  0xda   :  { %1104 = vmatprep.mubr.bf16.mxu0 %v13457_v37  ;;  %1297 = vmatprep.mubr.bf16.mxu1 %v13457_v37 }
  0xe1   :  { %8044 = vmatmul.mubr.msk.bf16.gmra.mrb[96].mxu0 %vm557_vm1, %v10077_v34  ;;  %8060 = vmatmul.mubr.msk.bf16.gmra.mrb[96].mxu1 %vm557_vm1, %v10077_v34  ;;  %v182_v34 = vld [vmem:[%s13342_s1 + $0x90] sm:$0xff] }
  0xe2   :  { %1114 = vmatprep.mubr.bf16.mxu0 %v13457_v37  ;;  %1307 = vmatprep.mubr.bf16.mxu1 %v13457_v37 }
  0xe9   :  { %8045 = vmatmul.mubr.msk.bf16.gmra.mrb[100].mxu0 %vm557_vm1, %v10101_v48  ;;  %8061 = vmatmul.mubr.msk.bf16.gmra.mrb[100].mxu1 %vm557_vm1, %v10101_v48  ;;  %v186_v48 = vld [vmem:[%s13342_s1 + $0xb0] sm:$0xff] }
  0xea   :  { %1124 = vmatprep.mubr.bf16.mxu0 %v13457_v37  ;;  %1317 = vmatprep.mubr.bf16.mxu1 %v13457_v37  ;;  %v8089_v38 = vcombine.high %v182_v34, %v186_v48  ;;  %v8088_v50 = vcombine.low %v182_v34, %v186_v48  ;;  %v8112_v34 = vcombine.low %v206_v6, %v210_v24  ;;  %v9266_v6 = vld [vmem:[%s13344_s3 + $0x2cc] ss:$16 sps:$4 sm:$0xff]   ;;  %v9267_v24 = vld [vmem:[%s13344_s3 + $0x2e0] ss:$16 sps:$4 sm:$0xff]  }
  0xeb   :  { %v8114_v48 = vcombine.low %v207_v45, %v211_v54 }
  0xf1   :  { %8046 = vmatmul.mubr.msk.bf16.gmra.mrb[104].mxu0 %vm557_vm1, %v10125_v5  ;;  %8062 = vmatmul.mubr.msk.bf16.gmra.mrb[104].mxu1 %vm557_vm1, %v10125_v5  ;;  %v8083_v5 = vcombine.high %v175_v4, %v179_v15 }
  0xf2   :  { %1134 = vmatprep.mubr.bf16.mxu0 %v13457_v37  ;;  %1327 = vmatprep.mubr.bf16.mxu1 %v13457_v37 }
  0xf9   :  { %8047 = vmatmul.mubr.msk.bf16.gmra.mrb[108].mxu0 %vm557_vm1, %v10149_v19  ;;  %8063 = vmatmul.mubr.msk.bf16.gmra.mrb[108].mxu1 %vm557_vm1, %v10149_v19  ;;  %v183_v19 = vld [vmem:[%s13342_s1 + $0x98] sm:$0xff] }
  0xfa   :  { %1144 = vmatprep.mubr.bf16.mxu0 %v13457_v37  ;;  %1337 = vmatprep.mubr.bf16.mxu1 %v13457_v37  ;;  %v8091_v49 = vcombine.high %v183_v19, %v187_v39  ;;  %v8090_v10 = vcombine.low %v183_v19, %v187_v39  ;;  %v10547_v19 = vpack.c.bf16 %v9898_v0, %v9830_v33 }
  0xfb   :  { %v10557_v33 = vpack.c.bf16 %v9946_v27, %v9903_v1  ;;  %v10567_v0 = vpack.c.bf16 %v9974_v55, %v9951_v28  ;;  %v10577_v1 = vpack.c.bf16 %v9998_v63, %v9979_v56  ;;  %v10587_v27 = vpack.c.bf16 %v10022_v12, %v10003_v2  ;;  %v13460_v12 = vld [vmem:[#allocation3_spill] sm:$0xff] }
  0xfc   :  { %v10597_v28 = vpack.c.bf16 %v10046_v20, %v10027_v14  ;;  %v10607_v55 = vpack.c.bf16 %v10070_v29, %v10051_v21  ;;  %v10617_v56 = vpack.c.bf16 %v10094_v46, %v10075_v32  ;;  %v10627_v63 = vpack.c.bf16 %v10118_v61, %v10099_v47  ;;  %v13461_v20 = vld [vmem:[#allocation4_spill] sm:$0xff]  ;;  %v13462_v21 = vld [vmem:[#allocation5_spill] sm:$0xff]  ;;  %v13463_v46 = vld [vmem:[#allocation6_spill] sm:$0xff] }
  0xfd   :  { %v10637_v2 = vpack.c.bf16 %v10142_v17, %v10123_v62  ;;  %v10647_v14 = vpack.c.bf16 %v13460_v12, %v10147_v18  ;;  %v10657_v29 = vpack.c.bf16 %v13462_v21, %v13461_v20  ;;  %v9227_v32 = vld [vmem:[%s13344_s3 + $0x204] ss:$16 sps:$4 sm:$0xff]   ;;  %v13464_v47 = vld [vmem:[#allocation7_spill] sm:$0xff]  ;;  %v9225_v17 = vld [vmem:[%s13344_s3 + $0x200] ss:$16 sps:$4 sm:$0xff]  }
  0xfe   :  { %v10670_v61 = vpack.c.bf16 %v13464_v47, %v13463_v46  ;;  %v9230_v62 = vld [vmem:[%s13344_s3 + $0x20c] ss:$16 sps:$4 sm:$0xff]   ;;  %v9228_v18 = vld [vmem:[%s13344_s3 + $0x208] ss:$16 sps:$4 sm:$0xff]   ;;  %v9297_v47 = vld [vmem:[%s13344_s3 + $0x380] ss:$16 sps:$4 sm:$0xff]  }
 0x101   :  { %8048 = vmatmul.mubr.msk.bf16.gmra.mrb[112].mxu0 %vm557_vm1, %v10173_v44  ;;  %8064 = vmatmul.mubr.msk.bf16.gmra.mrb[112].mxu1 %vm557_vm1, %v10173_v44  ;;  %v13458_v44 = vcombine.low %v10273_v51, %v10278_v25  ;;  %v190_v51 = vld [vmem:[%s13342_s1 + $0xd0] sm:$0xff]  ;;  %v191_v25 = vld [vmem:[%s13342_s1 + $0xd8] sm:$0xff] }
 0x102   :  { %1154 = vmatprep.mubr.bf16.mxu0 %v13457_v37  ;;  %1347 = vmatprep.mubr.bf16.mxu1 %v13457_v37 }
 0x109   :  { %8049 = vmatmul.mubr.msk.bf16.gmra.mrb[116].mxu0 %vm557_vm1, %v10197_v8  ;;  %8065 = vmatmul.mubr.msk.bf16.gmra.mrb[116].mxu1 %vm557_vm1, %v10197_v8  ;;  %v8080_v8 = vcombine.low %v174_v36, %v178_v57  ;;  %v8115_v36 = vcombine.high %v207_v45, %v211_v54  ;;  %v214_v57 = vld [vmem:[%s13342_s1 + $0x190] sm:$0xff]  ;;  %v9270_v54 = vld [vmem:[%s13344_s3 + $0x2e8] ss:$16 sps:$4 sm:$0xff]  }
 0x10a   :  { %1164 = vmatprep.mubr.bf16.mxu0 %v13457_v37  ;;  %1357 = vmatprep.mubr.bf16.mxu1 %v13457_v37  ;;  %v9269_v45 = vld [vmem:[%s13344_s3 + $0x2e4] ss:$16 sps:$4 sm:$0xff]  }
 0x111   :  { %8050 = vmatmul.mubr.msk.bf16.gmra.mrb[120].mxu0 %vm557_vm1, %v10216_v26  ;;  %8066 = vmatmul.mubr.msk.bf16.gmra.mrb[120].mxu1 %vm557_vm1, %v10216_v26  ;;  %v13459_v26 = vcombine.low %v10283_v7, %v10294_v58  ;;  %v194_v7 = vld [vmem:[%s13342_s1 + $0xf0] sm:$0xff]  ;;  %v195_v58 = vld [vmem:[%s13342_s1 + $0xf8] sm:$0xff] }
 0x112   :  { %1174 = vmatprep.mubr.bf16.mxu0 %v13457_v37  ;;  %1367 = vmatprep.mubr.bf16.mxu1 %v13457_v37  ;;  %v8097_v41 = vcombine.high %v190_v51, %v194_v7  ;;  %v8099_v30 = vcombine.high %v191_v25, %v195_v58  ;;  %v8096_v43 = vcombine.low %v190_v51, %v194_v7  ;;  %v9239_v51 = vld [vmem:[%s13344_s3 + $0x244] ss:$16 sps:$4 sm:$0xff]   ;;  %v9237_v7 = vld [vmem:[%s13344_s3 + $0x240] ss:$16 sps:$4 sm:$0xff]  }
 0x113   :  { %v8098_v52 = vcombine.low %v191_v25, %v195_v58  ;;  %v9240_v25 = vld [vmem:[%s13344_s3 + $0x248] ss:$16 sps:$4 sm:$0xff]   ;;  %v9243_v58 = vld [vmem:[%s13344_s3 + $0x260] ss:$16 sps:$4 sm:$0xff]  }
 0x119   :  { %8051 = vmatmul.mubr.msk.bf16.gmra.mrb[124].mxu0 %vm557_vm1, %v10231_v59  ;;  %8067 = vmatmul.mubr.msk.bf16.gmra.mrb[124].mxu1 %vm557_vm1, %v10231_v59  ;;  %v8082_v59 = vcombine.low %v175_v4, %v179_v15  ;;  %v218_v4 = vld [vmem:[%s13342_s1 + $0x1b0] sm:$0xff]  ;;  %v215_v15 = vld [vmem:[%s13342_s1 + $0x198] sm:$0xff] }
 0x11a   :  { %1738 = vmatprep.mubr.bf16.mxu0 %v13457_v37  ;;  %1931 = vmatprep.mubr.bf16.mxu1 %v13457_v37 }
 0x121   :  { %8124 = vmatmul.mubr.msk.bf16.vlgmr.msra.gmra.mrb[0].mxu0 %vm557_vm1, %v9715_v35  ;;  %8140 = vmatmul.mubr.msk.bf16.vlgmr.msra.gmra.mrb[0].mxu1 %vm557_vm1, %v9715_v35 }
 0x122   :  { %2093 = vmatpush1.bf16.msra.mxu0 %v13458_v44  ;;  %2286 = vmatpush1.bf16.msra.mxu1 %v13459_v26  ;;  %v8120_v44 = vcombine.low %v214_v57, %v218_v4  ;;  %v9233_v26 = vld [vmem:[%s13344_s3 + $0x224] ss:$16 sps:$4 sm:$0xff]  }
 0x123   :  { %1748 = vmatprep.mubr.bf16.mxu0 %v13457_v37  ;;  %1941 = vmatprep.mubr.bf16.mxu1 %v13457_v37 }
 0x124   :  { %2094 = vmatprep.subr.bf16.mxu0 %v8081_v22  ;;  %2287 = vmatprep.subr.bf16.mxu1 %v8083_v5  ;;  %v219_v22 = vld [vmem:[%s13342_s1 + $0x1b8] sm:$0xff]  ;;  %v8121_v5 = vcombine.high %v214_v57, %v218_v4  ;;  %v9279_v4 = vld [vmem:[%s13344_s3 + $0x320] ss:$16 sps:$4 sm:$0xff]  }
 0x125   :  { %v8123_v39 = vcombine.high %v215_v15, %v219_v22  ;;  %v9278_v57 = vld [vmem:[%s13344_s3 + $0x30c] ss:$16 sps:$4 sm:$0xff]  }
 0x126   :  { %2095 = vmatpush1.bf16.msra.mxu0 %v8080_v8  ;;  %2288 = vmatpush1.bf16.msra.mxu1 %v8082_v59  ;;  %v8122_v8 = vcombine.low %v215_v15, %v219_v22  ;;  %v9236_v59 = vld [vmem:[%s13344_s3 + $0x22c] ss:$16 sps:$4 sm:$0xff]   ;;  %v9281_v15 = vld [vmem:[%s13344_s3 + $0x324] ss:$16 sps:$4 sm:$0xff]   ;;  %v9282_v22 = vld [vmem:[%s13344_s3 + $0x328] ss:$16 sps:$4 sm:$0xff]  }
 0x127   :  { %2096 = vmatprep.subr.bf16.mxu0 %v8089_v38  ;;  %2289 = vmatprep.subr.bf16.mxu1 %v8091_v49  ;;  %v9231_v38 = vld [vmem:[%s13344_s3 + $0x220] ss:$16 sps:$4 sm:$0xff]   ;;  %v9234_v49 = vld [vmem:[%s13344_s3 + $0x228] ss:$16 sps:$4 sm:$0xff]  }
 0x129   :  { %8125 = vmatmul.mubr.msk.bf16.gmra.mrb[4].mxu0 %vm557_vm1, %v10479_v40  ;;  %8141 = vmatmul.mubr.msk.bf16.gmra.mrb[4].mxu1 %vm557_vm1, %v10479_v40 }
 0x12a   :  { %1758 = vmatprep.mubr.bf16.mxu0 %v13457_v37  ;;  %1951 = vmatprep.mubr.bf16.mxu1 %v13457_v37 }
 0x12b   :  { %2097 = vmatpush1.bf16.msra.mxu0 %v8088_v50  ;;  %2290 = vmatpush1.bf16.msra.mxu1 %v8090_v10  ;;  %v9245_v50 = vld [vmem:[%s13344_s3 + $0x264] ss:$16 sps:$4 sm:$0xff]   ;;  %v9246_v10 = vld [vmem:[%s13344_s3 + $0x268] ss:$16 sps:$4 sm:$0xff]  }
 0x12c   :  { %2098 = vmatprep.subr.bf16.mxu0 %v8097_v41  ;;  %2291 = vmatprep.subr.bf16.mxu1 %v8099_v30  ;;  %v9249_v41 = vld [vmem:[%s13344_s3 + $0x280] ss:$16 sps:$4 sm:$0xff]   ;;  %v9251_v30 = vld [vmem:[%s13344_s3 + $0x284] ss:$16 sps:$4 sm:$0xff]  }
 0x12f   :  { %2099 = vmatpush1.bf16.msra.mxu0 %v8096_v43  ;;  %2292 = vmatpush1.bf16.msra.mxu1 %v8098_v52  ;;  %v9258_v43 = vld [vmem:[%s13344_s3 + $0x2a8] ss:$16 sps:$4 sm:$0xff]   ;;  %v9260_v52 = vld [vmem:[%s13344_s3 + $0x2ac] ss:$16 sps:$4 sm:$0xff]  }
 0x130   :  { %2100 = vmatprep.subr.bf16.mxu0 %v8105_v53  ;;  %2293 = vmatprep.subr.bf16.mxu1 %v8107_v60  ;;  %v9261_v53 = vld [vmem:[%s13344_s3 + $0x2c0] ss:$16 sps:$4 sm:$0xff]   ;;  %v9264_v60 = vld [vmem:[%s13344_s3 + $0x2c8] ss:$16 sps:$4 sm:$0xff]  }
 0x131   :  { %8126 = vmatmul.mubr.msk.bf16.gmra.mrb[8].mxu0 %vm557_vm1, %v10513_v3  ;;  %8142 = vmatmul.mubr.msk.bf16.gmra.mrb[8].mxu1 %vm557_vm1, %v10513_v3 }
 0x132   :  { %1768 = vmatprep.mubr.bf16.mxu0 %v13457_v37  ;;  %1961 = vmatprep.mubr.bf16.mxu1 %v13457_v37 }
 0x133   :  { %2101 = vmatpush1.bf16.msra.mxu0 %v8104_v11  ;;  %2294 = vmatpush1.bf16.msra.mxu1 %v8106_v31  ;;  %v9272_v11 = vld [vmem:[%s13344_s3 + $0x2ec] ss:$16 sps:$4 sm:$0xff]   ;;  %v9273_v31 = vld [vmem:[%s13344_s3 + $0x300] ss:$16 sps:$4 sm:$0xff]  }
 0x134   :  { %2102 = vmatprep.subr.bf16.mxu0 %v8113_v42  ;;  %2295 = vmatprep.subr.bf16.mxu1 %v8115_v36  ;;  %v9275_v42 = vld [vmem:[%s13344_s3 + $0x304] ss:$16 sps:$4 sm:$0xff]   ;;  %v9276_v36 = vld [vmem:[%s13344_s3 + $0x308] ss:$16 sps:$4 sm:$0xff]  }
 0x137   :  { %2103 = vmatpush1.bf16.msra.mxu0 %v8112_v34  ;;  %2296 = vmatpush1.bf16.msra.mxu1 %v8114_v48  ;;  %v9284_v34 = vld [vmem:[%s13344_s3 + $0x32c] ss:$16 sps:$4 sm:$0xff]   ;;  %v9285_v48 = vld [vmem:[%s13344_s3 + $0x340] ss:$16 sps:$4 sm:$0xff]  }
 0x138   :  { %2104 = vmatprep.subr.bf16.mxu0 %v8121_v5  ;;  %2297 = vmatprep.subr.bf16.mxu1 %v8123_v39  ;;  %v9287_v5 = vld [vmem:[%s13344_s3 + $0x344] ss:$16 sps:$4 sm:$0xff]   ;;  %v9290_v39 = vld [vmem:[%s13344_s3 + $0x34c] ss:$16 sps:$4 sm:$0xff]  }
 0x139   :  { %8127 = vmatmul.mubr.msk.bf16.gmra.mrb[12].mxu0 %vm557_vm1, %v10547_v19  ;;  %8143 = vmatmul.mubr.msk.bf16.gmra.mrb[12].mxu1 %vm557_vm1, %v10547_v19 }
 0x13a   :  { %1778 = vmatprep.mubr.bf16.mxu0 %v13457_v37  ;;  %1971 = vmatprep.mubr.bf16.mxu1 %v13457_v37 }
 0x13b   :  { %2105 = vmatpush1.bf16.msra.mxu0 %v8120_v44  ;;  %2298 = vmatpush1.bf16.msra.mxu1 %v8122_v8  ;;  %v9291_v44 = vld [vmem:[%s13344_s3 + $0x360] ss:$16 sps:$4 sm:$0xff]   ;;  %v9293_v8 = vld [vmem:[%s13344_s3 + $0x364] ss:$16 sps:$4 sm:$0xff]  }
 0x13c   :  { %4026 = vmatprep.subr.bf16.mxu0 %v9227_v32  ;;  %4219 = vmatprep.subr.bf16.mxu1 %v9230_v62  ;;  %v9300_v62 = vld [vmem:[%s13344_s3 + $0x388] ss:$16 sps:$4 sm:$0xff]  }
 0x141   :  { %8128 = vmatmul.mubr.msk.bf16.gmra.mrb[16].mxu0 %vm557_vm1, %v10557_v33  ;;  %8144 = vmatmul.mubr.msk.bf16.gmra.mrb[16].mxu1 %vm557_vm1, %v10557_v33 }
 0x142   :  { %1788 = vmatprep.mubr.bf16.mxu0 %v13457_v37  ;;  %1981 = vmatprep.mubr.bf16.mxu1 %v13457_v37 }
 0x149   :  { %8129 = vmatmul.mubr.msk.bf16.gmra.mrb[20].mxu0 %vm557_vm1, %v10567_v0  ;;  %8145 = vmatmul.mubr.msk.bf16.gmra.mrb[20].mxu1 %vm557_vm1, %v10567_v0 }
 0x14a   :  { %1798 = vmatprep.mubr.bf16.mxu0 %v13457_v37  ;;  %1991 = vmatprep.mubr.bf16.mxu1 %v13457_v37 }
 0x151   :  { %8130 = vmatmul.mubr.msk.bf16.gmra.mrb[24].mxu0 %vm557_vm1, %v10577_v1  ;;  %8146 = vmatmul.mubr.msk.bf16.gmra.mrb[24].mxu1 %vm557_vm1, %v10577_v1 }
 0x152   :  { %1808 = vmatprep.mubr.bf16.mxu0 %v13457_v37  ;;  %2001 = vmatprep.mubr.bf16.mxu1 %v13457_v37 }
 0x159   :  { %8131 = vmatmul.mubr.msk.bf16.gmra.mrb[28].mxu0 %vm557_vm1, %v10587_v27  ;;  %8147 = vmatmul.mubr.msk.bf16.gmra.mrb[28].mxu1 %vm557_vm1, %v10587_v27 }
 0x15a   :  { %1818 = vmatprep.mubr.bf16.mxu0 %v13457_v37  ;;  %2011 = vmatprep.mubr.bf16.mxu1 %v13457_v37 }
 0x161   :  { %8132 = vmatmul.mubr.msk.bf16.gmra.mrb[32].mxu0 %vm557_vm1, %v10597_v28  ;;  %8148 = vmatmul.mubr.msk.bf16.gmra.mrb[32].mxu1 %vm557_vm1, %v10597_v28 }
 0x162   :  { %1828 = vmatprep.mubr.bf16.mxu0 %v13457_v37  ;;  %2021 = vmatprep.mubr.bf16.mxu1 %v13457_v37 }
 0x169   :  { %8133 = vmatmul.mubr.msk.bf16.gmra.mrb[36].mxu0 %vm557_vm1, %v10607_v55  ;;  %8149 = vmatmul.mubr.msk.bf16.gmra.mrb[36].mxu1 %vm557_vm1, %v10607_v55 }
 0x16a   :  { %1838 = vmatprep.mubr.bf16.mxu0 %v13457_v37  ;;  %2031 = vmatprep.mubr.bf16.mxu1 %v13457_v37 }
 0x171   :  { %8134 = vmatmul.mubr.msk.bf16.gmra.mrb[40].mxu0 %vm557_vm1, %v10617_v56  ;;  %8150 = vmatmul.mubr.msk.bf16.gmra.mrb[40].mxu1 %vm557_vm1, %v10617_v56 }
 0x172   :  { %1848 = vmatprep.mubr.bf16.mxu0 %v13457_v37  ;;  %2041 = vmatprep.mubr.bf16.mxu1 %v13457_v37 }
 0x179   :  { %8135 = vmatmul.mubr.msk.bf16.gmra.mrb[44].mxu0 %vm557_vm1, %v10627_v63  ;;  %8151 = vmatmul.mubr.msk.bf16.gmra.mrb[44].mxu1 %vm557_vm1, %v10627_v63 }
 0x17a   :  { %1858 = vmatprep.mubr.bf16.mxu0 %v13457_v37  ;;  %2051 = vmatprep.mubr.bf16.mxu1 %v13457_v37 }
 0x181   :  { %8136 = vmatmul.mubr.msk.bf16.gmra.mrb[48].mxu0 %vm557_vm1, %v10637_v2  ;;  %8152 = vmatmul.mubr.msk.bf16.gmra.mrb[48].mxu1 %vm557_vm1, %v10637_v2 }
 0x182   :  { %1868 = vmatprep.mubr.bf16.mxu0 %v13457_v37  ;;  %2061 = vmatprep.mubr.bf16.mxu1 %v13457_v37 }
 0x189   :  { %8137 = vmatmul.mubr.msk.bf16.gmra.mrb[52].mxu0 %vm557_vm1, %v10647_v14  ;;  %8153 = vmatmul.mubr.msk.bf16.gmra.mrb[52].mxu1 %vm557_vm1, %v10647_v14 }
 0x18a   :  { %1878 = vmatprep.mubr.bf16.mxu0 %v13457_v37  ;;  %2071 = vmatprep.mubr.bf16.mxu1 %v13457_v37 }
 0x191   :  { %8138 = vmatmul.mubr.msk.bf16.gmra.mrb[56].mxu0 %vm557_vm1, %v10657_v29  ;;  %8154 = vmatmul.mubr.msk.bf16.gmra.mrb[56].mxu1 %vm557_vm1, %v10657_v29 }
 0x192   :  { %1888 = vmatprep.mubr.bf16.mxu0 %v13457_v37  ;;  %2081 = vmatprep.mubr.bf16.mxu1 %v13457_v37 }
 0x199   :  { %8139 = vmatmul.mubr.msk.bf16.gmra.mrb[60].mxu0 %vm557_vm1, %v10670_v61  ;;  %8155 = vmatmul.mubr.msk.bf16.gmra.mrb[60].mxu1 %vm557_vm1, %v10670_v61 }
 0x19a   :  { %2124 = vmatprep.mubr.bf16.mxu0 %v13457_v37  ;;  %2317 = vmatprep.mubr.bf16.mxu1 %v13457_v37 }
 0x1a1   :  { %8156 = vmatmul.mubr.msk.bf16.vlgmr.msra.gmra.mrb[64].mxu0 %vm557_vm1, %v9715_v35  ;;  %8172 = vmatmul.mubr.msk.bf16.vlgmr.msra.gmra.mrb[64].mxu1 %vm557_vm1, %v9715_v35  ;;  %v9242_v35 = vld [vmem:[%s13344_s3 + $0x24c] ss:$16 sps:$4 sm:$0xff]  }
 0x1a2   :  { %2134 = vmatprep.mubr.bf16.mxu0 %v13457_v37  ;;  %2327 = vmatprep.mubr.bf16.mxu1 %v13457_v37 }
 0x1a3   :  { %4027 = vmatpush1.bf16.msra.mxu0 %v9225_v17  ;;  %4220 = vmatpush1.bf16.msra.mxu1 %v9228_v18  ;;  %v9302_v18 = vld [vmem:[%s13344_s3 + $0x38c] ss:$16 sps:$4 sm:$0xff]  }
 0x1a4   :  { %4028 = vmatprep.subr.bf16.mxu0 %v9233_v26  ;;  %4221 = vmatprep.subr.bf16.mxu1 %v9236_v59 }
 0x1a7   :  { %4029 = vmatpush1.bf16.msra.mxu0 %v9231_v38  ;;  %4222 = vmatpush1.bf16.msra.mxu1 %v9234_v49 }
 0x1a8   :  { %4030 = vmatprep.subr.bf16.mxu0 %v9239_v51  ;;  %4223 = vmatprep.subr.bf16.mxu1 %v9242_v35 }
 0x1a9   :  { %8157 = vmatmul.mubr.msk.bf16.gmra.mrb[68].mxu0 %vm557_vm1, %v10479_v40  ;;  %8173 = vmatmul.mubr.msk.bf16.gmra.mrb[68].mxu1 %vm557_vm1, %v10479_v40  ;;  %v9248_v40 = vld [vmem:[%s13344_s3 + $0x26c] ss:$16 sps:$4 sm:$0xff]  }
 0x1aa   :  { %2144 = vmatprep.mubr.bf16.mxu0 %v13457_v37  ;;  %2337 = vmatprep.mubr.bf16.mxu1 %v13457_v37 }
 0x1ab   :  { %4031 = vmatpush1.bf16.msra.mxu0 %v9237_v7  ;;  %4224 = vmatpush1.bf16.msra.mxu1 %v9240_v25 }
 0x1ac   :  { %4032 = vmatprep.subr.bf16.mxu0 %v9245_v50  ;;  %4225 = vmatprep.subr.bf16.mxu1 %v9248_v40 }
 0x1af   :  { %4033 = vmatpush1.bf16.msra.mxu0 %v9243_v58  ;;  %4226 = vmatpush1.bf16.msra.mxu1 %v9246_v10 }
 0x1b0   :  { %4034 = vmatprep.subr.bf16.mxu0 %v9251_v30  ;;  %4227 = vmatprep.subr.bf16.mxu1 %v9254_v16 }
 0x1b1   :  { %8158 = vmatmul.mubr.msk.bf16.gmra.mrb[72].mxu0 %vm557_vm1, %v10513_v3  ;;  %8174 = vmatmul.mubr.msk.bf16.gmra.mrb[72].mxu1 %vm557_vm1, %v10513_v3  ;;  %v9263_v3 = vld [vmem:[%s13344_s3 + $0x2c4] ss:$16 sps:$4 sm:$0xff]  }
 0x1b2   :  { %2154 = vmatprep.mubr.bf16.mxu0 %v13457_v37  ;;  %2347 = vmatprep.mubr.bf16.mxu1 %v13457_v37 }
 0x1b3   :  { %4035 = vmatpush1.bf16.msra.mxu0 %v9249_v41  ;;  %4228 = vmatpush1.bf16.msra.mxu1 %v9252_v9 }
 0x1b4   :  { %4036 = vmatprep.subr.bf16.mxu0 %v9257_v13  ;;  %4229 = vmatprep.subr.bf16.mxu1 %v9260_v52 }
 0x1b7   :  { %4037 = vmatpush1.bf16.msra.mxu0 %v9255_v23  ;;  %4230 = vmatpush1.bf16.msra.mxu1 %v9258_v43 }
 0x1b8   :  { %4038 = vmatprep.subr.bf16.mxu0 %v9263_v3  ;;  %4231 = vmatprep.subr.bf16.mxu1 %v9266_v6 }
 0x1b9   :  { %8159 = vmatmul.mubr.msk.bf16.gmra.mrb[76].mxu0 %vm557_vm1, %v10547_v19  ;;  %8175 = vmatmul.mubr.msk.bf16.gmra.mrb[76].mxu1 %vm557_vm1, %v10547_v19  ;;  %v9288_v19 = vld [vmem:[%s13344_s3 + $0x348] ss:$16 sps:$4 sm:$0xff]  }
 0x1ba   :  { %2164 = vmatprep.mubr.bf16.mxu0 %v13457_v37  ;;  %2357 = vmatprep.mubr.bf16.mxu1 %v13457_v37 }
 0x1bb   :  { %4039 = vmatpush1.bf16.msra.mxu0 %v9261_v53  ;;  %4232 = vmatpush1.bf16.msra.mxu1 %v9264_v60 }
 0x1bc   :  { %4040 = vmatprep.subr.bf16.mxu0 %v9269_v45  ;;  %4233 = vmatprep.subr.bf16.mxu1 %v9272_v11 }
 0x1bf   :  { %4041 = vmatpush1.bf16.msra.mxu0 %v9267_v24  ;;  %4234 = vmatpush1.bf16.msra.mxu1 %v9270_v54 }
 0x1c0   :  { %4042 = vmatprep.subr.bf16.mxu0 %v9275_v42  ;;  %4235 = vmatprep.subr.bf16.mxu1 %v9278_v57 }
 0x1c1   :  { %8160 = vmatmul.mubr.msk.bf16.gmra.mrb[80].mxu0 %vm557_vm1, %v10557_v33  ;;  %8176 = vmatmul.mubr.msk.bf16.gmra.mrb[80].mxu1 %vm557_vm1, %v10557_v33  ;;  %v9294_v33 = vld [vmem:[%s13344_s3 + $0x368] ss:$16 sps:$4 sm:$0xff]  }
 0x1c2   :  { %2174 = vmatprep.mubr.bf16.mxu0 %v13457_v37  ;;  %2367 = vmatprep.mubr.bf16.mxu1 %v13457_v37 }
 0x1c3   :  { %4043 = vmatpush1.bf16.msra.mxu0 %v9273_v31  ;;  %4236 = vmatpush1.bf16.msra.mxu1 %v9276_v36 }
 0x1c4   :  { %4044 = vmatprep.subr.bf16.mxu0 %v9281_v15  ;;  %4237 = vmatprep.subr.bf16.mxu1 %v9284_v34  ;;  %v9303_v34 = vld [vmem:[%s13344_s3 + $0x3a0] ss:$16 sps:$4 sm:$0xff]  }
 0x1c7   :  { %4045 = vmatpush1.bf16.msra.mxu0 %v9279_v4  ;;  %4238 = vmatpush1.bf16.msra.mxu1 %v9282_v22 }
 0x1c8   :  { %4046 = vmatprep.subr.bf16.mxu0 %v9287_v5  ;;  %4239 = vmatprep.subr.bf16.mxu1 %v9290_v39 }
 0x1c9   :  { %8161 = vmatmul.mubr.msk.bf16.gmra.mrb[84].mxu0 %vm557_vm1, %v10567_v0  ;;  %8177 = vmatmul.mubr.msk.bf16.gmra.mrb[84].mxu1 %vm557_vm1, %v10567_v0  ;;  %v9296_v0 = vld [vmem:[%s13344_s3 + $0x36c] ss:$16 sps:$4 sm:$0xff]  }
 0x1ca   :  { %2184 = vmatprep.mubr.bf16.mxu0 %v13457_v37  ;;  %2377 = vmatprep.mubr.bf16.mxu1 %v13457_v37 }
 0x1cb   :  { %4047 = vmatpush1.bf16.msra.mxu0 %v9285_v48  ;;  %4240 = vmatpush1.bf16.msra.mxu1 %v9288_v19  ;;  %v9305_v48 = vld [vmem:[%s13344_s3 + $0x3a4] ss:$16 sps:$4 sm:$0xff]  }
 0x1cc   :  { %4048 = vmatprep.subr.bf16.mxu0 %v9293_v8  ;;  %4241 = vmatprep.subr.bf16.mxu1 %v9296_v0 }
 0x1cf   :  { %4049 = vmatpush1.bf16.msra.mxu0 %v9291_v44  ;;  %4242 = vmatpush1.bf16.msra.mxu1 %v9294_v33  ;;  %v9306_v33 = vld [vmem:[%s13344_s3 + $0x3a8] ss:$16 sps:$4 sm:$0xff]  }
 0x1d0   :  { %4243 = vmatprep.subr.bf16.mxu1 %v9302_v18 }
 0x1d1   :  { %8162 = vmatmul.mubr.msk.bf16.gmra.mrb[88].mxu0 %vm557_vm1, %v10577_v1  ;;  %8178 = vmatmul.mubr.msk.bf16.gmra.mrb[88].mxu1 %vm557_vm1, %v10577_v1  ;;  %v13465_v1 = vld [vmem:[#allocation2_spill] sm:$0xff] }
 0x1d2   :  { %2194 = vmatprep.mubr.bf16.mxu0 %v13457_v37  ;;  %2387 = vmatprep.mubr.bf16.mxu1 %v13457_v37  ;;  %v13362_v12 = vsub.s32 1, %v13465_v1  ;;  %v13361_v20 = vsub.s32 3, %v13465_v1  ;;  %vm3480_vm2 = vcmp.lt.s32.totalorder %v13465_v1, 6 }
 0x1d3   :  { %4244 = vmatpush1.bf16.msra.mxu1 %v9300_v62 }
 0x1d9   :  { %8163 = vmatmul.mubr.msk.bf16.gmra.mrb[92].mxu0 %vm557_vm1, %v10587_v27  ;;  %8179 = vmatmul.mubr.msk.bf16.gmra.mrb[92].mxu1 %vm557_vm1, %v10587_v27  ;;  %v13364_v27 = vsub.s32 0, %v13465_v1 }
 0x1da   :  { %2204 = vmatprep.mubr.bf16.mxu0 %v13457_v37  ;;  %2397 = vmatprep.mubr.bf16.mxu1 %v13457_v37 }
 0x1e1   :  { %8164 = vmatmul.mubr.msk.bf16.gmra.mrb[96].mxu0 %vm557_vm1, %v10597_v28  ;;  %8180 = vmatmul.mubr.msk.bf16.gmra.mrb[96].mxu1 %vm557_vm1, %v10597_v28  ;;  %v10883_v28 = vld [vmem:[%s13345_s2] sm:$0xff] }
 0x1e2   :  { %2214 = vmatprep.mubr.bf16.mxu0 %v13457_v37  ;;  %2407 = vmatprep.mubr.bf16.mxu1 %v13457_v37  ;;  %v10893_v21 = vrot.slane %v10883_v28, %v13364_v27  ;;  %v10905_v46 = vrot.slane %v10883_v28, %v13362_v12  ;;  %v10920_v17 = vrot.slane %v10883_v28, %v13361_v20 }
 0x1e9   :  { %8165 = vmatmul.mubr.msk.bf16.gmra.mrb[100].mxu0 %vm557_vm1, %v10607_v55  ;;  %8181 = vmatmul.mubr.msk.bf16.gmra.mrb[100].mxu1 %vm557_vm1, %v10607_v55  ;;  %v13363_v55 = vsub.s32 2, %v13465_v1 }
 0x1ea   :  { %2224 = vmatprep.mubr.bf16.mxu0 %v13457_v37  ;;  %2417 = vmatprep.mubr.bf16.mxu1 %v13457_v37 }
 0x1eb   :  { %v10900_v32 = vrot.slane %v10883_v28, %v13363_v55 }
 0x1f1   :  { %8166 = vmatmul.mubr.msk.bf16.gmra.mrb[104].mxu0 %vm557_vm1, %v10617_v56  ;;  %8182 = vmatmul.mubr.msk.bf16.gmra.mrb[104].mxu1 %vm557_vm1, %v10617_v56  ;;  %v9299_v56 = vld [vmem:[%s13344_s3 + $0x384] ss:$16 sps:$4 sm:$0xff]  }
 0x1f2   :  { %2234 = vmatprep.mubr.bf16.mxu0 %v13457_v37  ;;  %2427 = vmatprep.mubr.bf16.mxu1 %v13457_v37 }
 0x1f3   :  { %4050 = vmatprep.subr.bf16.mxu0 %v9299_v56 }
 0x1f4   :  { %v1740_v26 = vpop.f32.mrb[0].mxu0  ;;  %v1933_v38 = vpop.f32.mrb[0].mxu1  ;;  %4051 = vmatpush1.bf16.msra.mxu0 %v9297_v47 }
 0x1f5   :  { %v2520_v59 = vadd.f32 %v10893_v21, %v1740_v26  ;;  %v1742_v49 = vpop.f32.mrb[1].mxu0  ;;  %v2522_v51 = vadd.f32 %v10900_v32, %v1933_v38  ;;  %v1935_v7 = vpop.f32.mrb[1].mxu1  ;;  %4052 = vmatprep.subr.bf16.mxu0 %v9305_v48  ;;  %v9308_v26 = vld [vmem:[%s13344_s3 + $0x3ac] ss:$16 sps:$4 sm:$0xff]  }
 0x1f6   :  { %v2521_v35 = vadd.f32 %v10905_v46, %v1742_v49  ;;  %v1744_v25 = vpop.f32.mrb[2].mxu0  ;;  %v2523_v50 = vadd.f32 %v10920_v17, %v1935_v7  ;;  %v1937_v40 = vpop.f32.mrb[2].mxu1  ;;  %4245 = vmatprep.subr.bf16.mxu1 %v9308_v26 }
 0x1f7   :  { %v2776_v58 = vmax.f32 %v2520_v59, 0.0  ;;  %v2528_v10 = vadd.f32 %v10893_v21, %v1744_v25  ;;  %v1746_v41 = vpop.f32.mrb[3].mxu0  ;;  %v2778_v30 = vmax.f32 %v2522_v51, 0.0  ;;  %v2530_v16 = vadd.f32 %v10900_v32, %v1937_v40  ;;  %v1939_v13 = vpop.f32.mrb[3].mxu1  ;;  %4246 = vmatpush1.bf16.msra.mxu1 %v9306_v33 }
 0x1f8   :  { %v2777_v9 = vmax.f32 %v2521_v35, 0.0  ;;  %v2529_v23 = vadd.f32 %v10905_v46, %v1746_v41  ;;  %v2779_v43 = vmax.f32 %v2523_v50, 0.0  ;;  %v2531_v53 = vadd.f32 %v10920_v17, %v1939_v13  ;;  %v9311_v50 = vld [vmem:[%s13344_s3 + $0x3c4] ss:$16 sps:$4 sm:$0xff]   ;;  %4053 = vmatpush1.bf16.msra.mxu0 %v9303_v34 }
 0x1f9   :  { %v2784_v52 = vmax.f32 %v2528_v10, 0.0  ;;  %8167 = vmatmul.mubr.msk.bf16.gmra.mrb[108].mxu0 %vm557_vm1, %v10627_v63  ;;  %v10936_v3 = vmax.f32 %v2776_v58, %v2778_v30  ;;  %v2786_v60 = vmax.f32 %v2530_v16, 0.0  ;;  %8183 = vmatmul.mubr.msk.bf16.gmra.mrb[108].mxu1 %vm557_vm1, %v10627_v63  ;;  %v9314_v10 = vld [vmem:[%s13344_s3 + $0x3cc] ss:$16 sps:$4 sm:$0xff]   ;;  %v9312_v30 = vld [vmem:[%s13344_s3 + $0x3c8] ss:$16 sps:$4 sm:$0xff]  }
 0x1fa   :  { %v2785_v6 = vmax.f32 %v2529_v23, 0.0  ;;  %2244 = vmatprep.mubr.bf16.mxu0 %v13457_v37  ;;  %v10941_v24 = vmax.f32 %v2777_v9, %v2779_v43  ;;  %v2787_v45 = vmax.f32 %v2531_v53, 0.0  ;;  %2437 = vmatprep.mubr.bf16.mxu1 %v13457_v37  ;;  %v9317_v34 = vld [vmem:[%s13344_s3 + $0x3e4] ss:$16 sps:$4 sm:$0xff]  }
 0x1fb   :  { %v10944_v54 = vmax.f32 %v2784_v52, %v2786_v60  ;;  %4054 = vmatprep.subr.bf16.mxu0 %v9311_v50  ;;  %4247 = vmatprep.subr.bf16.mxu1 %v9314_v10 }
 0x1fc   :  { %v1750_v11 = vpop.f32.mrb[4].mxu0  ;;  %v10946_v31 = vmax.f32 %v2785_v6, %v2787_v45  ;;  %v1943_v36 = vpop.f32.mrb[4].mxu1  ;;  %4248 = vmatpush1.bf16.msra.mxu1 %v9312_v30 }
 0x1fd   :  { %v2536_v42 = vadd.f32 %v10893_v21, %v1750_v11  ;;  %v1752_v57 = vpop.f32.mrb[5].mxu0  ;;  %v2538_v4 = vadd.f32 %v10900_v32, %v1943_v36  ;;  %v1945_v15 = vpop.f32.mrb[5].mxu1 }
 0x1fe   :  { %v2537_v63 = vadd.f32 %v10905_v46, %v1752_v57  ;;  %v1754_v22 = vpop.f32.mrb[6].mxu0  ;;  %v2539_v19 = vadd.f32 %v10920_v17, %v1945_v15  ;;  %v1947_v44 = vpop.f32.mrb[6].mxu1 }
 0x1ff   :  { %v2792_v5 = vmax.f32 %v2536_v42, 0.0  ;;  %v2544_v39 = vadd.f32 %v10893_v21, %v1754_v22  ;;  %v1756_v8 = vpop.f32.mrb[7].mxu0  ;;  %v2794_v0 = vmax.f32 %v2538_v4, 0.0  ;;  %v2546_v56 = vadd.f32 %v10900_v32, %v1947_v44  ;;  %v1949_v18 = vpop.f32.mrb[7].mxu1  ;;  %v9318_v44 = vld [vmem:[%s13344_s3 + $0x3e8] ss:$16 sps:$4 sm:$0xff]  }
 0x200   :  { %v2793_v47 = vmax.f32 %v2537_v63, 0.0  ;;  %v2545_v62 = vadd.f32 %v10905_v46, %v1756_v8  ;;  %v2795_v59 = vmax.f32 %v2539_v19, 0.0  ;;  %v2547_v49 = vadd.f32 %v10920_v17, %v1949_v18 }
 0x201   :  { %v2800_v38 = vmax.f32 %v2544_v39, 0.0  ;;  %8168 = vmatmul.mubr.msk.bf16.gmra.mrb[112].mxu0 %vm557_vm1, %v10637_v2  ;;  %v10970_v51 = vmax.f32 %v2792_v5, %v2794_v0  ;;  %v2802_v35 = vmax.f32 %v2546_v56, 0.0  ;;  %8184 = vmatmul.mubr.msk.bf16.gmra.mrb[112].mxu1 %vm557_vm1, %v10637_v2  ;;  %v9309_v2 = vld [vmem:[%s13344_s3 + $0x3c0] ss:$16 sps:$4 sm:$0xff]  }
 0x202   :  { %v2801_v7 = vmax.f32 %v2545_v62, 0.0  ;;  %2254 = vmatprep.mubr.bf16.mxu0 %v13457_v37  ;;  %v10975_v25 = vmax.f32 %v2793_v47, %v2795_v59  ;;  %v2803_v58 = vmax.f32 %v2547_v49, 0.0  ;;  %2447 = vmatprep.mubr.bf16.mxu1 %v13457_v37  ;;  %v9315_v39 = vld [vmem:[%s13344_s3 + $0x3e0] ss:$16 sps:$4 sm:$0xff]   ;;  %v9320_v47 = vld [vmem:[%s13344_s3 + $0x3ec] ss:$16 sps:$4 sm:$0xff]  }
 0x203   :  { %v10984_v40 = vmax.f32 %v2800_v38, %v2802_v35  ;;  %4055 = vmatpush1.bf16.msra.mxu0 %v9309_v2  ;;  %4249 = vmatprep.subr.bf16.mxu1 %v9320_v47 }
 0x204   :  { %v1760_v41 = vpop.f32.mrb[8].mxu0  ;;  %v10992_v9 = vmax.f32 %v2801_v7, %v2803_v58  ;;  %v1953_v23 = vpop.f32.mrb[8].mxu1  ;;  %4056 = vmatprep.subr.bf16.mxu0 %v9317_v34  ;;  %4250 = vmatpush1.bf16.msra.mxu1 %v9318_v44 }
 0x205   :  { %v2552_v16 = vadd.f32 %v10893_v21, %v1760_v41  ;;  %v1762_v13 = vpop.f32.mrb[9].mxu0  ;;  %v2554_v43 = vadd.f32 %v10900_v32, %v1953_v23  ;;  %v1955_v53 = vpop.f32.mrb[9].mxu1 }
 0x206   :  { %v2553_v52 = vadd.f32 %v10905_v46, %v1762_v13  ;;  %v1764_v60 = vpop.f32.mrb[10].mxu0  ;;  %v2555_v45 = vadd.f32 %v10920_v17, %v1955_v53  ;;  %v1957_v42 = vpop.f32.mrb[10].mxu1 }
 0x207   :  { %v2808_v6 = vmax.f32 %v2552_v16, 0.0  ;;  %v2560_v11 = vadd.f32 %v10893_v21, %v1764_v60  ;;  %v1766_v36 = vpop.f32.mrb[11].mxu0  ;;  %v2810_v57 = vmax.f32 %v2554_v43, 0.0  ;;  %v2562_v63 = vadd.f32 %v10900_v32, %v1957_v42  ;;  %v1959_v22 = vpop.f32.mrb[11].mxu1  ;;  %4057 = vmatpush1.bf16.msra.mxu0 %v9315_v39 }
 0x208   :  { %v2809_v4 = vmax.f32 %v2553_v52, 0.0  ;;  %v2561_v15 = vadd.f32 %v10905_v46, %v1766_v36  ;;  %v2811_v48 = vmax.f32 %v2555_v45, 0.0  ;;  %v2563_v19 = vadd.f32 %v10920_v17, %v1959_v22  ;;  %v9323_v22 = vld [vmem:[%s13344_s3 + $0x4] ss:$16 sps:$4 sm:$0xff]  }
 0x209   :  { %v2816_v5 = vmax.f32 %v2560_v11, 0.0  ;;  %8169 = vmatmul.mubr.msk.bf16.gmra.mrb[116].mxu0 %vm557_vm1, %v10647_v14  ;;  %v11013_v8 = vmax.f32 %v2808_v6, %v2810_v57  ;;  %v2818_v33 = vmax.f32 %v2562_v63, 0.0  ;;  %8185 = vmatmul.mubr.msk.bf16.gmra.mrb[116].mxu1 %vm557_vm1, %v10647_v14 }
 0x20a   :  { %v2817_v0 = vmax.f32 %v2561_v15, 0.0  ;;  %2264 = vmatprep.mubr.bf16.mxu0 %v13457_v37  ;;  %v11021_v56 = vmax.f32 %v2809_v4, %v2811_v48  ;;  %v2819_v62 = vmax.f32 %v2563_v19, 0.0  ;;  %2457 = vmatprep.mubr.bf16.mxu1 %v13457_v37  ;;  %v9326_v19 = vld [vmem:[%s13344_s3 + $0xc] ss:$16 sps:$4 sm:$0xff]  }
 0x20b   :  { %v11024_v18 = vmax.f32 %v2816_v5, %v2818_v33  ;;  %4732 = vmatprep.subr.bf16.mxu0 %v9323_v22  ;;  %4925 = vmatprep.subr.bf16.mxu1 %v9326_v19 }
 0x20c   :  { %v1770_v26 = vpop.f32.mrb[12].mxu0  ;;  %v11026_v59 = vmax.f32 %v2817_v0, %v2819_v62  ;;  %v1963_v38 = vpop.f32.mrb[12].mxu1 }
 0x20d   :  { %v2568_v14 = vadd.f32 %v10893_v21, %v1770_v26  ;;  %v1772_v49 = vpop.f32.mrb[13].mxu0  ;;  %v2570_v35 = vadd.f32 %v10900_v32, %v1963_v38  ;;  %v1965_v58 = vpop.f32.mrb[13].mxu1 }
 0x20e   :  { %v2569_v7 = vadd.f32 %v10905_v46, %v1772_v49  ;;  %v1774_v50 = vpop.f32.mrb[14].mxu0  ;;  %v2571_v41 = vadd.f32 %v10920_v17, %v1965_v58  ;;  %v1967_v30 = vpop.f32.mrb[14].mxu1 }
 0x20f   :  { %v2824_v10 = vmax.f32 %v2568_v14, 0.0  ;;  %v2576_v2 = vadd.f32 %v10893_v21, %v1774_v50  ;;  %v1776_v16 = vpop.f32.mrb[15].mxu0  ;;  %v2826_v23 = vmax.f32 %v2570_v35, 0.0  ;;  %v2578_v43 = vadd.f32 %v10900_v32, %v1967_v30  ;;  %v1969_v53 = vpop.f32.mrb[15].mxu1 }
 0x210   :  { %v2825_v13 = vmax.f32 %v2569_v7, 0.0  ;;  %v2577_v52 = vadd.f32 %v10905_v46, %v1776_v16  ;;  %v2827_v60 = vmax.f32 %v2571_v41, 0.0  ;;  %v2579_v45 = vadd.f32 %v10920_v17, %v1969_v53 }
 0x211   :  { %v2832_v6 = vmax.f32 %v2576_v2, 0.0  ;;  %8170 = vmatmul.mubr.msk.bf16.gmra.mrb[120].mxu0 %vm557_vm1, %v10657_v29  ;;  %v11038_v11 = vmax.f32 %v2824_v10, %v2826_v23  ;;  %v2834_v42 = vmax.f32 %v2578_v43, 0.0  ;;  %8186 = vmatmul.mubr.msk.bf16.gmra.mrb[120].mxu1 %vm557_vm1, %v10657_v29 }
 0x212   :  { %v2833_v36 = vmax.f32 %v2577_v52, 0.0  ;;  %2274 = vmatprep.mubr.bf16.mxu0 %v13457_v37  ;;  %v11043_v57 = vmax.f32 %v2825_v13, %v2827_v60  ;;  %v2835_v4 = vmax.f32 %v2579_v45, 0.0  ;;  %2467 = vmatprep.mubr.bf16.mxu1 %v13457_v37 }
 0x213   :  { %v11046_v63 = vmax.f32 %v2832_v6, %v2834_v42 }
 0x214   :  { %v1780_v15 = vpop.f32.mrb[16].mxu0  ;;  %v11051_v34 = vmax.f32 %v2833_v36, %v2835_v4  ;;  %v1973_v5 = vpop.f32.mrb[16].mxu1 }
 0x215   :  { %v2584_v48 = vadd.f32 %v10893_v21, %v1780_v15  ;;  %v1782_v29 = vpop.f32.mrb[17].mxu0  ;;  %v2586_v39 = vadd.f32 %v10900_v32, %v1973_v5  ;;  %v1975_v44 = vpop.f32.mrb[17].mxu1 }
 0x216   :  { %v2585_v37 = vadd.f32 %v10905_v46, %v1782_v29  ;;  %v1784_v33 = vpop.f32.mrb[18].mxu0  ;;  %v2587_v47 = vadd.f32 %v10920_v17, %v1975_v44  ;;  %v1977_v26 = vpop.f32.mrb[18].mxu1 }
 0x217   :  { %v2840_v0 = vmax.f32 %v2584_v48, 0.0  ;;  %v2592_v62 = vadd.f32 %v10893_v21, %v1784_v33  ;;  %v1786_v14 = vpop.f32.mrb[19].mxu0  ;;  %v2842_v38 = vmax.f32 %v2586_v39, 0.0  ;;  %v2594_v35 = vadd.f32 %v10900_v32, %v1977_v26  ;;  %v1979_v58 = vpop.f32.mrb[19].mxu1 }
 0x218   :  { %v2841_v49 = vmax.f32 %v2585_v37, 0.0  ;;  %v2593_v7 = vadd.f32 %v10905_v46, %v1786_v14  ;;  %v2843_v50 = vmax.f32 %v2587_v47, 0.0  ;;  %v2595_v41 = vadd.f32 %v10920_v17, %v1979_v58 }
 0x219   :  { %v2848_v10 = vmax.f32 %v2592_v62, 0.0  ;;  %8171 = vmatmul.mubr.msk.bf16.gmra.mrb[124].mxu0 %vm557_vm1, %v10670_v61  ;;  %v11066_v2 = vmax.f32 %v2840_v0, %v2842_v38  ;;  %v2850_v30 = vmax.f32 %v2594_v35, 0.0  ;;  %8187 = vmatmul.mubr.msk.bf16.gmra.mrb[124].mxu1 %vm557_vm1, %v10670_v61 }
 0x21a   :  { %v2849_v16 = vmax.f32 %v2593_v7, 0.0  ;;  %v11070_v23 = vmax.f32 %v2841_v49, %v2843_v50  ;;  %v2851_v13 = vmax.f32 %v2595_v41, 0.0 }
 0x21b   :  { %v11072_v43 = vmax.f32 %v2848_v10, %v2850_v30 }
 0x21c   :  { %v1790_v52 = vpop.f32.mrb[20].mxu0  ;;  %v11074_v53 = vmax.f32 %v2849_v16, %v2851_v13  ;;  %v1983_v6 = vpop.f32.mrb[20].mxu1 }
 0x21d   :  { %v2600_v60 = vadd.f32 %v10893_v21, %v1790_v52  ;;  %v1792_v45 = vpop.f32.mrb[21].mxu0  ;;  %v2602_v42 = vadd.f32 %v10900_v32, %v1983_v6  ;;  %v1985_v4 = vpop.f32.mrb[21].mxu1 }
 0x21e   :  { %v2601_v36 = vadd.f32 %v10905_v46, %v1792_v45  ;;  %v1794_v15 = vpop.f32.mrb[22].mxu0  ;;  %v2603_v61 = vadd.f32 %v10920_v17, %v1985_v4  ;;  %v1987_v5 = vpop.f32.mrb[22].mxu1 }
 0x21f   :  { %v2856_v22 = vmax.f32 %v2600_v60, 0.0  ;;  %v2608_v48 = vadd.f32 %v10893_v21, %v1794_v15  ;;  %v1796_v29 = vpop.f32.mrb[23].mxu0  ;;  %v2858_v19 = vmax.f32 %v2602_v42, 0.0  ;;  %v2610_v37 = vadd.f32 %v10900_v32, %v1987_v5  ;;  %v1989_v33 = vpop.f32.mrb[23].mxu1 }
 0x220   :  { %v2857_v39 = vmax.f32 %v2601_v36, 0.0  ;;  %v2609_v44 = vadd.f32 %v10905_v46, %v1796_v29  ;;  %v2859_v0 = vmax.f32 %v2603_v61, 0.0  ;;  %v2611_v62 = vadd.f32 %v10920_v17, %v1989_v33 }
 0x221   :  { %v2864_v47 = vmax.f32 %v2608_v48, 0.0  ;;  %v11084_v26 = vmax.f32 %v2856_v22, %v2858_v19  ;;  %v2866_v14 = vmax.f32 %v2610_v37, 0.0 }
 0x222   :  { %v2865_v38 = vmax.f32 %v2609_v44, 0.0  ;;  %v11086_v49 = vmax.f32 %v2857_v39, %v2859_v0  ;;  %v2867_v35 = vmax.f32 %v2611_v62, 0.0 }
 0x223   :  { %v11088_v7 = vmax.f32 %v2864_v47, %v2866_v14 }
 0x224   :  { %v1800_v58 = vpop.f32.mrb[24].mxu0  ;;  %v11090_v50 = vmax.f32 %v2865_v38, %v2867_v35  ;;  %v1993_v41 = vpop.f32.mrb[24].mxu1 }
 0x225   :  { %v2616_v10 = vadd.f32 %v10893_v21, %v1800_v58  ;;  %v1802_v30 = vpop.f32.mrb[25].mxu0  ;;  %v2618_v16 = vadd.f32 %v10900_v32, %v1993_v41  ;;  %v1995_v52 = vpop.f32.mrb[25].mxu1 }
 0x226   :  { %v2617_v13 = vadd.f32 %v10905_v46, %v1802_v30  ;;  %v1804_v60 = vpop.f32.mrb[26].mxu0  ;;  %v2619_v45 = vadd.f32 %v10920_v17, %v1995_v52  ;;  %v1997_v36 = vpop.f32.mrb[26].mxu1 }
 0x227   :  { %v2872_v6 = vmax.f32 %v2616_v10, 0.0  ;;  %v2624_v42 = vadd.f32 %v10893_v21, %v1804_v60  ;;  %v1806_v4 = vpop.f32.mrb[27].mxu0  ;;  %v2874_v15 = vmax.f32 %v2618_v16, 0.0  ;;  %v2626_v61 = vadd.f32 %v10900_v32, %v1997_v36  ;;  %v1999_v5 = vpop.f32.mrb[27].mxu1 }
 0x228   :  { %v2873_v22 = vmax.f32 %v2617_v13, 0.0  ;;  %v2625_v48 = vadd.f32 %v10905_v46, %v1806_v4  ;;  %v2875_v29 = vmax.f32 %v2619_v45, 0.0  ;;  %v2627_v39 = vadd.f32 %v10920_v17, %v1999_v5 }
 0x229   :  { %v2880_v19 = vmax.f32 %v2624_v42, 0.0  ;;  %v11100_v37 = vmax.f32 %v2872_v6, %v2874_v15  ;;  %v2882_v44 = vmax.f32 %v2626_v61, 0.0 }
 0x22a   :  { %v2881_v33 = vmax.f32 %v2625_v48, 0.0  ;;  %v11102_v0 = vmax.f32 %v2873_v22, %v2875_v29  ;;  %v2883_v47 = vmax.f32 %v2627_v39, 0.0 }
 0x22b   :  { %v11104_v62 = vmax.f32 %v2880_v19, %v2882_v44 }
 0x22c   :  { %v1810_v14 = vpop.f32.mrb[28].mxu0  ;;  %v11106_v38 = vmax.f32 %v2881_v33, %v2883_v47  ;;  %v2003_v58 = vpop.f32.mrb[28].mxu1 }
 0x22d   :  { %v2632_v35 = vadd.f32 %v10893_v21, %v1810_v14  ;;  %v1812_v10 = vpop.f32.mrb[29].mxu0  ;;  %v2634_v41 = vadd.f32 %v10900_v32, %v2003_v58  ;;  %v2005_v16 = vpop.f32.mrb[29].mxu1 }
 0x22e   :  { %v2633_v30 = vadd.f32 %v10905_v46, %v1812_v10  ;;  %v1814_v13 = vpop.f32.mrb[30].mxu0  ;;  %v2635_v60 = vadd.f32 %v10920_v17, %v2005_v16  ;;  %v2007_v45 = vpop.f32.mrb[30].mxu1 }
 0x22f   :  { %v2888_v52 = vmax.f32 %v2632_v35, 0.0  ;;  %v2640_v6 = vadd.f32 %v10893_v21, %v1814_v13  ;;  %v1816_v42 = vpop.f32.mrb[31].mxu0  ;;  %v2890_v36 = vmax.f32 %v2634_v41, 0.0  ;;  %v2642_v15 = vadd.f32 %v10900_v32, %v2007_v45  ;;  %v2009_v61 = vpop.f32.mrb[31].mxu1 }
 0x230   :  { %v2889_v4 = vmax.f32 %v2633_v30, 0.0  ;;  %v2641_v22 = vadd.f32 %v10905_v46, %v1816_v42  ;;  %v2891_v48 = vmax.f32 %v2635_v60, 0.0  ;;  %v2643_v29 = vadd.f32 %v10920_v17, %v2009_v61 }
 0x231   :  { %v2896_v5 = vmax.f32 %v2640_v6, 0.0  ;;  %v11116_v19 = vmax.f32 %v2888_v52, %v2890_v36  ;;  %v2898_v39 = vmax.f32 %v2642_v15, 0.0 }
 0x232   :  { %v2897_v44 = vmax.f32 %v2641_v22, 0.0  ;;  %v11118_v33 = vmax.f32 %v2889_v4, %v2891_v48  ;;  %v2899_v47 = vmax.f32 %v2643_v29, 0.0 }
 0x233   :  { %v11120_v14 = vmax.f32 %v2896_v5, %v2898_v39 }
 0x234   :  { %v1820_v35 = vpop.f32.mrb[32].mxu0  ;;  %v11122_v58 = vmax.f32 %v2897_v44, %v2899_v47  ;;  %v2013_v41 = vpop.f32.mrb[32].mxu1 }
 0x235   :  { %v2648_v10 = vadd.f32 %v10893_v21, %v1820_v35  ;;  %v1822_v30 = vpop.f32.mrb[33].mxu0  ;;  %v2650_v16 = vadd.f32 %v10900_v32, %v2013_v41  ;;  %v2015_v52 = vpop.f32.mrb[33].mxu1 }
 0x236   :  { %v2649_v13 = vadd.f32 %v10905_v46, %v1822_v30  ;;  %v1824_v60 = vpop.f32.mrb[34].mxu0  ;;  %v2651_v45 = vadd.f32 %v10920_v17, %v2015_v52  ;;  %v2017_v36 = vpop.f32.mrb[34].mxu1 }
 0x237   :  { %v2904_v6 = vmax.f32 %v2648_v10, 0.0  ;;  %v2656_v42 = vadd.f32 %v10893_v21, %v1824_v60  ;;  %v1826_v4 = vpop.f32.mrb[35].mxu0  ;;  %v2906_v15 = vmax.f32 %v2650_v16, 0.0  ;;  %v2658_v61 = vadd.f32 %v10900_v32, %v2017_v36  ;;  %v2019_v5 = vpop.f32.mrb[35].mxu1 }
 0x238   :  { %v2905_v22 = vmax.f32 %v2649_v13, 0.0  ;;  %v2657_v48 = vadd.f32 %v10905_v46, %v1826_v4  ;;  %v2907_v29 = vmax.f32 %v2651_v45, 0.0  ;;  %v2659_v44 = vadd.f32 %v10920_v17, %v2019_v5 }
 0x239   :  { %v2912_v39 = vmax.f32 %v2656_v42, 0.0  ;;  %v11132_v47 = vmax.f32 %v2904_v6, %v2906_v15  ;;  %v2914_v35 = vmax.f32 %v2658_v61, 0.0 }
 0x23a   :  { %v2913_v10 = vmax.f32 %v2657_v48, 0.0  ;;  %v11134_v41 = vmax.f32 %v2905_v22, %v2907_v29  ;;  %v2915_v30 = vmax.f32 %v2659_v44, 0.0 }
 0x23b   :  { %v11136_v52 = vmax.f32 %v2912_v39, %v2914_v35 }
 0x23c   :  { %v1830_v16 = vpop.f32.mrb[36].mxu0  ;;  %v11138_v13 = vmax.f32 %v2913_v10, %v2915_v30  ;;  %v2023_v36 = vpop.f32.mrb[36].mxu1 }
 0x23d   :  { %v2664_v60 = vadd.f32 %v10893_v21, %v1830_v16  ;;  %v1832_v4 = vpop.f32.mrb[37].mxu0  ;;  %v2666_v45 = vadd.f32 %v10900_v32, %v2023_v36  ;;  %v2025_v6 = vpop.f32.mrb[37].mxu1 }
 0x23e   :  { %v2665_v42 = vadd.f32 %v10905_v46, %v1832_v4  ;;  %v1834_v15 = vpop.f32.mrb[38].mxu0  ;;  %v2667_v22 = vadd.f32 %v10920_v17, %v2025_v6  ;;  %v2027_v5 = vpop.f32.mrb[38].mxu1 }
 0x23f   :  { %v2920_v61 = vmax.f32 %v2664_v60, 0.0  ;;  %v2672_v48 = vadd.f32 %v10893_v21, %v1834_v15  ;;  %v1836_v29 = vpop.f32.mrb[39].mxu0  ;;  %v2922_v39 = vmax.f32 %v2666_v45, 0.0  ;;  %v2674_v35 = vadd.f32 %v10900_v32, %v2027_v5  ;;  %v2029_v30 = vpop.f32.mrb[39].mxu1 }
 0x240   :  { %v2921_v44 = vmax.f32 %v2665_v42, 0.0  ;;  %v2673_v10 = vadd.f32 %v10905_v46, %v1836_v29  ;;  %v2923_v16 = vmax.f32 %v2667_v22, 0.0  ;;  %v2675_v4 = vadd.f32 %v10920_v17, %v2029_v30 }
 0x241   :  { %v2928_v36 = vmax.f32 %v2672_v48, 0.0  ;;  %v11148_v20 = vmax.f32 %v2920_v61, %v2922_v39  ;;  %v2930_v60 = vmax.f32 %v2674_v35, 0.0 }
 0x242   :  { %v2929_v12 = vmax.f32 %v2673_v10, 0.0  ;;  %v11150_v6 = vmax.f32 %v2921_v44, %v2923_v16  ;;  %v2931_v15 = vmax.f32 %v2675_v4, 0.0 }
 0x243   :  { %13466 = vst [vmem:[#allocation3_spill] sm:$0xff] %v11148_v20  ;;  %v11152_v55 = vmax.f32 %v2928_v36, %v2930_v60 }
 0x244   :  { %13467 = vst [vmem:[#allocation4_spill] sm:$0xff] %v11150_v6  ;;  %v1840_v45 = vpop.f32.mrb[40].mxu0  ;;  %v11154_v42 = vmax.f32 %v2929_v12, %v2931_v15  ;;  %v2033_v29 = vpop.f32.mrb[40].mxu1 }
 0x245   :  { %13468 = vst [vmem:[#allocation5_spill] sm:$0xff] %v11152_v55  ;;  %v2680_v5 = vadd.f32 %v10893_v21, %v1840_v45  ;;  %v1842_v27 = vpop.f32.mrb[41].mxu0  ;;  %v2682_v22 = vadd.f32 %v10900_v32, %v2033_v29  ;;  %v2035_v61 = vpop.f32.mrb[41].mxu1 }
 0x246   :  { %13469 = vst [vmem:[#allocation6_spill] sm:$0xff] %v11154_v42  ;;  %v2681_v48 = vadd.f32 %v10905_v46, %v1842_v27  ;;  %v1844_v39 = vpop.f32.mrb[42].mxu0  ;;  %v2683_v44 = vadd.f32 %v10920_v17, %v2035_v61  ;;  %v2037_v30 = vpop.f32.mrb[42].mxu1 }
 0x247   :  { %v2936_v35 = vmax.f32 %v2680_v5, 0.0  ;;  %v2688_v10 = vadd.f32 %v10893_v21, %v1844_v39  ;;  %v1846_v16 = vpop.f32.mrb[43].mxu0  ;;  %v2938_v36 = vmax.f32 %v2682_v22, 0.0  ;;  %v2690_v4 = vadd.f32 %v10900_v32, %v2037_v30  ;;  %v2039_v15 = vpop.f32.mrb[43].mxu1 }
 0x248   :  { %v2937_v12 = vmax.f32 %v2681_v48, 0.0  ;;  %v2689_v60 = vadd.f32 %v10905_v46, %v1846_v16  ;;  %v2939_v45 = vmax.f32 %v2683_v44, 0.0  ;;  %v2691_v27 = vadd.f32 %v10920_v17, %v2039_v15 }
 0x249   :  { %v2944_v29 = vmax.f32 %v2688_v10, 0.0  ;;  %v11164_v42 = vmax.f32 %v2936_v35, %v2938_v36  ;;  %v2946_v5 = vmax.f32 %v2690_v4, 0.0 }
 0x24a   :  { %v2945_v55 = vmax.f32 %v2689_v60, 0.0  ;;  %v11166_v61 = vmax.f32 %v2937_v12, %v2939_v45  ;;  %v2947_v39 = vmax.f32 %v2691_v27, 0.0 }
 0x24b   :  { %13470 = vst [vmem:[#allocation7_spill] sm:$0xff] %v11164_v42  ;;  %v11168_v6 = vmax.f32 %v2944_v29, %v2946_v5 }
 0x24c   :  { %13471 = vst [vmem:[#allocation2_spill] sm:$0xff] %v11166_v61  ;;  %v1850_v22 = vpop.f32.mrb[44].mxu0  ;;  %v11170_v48 = vmax.f32 %v2945_v55, %v2947_v39  ;;  %v2043_v16 = vpop.f32.mrb[44].mxu1 }
 0x24d   :  { %13472 = vst [vmem:[#allocation8_spill] sm:$0xff] %v11168_v6  ;;  %v2696_v30 = vadd.f32 %v10893_v21, %v1850_v22  ;;  %v1852_v20 = vpop.f32.mrb[45].mxu0  ;;  %v2698_v44 = vadd.f32 %v10900_v32, %v2043_v16  ;;  %v2045_v35 = vpop.f32.mrb[45].mxu1 }
 0x24e   :  { %13473 = vst [vmem:[#allocation9_spill] sm:$0xff] %v11170_v48  ;;  %v2697_v10 = vadd.f32 %v10905_v46, %v1852_v20  ;;  %v1854_v36 = vpop.f32.mrb[46].mxu0  ;;  %v2699_v12 = vadd.f32 %v10920_v17, %v2045_v35  ;;  %v2047_v15 = vpop.f32.mrb[46].mxu1 }
 0x24f   :  { %v2952_v4 = vmax.f32 %v2696_v30, 0.0  ;;  %v2704_v60 = vadd.f32 %v10893_v21, %v1854_v36  ;;  %v1856_v45 = vpop.f32.mrb[47].mxu0  ;;  %v2954_v29 = vmax.f32 %v2698_v44, 0.0  ;;  %v2706_v27 = vadd.f32 %v10900_v32, %v2047_v15  ;;  %v2049_v39 = vpop.f32.mrb[47].mxu1 }
 0x250   :  { %v2953_v55 = vmax.f32 %v2697_v10, 0.0  ;;  %v2705_v5 = vadd.f32 %v10905_v46, %v1856_v45  ;;  %v2955_v22 = vmax.f32 %v2699_v12, 0.0  ;;  %v2707_v20 = vadd.f32 %v10920_v17, %v2049_v39 }
 0x251   :  { %v2960_v16 = vmax.f32 %v2704_v60, 0.0  ;;  %v11180_v48 = vmax.f32 %v2952_v4, %v2954_v29  ;;  %v2962_v30 = vmax.f32 %v2706_v27, 0.0 }
 0x252   :  { %v2961_v6 = vmax.f32 %v2705_v5, 0.0  ;;  %v11182_v35 = vmax.f32 %v2953_v55, %v2955_v22  ;;  %v2963_v36 = vmax.f32 %v2707_v20, 0.0 }
 0x253   :  { %13474 = vst [vmem:[#allocation10_spill] sm:$0xff] %v11180_v48  ;;  %v11184_v61 = vmax.f32 %v2960_v16, %v2962_v30 }
 0x254   :  { %13475 = vst [vmem:[#allocation11_spill] sm:$0xff] %v11182_v35  ;;  %v1860_v44 = vpop.f32.mrb[48].mxu0  ;;  %v11186_v10 = vmax.f32 %v2961_v6, %v2963_v36  ;;  %v2053_v45 = vpop.f32.mrb[48].mxu1 }
 0x255   :  { %13476 = vst [vmem:[#allocation12_spill] sm:$0xff] %v11184_v61  ;;  %v2712_v15 = vadd.f32 %v10893_v21, %v1860_v44  ;;  %v1862_v42 = vpop.f32.mrb[49].mxu0  ;;  %v2714_v12 = vadd.f32 %v10900_v32, %v2053_v45  ;;  %v2055_v4 = vpop.f32.mrb[49].mxu1 }
 0x256   :  { %13477 = vst [vmem:[#allocation13_spill] sm:$0xff] %v11186_v10  ;;  %v2713_v60 = vadd.f32 %v10905_v46, %v1862_v42  ;;  %v1864_v29 = vpop.f32.mrb[50].mxu0  ;;  %v2715_v55 = vadd.f32 %v10920_v17, %v2055_v4  ;;  %v2057_v39 = vpop.f32.mrb[50].mxu1 }
 0x257   :  { %v2968_v27 = vmax.f32 %v2712_v15, 0.0  ;;  %v2720_v5 = vadd.f32 %v10893_v21, %v1864_v29  ;;  %v1866_v22 = vpop.f32.mrb[51].mxu0  ;;  %v2970_v16 = vmax.f32 %v2714_v12, 0.0  ;;  %v2722_v20 = vadd.f32 %v10900_v32, %v2057_v39  ;;  %v2059_v36 = vpop.f32.mrb[51].mxu1 }
 0x258   :  { %v2969_v6 = vmax.f32 %v2713_v60, 0.0  ;;  %v2721_v30 = vadd.f32 %v10905_v46, %v1866_v22  ;;  %v2971_v44 = vmax.f32 %v2715_v55, 0.0  ;;  %v2723_v42 = vadd.f32 %v10920_v17, %v2059_v36 }
 0x259   :  { %v2976_v45 = vmax.f32 %v2720_v5, 0.0  ;;  %v11196_v10 = vmax.f32 %v2968_v27, %v2970_v16  ;;  %v2978_v15 = vmax.f32 %v2722_v20, 0.0 }
 0x25a   :  { %v2977_v61 = vmax.f32 %v2721_v30, 0.0  ;;  %v11198_v4 = vmax.f32 %v2969_v6, %v2971_v44  ;;  %v2979_v29 = vmax.f32 %v2723_v42, 0.0 }
 0x25b   :  { %13478 = vst [vmem:[#allocation14_spill] sm:$0xff] %v11196_v10  ;;  %v11200_v35 = vmax.f32 %v2976_v45, %v2978_v15 }
 0x25c   :  { %13479 = vst [vmem:[#allocation15_spill] sm:$0xff] %v11198_v4  ;;  %v1870_v12 = vpop.f32.mrb[52].mxu0  ;;  %v11202_v60 = vmax.f32 %v2977_v61, %v2979_v29  ;;  %v2063_v22 = vpop.f32.mrb[52].mxu1 }
 0x25d   :  { %13480 = vst [vmem:[#allocation16_spill] sm:$0xff] %v11200_v35  ;;  %v2728_v39 = vadd.f32 %v10893_v21, %v1870_v12  ;;  %v1872_v48 = vpop.f32.mrb[53].mxu0  ;;  %v2730_v55 = vadd.f32 %v10900_v32, %v2063_v22  ;;  %v2065_v27 = vpop.f32.mrb[53].mxu1 }
 0x25e   :  { %13481 = vst [vmem:[#allocation17_spill] sm:$0xff] %v11202_v60  ;;  %v2729_v5 = vadd.f32 %v10905_v46, %v1872_v48  ;;  %v1874_v16 = vpop.f32.mrb[54].mxu0  ;;  %v2731_v6 = vadd.f32 %v10920_v17, %v2065_v27  ;;  %v2067_v36 = vpop.f32.mrb[54].mxu1 }
 0x25f   :  { %v2984_v20 = vmax.f32 %v2728_v39, 0.0  ;;  %v2736_v30 = vadd.f32 %v10893_v21, %v1874_v16  ;;  %v1876_v44 = vpop.f32.mrb[55].mxu0  ;;  %v2986_v45 = vmax.f32 %v2730_v55, 0.0  ;;  %v2738_v42 = vadd.f32 %v10900_v32, %v2067_v36  ;;  %v2069_v29 = vpop.f32.mrb[55].mxu1 }
 0x260   :  { %v2985_v61 = vmax.f32 %v2729_v5, 0.0  ;;  %v2737_v15 = vadd.f32 %v10905_v46, %v1876_v44  ;;  %v2987_v12 = vmax.f32 %v2731_v6, 0.0  ;;  %v2739_v48 = vadd.f32 %v10920_v17, %v2069_v29 }
 0x261   :  { %v2992_v22 = vmax.f32 %v2736_v30, 0.0  ;;  %v11212_v60 = vmax.f32 %v2984_v20, %v2986_v45  ;;  %v2994_v39 = vmax.f32 %v2738_v42, 0.0 }
 0x262   :  { %v2993_v35 = vmax.f32 %v2737_v15, 0.0  ;;  %v11214_v27 = vmax.f32 %v2985_v61, %v2987_v12  ;;  %v2995_v16 = vmax.f32 %v2739_v48, 0.0 }
 0x263   :  { %13482 = vst [vmem:[#allocation18_spill] sm:$0xff] %v11212_v60  ;;  %v11216_v4 = vmax.f32 %v2992_v22, %v2994_v39 }
 0x264   :  { %13483 = vst [vmem:[#allocation19_spill] sm:$0xff] %v11214_v27  ;;  %v1880_v55 = vpop.f32.mrb[56].mxu0  ;;  %v11218_v5 = vmax.f32 %v2993_v35, %v2995_v16  ;;  %v2073_v44 = vpop.f32.mrb[56].mxu1  ;;  %v2498_v27 = vsub.s32 4, %v13465_v1 }
 0x265   :  { %13484 = vst [vmem:[#allocation20_spill] sm:$0xff] %v11216_v4  ;;  %v2744_v36 = vadd.f32 %v10893_v21, %v1880_v55  ;;  %v1882_v10 = vpop.f32.mrb[57].mxu0  ;;  %v2746_v6 = vadd.f32 %v10900_v32, %v2073_v44  ;;  %v2075_v20 = vpop.f32.mrb[57].mxu1 }
 0x266   :  { %13485 = vst [vmem:[#allocation21_spill] sm:$0xff] %v11218_v5  ;;  %v2745_v30 = vadd.f32 %v10905_v46, %v1882_v10  ;;  %v1884_v45 = vpop.f32.mrb[58].mxu0  ;;  %v2747_v61 = vadd.f32 %v10920_v17, %v2075_v20  ;;  %v2077_v29 = vpop.f32.mrb[58].mxu1 }
 0x267   :  { %v3000_v42 = vmax.f32 %v2744_v36, 0.0  ;;  %v2752_v15 = vadd.f32 %v10893_v21, %v1884_v45  ;;  %v1886_v12 = vpop.f32.mrb[59].mxu0  ;;  %v3002_v22 = vmax.f32 %v2746_v6, 0.0  ;;  %v2754_v48 = vadd.f32 %v10900_v32, %v2077_v29  ;;  %v2079_v16 = vpop.f32.mrb[59].mxu1 }
 0x268   :  { %v3001_v35 = vmax.f32 %v2745_v30, 0.0  ;;  %v2753_v39 = vadd.f32 %v10905_v46, %v1886_v12  ;;  %v3003_v55 = vmax.f32 %v2747_v61, 0.0  ;;  %v2755_v10 = vadd.f32 %v10920_v17, %v2079_v16 }
 0x269   :  { %v3008_v44 = vmax.f32 %v2752_v15, 0.0  ;;  %v11228_v5 = vmax.f32 %v3000_v42, %v3002_v22  ;;  %v3010_v36 = vmax.f32 %v2754_v48, 0.0  ;;  %v2506_v16 = vsub.s32 6, %v13465_v1 }
 0x26a   :  { %v3009_v4 = vmax.f32 %v2753_v39, 0.0  ;;  %v11230_v20 = vmax.f32 %v3001_v35, %v3003_v55  ;;  %v3011_v45 = vmax.f32 %v2755_v10, 0.0  ;;  %v2502_v39 = vsub.s32 5, %v13465_v1 }
 0x26b   :  { %13486 = vst [vmem:[#allocation22_spill] sm:$0xff] %v11228_v5  ;;  %v11233_v6 = vmax.f32 %v3008_v44, %v3010_v36  ;;  %v2510_v55 = vsub.s32 7, %v13465_v1 }
 0x26c   :  { %13487 = vst [vmem:[#allocation23_spill] sm:$0xff] %v11230_v20  ;;  %v1890_v30 = vpop.f32.mrb[60].mxu0  ;;  %v11235_v29 = vmax.f32 %v3009_v4, %v3011_v45  ;;  %v2083_v61 = vpop.f32.mrb[60].mxu1 }
 0x26d   :  { %13488 = vst [vmem:[#allocation24_spill] sm:$0xff] %v11233_v6  ;;  %v2760_v12 = vadd.f32 %v10893_v21, %v1890_v30  ;;  %v1892_v15 = vpop.f32.mrb[61].mxu0  ;;  %v2762_v42 = vadd.f32 %v10900_v32, %v2083_v61  ;;  %v2085_v35 = vpop.f32.mrb[61].mxu1  ;;  %v11246_v30 = vrot.slane %v10883_v28, %v2498_v27 }
 0x26e   :  { %13489 = vst [vmem:[#allocation25_spill] sm:$0xff] %v11235_v29  ;;  %v2761_v22 = vadd.f32 %v10905_v46, %v1892_v15  ;;  %v1894_v48 = vpop.f32.mrb[62].mxu0  ;;  %v2763_v4 = vadd.f32 %v10920_v17, %v2085_v35  ;;  %v2087_v36 = vpop.f32.mrb[62].mxu1 }
 0x26f   :  { %v3016_v44 = vmax.f32 %v2760_v12, 0.0  ;;  %v2768_v10 = vadd.f32 %v10893_v21, %v1894_v48  ;;  %v1896_v45 = vpop.f32.mrb[63].mxu0  ;;  %v3018_v29 = vmax.f32 %v2762_v42, 0.0  ;;  %v2770_v15 = vadd.f32 %v10900_v32, %v2087_v36  ;;  %v2089_v20 = vpop.f32.mrb[63].mxu1  ;;  %v9597_v21 = vld [vmem:[%s13345_s2] sm:$0xff] }
 0x270   :  { %v3017_v61 = vmax.f32 %v2761_v22, 0.0  ;;  %v2769_v6 = vadd.f32 %v10905_v46, %v1896_v45  ;;  %v3019_v5 = vmax.f32 %v2763_v4, 0.0  ;;  %v2771_v12 = vadd.f32 %v10920_v17, %v2089_v20 }
 0x271   :  { %v3024_v60 = vmax.f32 %v2768_v10, 0.0  ;;  %v11254_v35 = vrot.slane %v9597_v21, %v2506_v16  ;;  %v11256_v48 = vmax.f32 %v3016_v44, %v3018_v29  ;;  %v3026_v28 = vmax.f32 %v2770_v15, 0.0 }
 0x272   :  { %v3025_v27 = vmax.f32 %v2769_v6, 0.0  ;;  %v11258_v42 = vrot.slane %v9597_v21, %v2502_v39  ;;  %v11260_v32 = vmax.f32 %v3017_v61, %v3019_v5  ;;  %v3027_v46 = vmax.f32 %v2771_v12, 0.0 }
 0x273   :  { %v11262_v22 = vrot.slane %v9597_v21, %v2510_v55  ;;  %v11264_v4 = vmax.f32 %v3024_v60, %v3026_v28 }
 0x274   :  { %13490 = vst [vmem:[#allocation26_spill] sm:$0xff] %v11260_v32  ;;  %v2126_v17 = vpop.f32.mrb[64].mxu0  ;;  %v11266_v20 = vmax.f32 %v3025_v27, %v3027_v46  ;;  %v2319_v16 = vpop.f32.mrb[64].mxu1 }
 0x275   :  { %13491 = vst [vmem:[#allocation27_spill] sm:$0xff] %v11264_v4  ;;  %v2524_v10 = vadd.f32 %v11246_v30, %v2126_v17  ;;  %v2128_v36 = vpop.f32.mrb[65].mxu0  ;;  %v2526_v29 = vadd.f32 %v11254_v35, %v2319_v16  ;;  %v2321_v39 = vpop.f32.mrb[65].mxu1 }
 0x276   :  { %13492 = vst [vmem:[#allocation28_spill] sm:$0xff] %v11266_v20  ;;  %v2525_v6 = vadd.f32 %v11258_v42, %v2128_v36  ;;  %v2130_v44 = vpop.f32.mrb[66].mxu0  ;;  %v2527_v45 = vadd.f32 %v11262_v22, %v2321_v39  ;;  %v2323_v60 = vpop.f32.mrb[66].mxu1 }
 0x277   :  { %v2780_v5 = vmax.f32 %v2524_v10, 0.0  ;;  %v2532_v55 = vadd.f32 %v11246_v30, %v2130_v44  ;;  %v2132_v61 = vpop.f32.mrb[67].mxu0  ;;  %v2782_v15 = vmax.f32 %v2526_v29, 0.0  ;;  %v2534_v21 = vadd.f32 %v11254_v35, %v2323_v60  ;;  %v2325_v27 = vpop.f32.mrb[67].mxu1 }
 0x278   :  { %v2781_v12 = vmax.f32 %v2525_v6, 0.0  ;;  %v2533_v28 = vadd.f32 %v11258_v42, %v2132_v61  ;;  %v2783_v46 = vmax.f32 %v2527_v45, 0.0  ;;  %v2535_v16 = vadd.f32 %v11262_v22, %v2325_v27 }
 0x279   :  { %v2788_v17 = vmax.f32 %v2532_v55, 0.0  ;;  %v3096_v36 = vmax.f32 %v2780_v5, %v2782_v15  ;;  %v2790_v20 = vmax.f32 %v2534_v21, 0.0 }
 0x27a   :  { %v2789_v10 = vmax.f32 %v2533_v28, 0.0  ;;  %v3097_v4 = vmax.f32 %v2781_v12, %v2783_v46  ;;  %v2791_v39 = vmax.f32 %v2535_v16, 0.0 }
 0x27b   :  { %v11277_v44 = vmax.f32 %v10936_v3, %v3096_v36  ;;  %v3098_v32 = vmax.f32 %v2788_v17, %v2790_v20 }
 0x27c   :  { %v2136_v29 = vpop.f32.mrb[68].mxu0  ;;  %v11280_v6 = vmax.f32 %v10941_v24, %v3097_v4  ;;  %v3099_v60 = vmax.f32 %v2789_v10, %v2791_v39  ;;  %v2329_v45 = vpop.f32.mrb[68].mxu1 }
 0x27d   :  { %13493 = vst [vmem:[#allocation29_spill] sm:$0xff] %v11277_v44  ;;  %v2540_v61 = vadd.f32 %v11246_v30, %v2136_v29  ;;  %v2138_v55 = vpop.f32.mrb[69].mxu0  ;;  %v11284_v27 = vmax.f32 %v10944_v54, %v3098_v32  ;;  %v2542_v5 = vadd.f32 %v11254_v35, %v2329_v45  ;;  %v2331_v15 = vpop.f32.mrb[69].mxu1 }
 0x27e   :  { %13494 = vst [vmem:[#allocation30_spill] sm:$0xff] %v11280_v6  ;;  %v2140_v12 = vpop.f32.mrb[70].mxu0  ;;  %v11288_v3 = vmax.f32 %v10946_v31, %v3099_v60  ;;  %v2541_v21 = vadd.f32 %v11258_v42, %v2138_v55  ;;  %v2543_v24 = vadd.f32 %v11262_v22, %v2331_v15  ;;  %v2333_v4 = vpop.f32.mrb[70].mxu1 }
 0x27f   :  { %13495 = vst [vmem:[#allocation31_spill] sm:$0xff] %v11284_v27  ;;  %v2796_v20 = vmax.f32 %v2540_v61, 0.0  ;;  %v2142_v28 = vpop.f32.mrb[71].mxu0  ;;  %v11294_v46 = vpack.c.bf16 %v11284_v27, %v11277_v44  ;;  %v3258_v54 = vrot.slane %v11284_v27, 1  ;;  %v2798_v32 = vmax.f32 %v2542_v5, 0.0  ;;  %v2335_v17 = vpop.f32.mrb[71].mxu1 }
 0x280   :  { %13496 = vst [vmem:[#allocation32_spill] sm:$0xff] %v11288_v3  ;;  %v2797_v16 = vmax.f32 %v2541_v21, 0.0  ;;  %v2799_v36 = vmax.f32 %v2543_v24, 0.0  ;;  %v2548_v31 = vadd.f32 %v11246_v30, %v2140_v12  ;;  %v2550_v10 = vadd.f32 %v11254_v35, %v2333_v4 }
 0x281   :  { %13497 = vst [vmem:[#allocation33_spill] sm:$0xff] %v11294_v46  ;;  %v3100_v29 = vmax.f32 %v2796_v20, %v2798_v32  ;;  %v2549_v60 = vadd.f32 %v11258_v42, %v2142_v28  ;;  %v2551_v61 = vadd.f32 %v11262_v22, %v2335_v17  ;;  %v3259_v46 = vrot.slane %v11288_v3, 1 }
 0x282   :  { %v3101_v45 = vmax.f32 %v2797_v16, %v2799_v36  ;;  %v2804_v55 = vmax.f32 %v2548_v31, 0.0  ;;  %v2806_v15 = vmax.f32 %v2550_v10, 0.0  ;;  %v13368_v4 = vrot.slane %v11280_v6, 1 }
 0x283   :  { %v11304_v5 = vmax.f32 %v10970_v51, %v3100_v29  ;;  %v2805_v21 = vmax.f32 %v2549_v60, 0.0  ;;  %v2807_v24 = vmax.f32 %v2551_v61, 0.0  ;;  %v13498_v16 = vrot.slane %v11277_v44, 1 }
 0x284   :  { %v2146_v12 = vpop.f32.mrb[72].mxu0  ;;  %v11308_v39 = vmax.f32 %v10975_v25, %v3101_v45  ;;  %v3102_v20 = vmax.f32 %v2804_v55, %v2806_v15  ;;  %v2339_v32 = vpop.f32.mrb[72].mxu1  ;;  %v3381_v25 = vsel %vm115_vm0, %v13368_v4, %v3259_v46 }
 0x285   :  { %v2556_v28 = vadd.f32 %v11246_v30, %v2146_v12  ;;  %v2148_v17 = vpop.f32.mrb[73].mxu0  ;;  %v3380_v36 = vsel %vm115_vm0, %v13498_v16, %v3258_v54  ;;  %v3103_v31 = vmax.f32 %v2805_v21, %v2807_v24  ;;  %v2558_v10 = vadd.f32 %v11254_v35, %v2339_v32  ;;  %v2341_v29 = vpop.f32.mrb[73].mxu1 }
 0x286   :  { %v2150_v60 = vpop.f32.mrb[74].mxu0  ;;  %v11322_v61 = vmax.f32 %v10984_v40, %v3102_v20  ;;  %v2557_v55 = vadd.f32 %v11258_v42, %v2148_v17  ;;  %v2559_v15 = vadd.f32 %v11262_v22, %v2341_v29  ;;  %v2343_v12 = vpop.f32.mrb[74].mxu1  ;;  %v3261_v44 = vrot.slane %v11308_v39, 1 }
 0x287   :  { %v2812_v45 = vmax.f32 %v2556_v28, 0.0  ;;  %v2152_v16 = vpop.f32.mrb[75].mxu0  ;;  %v11327_v21 = vmax.f32 %v10992_v9, %v3103_v31  ;;  %v2814_v24 = vmax.f32 %v2558_v10, 0.0  ;;  %v2564_v32 = vadd.f32 %v11246_v30, %v2150_v60  ;;  %v2345_v3 = vpop.f32.mrb[75].mxu1 }
 0x288   :  { %v2566_v51 = vadd.f32 %v11254_v35, %v2343_v12  ;;  %v2813_v4 = vmax.f32 %v2557_v55, 0.0  ;;  %v2815_v27 = vmax.f32 %v2559_v15, 0.0  ;;  %v2565_v40 = vadd.f32 %v11258_v42, %v2152_v16 }
 0x289   :  { %v2567_v20 = vadd.f32 %v11262_v22, %v2345_v3  ;;  %v3104_v28 = vmax.f32 %v2812_v45, %v2814_v24  ;;  %v2820_v17 = vmax.f32 %v2564_v32, 0.0  ;;  %v13499_v10 = vrot.slane %v11304_v5, 1 }
 0x28a   :  { %v2822_v29 = vmax.f32 %v2566_v51, 0.0  ;;  %v3105_v6 = vmax.f32 %v2813_v4, %v2815_v27  ;;  %v2821_v9 = vmax.f32 %v2565_v40, 0.0  ;;  %v3379_v3 = vsel %vm115_vm0, %v3259_v46, %v3261_v44  ;;  %v9321_v27 = vld [vmem:[%s13344_s3] ss:$16 sps:$4 sm:$0xff]   ;;  %v9329_v46 = vld [vmem:[%s13344_s3 + $0x24] ss:$16 sps:$4 sm:$0xff]  }
 0x28b   :  { %v2823_v31 = vmax.f32 %v2567_v20, 0.0  ;;  %v3378_v60 = vsel %vm115_vm0, %v3258_v54, %v13499_v10  ;;  %v11339_v55 = vmax.f32 %v11013_v8, %v3104_v28  ;;  %v3385_v16 = vpack.c.bf16 %v3379_v3, %v3381_v25  ;;  %v9324_v8 = vld [vmem:[%s13344_s3 + $0x8] ss:$16 sps:$4 sm:$0xff]   ;;  %v9332_v28 = vld [vmem:[%s13344_s3 + $0x2c] ss:$16 sps:$4 sm:$0xff]  }
 0x28c   :  { %v3106_v15 = vmax.f32 %v2820_v17, %v2822_v29  ;;  %v2156_v45 = vpop.f32.mrb[76].mxu0  ;;  %v3384_v12 = vpack.c.bf16 %v3378_v60, %v3380_v36  ;;  %v11347_v4 = vmax.f32 %v11021_v56, %v3105_v6  ;;  %v2349_v24 = vpop.f32.mrb[76].mxu1  ;;  %v3263_v20 = vrot.slane %v11327_v21, 1 }
 0x28d   :  { %v3107_v51 = vmax.f32 %v2821_v9, %v2823_v31  ;;  %v2572_v54 = vadd.f32 %v11246_v30, %v2156_v45  ;;  %v2158_v32 = vpop.f32.mrb[77].mxu0  ;;  %v2574_v56 = vadd.f32 %v11254_v35, %v2349_v24  ;;  %v2351_v25 = vpop.f32.mrb[77].mxu1  ;;  %4058 = vmatprep.mubr.bf16.mxu0 %v3385_v16  ;;  %4251 = vmatprep.mubr.bf16.mxu1 %v3385_v16 }
 0x28e   :  { %v11357_v36 = vmax.f32 %v11024_v18, %v3106_v15  ;;  %v2573_v6 = vadd.f32 %v11258_v42, %v2158_v32  ;;  %v2160_v40 = vpop.f32.mrb[78].mxu0  ;;  %v2575_v18 = vadd.f32 %v11262_v22, %v2351_v25  ;;  %v2353_v31 = vpop.f32.mrb[78].mxu1  ;;  %4059 = vmatmul.mubr.bf16.vlgmr.msra.gmra.mrb[128].mxu0 %v3384_v12  ;;  %4252 = vmatmul.mubr.bf16.vlgmr.msra.gmra.mrb[128].mxu1 %v3384_v12  ;;  %v9327_v32 = vld [vmem:[%s13344_s3 + $0x20] ss:$16 sps:$4 sm:$0xff]  }
 0x28f   :  { %v11366_v17 = vmax.f32 %v11026_v59, %v3107_v51  ;;  %v2828_v29 = vmax.f32 %v2572_v54, 0.0  ;;  %v2580_v9 = vadd.f32 %v11246_v30, %v2160_v40  ;;  %v2162_v10 = vpop.f32.mrb[79].mxu0  ;;  %v2830_v60 = vmax.f32 %v2574_v56, 0.0  ;;  %v2355_v24 = vpop.f32.mrb[79].mxu1  ;;  %4733 = vmatpush1.bf16.msra.mxu0 %v9321_v27  ;;  %4926 = vmatpush1.bf16.msra.mxu1 %v9324_v8 }
 0x290   :  { %v2829_v15 = vmax.f32 %v2573_v6, 0.0  ;;  %v2582_v3 = vadd.f32 %v11254_v35, %v2353_v31  ;;  %v2581_v45 = vadd.f32 %v11258_v42, %v2162_v10  ;;  %v2831_v59 = vmax.f32 %v2575_v18, 0.0  ;;  %4734 = vmatprep.subr.bf16.mxu0 %v9329_v46  ;;  %4927 = vmatprep.subr.bf16.mxu1 %v9332_v28 }
 0x291   :  { %v2836_v51 = vmax.f32 %v2580_v9, 0.0  ;;  %v2583_v16 = vadd.f32 %v11262_v22, %v2355_v24  ;;  %v3265_v54 = vrot.slane %v11347_v4, 1  ;;  %v3108_v56 = vmax.f32 %v2828_v29, %v2830_v60  ;;  %v9330_v29 = vld [vmem:[%s13344_s3 + $0x28] ss:$16 sps:$4 sm:$0xff]   ;;  %v9335_v9 = vld [vmem:[%s13344_s3 + $0x44] ss:$16 sps:$4 sm:$0xff]  }
 0x292   :  { %v2838_v12 = vmax.f32 %v2582_v3, 0.0  ;;  %v2837_v6 = vmax.f32 %v2581_v45, 0.0  ;;  %v3377_v25 = vsel %vm115_vm0, %v3261_v44, %v3263_v20  ;;  %v3109_v40 = vmax.f32 %v2829_v15, %v2831_v59 }
 0x293   :  { %v2839_v27 = vmax.f32 %v2583_v16, 0.0  ;;  %v3375_v8 = vsel %vm115_vm0, %v3263_v20, %v3265_v54  ;;  %v3262_v18 = vrot.slane %v11322_v61, 1  ;;  %v11391_v44 = vmax.f32 %v11038_v11, %v3108_v56  ;;  %v9338_v20 = vld [vmem:[%s13344_s3 + $0x4c] ss:$16 sps:$4 sm:$0xff]   ;;  %4735 = vmatpush1.bf16.msra.mxu0 %v9327_v32  ;;  %4928 = vmatpush1.bf16.msra.mxu1 %v9330_v29 }
 0x294   :  { %v3110_v46 = vmax.f32 %v2836_v51, %v2838_v12  ;;  %v3387_v28 = vpack.c.bf16 %v3375_v8, %v3377_v25  ;;  %v2166_v31 = vpop.f32.mrb[80].mxu0  ;;  %v13374_v10 = vrot.slane %v11339_v55, 1  ;;  %v11398_v60 = vmax.f32 %v11043_v57, %v3109_v40  ;;  %v2359_v45 = vpop.f32.mrb[80].mxu1  ;;  %v9333_v51 = vld [vmem:[%s13344_s3 + $0x40] ss:$16 sps:$4 sm:$0xff]   ;;  %4736 = vmatprep.subr.bf16.mxu0 %v9335_v9  ;;  %4929 = vmatprep.subr.bf16.mxu1 %v9338_v20 }
 0x295   :  { %v3111_v15 = vmax.f32 %v2837_v6, %v2839_v27  ;;  %v2588_v3 = vadd.f32 %v11246_v30, %v2166_v31  ;;  %v13500_v24 = vrot.slane %v11304_v5, 1  ;;  %v2168_v59 = vpop.f32.mrb[81].mxu0  ;;  %v2590_v57 = vadd.f32 %v11254_v35, %v2359_v45  ;;  %v2361_v12 = vpop.f32.mrb[81].mxu1  ;;  %v9336_v25 = vld [vmem:[%s13344_s3 + $0x48] ss:$16 sps:$4 sm:$0xff]  }
 0x296   :  { %v11409_v16 = vmax.f32 %v11046_v63, %v3110_v46  ;;  %4068 = vmatprep.mubr.bf16.mxu0 %v3387_v28  ;;  %4261 = vmatprep.mubr.bf16.mxu1 %v3387_v28  ;;  %v3374_v56 = vsel %vm115_vm0, %v3262_v18, %v13374_v10  ;;  %v2170_v6 = vpop.f32.mrb[82].mxu0  ;;  %v3267_v32 = vrot.slane %v11366_v17, 1  ;;  %v2589_v8 = vadd.f32 %v11258_v42, %v2168_v59  ;;  %v2363_v46 = vpop.f32.mrb[82].mxu1  ;;  %v9344_v29 = vld [vmem:[%s13344_s3 + $0x6c] ss:$16 sps:$4 sm:$0xff]  }
 0x297   :  { %v3376_v11 = vsel %vm115_vm0, %v13500_v24, %v3262_v18  ;;  %v11421_v63 = vmax.f32 %v11051_v34, %v3111_v15  ;;  %v2844_v40 = vmax.f32 %v2588_v3, 0.0  ;;  %v2172_v28 = vpop.f32.mrb[83].mxu0  ;;  %v9341_v18 = vld [vmem:[%s13344_s3 + $0x64] ss:$16 sps:$4 sm:$0xff]   ;;  %v2846_v31 = vmax.f32 %v2590_v57, 0.0  ;;  %v2365_v15 = vpop.f32.mrb[83].mxu1  ;;  %4737 = vmatpush1.bf16.msra.mxu0 %v9333_v51  ;;  %4930 = vmatpush1.bf16.msra.mxu1 %v9336_v25 }
 0x298   :  { %v3386_v27 = vpack.c.bf16 %v3374_v56, %v3376_v11  ;;  %v2591_v45 = vadd.f32 %v11262_v22, %v2361_v12  ;;  %v2596_v24 = vadd.f32 %v11246_v30, %v2170_v6  ;;  %v2598_v34 = vadd.f32 %v11254_v35, %v2363_v46  ;;  %4738 = vmatprep.subr.bf16.mxu0 %v9341_v18  ;;  %v9342_v51 = vld [vmem:[%s13344_s3 + $0x68] ss:$16 sps:$4 sm:$0xff]  }
 0x299   :  { %v2845_v9 = vmax.f32 %v2589_v8, 0.0  ;;  %v2597_v3 = vadd.f32 %v11258_v42, %v2172_v28  ;;  %v2599_v11 = vadd.f32 %v11262_v22, %v2365_v15  ;;  %v3269_v59 = vrot.slane %v11398_v60, 1  ;;  %4931 = vmatprep.subr.bf16.mxu1 %v9344_v29 }
 0x29a   :  { %4069 = vmatmul.mubr.bf16.gmra.mrb[132].mxu0 %v3386_v27  ;;  %4262 = vmatmul.mubr.bf16.gmra.mrb[132].mxu1 %v3386_v27  ;;  %v3112_v57 = vmax.f32 %v2844_v40, %v2846_v31  ;;  %v2847_v56 = vmax.f32 %v2591_v45, 0.0  ;;  %v2852_v12 = vmax.f32 %v2596_v24, 0.0  ;;  %v2854_v6 = vmax.f32 %v2598_v34, 0.0  ;;  %v9339_v40 = vld [vmem:[%s13344_s3 + $0x60] ss:$16 sps:$4 sm:$0xff]  }
 0x29b   :  { %v2853_v46 = vmax.f32 %v2597_v3, 0.0  ;;  %v2855_v20 = vmax.f32 %v2599_v11, 0.0  ;;  %v3371_v10 = vsel %vm115_vm0, %v3267_v32, %v3269_v59  ;;  %v3373_v27 = vsel %vm115_vm0, %v3265_v54, %v3267_v32  ;;  %v9347_v54 = vld [vmem:[%s13344_s3 + $0x84] ss:$16 sps:$4 sm:$0xff]   ;;  %v9350_v32 = vld [vmem:[%s13344_s3 + $0x8c] ss:$16 sps:$4 sm:$0xff]   ;;  %4739 = vmatpush1.bf16.msra.mxu0 %v9339_v40  ;;  %4932 = vmatpush1.bf16.msra.mxu1 %v9342_v51 }
 0x29c   :  { %v11451_v8 = vmax.f32 %v11066_v2, %v3112_v57  ;;  %v3113_v28 = vmax.f32 %v2845_v9, %v2847_v56  ;;  %v3114_v31 = vmax.f32 %v2852_v12, %v2854_v6  ;;  %v3389_v45 = vpack.c.bf16 %v3371_v10, %v3373_v27  ;;  %v2176_v24 = vpop.f32.mrb[84].mxu0  ;;  %v2369_v34 = vpop.f32.mrb[84].mxu1  ;;  %v9345_v12 = vld [vmem:[%s13344_s3 + $0x80] ss:$16 sps:$4 sm:$0xff]   ;;  %4740 = vmatprep.subr.bf16.mxu0 %v9347_v54 }
 0x29d   :  { %v3115_v25 = vmax.f32 %v2853_v46, %v2855_v20  ;;  %v2604_v18 = vadd.f32 %v11246_v30, %v2176_v24  ;;  %v3266_v2 = vrot.slane %v11357_v36, 1  ;;  %v13375_v15 = vrot.slane %v11391_v44, 1  ;;  %v2178_v9 = vpop.f32.mrb[85].mxu0  ;;  %v2371_v11 = vpop.f32.mrb[85].mxu1  ;;  %4933 = vmatprep.subr.bf16.mxu1 %v9350_v32 }
 0x29e   :  { %13501 = vst [vmem:[#allocation34_spill] sm:$0xff] %v11451_v8  ;;  %v11463_v10 = vmax.f32 %v11070_v23, %v3113_v28  ;;  %v11466_v29 = vmax.f32 %v11072_v43, %v3114_v31  ;;  %4078 = vmatprep.mubr.bf16.mxu0 %v3389_v45  ;;  %4271 = vmatprep.mubr.bf16.mxu1 %v3389_v45  ;;  %v2180_v57 = vpop.f32.mrb[86].mxu0  ;;  %v3271_v56 = vrot.slane %v11421_v63, 1  ;;  %v13504_v46 = vrot.slane %v11339_v55, 1  ;;  %v2373_v27 = vpop.f32.mrb[86].mxu1 }
 0x29f   :  { %v2606_v3 = vadd.f32 %v11254_v35, %v2369_v34  ;;  %v11474_v6 = vmax.f32 %v11074_v53, %v3115_v25  ;;  %v2860_v23 = vmax.f32 %v2604_v18, 0.0  ;;  %v3370_v43 = vsel %vm115_vm0, %v3266_v2, %v13375_v15  ;;  %v2182_v28 = vpop.f32.mrb[87].mxu0  ;;  %v9348_v53 = vld [vmem:[%s13344_s3 + $0x88] ss:$16 sps:$4 sm:$0xff]   ;;  %v2375_v18 = vpop.f32.mrb[87].mxu1  ;;  %4741 = vmatpush1.bf16.msra.mxu0 %v9345_v12 }
 0x2a0   :  { %13502 = vst [vmem:[#allocation35_spill] sm:$0xff] %v11466_v29  ;;  %v3372_v20 = vsel %vm115_vm0, %v13504_v46, %v3266_v2  ;;  %v2605_v24 = vadd.f32 %v11258_v42, %v2178_v9  ;;  %v2607_v25 = vadd.f32 %v11262_v22, %v2371_v11  ;;  %v9353_v34 = vld [vmem:[%s13344_s3 + $0xa4] ss:$16 sps:$4 sm:$0xff]   ;;  %v2612_v40 = vadd.f32 %v11246_v30, %v2180_v57  ;;  %v9356_v9 = vld [vmem:[%s13344_s3 + $0xac] ss:$16 sps:$4 sm:$0xff]  }
 0x2a1   :  { %13503 = vst [vmem:[#allocation36_spill] sm:$0xff] %v11474_v6  ;;  %v2862_v31 = vmax.f32 %v2606_v3, 0.0  ;;  %v3388_v45 = vpack.c.bf16 %v3370_v43, %v3372_v20  ;;  %v2614_v51 = vadd.f32 %v11254_v35, %v2373_v27  ;;  %v2613_v2 = vadd.f32 %v11258_v42, %v2182_v28  ;;  %4934 = vmatpush1.bf16.msra.mxu1 %v9348_v53  ;;  %v9351_v12 = vld [vmem:[%s13344_s3 + $0xa0] ss:$16 sps:$4 sm:$0xff]  }
 0x2a2   :  { %v2615_v3 = vadd.f32 %v11262_v22, %v2375_v18  ;;  %v2861_v54 = vmax.f32 %v2605_v24, 0.0  ;;  %v2863_v32 = vmax.f32 %v2607_v25, 0.0  ;;  %v3273_v43 = vrot.slane %v11463_v10, 1  ;;  %4742 = vmatprep.subr.bf16.mxu0 %v9353_v34  ;;  %4935 = vmatprep.subr.bf16.mxu1 %v9356_v9 }
 0x2a3   :  { %v3116_v11 = vmax.f32 %v2860_v23, %v2862_v31  ;;  %4079 = vmatmul.mubr.bf16.gmra.mrb[136].mxu0 %v3388_v45  ;;  %4272 = vmatmul.mubr.bf16.gmra.mrb[136].mxu1 %v3388_v45  ;;  %v2868_v46 = vmax.f32 %v2612_v40, 0.0  ;;  %v2870_v20 = vmax.f32 %v2614_v51, 0.0  ;;  %v2869_v57 = vmax.f32 %v2613_v2, 0.0 }
 0x2a4   :  { %v2871_v15 = vmax.f32 %v2615_v3, 0.0  ;;  %v3117_v28 = vmax.f32 %v2861_v54, %v2863_v32  ;;  %v3367_v23 = vsel %vm115_vm0, %v3271_v56, %v3273_v43  ;;  %v3369_v31 = vsel %vm115_vm0, %v3269_v59, %v3271_v56  ;;  %v2186_v45 = vpop.f32.mrb[88].mxu0  ;;  %v2379_v40 = vpop.f32.mrb[88].mxu1  ;;  %v9359_v59 = vld [vmem:[%s13344_s3 + $0xc4] ss:$16 sps:$4 sm:$0xff]   ;;  %4743 = vmatpush1.bf16.msra.mxu0 %v9351_v12 }
 0x2a5   :  { %v11501_v27 = vmax.f32 %v11084_v26, %v3116_v11  ;;  %v9354_v26 = vld [vmem:[%s13344_s3 + $0xa8] ss:$16 sps:$4 sm:$0xff]   ;;  %v3118_v53 = vmax.f32 %v2868_v46, %v2870_v20  ;;  %v3391_v25 = vpack.c.bf16 %v3367_v23, %v3369_v31  ;;  %v2620_v18 = vadd.f32 %v11246_v30, %v2186_v45  ;;  %v2188_v51 = vpop.f32.mrb[89].mxu0  ;;  %v9362_v56 = vld [vmem:[%s13344_s3 + $0xcc] ss:$16 sps:$4 sm:$0xff]   ;;  %v2381_v11 = vpop.f32.mrb[89].mxu1  ;;  %4744 = vmatprep.subr.bf16.mxu0 %v9359_v59 }
 0x2a6   :  { %v3119_v24 = vmax.f32 %v2869_v57, %v2871_v15  ;;  %v11525_v34 = vmax.f32 %v11086_v49, %v3117_v28  ;;  %v2622_v2 = vadd.f32 %v11254_v35, %v2379_v40  ;;  %v3270_v15 = vrot.slane %v11409_v16, 1  ;;  %v2190_v54 = vpop.f32.mrb[90].mxu0  ;;  %v2383_v20 = vpop.f32.mrb[90].mxu1  ;;  %4936 = vmatpush1.bf16.msra.mxu1 %v9354_v26  ;;  %v9365_v12 = vld [vmem:[%s13344_s3 + $0xe4] ss:$16 sps:$4 sm:$0xff]  }
 0x2a7   :  { %13505 = vst [vmem:[#allocation37_spill] sm:$0xff] %v11501_v27  ;;  %v3272_v3 = vrot.slane %v11451_v8, 1  ;;  %v11531_v9 = vmax.f32 %v11088_v7, %v3118_v53  ;;  %4088 = vmatprep.mubr.bf16.mxu0 %v3391_v25  ;;  %4281 = vmatprep.mubr.bf16.mxu1 %v3391_v25  ;;  %v2876_v46 = vmax.f32 %v2620_v18, 0.0  ;;  %v2621_v49 = vadd.f32 %v11258_v42, %v2188_v51  ;;  %v2192_v57 = vpop.f32.mrb[91].mxu0  ;;  %v2385_v45 = vpop.f32.mrb[91].mxu1  ;;  %v13560_v8 = vld [vmem:[#allocation24_spill] sm:$0xff] }
 0x2a8   :  { %13506 = vst [vmem:[#allocation38_spill] sm:$0xff] %v11525_v34  ;;  %v11534_v32 = vmax.f32 %v11090_v50, %v3119_v24  ;;  %v2878_v28 = vmax.f32 %v2622_v2, 0.0  ;;  %v13509_v31 = vrot.slane %v11391_v44, 1  ;;  %v2623_v50 = vadd.f32 %v11262_v22, %v2381_v11  ;;  %v9357_v53 = vld [vmem:[%s13344_s3 + $0xc0] ss:$16 sps:$4 sm:$0xff]   ;;  %4937 = vmatprep.subr.bf16.mxu1 %v9362_v56 }
 0x2a9   :  { %13507 = vst [vmem:[#allocation39_spill] sm:$0xff] %v11531_v9  ;;  %v3366_v23 = vsel %vm115_vm0, %v3270_v15, %v3272_v3  ;;  %v9360_v24 = vld [vmem:[%s13344_s3 + $0xc8] ss:$16 sps:$4 sm:$0xff]   ;;  %v2877_v18 = vmax.f32 %v2621_v49, 0.0  ;;  %v2628_v40 = vadd.f32 %v11246_v30, %v2190_v54  ;;  %v2630_v51 = vadd.f32 %v11254_v35, %v2383_v20  ;;  %v9368_v49 = vld [vmem:[%s13344_s3 + $0xec] ss:$16 sps:$4 sm:$0xff]   ;;  %4745 = vmatpush1.bf16.msra.mxu0 %v9357_v53 }
 0x2aa   :  { %13508 = vst [vmem:[#allocation40_spill] sm:$0xff] %v11534_v32  ;;  %v3368_v7 = vsel %vm115_vm0, %v13509_v31, %v3270_v15  ;;  %v3120_v26 = vmax.f32 %v2876_v46, %v2878_v28  ;;  %v2879_v2 = vmax.f32 %v2623_v50, 0.0  ;;  %v2629_v15 = vadd.f32 %v11258_v42, %v2192_v57  ;;  %4938 = vmatpush1.bf16.msra.mxu1 %v9360_v24  ;;  %v9363_v53 = vld [vmem:[%s13344_s3 + $0xe0] ss:$16 sps:$4 sm:$0xff]   ;;  %v9366_v24 = vld [vmem:[%s13344_s3 + $0xe8] ss:$16 sps:$4 sm:$0xff]  }
 0x2ab   :  { %v3390_v25 = vpack.c.bf16 %v3366_v23, %v3368_v7  ;;  %v2631_v11 = vadd.f32 %v11262_v22, %v2385_v45  ;;  %v2884_v54 = vmax.f32 %v2628_v40, 0.0  ;;  %v2886_v20 = vmax.f32 %v2630_v51, 0.0  ;;  %4746 = vmatprep.subr.bf16.mxu0 %v9365_v12  ;;  %4939 = vmatprep.subr.bf16.mxu1 %v9368_v49  ;;  %v9374_v12 = vld [vmem:[%s13344_s3 + $0x10c] ss:$16 sps:$4 sm:$0xff]  }
 0x2ac   :  { %v3275_v59 = vrot.slane %v11474_v6, 1  ;;  %v3277_v56 = vrot.slane %v11525_v34, 1  ;;  %v11565_v23 = vmax.f32 %v11100_v37, %v3120_v26  ;;  %v3121_v46 = vmax.f32 %v2877_v18, %v2879_v2  ;;  %v2196_v31 = vpop.f32.mrb[92].mxu0 }
 0x2ad   :  { %4089 = vmatmul.mubr.bf16.gmra.mrb[140].mxu0 %v3390_v25  ;;  %4282 = vmatmul.mubr.bf16.gmra.mrb[140].mxu1 %v3390_v25  ;;  %v2885_v28 = vmax.f32 %v2629_v15, 0.0  ;;  %v2887_v57 = vmax.f32 %v2631_v11, 0.0  ;;  %v3122_v7 = vmax.f32 %v2884_v54, %v2886_v20  ;;  %v2636_v37 = vadd.f32 %v11246_v30, %v2196_v31  ;;  %v2389_v25 = vpop.f32.mrb[92].mxu1  ;;  %v2198_v18 = vpop.f32.mrb[93].mxu0  ;;  %v9371_v11 = vld [vmem:[%s13344_s3 + $0x104] ss:$16 sps:$4 sm:$0xff]  }
 0x2ae   :  { %13510 = vst [vmem:[#allocation41_spill] sm:$0xff] %v11565_v23  ;;  %v3363_v50 = vsel %vm115_vm0, %v3275_v59, %v3277_v56  ;;  %v3365_v45 = vsel %vm115_vm0, %v3273_v43, %v3275_v59  ;;  %v11583_v40 = vmax.f32 %v11102_v0, %v3121_v46  ;;  %v2638_v43 = vadd.f32 %v11254_v35, %v2389_v25  ;;  %v2391_v2 = vpop.f32.mrb[93].mxu1  ;;  %v2200_v15 = vpop.f32.mrb[94].mxu0  ;;  %v9369_v25 = vld [vmem:[%s13344_s3 + $0x100] ss:$16 sps:$4 sm:$0xff]  }
 0x2af   :  { %v3123_v51 = vmax.f32 %v2885_v28, %v2887_v57  ;;  %v3393_v26 = vpack.c.bf16 %v3363_v50, %v3365_v45  ;;  %v11593_v54 = vmax.f32 %v11104_v62, %v3122_v7  ;;  %v2892_v0 = vmax.f32 %v2636_v37, 0.0  ;;  %v2393_v46 = vpop.f32.mrb[94].mxu1  ;;  %v2202_v28 = vpop.f32.mrb[95].mxu0  ;;  %4747 = vmatpush1.bf16.msra.mxu0 %v9363_v53  ;;  %4940 = vmatpush1.bf16.msra.mxu1 %v9366_v24  ;;  %v9380_v24 = vld [vmem:[%s13344_s3 + $0x12c] ss:$16 sps:$4 sm:$0xff]  }
 0x2b0   :  { %13511 = vst [vmem:[#allocation42_spill] sm:$0xff] %v11583_v40  ;;  %v3274_v20 = vrot.slane %v11466_v29, 1  ;;  %v13377_v59 = vrot.slane %v11501_v27, 1  ;;  %v2894_v57 = vmax.f32 %v2638_v43, 0.0  ;;  %v2637_v31 = vadd.f32 %v11258_v42, %v2198_v18  ;;  %v2395_v45 = vpop.f32.mrb[95].mxu1  ;;  %4748 = vmatprep.subr.bf16.mxu0 %v9371_v11  ;;  %4941 = vmatprep.subr.bf16.mxu1 %v9374_v12 }
 0x2b1   :  { %13512 = vst [vmem:[#allocation43_spill] sm:$0xff] %v11593_v54  ;;  %v11598_v49 = vmax.f32 %v11106_v38, %v3123_v51  ;;  %4098 = vmatprep.mubr.bf16.mxu0 %v3393_v26  ;;  %4291 = vmatprep.mubr.bf16.mxu1 %v3393_v26  ;;  %v2639_v50 = vadd.f32 %v11262_v22, %v2391_v2  ;;  %v9372_v2 = vld [vmem:[%s13344_s3 + $0x108] ss:$16 sps:$4 sm:$0xff]  }
 0x2b2   :  { %v3362_v62 = vsel %vm115_vm0, %v3274_v20, %v13377_v59  ;;  %v3364_v7 = vsel %vm115_vm0, %v3272_v3, %v3274_v20  ;;  %v2644_v38 = vadd.f32 %v11246_v30, %v2200_v15  ;;  %v2646_v37 = vadd.f32 %v11254_v35, %v2393_v46 }
 0x2b3   :  { %13513 = vst [vmem:[#allocation44_spill] sm:$0xff] %v11598_v49  ;;  %v3124_v18 = vmax.f32 %v2892_v0, %v2894_v57  ;;  %v3392_v51 = vpack.c.bf16 %v3362_v62, %v3364_v7  ;;  %v2893_v26 = vmax.f32 %v2637_v31, 0.0  ;;  %v2895_v43 = vmax.f32 %v2639_v50, 0.0  ;;  %v9377_v0 = vld [vmem:[%s13344_s3 + $0x124] ss:$16 sps:$4 sm:$0xff]   ;;  %4749 = vmatpush1.bf16.msra.mxu0 %v9369_v25  ;;  %4942 = vmatpush1.bf16.msra.mxu1 %v9372_v2 }
 0x2b4   :  { %v2900_v3 = vmax.f32 %v2644_v38, 0.0  ;;  %v2902_v20 = vmax.f32 %v2646_v37, 0.0  ;;  %v2645_v15 = vadd.f32 %v11258_v42, %v2202_v28  ;;  %v2647_v53 = vadd.f32 %v11262_v22, %v2395_v45  ;;  %v2206_v31 = vpop.f32.mrb[96].mxu0  ;;  %v2399_v7 = vpop.f32.mrb[96].mxu1  ;;  %4750 = vmatprep.subr.bf16.mxu0 %v9377_v0  ;;  %4943 = vmatprep.subr.bf16.mxu1 %v9380_v24  ;;  %v9386_v2 = vld [vmem:[%s13344_s3 + $0x14c] ss:$16 sps:$4 sm:$0xff]  }
 0x2b5   :  { %v11627_v11 = vmax.f32 %v11116_v19, %v3124_v18  ;;  %4099 = vmatmul.mubr.bf16.gmra.mrb[144].mxu0 %v3392_v51  ;;  %4292 = vmatmul.mubr.bf16.gmra.mrb[144].mxu1 %v3392_v51  ;;  %v3125_v46 = vmax.f32 %v2893_v26, %v2895_v43  ;;  %v3279_v57 = vrot.slane %v11534_v32, 1  ;;  %v13376_v28 = vrot.slane %v11583_v40, 1  ;;  %v2208_v38 = vpop.f32.mrb[97].mxu0  ;;  %v9375_v19 = vld [vmem:[%s13344_s3 + $0x120] ss:$16 sps:$4 sm:$0xff]   ;;  %v2401_v25 = vpop.f32.mrb[97].mxu1 }
 0x2b6   :  { %v3126_v12 = vmax.f32 %v2900_v3, %v2902_v20  ;;  %v2901_v50 = vmax.f32 %v2645_v15, 0.0  ;;  %v2903_v45 = vmax.f32 %v2647_v53, 0.0  ;;  %v2652_v62 = vadd.f32 %v11246_v30, %v2206_v31  ;;  %v2210_v43 = vpop.f32.mrb[98].mxu0  ;;  %v9383_v3 = vld [vmem:[%s13344_s3 + $0x144] ss:$16 sps:$4 sm:$0xff]  }
 0x2b7   :  { %13514 = vst [vmem:[#allocation45_spill] sm:$0xff] %v11627_v11  ;;  %v11636_v37 = vmax.f32 %v11118_v33, %v3125_v46  ;;  %v3359_v18 = vsel %vm115_vm0, %v3279_v57, %v13376_v28  ;;  %v3361_v51 = vsel %vm115_vm0, %v3277_v56, %v3279_v57  ;;  %v2654_v26 = vadd.f32 %v11254_v35, %v2399_v7  ;;  %v9378_v33 = vld [vmem:[%s13344_s3 + $0x128] ss:$16 sps:$4 sm:$0xff]   ;;  %v2403_v56 = vpop.f32.mrb[98].mxu1  ;;  %v2212_v57 = vpop.f32.mrb[99].mxu0 }
 0x2b8   :  { %v11654_v20 = vmax.f32 %v11120_v14, %v3126_v12  ;;  %v3127_v15 = vmax.f32 %v2901_v50, %v2903_v45  ;;  %v3395_v53 = vpack.c.bf16 %v3359_v18, %v3361_v51  ;;  %v2908_v46 = vmax.f32 %v2652_v62, 0.0  ;;  %v2405_v14 = vpop.f32.mrb[99].mxu1  ;;  %4751 = vmatpush1.bf16.msra.mxu0 %v9375_v19  ;;  %4944 = vmatpush1.bf16.msra.mxu1 %v9378_v33  ;;  %v9381_v51 = vld [vmem:[%s13344_s3 + $0x140] ss:$16 sps:$4 sm:$0xff]   ;;  %v9392_v19 = vld [vmem:[%s13344_s3 + $0x16c] ss:$16 sps:$4 sm:$0xff]  }
 0x2b9   :  { %13515 = vst [vmem:[#allocation46_spill] sm:$0xff] %v11636_v37  ;;  %v2910_v31 = vmax.f32 %v2654_v26, 0.0  ;;  %v3278_v7 = vrot.slane %v11531_v9, 1  ;;  %v13378_v28 = vrot.slane %v11565_v23, 1  ;;  %v2653_v59 = vadd.f32 %v11258_v42, %v2208_v38  ;;  %v9384_v26 = vld [vmem:[%s13344_s3 + $0x148] ss:$16 sps:$4 sm:$0xff]   ;;  %4752 = vmatprep.subr.bf16.mxu0 %v9383_v3  ;;  %4945 = vmatprep.subr.bf16.mxu1 %v9386_v2 }
 0x2ba   :  { %13516 = vst [vmem:[#allocation47_spill] sm:$0xff] %v11654_v20  ;;  %v11663_v12 = vmax.f32 %v11122_v58, %v3127_v15  ;;  %4108 = vmatprep.mubr.bf16.mxu0 %v3395_v53  ;;  %4301 = vmatprep.mubr.bf16.mxu1 %v3395_v53  ;;  %v2655_v0 = vadd.f32 %v11262_v22, %v2401_v25  ;;  %v3283_v50 = vrot.slane %v11598_v49, 1  ;;  %v13518_v38 = vrot.slane %v11501_v27, 1 }
 0x2bb   :  { %v2660_v24 = vadd.f32 %v11246_v30, %v2210_v43  ;;  %v3128_v45 = vmax.f32 %v2908_v46, %v2910_v31  ;;  %v3358_v62 = vsel %vm115_vm0, %v3278_v7, %v13378_v28  ;;  %v2909_v18 = vmax.f32 %v2653_v59, 0.0  ;;  %v9389_v59 = vld [vmem:[%s13344_s3 + $0x164] ss:$16 sps:$4 sm:$0xff]  }
 0x2bc   :  { %13517 = vst [vmem:[#allocation48_spill] sm:$0xff] %v11663_v12  ;;  %v3360_v58 = vsel %vm115_vm0, %v13518_v38, %v3278_v7  ;;  %v2911_v43 = vmax.f32 %v2655_v0, 0.0  ;;  %v2662_v53 = vadd.f32 %v11254_v35, %v2403_v56  ;;  %v2661_v46 = vadd.f32 %v11258_v42, %v2212_v57  ;;  %v2216_v56 = vpop.f32.mrb[100].mxu0  ;;  %v9387_v57 = vld [vmem:[%s13344_s3 + $0x160] ss:$16 sps:$4 sm:$0xff]   ;;  %4753 = vmatpush1.bf16.msra.mxu0 %v9381_v51 }
 0x2bd   :  { %v3394_v25 = vpack.c.bf16 %v3358_v62, %v3360_v58  ;;  %v2916_v15 = vmax.f32 %v2660_v24, 0.0  ;;  %v11690_v33 = vmax.f32 %v11132_v47, %v3128_v45  ;;  %v2663_v31 = vadd.f32 %v11262_v22, %v2405_v14  ;;  %v2409_v47 = vpop.f32.mrb[100].mxu1  ;;  %v2218_v45 = vpop.f32.mrb[101].mxu0  ;;  %4946 = vmatpush1.bf16.msra.mxu1 %v9384_v26  ;;  %4754 = vmatprep.subr.bf16.mxu0 %v9389_v59 }
 0x2be   :  { %v13381_v7 = vrot.slane %v11636_v37, 1  ;;  %v3129_v3 = vmax.f32 %v2909_v18, %v2911_v43  ;;  %v2918_v2 = vmax.f32 %v2662_v53, 0.0  ;;  %v13520_v0 = vrot.slane %v11583_v40, 1  ;;  %v2220_v43 = vpop.f32.mrb[102].mxu0  ;;  %v9390_v53 = vld [vmem:[%s13344_s3 + $0x168] ss:$16 sps:$4 sm:$0xff]   ;;  %4947 = vmatprep.subr.bf16.mxu1 %v9392_v19 }
 0x2bf   :  { %13519 = vst [vmem:[#allocation49_spill] sm:$0xff] %v11690_v33  ;;  %4109 = vmatmul.mubr.bf16.gmra.mrb[148].mxu0 %v3394_v25  ;;  %4302 = vmatmul.mubr.bf16.gmra.mrb[148].mxu1 %v3394_v25  ;;  %v2668_v62 = vadd.f32 %v11246_v30, %v2216_v56  ;;  %v2917_v14 = vmax.f32 %v2661_v46, 0.0  ;;  %v2919_v38 = vmax.f32 %v2663_v31, 0.0  ;;  %v2670_v18 = vadd.f32 %v11254_v35, %v2409_v47  ;;  %v2411_v25 = vpop.f32.mrb[101].mxu1  ;;  %v2222_v49 = vpop.f32.mrb[103].mxu0 }
 0x2c0   :  { %v3357_v24 = vsel %vm115_vm0, %v13520_v0, %v3283_v50  ;;  %v3355_v58 = vsel %vm115_vm0, %v3283_v50, %v13381_v7  ;;  %v11712_v56 = vmax.f32 %v11134_v41, %v3129_v3  ;;  %v3130_v46 = vmax.f32 %v2916_v15, %v2918_v2  ;;  %v2413_v28 = vpop.f32.mrb[102].mxu1  ;;  %v9395_v50 = vld [vmem:[%s13344_s3 + $0x184] ss:$16 sps:$4 sm:$0xff]   ;;  %v9398_v41 = vld [vmem:[%s13344_s3 + $0x18c] ss:$16 sps:$4 sm:$0xff]   ;;  %4755 = vmatpush1.bf16.msra.mxu0 %v9387_v57 }
 0x2c1   :  { %v3397_v31 = vpack.c.bf16 %v3355_v58, %v3357_v24  ;;  %v2924_v0 = vmax.f32 %v2668_v62, 0.0  ;;  %v3131_v51 = vmax.f32 %v2917_v14, %v2919_v38  ;;  %v2926_v26 = vmax.f32 %v2670_v18, 0.0  ;;  %v2415_v40 = vpop.f32.mrb[103].mxu1  ;;  %4948 = vmatpush1.bf16.msra.mxu1 %v9390_v53  ;;  %4756 = vmatprep.subr.bf16.mxu0 %v9395_v50  ;;  %v13525_v57 = vld [vmem:[#allocation3_spill] sm:$0xff] }
 0x2c2   :  { %13521 = vst [vmem:[#allocation50_spill] sm:$0xff] %v11712_v56  ;;  %v3282_v47 = vrot.slane %v11593_v54, 1  ;;  %v13384_v7 = vrot.slane %v11627_v11, 1  ;;  %v11723_v15 = vmax.f32 %v11136_v52, %v3130_v46  ;;  %v2669_v59 = vadd.f32 %v11258_v42, %v2218_v45  ;;  %v9393_v45 = vld [vmem:[%s13344_s3 + $0x180] ss:$16 sps:$4 sm:$0xff]   ;;  %4949 = vmatprep.subr.bf16.mxu1 %v9398_v41 }
 0x2c3   :  { %4118 = vmatprep.mubr.bf16.mxu0 %v3397_v31  ;;  %4311 = vmatprep.mubr.bf16.mxu1 %v3397_v31  ;;  %v2671_v19 = vadd.f32 %v11262_v22, %v2411_v25  ;;  %v3287_v3 = vrot.slane %v11663_v12, 1  ;;  %v11729_v2 = vmax.f32 %v11138_v13, %v3131_v51  ;;  %v3132_v24 = vmax.f32 %v2924_v0, %v2926_v26  ;;  %v9396_v25 = vld [vmem:[%s13344_s3 + $0x188] ss:$16 sps:$4 sm:$0xff]   ;;  %v9401_v46 = vld [vmem:[%s13344_s3 + $0x1a4] ss:$16 sps:$4 sm:$0xff]  }
 0x2c4   :  { %13522 = vst [vmem:[#allocation51_spill] sm:$0xff] %v11723_v15  ;;  %v3354_v62 = vsel %vm115_vm0, %v3282_v47, %v13384_v7  ;;  %v13524_v52 = vrot.slane %v11565_v23, 1  ;;  %v2925_v58 = vmax.f32 %v2669_v59, 0.0  ;;  %v2676_v18 = vadd.f32 %v11246_v30, %v2220_v43  ;;  %v2226_v43 = vpop.f32.mrb[104].mxu0  ;;  %v9404_v53 = vld [vmem:[%s13344_s3 + $0x1ac] ss:$16 sps:$4 sm:$0xff]   ;;  %4757 = vmatpush1.bf16.msra.mxu0 %v9393_v45 }
 0x2c5   :  { %13523 = vst [vmem:[#allocation52_spill] sm:$0xff] %v11729_v2  ;;  %v2927_v13 = vmax.f32 %v2671_v19, 0.0  ;;  %v11750_v31 = vmax.f32 %v13525_v57, %v3132_v24  ;;  %v2678_v0 = vadd.f32 %v11254_v35, %v2413_v28  ;;  %v2677_v51 = vadd.f32 %v11258_v42, %v2222_v49  ;;  %v2419_v49 = vpop.f32.mrb[104].mxu1  ;;  %v2228_v24 = vpop.f32.mrb[105].mxu0  ;;  %4950 = vmatpush1.bf16.msra.mxu1 %v9396_v25  ;;  %v9402_v45 = vld [vmem:[%s13344_s3 + $0x1a8] ss:$16 sps:$4 sm:$0xff]  }
 0x2c6   :  { %v3356_v14 = vsel %vm115_vm0, %v13524_v52, %v3282_v47  ;;  %v2679_v26 = vadd.f32 %v11262_v22, %v2415_v40  ;;  %v2932_v47 = vmax.f32 %v2676_v18, 0.0  ;;  %v13387_v59 = vrot.slane %v11712_v56, 1  ;;  %v9399_v40 = vld [vmem:[%s13344_s3 + $0x1a0] ss:$16 sps:$4 sm:$0xff]   ;;  %4758 = vmatprep.subr.bf16.mxu0 %v9401_v46  ;;  %4951 = vmatprep.subr.bf16.mxu1 %v9404_v53 }
 0x2c7   :  { %v3396_v38 = vpack.c.bf16 %v3354_v62, %v3356_v14  ;;  %13526 = vst [vmem:[#allocation3_spill] sm:$0xff] %v11750_v31  ;;  %v3133_v50 = vmax.f32 %v2925_v58, %v2927_v13  ;;  %v13527_v19 = vrot.slane %v11636_v37, 1  ;;  %v2934_v41 = vmax.f32 %v2678_v0, 0.0  ;;  %v2230_v58 = vpop.f32.mrb[106].mxu0  ;;  %v13528_v13 = vld [vmem:[#allocation4_spill] sm:$0xff] }
 0x2c8   :  { %v2933_v62 = vmax.f32 %v2677_v51, 0.0  ;;  %v2935_v52 = vmax.f32 %v2679_v26, 0.0  ;;  %v2684_v14 = vadd.f32 %v11246_v30, %v2226_v43  ;;  %v3351_v57 = vsel %vm115_vm0, %v3287_v3, %v13387_v59  ;;  %v2232_v51 = vpop.f32.mrb[107].mxu0  ;;  %4759 = vmatpush1.bf16.msra.mxu0 %v9399_v40  ;;  %v9413_v40 = vld [vmem:[%s13344_s3 + $0x1e4] ss:$16 sps:$4 sm:$0xff]  }
 0x2c9   :  { %4119 = vmatmul.mubr.bf16.gmra.mrb[152].mxu0 %v3396_v38  ;;  %4312 = vmatmul.mubr.bf16.gmra.mrb[152].mxu1 %v3396_v38  ;;  %v3353_v28 = vsel %vm115_vm0, %v13527_v19, %v3287_v3  ;;  %v2421_v38 = vpop.f32.mrb[105].mxu1  ;;  %v11768_v18 = vmax.f32 %v13528_v13, %v3133_v50  ;;  %v2686_v19 = vadd.f32 %v11254_v35, %v2419_v49  ;;  %v3286_v7 = vrot.slane %v11654_v20, 1  ;;  %v9407_v3 = vld [vmem:[%s13344_s3 + $0x1c4] ss:$16 sps:$4 sm:$0xff]   ;;  %v9410_v49 = vld [vmem:[%s13344_s3 + $0x1cc] ss:$16 sps:$4 sm:$0xff]  }
 0x2ca   :  { %v2423_v0 = vpop.f32.mrb[106].mxu1  ;;  %v3134_v26 = vmax.f32 %v2932_v47, %v2934_v41  ;;  %v3135_v43 = vmax.f32 %v2933_v62, %v2935_v52  ;;  %v3399_v50 = vpack.c.bf16 %v3351_v57, %v3353_v28  ;;  %v2940_v13 = vmax.f32 %v2684_v14, 0.0  ;;  %v13531_v41 = vld [vmem:[#allocation5_spill] sm:$0xff]  ;;  %v13533_v62 = vld [vmem:[#allocation6_spill] sm:$0xff]  ;;  %4952 = vmatpush1.bf16.msra.mxu1 %v9402_v45  ;;  %4760 = vmatprep.subr.bf16.mxu0 %v9407_v3  ;;  %v13535_v45 = vld [vmem:[#allocation7_spill] sm:$0xff] }
 0x2cb   :  { %13529 = vst [vmem:[#allocation4_spill] sm:$0xff] %v11768_v18  ;;  %v2425_v12 = vpop.f32.mrb[107].mxu1  ;;  %v2942_v25 = vmax.f32 %v2686_v19, 0.0  ;;  %v13390_v46 = vrot.slane %v11690_v33, 1  ;;  %v13530_v59 = vrot.slane %v11627_v11, 1  ;;  %v2685_v28 = vadd.f32 %v11258_v42, %v2228_v24  ;;  %4953 = vmatprep.subr.bf16.mxu1 %v9410_v49 }
 0x2cc   :  { %v11792_v53 = vmax.f32 %v13531_v41, %v3134_v26  ;;  %v11795_v52 = vmax.f32 %v13533_v62, %v3135_v43  ;;  %4128 = vmatprep.mubr.bf16.mxu0 %v3399_v50  ;;  %4321 = vmatprep.mubr.bf16.mxu1 %v3399_v50  ;;  %v2687_v14 = vadd.f32 %v11262_v22, %v2421_v38  ;;  %v3291_v57 = vrot.slane %v11729_v2, 1  ;;  %v9405_v26 = vld [vmem:[%s13344_s3 + $0x1c0] ss:$16 sps:$4 sm:$0xff]   ;;  %v9408_v38 = vld [vmem:[%s13344_s3 + $0x1c8] ss:$16 sps:$4 sm:$0xff]  }
 0x2cd   :  { %v3352_v47 = vsel %vm115_vm0, %v13530_v59, %v3286_v7  ;;  %v3136_v19 = vmax.f32 %v2940_v13, %v2942_v25  ;;  %v3350_v59 = vsel %vm115_vm0, %v3286_v7, %v13390_v46  ;;  %v2941_v20 = vmax.f32 %v2685_v28, 0.0  ;;  %v2236_v7 = vpop.f32.mrb[108].mxu0  ;;  %4761 = vmatpush1.bf16.msra.mxu0 %v9405_v26  ;;  %v9419_v26 = vld [vmem:[%s13344_s3 + $0x404] ss:$16 sps:$4 sm:$0xff]  }
 0x2ce   :  { %13532 = vst [vmem:[#allocation5_spill] sm:$0xff] %v11792_v53  ;;  %13534 = vst [vmem:[#allocation6_spill] sm:$0xff] %v11795_v52  ;;  %v2692_v24 = vadd.f32 %v11246_v30, %v2230_v58  ;;  %v3398_v43 = vpack.c.bf16 %v3350_v59, %v3352_v47  ;;  %v2943_v50 = vmax.f32 %v2687_v14, 0.0  ;;  %v2694_v13 = vadd.f32 %v11254_v35, %v2423_v0  ;;  %v9416_v58 = vld [vmem:[%s13344_s3 + $0x1ec] ss:$16 sps:$4 sm:$0xff]   ;;  %v2238_v62 = vpop.f32.mrb[109].mxu0 }
 0x2cf   :  { %v2693_v25 = vadd.f32 %v11258_v42, %v2232_v51  ;;  %v11819_v28 = vmax.f32 %v13535_v45, %v3136_v19  ;;  %v2695_v41 = vadd.f32 %v11262_v22, %v2425_v12  ;;  %v13397_v0 = vrot.slane %v11768_v18, 1  ;;  %v2429_v51 = vpop.f32.mrb[108].mxu1  ;;  %v2240_v19 = vpop.f32.mrb[110].mxu0  ;;  %4954 = vmatpush1.bf16.msra.mxu1 %v9408_v38  ;;  %4762 = vmatprep.subr.bf16.mxu0 %v9413_v40 }
 0x2d0   :  { %v2948_v47 = vmax.f32 %v2692_v24, 0.0  ;;  %v3137_v3 = vmax.f32 %v2941_v20, %v2943_v50  ;;  %v2950_v49 = vmax.f32 %v2694_v13, 0.0  ;;  %v13537_v59 = vrot.slane %v11712_v56, 1  ;;  %v2431_v2 = vpop.f32.mrb[109].mxu1  ;;  %v2242_v50 = vpop.f32.mrb[111].mxu0  ;;  %4955 = vmatprep.subr.bf16.mxu1 %v9416_v58 }
 0x2d1   :  { %13536 = vst [vmem:[#allocation7_spill] sm:$0xff] %v11819_v28  ;;  %4129 = vmatmul.mubr.bf16.gmra.mrb[156].mxu0 %v3398_v43  ;;  %4322 = vmatmul.mubr.bf16.gmra.mrb[156].mxu1 %v3398_v43  ;;  %v2949_v14 = vmax.f32 %v2693_v25, 0.0  ;;  %v2951_v45 = vmax.f32 %v2695_v41, 0.0  ;;  %v3347_v12 = vsel %vm115_vm0, %v3291_v57, %v13397_v0  ;;  %v2700_v24 = vadd.f32 %v11246_v30, %v2236_v7  ;;  %v2433_v20 = vpop.f32.mrb[110].mxu1  ;;  %v9411_v13 = vld [vmem:[%s13344_s3 + $0x1e0] ss:$16 sps:$4 sm:$0xff]  }
 0x2d2   :  { %v3349_v46 = vsel %vm115_vm0, %v13537_v59, %v3291_v57  ;;  %v2702_v43 = vadd.f32 %v11254_v35, %v2429_v51  ;;  %v13538_v25 = vld [vmem:[#allocation2_spill] sm:$0xff]  ;;  %v3138_v41 = vmax.f32 %v2948_v47, %v2950_v49  ;;  %v3290_v11 = vrot.slane %v11723_v15, 1  ;;  %v2435_v57 = vpop.f32.mrb[111].mxu1  ;;  %v9414_v7 = vld [vmem:[%s13344_s3 + $0x1e8] ss:$16 sps:$4 sm:$0xff]   ;;  %v13540_v47 = vld [vmem:[#allocation8_spill] sm:$0xff]  ;;  %4763 = vmatpush1.bf16.msra.mxu0 %v9411_v13 }
 0x2d3   :  { %v11837_v59 = vmax.f32 %v13538_v25, %v3137_v3  ;;  %v3401_v56 = vpack.c.bf16 %v3347_v12, %v3349_v46  ;;  %v3139_v38 = vmax.f32 %v2949_v14, %v2951_v45  ;;  %v2956_v51 = vmax.f32 %v2700_v24, 0.0  ;;  %v9422_v46 = vld [vmem:[%s13344_s3 + $0x40c] ss:$16 sps:$4 sm:$0xff]   ;;  %4956 = vmatpush1.bf16.msra.mxu1 %v9414_v7  ;;  %5503 = vmatprep.subr.bf16.mxu0 %v9419_v26 }
 0x2d4   :  { %v2958_v0 = vmax.f32 %v2702_v43, 0.0  ;;  %v3292_v3 = vrot.slane %v11750_v31, 1  ;;  %v11851_v40 = vmax.f32 %v13540_v47, %v3138_v41  ;;  %v13542_v58 = vrot.slane %v11690_v33, 1  ;;  %v13543_v12 = vld [vmem:[#allocation9_spill] sm:$0xff]  ;;  %v2246_v15 = vpop.f32.mrb[112].mxu0  ;;  %5696 = vmatprep.subr.bf16.mxu1 %v9422_v46 }
 0x2d5   :  { %13539 = vst [vmem:[#allocation2_spill] sm:$0xff] %v11837_v59  ;;  %4138 = vmatprep.mubr.bf16.mxu0 %v3401_v56  ;;  %4331 = vmatprep.mubr.bf16.mxu1 %v3401_v56  ;;  %v2701_v14 = vadd.f32 %v11258_v42, %v2238_v62  ;;  %v3295_v45 = vrot.slane %v11795_v52, 1  ;;  %v11860_v24 = vmax.f32 %v13543_v12, %v3139_v38  ;;  %v13545_v62 = vld [vmem:[#allocation10_spill] sm:$0xff]  ;;  %v13546_v7 = vrot.slane %v11768_v18, 1 }
 0x2d6   :  { %13541 = vst [vmem:[#allocation8_spill] sm:$0xff] %v11851_v40  ;;  %v3348_v49 = vsel %vm115_vm0, %v13542_v58, %v3290_v11  ;;  %v3140_v43 = vmax.f32 %v2956_v51, %v2958_v0  ;;  %v3346_v25 = vsel %vm115_vm0, %v3290_v11, %v3292_v3  ;;  %v2703_v41 = vadd.f32 %v11262_v22, %v2431_v2  ;;  %v2439_v51 = vpop.f32.mrb[112].mxu1  ;;  %v2248_v2 = vpop.f32.mrb[113].mxu0 }
 0x2d7   :  { %13544 = vst [vmem:[#allocation9_spill] sm:$0xff] %v11860_v24  ;;  %v3400_v56 = vpack.c.bf16 %v3346_v25, %v3348_v49  ;;  %v2957_v47 = vmax.f32 %v2701_v14, 0.0  ;;  %v2708_v31 = vadd.f32 %v11246_v30, %v2240_v19  ;;  %v2710_v58 = vadd.f32 %v11254_v35, %v2433_v20  ;;  %v2441_v49 = vpop.f32.mrb[113].mxu1  ;;  %v2250_v14 = vpop.f32.mrb[114].mxu0 }
 0x2d8   :  { %v11868_v52 = vmax.f32 %v13545_v62, %v3140_v43  ;;  %v2959_v38 = vmax.f32 %v2703_v41, 0.0  ;;  %v2709_v0 = vadd.f32 %v11258_v42, %v2242_v50  ;;  %v2711_v11 = vadd.f32 %v11262_v22, %v2435_v57  ;;  %v2443_v25 = vpop.f32.mrb[114].mxu1  ;;  %v2252_v46 = vpop.f32.mrb[115].mxu0 }
 0x2d9   :  { %4139 = vmatmul.mubr.bf16.gmra.mrb[160].mxu0 %v3400_v56  ;;  %4332 = vmatmul.mubr.bf16.gmra.mrb[160].mxu1 %v3400_v56  ;;  %v2964_v13 = vmax.f32 %v2708_v31, 0.0  ;;  %v2966_v19 = vmax.f32 %v2710_v58, 0.0  ;;  %v3297_v20 = vrot.slane %v11837_v59, 1  ;;  %v3345_v26 = vsel %vm115_vm0, %v13546_v7, %v3295_v45  ;;  %v2445_v62 = vpop.f32.mrb[115].mxu1  ;;  %v13547_v59 = vld [vmem:[#allocation11_spill] sm:$0xff] }
 0x2da   :  { %v3141_v12 = vmax.f32 %v2957_v47, %v2959_v38  ;;  %v2965_v50 = vmax.f32 %v2709_v0, 0.0  ;;  %v2967_v43 = vmax.f32 %v2711_v11, 0.0  ;;  %v2716_v57 = vadd.f32 %v11246_v30, %v2246_v15  ;;  %v13548_v0 = vld [vmem:[#allocation12_spill] sm:$0xff] }
 0x2db   :  { %v3142_v41 = vmax.f32 %v2964_v13, %v2966_v19  ;;  %v3343_v31 = vsel %vm115_vm0, %v3295_v45, %v3297_v20  ;;  %v2718_v56 = vadd.f32 %v11254_v35, %v2439_v51  ;;  %v3294_v58 = vrot.slane %v11792_v53, 1  ;;  %v13549_v19 = vld [vmem:[#allocation13_spill] sm:$0xff] }
 0x2dc   :  { %v11883_v7 = vmax.f32 %v13547_v59, %v3141_v12  ;;  %v3143_v18 = vmax.f32 %v2965_v50, %v2967_v43  ;;  %v3403_v47 = vpack.c.bf16 %v3343_v31, %v3345_v26  ;;  %v2972_v38 = vmax.f32 %v2716_v57, 0.0 }
 0x2dd   :  { %v11886_v11 = vmax.f32 %v13548_v0, %v3142_v41  ;;  %v2974_v15 = vmax.f32 %v2718_v56, 0.0  ;;  %v3296_v13 = vrot.slane %v11819_v28, 1  ;;  %v3344_v45 = vsel %vm115_vm0, %v3292_v3, %v3294_v58  ;;  %v2256_v3 = vpop.f32.mrb[116].mxu0  ;;  %v2449_v0 = vpop.f32.mrb[116].mxu1 }
 0x2de   :  { %v11892_v51 = vmax.f32 %v13549_v19, %v3143_v18  ;;  %4148 = vmatprep.mubr.bf16.mxu0 %v3403_v47  ;;  %4341 = vmatprep.mubr.bf16.mxu1 %v3403_v47  ;;  %v2717_v59 = vadd.f32 %v11258_v42, %v2248_v2  ;;  %v2719_v12 = vadd.f32 %v11262_v22, %v2441_v49  ;;  %v3299_v26 = vrot.slane %v11860_v24, 1  ;;  %v2258_v2 = vpop.f32.mrb[117].mxu0  ;;  %v13550_v19 = vld [vmem:[#allocation14_spill] sm:$0xff] }
 0x2df   :  { %v3144_v50 = vmax.f32 %v2972_v38, %v2974_v15  ;;  %v3342_v43 = vsel %vm115_vm0, %v3294_v58, %v3296_v13  ;;  %v2724_v57 = vadd.f32 %v11246_v30, %v2250_v14  ;;  %v2726_v41 = vadd.f32 %v11254_v35, %v2443_v25  ;;  %v2451_v58 = vpop.f32.mrb[117].mxu1  ;;  %v2260_v24 = vpop.f32.mrb[118].mxu0 }
 0x2e0   :  { %v3402_v31 = vpack.c.bf16 %v3342_v43, %v3344_v45  ;;  %v2973_v18 = vmax.f32 %v2717_v59, 0.0  ;;  %v2975_v56 = vmax.f32 %v2719_v12, 0.0  ;;  %v2725_v47 = vadd.f32 %v11258_v42, %v2252_v46  ;;  %v2453_v59 = vpop.f32.mrb[118].mxu1  ;;  %v2262_v12 = vpop.f32.mrb[119].mxu0 }
 0x2e1   :  { %v11903_v49 = vmax.f32 %v13550_v19, %v3144_v50  ;;  %v2980_v28 = vmax.f32 %v2724_v57, 0.0  ;;  %v2982_v38 = vmax.f32 %v2726_v41, 0.0  ;;  %v2727_v15 = vadd.f32 %v11262_v22, %v2445_v62  ;;  %v2455_v62 = vpop.f32.mrb[119].mxu1  ;;  %v13551_v19 = vld [vmem:[#allocation15_spill] sm:$0xff] }
 0x2e2   :  { %4149 = vmatmul.mubr.bf16.gmra.mrb[164].mxu0 %v3402_v31  ;;  %4342 = vmatmul.mubr.bf16.gmra.mrb[164].mxu1 %v3402_v31  ;;  %v3145_v14 = vmax.f32 %v2973_v18, %v2975_v56  ;;  %v2981_v25 = vmax.f32 %v2725_v47, 0.0  ;;  %v3301_v45 = vrot.slane %v11883_v7, 1  ;;  %v3341_v46 = vsel %vm115_vm0, %v3297_v20, %v3299_v26  ;;  %v13552_v20 = vld [vmem:[#allocation16_spill] sm:$0xff] }
 0x2e3   :  { %v3146_v43 = vmax.f32 %v2980_v28, %v2982_v38  ;;  %v2983_v50 = vmax.f32 %v2727_v15, 0.0  ;;  %v2732_v57 = vadd.f32 %v11246_v30, %v2256_v3  ;;  %v2734_v41 = vadd.f32 %v11254_v35, %v2449_v0 }
 0x2e4   :  { %v11912_v53 = vmax.f32 %v13551_v19, %v3145_v14  ;;  %v3339_v31 = vsel %vm115_vm0, %v3299_v26, %v3301_v45  ;;  %v3298_v18 = vrot.slane %v11851_v40, 1  ;;  %v3300_v56 = vrot.slane %v11868_v52, 1  ;;  %v13553_v26 = vld [vmem:[#allocation17_spill] sm:$0xff] }
 0x2e5   :  { %v11919_v47 = vmax.f32 %v13552_v20, %v3146_v43  ;;  %v3147_v28 = vmax.f32 %v2981_v25, %v2983_v50  ;;  %v3405_v38 = vpack.c.bf16 %v3339_v31, %v3341_v46  ;;  %v2988_v15 = vmax.f32 %v2732_v57, 0.0  ;;  %v2266_v46 = vpop.f32.mrb[120].mxu0 }
 0x2e6   :  { %v2990_v3 = vmax.f32 %v2734_v41, 0.0  ;;  %v3338_v0 = vsel %vm115_vm0, %v3298_v18, %v3300_v56  ;;  %v3340_v14 = vsel %vm115_vm0, %v3296_v13, %v3298_v18  ;;  %v2733_v19 = vadd.f32 %v11258_v42, %v2258_v2  ;;  %v2459_v13 = vpop.f32.mrb[120].mxu1  ;;  %v2268_v18 = vpop.f32.mrb[121].mxu0 }
 0x2e7   :  { %v11927_v33 = vmax.f32 %v13553_v26, %v3147_v28  ;;  %4158 = vmatprep.mubr.bf16.mxu0 %v3405_v38  ;;  %4351 = vmatprep.mubr.bf16.mxu1 %v3405_v38  ;;  %v3404_v40 = vpack.c.bf16 %v3338_v0, %v3340_v14  ;;  %v2735_v43 = vadd.f32 %v11262_v22, %v2451_v58  ;;  %v3303_v25 = vrot.slane %v11892_v51, 1  ;;  %v2461_v0 = vpop.f32.mrb[121].mxu1  ;;  %v2270_v58 = vpop.f32.mrb[122].mxu0  ;;  %v13554_v14 = vld [vmem:[#allocation18_spill] sm:$0xff] }
 0x2e8   :  { %v3148_v50 = vmax.f32 %v2988_v15, %v2990_v3  ;;  %v2989_v57 = vmax.f32 %v2733_v19, 0.0  ;;  %v2740_v41 = vadd.f32 %v11246_v30, %v2260_v24  ;;  %v2742_v31 = vadd.f32 %v11254_v35, %v2453_v59  ;;  %v2463_v3 = vpop.f32.mrb[122].mxu1  ;;  %v2272_v19 = vpop.f32.mrb[123].mxu0 }
 0x2e9   :  { %v2991_v2 = vmax.f32 %v2735_v43, 0.0  ;;  %v2741_v20 = vadd.f32 %v11258_v42, %v2262_v12  ;;  %v2743_v28 = vadd.f32 %v11262_v22, %v2455_v62  ;;  %v3305_v38 = vrot.slane %v11912_v53, 1  ;;  %v2465_v54 = vpop.f32.mrb[123].mxu1 }
 0x2ea   :  { %v11937_v26 = vmax.f32 %v13554_v14, %v3148_v50  ;;  %4159 = vmatmul.mubr.bf16.gmra.mrb[168].mxu0 %v3404_v40  ;;  %4352 = vmatmul.mubr.bf16.gmra.mrb[168].mxu1 %v3404_v40  ;;  %v2996_v15 = vmax.f32 %v2740_v41, 0.0  ;;  %v2998_v24 = vmax.f32 %v2742_v31, 0.0  ;;  %v3337_v59 = vsel %vm115_vm0, %v3301_v45, %v3303_v25  ;;  %v13555_v41 = vld [vmem:[#allocation19_spill] sm:$0xff] }
 0x2eb   :  { %v3149_v43 = vmax.f32 %v2989_v57, %v2991_v2  ;;  %v2997_v12 = vmax.f32 %v2741_v20, 0.0  ;;  %v2999_v37 = vmax.f32 %v2743_v28, 0.0  ;;  %v3335_v62 = vsel %vm115_vm0, %v3303_v25, %v3305_v38  ;;  %v13556_v2 = vld [vmem:[#allocation20_spill] sm:$0xff] }
 0x2ec   :  { %v3150_v23 = vmax.f32 %v2996_v15, %v2998_v24  ;;  %v3407_v9 = vpack.c.bf16 %v3335_v62, %v3337_v59  ;;  %v2748_v50 = vadd.f32 %v11246_v30, %v2266_v46  ;;  %v2750_v40 = vadd.f32 %v11254_v35, %v2459_v13  ;;  %v13557_v46 = vld [vmem:[#allocation21_spill] sm:$0xff] }
 0x2ed   :  { %v11946_v31 = vmax.f32 %v13555_v41, %v3149_v43  ;;  %v3151_v14 = vmax.f32 %v2997_v12, %v2999_v37  ;;  %v3302_v45 = vrot.slane %v11886_v11, 1  ;;  %v3304_v57 = vrot.slane %v11903_v49, 1  ;;  %v2276_v43 = vpop.f32.mrb[124].mxu0 }
 0x2ee   :  { %v11951_v20 = vmax.f32 %v13556_v2, %v3150_v23  ;;  %4168 = vmatprep.mubr.bf16.mxu0 %v3407_v9  ;;  %4361 = vmatprep.mubr.bf16.mxu1 %v3407_v9  ;;  %v3004_v25 = vmax.f32 %v2748_v50, 0.0  ;;  %v3006_v28 = vmax.f32 %v2750_v40, 0.0  ;;  %v2749_v15 = vadd.f32 %v11258_v42, %v2268_v18  ;;  %v2469_v50 = vpop.f32.mrb[124].mxu1  ;;  %v2278_v40 = vpop.f32.mrb[125].mxu0 }
 0x2ef   :  { %v11955_v24 = vmax.f32 %v13557_v46, %v3151_v14  ;;  %v3334_v13 = vsel %vm115_vm0, %v3302_v45, %v3304_v57  ;;  %v3336_v37 = vsel %vm115_vm0, %v3300_v56, %v3302_v45  ;;  %v2751_v59 = vadd.f32 %v11262_v22, %v2461_v0  ;;  %v2471_v46 = vpop.f32.mrb[125].mxu1  ;;  %v2280_v27 = vpop.f32.mrb[126].mxu0  ;;  %v13558_v56 = vld [vmem:[#allocation22_spill] sm:$0xff] }
 0x2f0   :  { %v3152_v23 = vmax.f32 %v3004_v25, %v3006_v28  ;;  %v3406_v12 = vpack.c.bf16 %v3334_v13, %v3336_v37  ;;  %v3005_v62 = vmax.f32 %v2749_v15, 0.0  ;;  %v2756_v9 = vadd.f32 %v11246_v30, %v2270_v58  ;;  %v2473_v28 = vpop.f32.mrb[126].mxu1  ;;  %v2282_v15 = vpop.f32.mrb[127].mxu0 }
 0x2f1   :  { %v3007_v18 = vmax.f32 %v2751_v59, 0.0  ;;  %v2758_v41 = vadd.f32 %v11254_v35, %v2463_v3  ;;  %v2757_v14 = vadd.f32 %v11258_v42, %v2272_v19  ;;  %v2759_v2 = vadd.f32 %v11262_v22, %v2465_v54  ;;  %v2475_v59 = vpop.f32.mrb[127].mxu1 }
 0x2f2   :  { %v11967_v45 = vmax.f32 %v13558_v56, %v3152_v23  ;;  %4169 = vmatmul.mubr.bf16.gmra.mrb[172].mxu0 %v3406_v12  ;;  %4362 = vmatmul.mubr.bf16.gmra.mrb[172].mxu1 %v3406_v12  ;;  %v3012_v0 = vmax.f32 %v2756_v9, 0.0  ;;  %v3307_v25 = vrot.slane %v11927_v33, 1  ;;  %v3309_v58 = vrot.slane %v11946_v31, 1  ;;  %v13559_v56 = vld [vmem:[#allocation23_spill] sm:$0xff] }
 0x2f3   :  { %v3153_v13 = vmax.f32 %v3005_v62, %v3007_v18  ;;  %v3014_v3 = vmax.f32 %v2758_v41, 0.0  ;;  %v3013_v37 = vmax.f32 %v2757_v14, 0.0  ;;  %v3015_v19 = vmax.f32 %v2759_v2, 0.0 }
 0x2f4   :  { %v3331_v54 = vsel %vm115_vm0, %v3307_v25, %v3309_v58  ;;  %v3333_v23 = vsel %vm115_vm0, %v3305_v38, %v3307_v25  ;;  %v2764_v12 = vadd.f32 %v11246_v30, %v2276_v43  ;;  %v2766_v9 = vadd.f32 %v11254_v35, %v2469_v50  ;;  %v13561_v38 = vld [vmem:[#allocation25_spill] sm:$0xff] }
 0x2f5   :  { %v11978_v32 = vmax.f32 %v13559_v56, %v3153_v13  ;;  %v3154_v34 = vmax.f32 %v3012_v0, %v3014_v3  ;;  %v3155_v29 = vmax.f32 %v3013_v37, %v3015_v19  ;;  %v3409_v62 = vpack.c.bf16 %v3331_v54, %v3333_v23 }
 0x2f6   :  { %v3020_v18 = vmax.f32 %v2764_v12, 0.0  ;;  %v3022_v41 = vmax.f32 %v2766_v9, 0.0  ;;  %v3306_v14 = vrot.slane %v11919_v47, 1  ;;  %v3308_v2 = vrot.slane %v11937_v26, 1 }
 0x2f7   :  { %v11983_v6 = vmax.f32 %v13560_v8, %v3154_v34  ;;  %v11986_v25 = vmax.f32 %v13561_v38, %v3155_v29  ;;  %4178 = vmatprep.mubr.bf16.mxu0 %v3409_v62  ;;  %4371 = vmatprep.mubr.bf16.mxu1 %v3409_v62  ;;  %v2765_v43 = vadd.f32 %v11258_v42, %v2278_v40  ;;  %v3311_v50 = vrot.slane %v11955_v24, 1 }
 0x2f8   :  { %v3156_v0 = vmax.f32 %v3020_v18, %v3022_v41  ;;  %v3330_v13 = vsel %vm115_vm0, %v3306_v14, %v3308_v2  ;;  %v3332_v3 = vsel %vm115_vm0, %v3304_v57, %v3306_v14  ;;  %v2767_v37 = vadd.f32 %v11262_v22, %v2471_v46  ;;  %v13563_v14 = vld [vmem:[#allocation27_spill] sm:$0xff] }
 0x2f9   :  { %v3408_v8 = vpack.c.bf16 %v3330_v13, %v3332_v3  ;;  %v3021_v34 = vmax.f32 %v2765_v43, 0.0  ;;  %v2772_v29 = vadd.f32 %v11246_v30, %v2280_v27  ;;  %v2774_v19 = vadd.f32 %v11254_v35, %v2473_v28  ;;  %v13564_v13 = vld [vmem:[#allocation28_spill] sm:$0xff] }
 0x2fa   :  { %v11998_v54 = vmax.f32 %v11256_v48, %v3156_v0  ;;  %v3023_v40 = vmax.f32 %v2767_v37, 0.0  ;;  %v2773_v23 = vadd.f32 %v11258_v42, %v2282_v15  ;;  %v2775_v12 = vadd.f32 %v11262_v22, %v2475_v59  ;;  %v13562_v59 = vld [vmem:[#allocation26_spill] sm:$0xff] }
 0x2fb   :  { %4179 = vmatmul.mubr.bf16.gmra.mrb[176].mxu0 %v3408_v8  ;;  %4372 = vmatmul.mubr.bf16.gmra.mrb[176].mxu1 %v3408_v8  ;;  %v3028_v9 = vmax.f32 %v2772_v29, 0.0  ;;  %v3030_v57 = vmax.f32 %v2774_v19, 0.0  ;;  %v3313_v46 = vrot.slane %v11978_v32, 1  ;;  %v3329_v56 = vsel %vm115_vm0, %v3309_v58, %v3311_v50 }
 0x2fc   :  { %v3157_v30 = vmax.f32 %v3021_v34, %v3023_v40  ;;  %v3029_v27 = vmax.f32 %v2773_v23, 0.0  ;;  %v3031_v35 = vmax.f32 %v2775_v12, 0.0  ;;  %v3310_v48 = vrot.slane %v11951_v20, 1 }
 0x2fd   :  { %v3158_v28 = vmax.f32 %v3028_v9, %v3030_v57  ;;  %v3327_v42 = vsel %vm115_vm0, %v3311_v50, %v3313_v46  ;;  %v3312_v22 = vrot.slane %v11967_v45, 1  ;;  %v3315_v15 = vrot.slane %v11986_v25, 1 }
 0x2fe   :  { %v12011_v62 = vmax.f32 %v13562_v59, %v3157_v30  ;;  %v3159_v18 = vmax.f32 %v3029_v27, %v3031_v35  ;;  %v3411_v41 = vpack.c.bf16 %v3327_v42, %v3329_v56  ;;  %v3328_v58 = vsel %vm115_vm0, %v3308_v2, %v3310_v48  ;;  %v13565_v56 = vld [vmem:[#allocation30_spill] sm:$0xff]  ;;  %v13567_v35 = vld [vmem:[#allocation29_spill] sm:$0xff] }
 0x2ff   :  { %v12016_v38 = vmax.f32 %v13563_v14, %v3158_v28  ;;  %v3326_v43 = vsel %vm115_vm0, %v3310_v48, %v3312_v22  ;;  %v3325_v50 = vsel %vm115_vm0, %v3313_v46, %v3315_v15  ;;  %v3314_v0 = vrot.slane %v11983_v6, 1 }
 0x300   :  { %v12024_v3 = vmax.f32 %v13564_v13, %v3159_v18  ;;  %4188 = vmatprep.mubr.bf16.mxu0 %v3411_v41  ;;  %4381 = vmatprep.mubr.bf16.mxu1 %v3411_v41  ;;  %v3410_v37 = vpack.c.bf16 %v3326_v43, %v3328_v58  ;;  %v3317_v8 = vrot.slane %v12011_v62, 1  ;;  %v3316_v2 = vrot.slane %v11998_v54, 1 }
 0x301   :  { %v3324_v34 = vsel %vm115_vm0, %v3312_v22, %v3314_v0  ;;  %v3318_v29 = vrot.slane %v12016_v38, 1  ;;  %v13566_v30 = vrot.slane %v13565_v56, 1  ;;  %v13568_v48 = vrot.slane %v13567_v35, 1 }
 0x302   :  { %v3323_v19 = vsel %vm115_vm0, %v3315_v15, %v3317_v8  ;;  %v3322_v40 = vsel %vm115_vm0, %v3314_v0, %v3316_v2  ;;  %v3319_v23 = vrot.slane %v12024_v3, 1  ;;  %v13569_v15 = vld [vmem:[#allocation31_spill] sm:$0xff]  ;;  %v13438_v18 = vrot.slane %v11304_v5, 2 }
 0x303   :  { %4189 = vmatmul.mubr.bf16.gmra.mrb[180].mxu0 %v3410_v37  ;;  %4382 = vmatmul.mubr.bf16.gmra.mrb[180].mxu1 %v3410_v37  ;;  %v3413_v12 = vpack.c.bf16 %v3323_v19, %v3325_v50  ;;  %v3412_v9 = vpack.c.bf16 %v3322_v40, %v3324_v34  ;;  %v3320_v57 = vsel %vm115_vm0, %v3316_v2, %v3318_v29  ;;  %v3418_v59 = vrot.slane %v13569_v15, 2  ;;  %v13570_v19 = vld [vmem:[#allocation32_spill] sm:$0xff] }
 0x304   :  { %v3321_v46 = vsel %vm115_vm0, %v3317_v8, %v3319_v23  ;;  %v3383_v27 = vsel %vm115_vm0, %v3319_v23, %v13566_v30  ;;  %v3382_v28 = vsel %vm115_vm0, %v3318_v29, %v13568_v48  ;;  %v12052_v41 = vpack.c.bf16 %v11927_v33, %v11912_v53  ;;  %v9417_v23 = vld [vmem:[%s13344_s3 + $0x400] ss:$16 sps:$4 sm:$0xff]   ;;  %v13571_v30 = vld [vmem:[#allocation33_spill] sm:$0xff] }
 0x305   :  { %4198 = vmatprep.mubr.bf16.mxu0 %v3413_v12  ;;  %4391 = vmatprep.mubr.bf16.mxu1 %v3413_v12  ;;  %v3415_v42 = vpack.c.bf16 %v3383_v27, %v3321_v46  ;;  %v3414_v22 = vpack.c.bf16 %v3382_v28, %v3320_v57  ;;  %v12056_v58 = vpack.c.bf16 %v11919_v47, %v11903_v49  ;;  %v13439_v0 = vrot.slane %v13567_v35, 2  ;;  %v9420_v12 = vld [vmem:[%s13344_s3 + $0x408] ss:$16 sps:$4 sm:$0xff]   ;;  %v9425_v57 = vld [vmem:[%s13344_s3 + $0x424] ss:$16 sps:$4 sm:$0xff]  }
 0x306   :  { %v12060_v14 = vpack.c.bf16 %v11955_v24, %v11946_v31  ;;  %v12064_v43 = vpack.c.bf16 %v11951_v20, %v11937_v26  ;;  %v12068_v50 = vpack.c.bf16 %v11986_v25, %v11978_v32  ;;  %v12073_v13 = vpack.c.bf16 %v11983_v6, %v11967_v45  ;;  %v9428_v46 = vld [vmem:[%s13344_s3 + $0x42c] ss:$16 sps:$4 sm:$0xff]   ;;  %v9423_v27 = vld [vmem:[%s13344_s3 + $0x420] ss:$16 sps:$4 sm:$0xff]   ;;  %v9426_v48 = vld [vmem:[%s13344_s3 + $0x428] ss:$16 sps:$4 sm:$0xff]  }
 0x307   :  { %v12077_v37 = vpack.c.bf16 %v12024_v3, %v12011_v62  ;;  %v12081_v8 = vpack.c.bf16 %v12016_v38, %v11998_v54  ;;  %v3539_v2 = vsel %vm3480_vm2, %v3418_v59, %v13438_v18  ;;  %v3541_v34 = vsel %vm3480_vm2, %v13439_v0, %v3418_v59  ;;  %v9431_v28 = vld [vmem:[%s13344_s3 + $0x444] ss:$16 sps:$4 sm:$0xff]   ;;  %v9429_v15 = vld [vmem:[%s13344_s3 + $0x440] ss:$16 sps:$4 sm:$0xff]   ;;  %v9432_v59 = vld [vmem:[%s13344_s3 + $0x448] ss:$16 sps:$4 sm:$0xff]  }
 0x308   :  { %v12092_v29 = vpack.c.bf16 %v3539_v2, %v3541_v34  ;;  %v3225_v40 = vpack.c.bf16 %v13570_v19, %v13565_v56  ;;  %v3229_v2 = vpack.c.bf16 %v11366_v17, %v11347_v4  ;;  %v9437_v34 = vld [vmem:[%s13344_s3 + $0x464] ss:$16 sps:$4 sm:$0xff]   ;;  %v3467_v18 = vrot.slane %v11927_v33, 2 }
 0x30b   :  { %4199 = vmatmul.mubr.bf16.gmra.mrb[184].mxu0 %v3412_v9  ;;  %4392 = vmatmul.mubr.bf16.gmra.mrb[184].mxu1 %v3412_v9  ;;  %v3227_v9 = vpack.c.bf16 %v11327_v21, %v11308_v39 }
 0x30c   :  { %4208 = vmatprep.mubr.bf16.mxu0 %v3415_v42  ;;  %4401 = vmatprep.mubr.bf16.mxu1 %v3415_v42  ;;  %v9434_v42 = vld [vmem:[%s13344_s3 + $0x44c] ss:$16 sps:$4 sm:$0xff]  }
 0x313   :  { %4209 = vmatmul.mubr.bf16.gmra.mrb[188].mxu0 %v3414_v22  ;;  %4402 = vmatmul.mubr.bf16.gmra.mrb[188].mxu1 %v3414_v22  ;;  %v3226_v22 = vpack.c.bf16 %v11322_v61, %v11304_v5 }
 0x314   :  { %4764 = vmatprep.mubr.bf16.mxu0 %v3225_v40  ;;  %4957 = vmatprep.mubr.bf16.mxu1 %v3225_v40  ;;  %v9440_v40 = vld [vmem:[%s13344_s3 + $0x46c] ss:$16 sps:$4 sm:$0xff]  }
 0x31b   :  { %4765 = vmatmul.mubr.bf16.vlgmr.msra.gmra.mrb[128].mxu0 %v13571_v30  ;;  %4958 = vmatmul.mubr.bf16.vlgmr.msra.gmra.mrb[128].mxu1 %v13571_v30  ;;  %v13440_v30 = vrot.slane %v11883_v7, 2 }
 0x31c   :  { %4774 = vmatprep.mubr.bf16.mxu0 %v3227_v9  ;;  %4967 = vmatprep.mubr.bf16.mxu1 %v3227_v9  ;;  %v3228_v9 = vpack.c.bf16 %v11357_v36, %v11339_v55 }
 0x31d   :  { %5504 = vmatpush1.bf16.msra.mxu0 %v9417_v23  ;;  %5697 = vmatpush1.bf16.msra.mxu1 %v9420_v12  ;;  %v9435_v23 = vld [vmem:[%s13344_s3 + $0x460] ss:$16 sps:$4 sm:$0xff]   ;;  %v9438_v12 = vld [vmem:[%s13344_s3 + $0x468] ss:$16 sps:$4 sm:$0xff]  }
 0x31e   :  { %5505 = vmatprep.subr.bf16.mxu0 %v9425_v57  ;;  %5698 = vmatprep.subr.bf16.mxu1 %v9428_v46  ;;  %v9443_v57 = vld [vmem:[%s13344_s3 + $0x484] ss:$16 sps:$4 sm:$0xff]   ;;  %v9446_v46 = vld [vmem:[%s13344_s3 + $0x48c] ss:$16 sps:$4 sm:$0xff]  }
 0x321   :  { %5506 = vmatpush1.bf16.msra.mxu0 %v9423_v27  ;;  %5699 = vmatpush1.bf16.msra.mxu1 %v9426_v48  ;;  %v3463_v27 = vrot.slane %v11892_v51, 2  ;;  %v3465_v48 = vrot.slane %v11912_v53, 2  ;;  %v9441_v53 = vld [vmem:[%s13344_s3 + $0x480] ss:$16 sps:$4 sm:$0xff]  }
 0x322   :  { %5507 = vmatprep.subr.bf16.mxu0 %v9431_v28  ;;  %5700 = vmatprep.subr.bf16.mxu1 %v9434_v42  ;;  %v3462_v28 = vrot.slane %v11886_v11, 2  ;;  %v3231_v42 = vpack.c.bf16 %v11421_v63, %v11398_v60 }
 0x323   :  { %4775 = vmatmul.mubr.bf16.gmra.mrb[132].mxu0 %v3226_v22  ;;  %4968 = vmatmul.mubr.bf16.gmra.mrb[132].mxu1 %v3226_v22 }
 0x324   :  { %4784 = vmatprep.mubr.bf16.mxu0 %v3229_v2  ;;  %4977 = vmatprep.mubr.bf16.mxu1 %v3229_v2  ;;  %v12165_v2 = vpack.c.bf16 %v11409_v16, %v11391_v44 }
 0x325   :  { %5508 = vmatpush1.bf16.msra.mxu0 %v9429_v15  ;;  %5701 = vmatpush1.bf16.msra.mxu1 %v9432_v59  ;;  %v13441_v15 = vrot.slane %v11868_v52, 2  ;;  %v3464_v59 = vrot.slane %v11903_v49, 2  ;;  %v3498_v49 = vsel %vm3480_vm2, %v13440_v30, %v3463_v27 }
 0x326   :  { %5509 = vmatprep.subr.bf16.mxu0 %v9437_v34  ;;  %5702 = vmatprep.subr.bf16.mxu1 %v9440_v40  ;;  %v9444_v34 = vld [vmem:[%s13344_s3 + $0x488] ss:$16 sps:$4 sm:$0xff]   ;;  %v3496_v40 = vsel %vm3480_vm2, %v3463_v27, %v3465_v48  ;;  %v3494_v27 = vsel %vm3480_vm2, %v3465_v48, %v3467_v18  ;;  %v9447_v48 = vld [vmem:[%s13344_s3 + $0x4a0] ss:$16 sps:$4 sm:$0xff]  }
 0x327   :  { %v12186_v0 = vpack.c.bf16 %v3496_v40, %v3498_v49  ;;  %v3495_v22 = vsel %vm3480_vm2, %v3462_v28, %v3464_v59  ;;  %v3497_v33 = vsel %vm3480_vm2, %v13441_v15, %v3462_v28  ;;  %v3466_v40 = vrot.slane %v11919_v47, 2  ;;  %v9450_v47 = vld [vmem:[%s13344_s3 + $0x4a8] ss:$16 sps:$4 sm:$0xff]  }
 0x328   :  { %v3468_v49 = vrot.slane %v11937_v26, 2  ;;  %v3471_v28 = vrot.slane %v11955_v24, 2  ;;  %v9455_v24 = vld [vmem:[%s13344_s3 + $0x4c4] ss:$16 sps:$4 sm:$0xff]  }
 0x329   :  { %5510 = vmatpush1.bf16.msra.mxu0 %v9435_v23  ;;  %5703 = vmatpush1.bf16.msra.mxu1 %v9438_v12  ;;  %v9449_v23 = vld [vmem:[%s13344_s3 + $0x4a4] ss:$16 sps:$4 sm:$0xff]   ;;  %v9452_v12 = vld [vmem:[%s13344_s3 + $0x4ac] ss:$16 sps:$4 sm:$0xff]  }
 0x32a   :  { %5511 = vmatprep.subr.bf16.mxu0 %v9443_v57  ;;  %5704 = vmatprep.subr.bf16.mxu1 %v9446_v46  ;;  %v3469_v57 = vrot.slane %v11946_v31, 2  ;;  %v12195_v46 = vpack.c.bf16 %v3495_v22, %v3497_v33  ;;  %v3473_v31 = vrot.slane %v11978_v32, 2  ;;  %v3493_v32 = vsel %vm3480_vm2, %v3464_v59, %v3466_v40 }
 0x32b   :  { %4785 = vmatmul.mubr.bf16.gmra.mrb[136].mxu0 %v3228_v9  ;;  %4978 = vmatmul.mubr.bf16.gmra.mrb[136].mxu1 %v3228_v9  ;;  %v3470_v9 = vrot.slane %v11951_v20, 2  ;;  %v3472_v20 = vrot.slane %v11967_v45, 2  ;;  %v3475_v45 = vrot.slane %v11986_v25, 2  ;;  %v13576_v25 = vld [vmem:[#allocation36_spill] sm:$0xff] }
 0x32c   :  { %4794 = vmatprep.mubr.bf16.mxu0 %v3231_v42  ;;  %4987 = vmatprep.mubr.bf16.mxu1 %v3231_v42  ;;  %v3492_v30 = vsel %vm3480_vm2, %v3467_v18, %v3469_v57  ;;  %v3491_v18 = vsel %vm3480_vm2, %v3466_v40, %v3468_v49  ;;  %v9458_v42 = vld [vmem:[%s13344_s3 + $0x4cc] ss:$16 sps:$4 sm:$0xff]   ;;  %v3488_v22 = vsel %vm3480_vm2, %v3471_v28, %v3473_v31  ;;  %v3474_v40 = vrot.slane %v11983_v6, 2 }
 0x32d   :  { %5512 = vmatpush1.bf16.msra.mxu0 %v9441_v53  ;;  %5705 = vmatpush1.bf16.msra.mxu1 %v9444_v34  ;;  %v12212_v26 = vpack.c.bf16 %v3492_v30, %v3494_v27  ;;  %v12225_v30 = vpack.c.bf16 %v3491_v18, %v3493_v32  ;;  %v3490_v59 = vsel %vm3480_vm2, %v3469_v57, %v3471_v28  ;;  %v3476_v57 = vrot.slane %v11998_v54, 2 }
 0x32e   :  { %5513 = vmatprep.subr.bf16.mxu0 %v9449_v23  ;;  %5706 = vmatprep.subr.bf16.mxu1 %v9452_v12  ;;  %v12232_v53 = vpack.c.bf16 %v3488_v22, %v3490_v59  ;;  %v3487_v34 = vsel %vm3480_vm2, %v3470_v9, %v3472_v20  ;;  %v3489_v23 = vsel %vm3480_vm2, %v3468_v49, %v3470_v9  ;;  %v3477_v12 = vrot.slane %v12011_v62, 2  ;;  %v9453_v49 = vld [vmem:[%s13344_s3 + $0x4c0] ss:$16 sps:$4 sm:$0xff]   ;;  %v9456_v62 = vld [vmem:[%s13344_s3 + $0x4c8] ss:$16 sps:$4 sm:$0xff]  }
 0x32f   :  { %13572 = vst [vmem:[#allocation10_spill] sm:$0xff] %v12212_v26  ;;  %13573 = vst [vmem:[#allocation11_spill] sm:$0xff] %v12225_v30  ;;  %v12239_v33 = vpack.c.bf16 %v3487_v34, %v3489_v23  ;;  %v3486_v27 = vsel %vm3480_vm2, %v3473_v31, %v3475_v45  ;;  %v3233_v28 = vpack.c.bf16 %v13576_v25, %v11463_v10  ;;  %v3479_v6 = vrot.slane %v12024_v3, 2  ;;  %v9461_v9 = vld [vmem:[%s13344_s3 + $0x4e4] ss:$16 sps:$4 sm:$0xff]   ;;  %v13606_v30 = vld [vmem:[#allocation9_spill] sm:$0xff] }
 0x330   :  { %13574 = vst [vmem:[#allocation12_spill] sm:$0xff] %v12232_v53  ;;  %v3484_v31 = vsel %vm3480_vm2, %v3475_v45, %v3477_v12  ;;  %v3478_v54 = vrot.slane %v12016_v38, 2  ;;  %v3483_v18 = vsel %vm3480_vm2, %v3474_v40, %v3476_v57  ;;  %v3485_v3 = vsel %vm3480_vm2, %v3472_v20, %v3474_v40  ;;  %v9459_v45 = vld [vmem:[%s13344_s3 + $0x4e0] ss:$16 sps:$4 sm:$0xff]   ;;  %v9462_v34 = vld [vmem:[%s13344_s3 + $0x4e8] ss:$16 sps:$4 sm:$0xff]  }
 0x331   :  { %13575 = vst [vmem:[#allocation13_spill] sm:$0xff] %v12239_v33  ;;  %5514 = vmatpush1.bf16.msra.mxu0 %v9447_v48  ;;  %5707 = vmatpush1.bf16.msra.mxu1 %v9450_v47  ;;  %v9464_v48 = vld [vmem:[%s13344_s3 + $0x4ec] ss:$16 sps:$4 sm:$0xff]   ;;  %v12263_v47 = vpack.c.bf16 %v3484_v31, %v3486_v27  ;;  %v12271_v38 = vpack.c.bf16 %v3483_v18, %v3485_v3  ;;  %v13581_v59 = vrot.slane %v13567_v35, 2  ;;  %v9467_v35 = vld [vmem:[%s13344_s3 + $0x504] ss:$16 sps:$4 sm:$0xff]  }
 0x332   :  { %5515 = vmatprep.subr.bf16.mxu0 %v9455_v24  ;;  %5708 = vmatprep.subr.bf16.mxu1 %v9458_v42  ;;  %v3482_v32 = vsel %vm3480_vm2, %v3477_v12, %v3479_v6  ;;  %v13579_v24 = vrot.slane %v13565_v56, 2  ;;  %v3481_v20 = vsel %vm3480_vm2, %v3476_v57, %v3478_v54  ;;  %v9470_v12 = vld [vmem:[%s13344_s3 + $0x50c] ss:$16 sps:$4 sm:$0xff]   ;;  %v13583_v27 = vld [vmem:[#allocation34_spill] sm:$0xff]  ;;  %v13586_v31 = vld [vmem:[#allocation40_spill] sm:$0xff] }
 0x333   :  { %13577 = vst [vmem:[#allocation14_spill] sm:$0xff] %v12263_v47  ;;  %4795 = vmatmul.mubr.bf16.gmra.mrb[140].mxu0 %v12165_v2  ;;  %4988 = vmatmul.mubr.bf16.gmra.mrb[140].mxu1 %v12165_v2  ;;  %13578 = vst [vmem:[#allocation15_spill] sm:$0xff] %v12271_v38  ;;  %v3543_v2 = vsel %vm3480_vm2, %v3478_v54, %v13581_v59  ;;  %v13584_v40 = vld [vmem:[#allocation35_spill] sm:$0xff]  ;;  %v9473_v54 = vld [vmem:[%s13344_s3 + $0x524] ss:$16 sps:$4 sm:$0xff]  }
 0x334   :  { %v3544_v42 = vsel %vm3480_vm2, %v3479_v6, %v13579_v24  ;;  %4804 = vmatprep.mubr.bf16.mxu0 %v3233_v28  ;;  %4997 = vmatprep.mubr.bf16.mxu1 %v3233_v28  ;;  %v12293_v23 = vpack.c.bf16 %v3543_v2, %v3481_v20  ;;  %v3232_v57 = vpack.c.bf16 %v13584_v40, %v13583_v27  ;;  %v9465_v28 = vld [vmem:[%s13344_s3 + $0x500] ss:$16 sps:$4 sm:$0xff]   ;;  %v9474_v18 = vld [vmem:[%s13344_s3 + $0x528] ss:$16 sps:$4 sm:$0xff]   ;;  %v9479_v3 = vld [vmem:[%s13344_s3 + $0x544] ss:$16 sps:$4 sm:$0xff]  }
 0x335   :  { %v12279_v22 = vpack.c.bf16 %v3544_v42, %v3482_v32  ;;  %5516 = vmatpush1.bf16.msra.mxu0 %v9453_v49  ;;  %5709 = vmatpush1.bf16.msra.mxu1 %v9456_v62  ;;  %v9468_v49 = vld [vmem:[%s13344_s3 + $0x508] ss:$16 sps:$4 sm:$0xff]   ;;  %v13585_v62 = vld [vmem:[#allocation38_spill] sm:$0xff]  ;;  %v9482_v32 = vld [vmem:[%s13344_s3 + $0x54c] ss:$16 sps:$4 sm:$0xff]  }
 0x336   :  { %13582 = vst [vmem:[#allocation17_spill] sm:$0xff] %v12293_v23  ;;  %5517 = vmatprep.subr.bf16.mxu0 %v9461_v9  ;;  %5710 = vmatprep.subr.bf16.mxu1 %v9464_v48  ;;  %v3235_v6 = vpack.c.bf16 %v13586_v31, %v13585_v62  ;;  %v9476_v9 = vld [vmem:[%s13344_s3 + $0x52c] ss:$16 sps:$4 sm:$0xff]   ;;  %v9471_v48 = vld [vmem:[%s13344_s3 + $0x520] ss:$16 sps:$4 sm:$0xff]  }
 0x337   :  { %13580 = vst [vmem:[#allocation16_spill] sm:$0xff] %v12279_v22  ;;  %v13587_v24 = vld [vmem:[#allocation37_spill] sm:$0xff]  ;;  %v13588_v42 = vld [vmem:[#allocation39_spill] sm:$0xff]  ;;  %v9477_v59 = vld [vmem:[%s13344_s3 + $0x540] ss:$16 sps:$4 sm:$0xff]  }
 0x338   :  { %v3234_v20 = vpack.c.bf16 %v13588_v42, %v13587_v24  ;;  %v9480_v2 = vld [vmem:[%s13344_s3 + $0x548] ss:$16 sps:$4 sm:$0xff]   ;;  %v9509_v23 = vld [vmem:[%s13344_s3 + $0x5e4] ss:$16 sps:$4 sm:$0xff]  }
 0x339   :  { %5518 = vmatpush1.bf16.msra.mxu0 %v9459_v45  ;;  %5711 = vmatpush1.bf16.msra.mxu1 %v9462_v34  ;;  %v13589_v45 = vld [vmem:[#allocation42_spill] sm:$0xff]  ;;  %v13590_v34 = vld [vmem:[#allocation44_spill] sm:$0xff]  ;;  %v13600_v22 = vld [vmem:[#allocation51_spill] sm:$0xff] }
 0x33a   :  { %5519 = vmatprep.subr.bf16.mxu0 %v9467_v35  ;;  %5712 = vmatprep.subr.bf16.mxu1 %v9470_v12  ;;  %v3237_v35 = vpack.c.bf16 %v13590_v34, %v13589_v45  ;;  %v9485_v12 = vld [vmem:[%s13344_s3 + $0x564] ss:$16 sps:$4 sm:$0xff]  }
 0x33b   :  { %4805 = vmatmul.mubr.bf16.gmra.mrb[144].mxu0 %v3232_v57  ;;  %4998 = vmatmul.mubr.bf16.gmra.mrb[144].mxu1 %v3232_v57  ;;  %v9488_v57 = vld [vmem:[%s13344_s3 + $0x56c] ss:$16 sps:$4 sm:$0xff]   ;;  %v13602_v47 = vld [vmem:[#allocation6_spill] sm:$0xff] }
 0x33c   :  { %4814 = vmatprep.mubr.bf16.mxu0 %v3235_v6  ;;  %5007 = vmatprep.mubr.bf16.mxu1 %v3235_v6  ;;  %v9491_v6 = vld [vmem:[%s13344_s3 + $0x584] ss:$16 sps:$4 sm:$0xff]  }
 0x33d   :  { %5520 = vmatpush1.bf16.msra.mxu0 %v9465_v28  ;;  %5713 = vmatpush1.bf16.msra.mxu1 %v9468_v49  ;;  %v9483_v28 = vld [vmem:[%s13344_s3 + $0x560] ss:$16 sps:$4 sm:$0xff]   ;;  %v9486_v49 = vld [vmem:[%s13344_s3 + $0x568] ss:$16 sps:$4 sm:$0xff]  }
 0x33e   :  { %5521 = vmatprep.subr.bf16.mxu0 %v9473_v54  ;;  %5714 = vmatprep.subr.bf16.mxu1 %v9476_v9  ;;  %v9494_v54 = vld [vmem:[%s13344_s3 + $0x58c] ss:$16 sps:$4 sm:$0xff]   ;;  %v13605_v53 = vld [vmem:[#allocation2_spill] sm:$0xff] }
 0x33f   :  { %v13591_v9 = vld [vmem:[#allocation41_spill] sm:$0xff]  ;;  %v3245_v26 = vpack.c.bf16 %v13606_v30, %v13605_v53 }
 0x341   :  { %5522 = vmatpush1.bf16.msra.mxu0 %v9471_v48  ;;  %5715 = vmatpush1.bf16.msra.mxu1 %v9474_v18  ;;  %v13592_v48 = vld [vmem:[#allocation43_spill] sm:$0xff] }
 0x342   :  { %5523 = vmatprep.subr.bf16.mxu0 %v9479_v3  ;;  %5716 = vmatprep.subr.bf16.mxu1 %v9482_v32  ;;  %v3236_v18 = vpack.c.bf16 %v13592_v48, %v13591_v9  ;;  %v9489_v3 = vld [vmem:[%s13344_s3 + $0x580] ss:$16 sps:$4 sm:$0xff]   ;;  %v9492_v32 = vld [vmem:[%s13344_s3 + $0x588] ss:$16 sps:$4 sm:$0xff]  }
 0x343   :  { %4815 = vmatmul.mubr.bf16.gmra.mrb[148].mxu0 %v3234_v20  ;;  %5008 = vmatmul.mubr.bf16.gmra.mrb[148].mxu1 %v3234_v20  ;;  %v13593_v20 = vld [vmem:[#allocation46_spill] sm:$0xff] }
 0x344   :  { %4824 = vmatprep.mubr.bf16.mxu0 %v3237_v35  ;;  %5017 = vmatprep.mubr.bf16.mxu1 %v3237_v35  ;;  %v9497_v35 = vld [vmem:[%s13344_s3 + $0x5a4] ss:$16 sps:$4 sm:$0xff]  }
 0x345   :  { %5524 = vmatpush1.bf16.msra.mxu0 %v9477_v59  ;;  %5717 = vmatpush1.bf16.msra.mxu1 %v9480_v2  ;;  %v13594_v59 = vld [vmem:[#allocation48_spill] sm:$0xff] }
 0x346   :  { %5525 = vmatprep.subr.bf16.mxu0 %v9485_v12  ;;  %5718 = vmatprep.subr.bf16.mxu1 %v9488_v57  ;;  %v3239_v2 = vpack.c.bf16 %v13594_v59, %v13593_v20  ;;  %v9500_v12 = vld [vmem:[%s13344_s3 + $0x5ac] ss:$16 sps:$4 sm:$0xff]   ;;  %v9495_v57 = vld [vmem:[%s13344_s3 + $0x5a0] ss:$16 sps:$4 sm:$0xff]  }
 0x349   :  { %5526 = vmatpush1.bf16.msra.mxu0 %v9483_v28  ;;  %5719 = vmatpush1.bf16.msra.mxu1 %v9486_v49  ;;  %v9498_v28 = vld [vmem:[%s13344_s3 + $0x5a8] ss:$16 sps:$4 sm:$0xff]   ;;  %v9503_v49 = vld [vmem:[%s13344_s3 + $0x5c4] ss:$16 sps:$4 sm:$0xff]  }
 0x34a   :  { %5527 = vmatprep.subr.bf16.mxu0 %v9491_v6  ;;  %5720 = vmatprep.subr.bf16.mxu1 %v9494_v54  ;;  %v9506_v6 = vld [vmem:[%s13344_s3 + $0x5cc] ss:$16 sps:$4 sm:$0xff]  }
 0x34b   :  { %4825 = vmatmul.mubr.bf16.gmra.mrb[152].mxu0 %v3236_v18  ;;  %5018 = vmatmul.mubr.bf16.gmra.mrb[152].mxu1 %v3236_v18  ;;  %v13595_v54 = vld [vmem:[#allocation45_spill] sm:$0xff]  ;;  %v13596_v18 = vld [vmem:[#allocation47_spill] sm:$0xff] }
 0x34c   :  { %4834 = vmatprep.mubr.bf16.mxu0 %v3239_v2  ;;  %5027 = vmatprep.mubr.bf16.mxu1 %v3239_v2  ;;  %v9504_v2 = vld [vmem:[%s13344_s3 + $0x5c8] ss:$16 sps:$4 sm:$0xff]  }
 0x34d   :  { %5528 = vmatpush1.bf16.msra.mxu0 %v9489_v3  ;;  %5721 = vmatpush1.bf16.msra.mxu1 %v9492_v32  ;;  %v3238_v3 = vpack.c.bf16 %v13596_v18, %v13595_v54  ;;  %v9501_v32 = vld [vmem:[%s13344_s3 + $0x5c0] ss:$16 sps:$4 sm:$0xff]  }
 0x34e   :  { %5529 = vmatprep.subr.bf16.mxu0 %v9497_v35  ;;  %5722 = vmatprep.subr.bf16.mxu1 %v9500_v12  ;;  %v13597_v35 = vld [vmem:[#allocation50_spill] sm:$0xff]  ;;  %v13598_v12 = vld [vmem:[#allocation52_spill] sm:$0xff] }
 0x34f   :  { %v3241_v15 = vpack.c.bf16 %v13598_v12, %v13597_v35 }
 0x351   :  { %5530 = vmatpush1.bf16.msra.mxu0 %v9495_v57  ;;  %5723 = vmatpush1.bf16.msra.mxu1 %v9498_v28  ;;  %v9512_v57 = vld [vmem:[%s13344_s3 + $0x5ec] ss:$16 sps:$4 sm:$0xff]   ;;  %v9507_v28 = vld [vmem:[%s13344_s3 + $0x5e0] ss:$16 sps:$4 sm:$0xff]  }
 0x352   :  { %5531 = vmatprep.subr.bf16.mxu0 %v9503_v49  ;;  %5724 = vmatprep.subr.bf16.mxu1 %v9506_v6  ;;  %v9510_v49 = vld [vmem:[%s13344_s3 + $0x5e8] ss:$16 sps:$4 sm:$0xff]  }
 0x353   :  { %4835 = vmatmul.mubr.bf16.gmra.mrb[156].mxu0 %v3238_v3  ;;  %5028 = vmatmul.mubr.bf16.gmra.mrb[156].mxu1 %v3238_v3  ;;  %v13599_v6 = vld [vmem:[#allocation49_spill] sm:$0xff]  ;;  %v13601_v3 = vld [vmem:[#allocation4_spill] sm:$0xff] }
 0x354   :  { %4844 = vmatprep.mubr.bf16.mxu0 %v3241_v15  ;;  %5037 = vmatprep.mubr.bf16.mxu1 %v3241_v15  ;;  %v3240_v38 = vpack.c.bf16 %v13600_v22, %v13599_v6  ;;  %v3243_v15 = vpack.c.bf16 %v13602_v47, %v13601_v3 }
 0x355   :  { %5532 = vmatpush1.bf16.msra.mxu0 %v9501_v32  ;;  %5725 = vmatpush1.bf16.msra.mxu1 %v9504_v2  ;;  %v13603_v32 = vld [vmem:[#allocation3_spill] sm:$0xff]  ;;  %v13604_v2 = vld [vmem:[#allocation5_spill] sm:$0xff] }
 0x356   :  { %5533 = vmatprep.subr.bf16.mxu0 %v9509_v23  ;;  %5726 = vmatprep.subr.bf16.mxu1 %v9512_v57  ;;  %v3242_v33 = vpack.c.bf16 %v13604_v2, %v13603_v32  ;;  %v13607_v23 = vld [vmem:[#allocation7_spill] sm:$0xff]  ;;  %v13608_v57 = vld [vmem:[#allocation8_spill] sm:$0xff] }
 0x359   :  { %5534 = vmatpush1.bf16.msra.mxu0 %v9507_v28  ;;  %5727 = vmatpush1.bf16.msra.mxu1 %v9510_v49  ;;  %v3244_v28 = vpack.c.bf16 %v13608_v57, %v13607_v23  ;;  %v3247_v49 = vpack.c.bf16 %v11892_v51, %v11883_v7  ;;  %v3419_v51 = vrot.slane %v13570_v19, 2  ;;  %v3424_v19 = vrot.slane %v11339_v55, 2 }
 0x35a   :  { %v3437_v55 = vrot.slane %v13585_v62, 2  ;;  %v3445_v62 = vrot.slane %v13593_v20, 2 }
 0x35b   :  { %4845 = vmatmul.mubr.bf16.gmra.mrb[160].mxu0 %v3240_v38  ;;  %5038 = vmatmul.mubr.bf16.gmra.mrb[160].mxu1 %v3240_v38  ;;  %v3246_v38 = vpack.c.bf16 %v11886_v11, %v11868_v52  ;;  %v3421_v11 = vrot.slane %v11308_v39, 2  ;;  %v3423_v39 = vrot.slane %v11327_v21, 2  ;;  %v3430_v21 = vrot.slane %v11409_v16, 2  ;;  %v9513_v16 = vld [vmem:[%s13346_s5 + $0x40] sm:$0xff]  }
 0x35c   :  { %4854 = vmatprep.mubr.bf16.mxu0 %v3243_v15  ;;  %5047 = vmatprep.mubr.bf16.mxu1 %v3243_v15  ;;  %v3431_v15 = vrot.slane %v11421_v63, 2  ;;  %v3438_v63 = vrot.slane %v13588_v42, 2  ;;  %v9516_v42 = vld [vmem:[%s13346_s5 + $0x80] sm:$0xff]  }
 0x35d   :  { %8580 = vmatprep.subr.bf16.mxu0 %v9513_v16 }
 0x363   :  { %4855 = vmatmul.mubr.bf16.gmra.mrb[164].mxu0 %v3242_v33  ;;  %5048 = vmatmul.mubr.bf16.gmra.mrb[164].mxu1 %v3242_v33  ;;  %v3426_v33 = vrot.slane %v11357_v36, 2  ;;  %v3434_v36 = vrot.slane %v13584_v40, 2 }
 0x364   :  { %4864 = vmatprep.mubr.bf16.mxu0 %v3245_v26  ;;  %5057 = vmatprep.mubr.bf16.mxu1 %v3245_v26  ;;  %v3427_v26 = vrot.slane %v11366_v17, 2  ;;  %v3436_v17 = vrot.slane %v13587_v24, 2  ;;  %v3442_v24 = vrot.slane %v13592_v48, 2 }
 0x36b   :  { %4865 = vmatmul.mubr.bf16.gmra.mrb[168].mxu0 %v3244_v28  ;;  %5058 = vmatmul.mubr.bf16.gmra.mrb[168].mxu1 %v3244_v28  ;;  %v3433_v28 = vrot.slane %v11463_v10, 2  ;;  %v3440_v10 = vrot.slane %v13591_v9, 2  ;;  %v3446_v9 = vrot.slane %v13596_v18, 2  ;;  %v3457_v18 = vrot.slane %v13605_v53, 2 }
 0x36c   :  { %4874 = vmatprep.mubr.bf16.mxu0 %v3247_v49  ;;  %5067 = vmatprep.mubr.bf16.mxu1 %v3247_v49 }
 0x373   :  { %4875 = vmatmul.mubr.bf16.gmra.mrb[172].mxu0 %v3246_v38  ;;  %5068 = vmatmul.mubr.bf16.gmra.mrb[172].mxu1 %v3246_v38 }
 0x374   :  { %4884 = vmatprep.mubr.bf16.mxu0 %v12052_v41  ;;  %5077 = vmatprep.mubr.bf16.mxu1 %v12052_v41  ;;  %v3540_v41 = vsel %vm3480_vm2, %v3419_v51, %v3421_v11 }
 0x37b   :  { %4885 = vmatmul.mubr.bf16.gmra.mrb[176].mxu0 %v12056_v58  ;;  %5078 = vmatmul.mubr.bf16.gmra.mrb[176].mxu1 %v12056_v58  ;;  %v13609_v58 = vrot.slane %v13565_v56, 2  ;;  %v3428_v56 = vrot.slane %v11391_v44, 2  ;;  %v3439_v44 = vrot.slane %v13586_v31, 2  ;;  %v9514_v31 = vld [vmem:[%s13346_s5] sm:$0xff]  }
 0x37c   :  { %4894 = vmatprep.mubr.bf16.mxu0 %v12060_v14  ;;  %5087 = vmatprep.mubr.bf16.mxu1 %v12060_v14 }
 0x37d   :  { %v3542_v14 = vsel %vm3480_vm2, %v13609_v58, %v3419_v51 }
 0x383   :  { %4895 = vmatmul.mubr.bf16.gmra.mrb[180].mxu0 %v12064_v43  ;;  %5088 = vmatmul.mubr.bf16.gmra.mrb[180].mxu1 %v12064_v43  ;;  %v3425_v43 = vrot.slane %v11347_v4, 2  ;;  %v3432_v4 = vrot.slane %v13583_v27, 2 }
 0x384   :  { %4904 = vmatprep.mubr.bf16.mxu0 %v12068_v50  ;;  %5097 = vmatprep.mubr.bf16.mxu1 %v12068_v50  ;;  %v3546_v50 = vpack.c.bf16 %v3540_v41, %v3542_v14  ;;  %v13610_v41 = vrot.slane %v11304_v5, 2  ;;  %v3533_v5 = vsel %vm3480_vm2, %v3424_v19, %v3426_v33 }
 0x385   :  { %v3536_v40 = vsel %vm3480_vm2, %v3423_v39, %v3425_v43  ;;  %v3534_v14 = vsel %vm3480_vm2, %v3425_v43, %v3427_v26  ;;  %v3527_v43 = vsel %vm3480_vm2, %v3430_v21, %v3432_v4 }
 0x38b   :  { %4905 = vmatmul.mubr.bf16.gmra.mrb[184].mxu0 %v12073_v13  ;;  %5098 = vmatmul.mubr.bf16.gmra.mrb[184].mxu1 %v12073_v13  ;;  %v3422_v13 = vrot.slane %v11322_v61, 2  ;;  %v3435_v61 = vrot.slane %v13576_v25, 2  ;;  %v9515_v25 = vld [vmem:[%s13346_s5 + $0xc0] sm:$0xff]  }
 0x38c   :  { %4914 = vmatprep.mubr.bf16.mxu0 %v12077_v37  ;;  %5107 = vmatprep.mubr.bf16.mxu1 %v12077_v37  ;;  %v3429_v37 = vrot.slane %v11398_v60, 2  ;;  %v3441_v60 = vrot.slane %v13589_v45, 2 }
 0x38d   :  { %8608 = vmatprep.subr.bf16.mxu1 %v9515_v25  ;;  %v3535_v38 = vsel %vm3480_vm2, %v3422_v13, %v3424_v19  ;;  %v3529_v19 = vsel %vm3480_vm2, %v3428_v56, %v3430_v21  ;;  %v3522_v21 = vsel %vm3480_vm2, %v3437_v55, %v3439_v44 }
 0x38e   :  { %v3532_v51 = vsel %vm3480_vm2, %v3427_v26, %v3429_v37  ;;  %v3524_v26 = vsel %vm3480_vm2, %v3435_v61, %v3437_v55 }
 0x393   :  { %4915 = vmatmul.mubr.bf16.gmra.mrb[188].mxu0 %v12081_v8  ;;  %5108 = vmatmul.mubr.bf16.gmra.mrb[188].mxu1 %v12081_v8  ;;  %v3443_v8 = vrot.slane %v13590_v34, 2  ;;  %v3538_v34 = vsel %vm3480_vm2, %v3421_v11, %v3423_v39  ;;  %v3537_v11 = vsel %vm3480_vm2, %v13610_v41, %v3422_v13  ;;  %v3531_v39 = vsel %vm3480_vm2, %v3426_v33, %v3428_v56 }
 0x394   :  { %5535 = vmatprep.mubr.bf16.mxu0 %v3546_v50  ;;  %5728 = vmatprep.mubr.bf16.mxu1 %v3546_v50  ;;  %v3548_v49 = vpack.c.bf16 %v3536_v40, %v3538_v34  ;;  %v3547_v58 = vpack.c.bf16 %v3535_v38, %v3537_v11  ;;  %v3528_v50 = vsel %vm3480_vm2, %v3431_v15, %v3433_v28  ;;  %v3444_v34 = vrot.slane %v13595_v54, 2 }
 0x395   :  { %v3549_v16 = vpack.c.bf16 %v3531_v39, %v3533_v5  ;;  %v3530_v13 = vsel %vm3480_vm2, %v3429_v37, %v3431_v15  ;;  %v3551_v33 = vpack.c.bf16 %v3527_v43, %v3529_v19  ;;  %v3526_v37 = vsel %vm3480_vm2, %v3433_v28, %v3435_v61 }
 0x396   :  { %v3552_v25 = vpack.c.bf16 %v3528_v50, %v3530_v13  ;;  %v3554_v15 = vpack.c.bf16 %v3524_v26, %v3526_v37  ;;  %v3523_v40 = vsel %vm3480_vm2, %v3434_v36, %v3436_v17  ;;  %v3525_v56 = vsel %vm3480_vm2, %v3432_v4, %v3434_v36  ;;  %v13615_v37 = vld [vmem:[#allocation12_spill] sm:$0xff] }
 0x397   :  { %v3553_v28 = vpack.c.bf16 %v3523_v40, %v3525_v56  ;;  %v3516_v27 = vsel %vm3480_vm2, %v3443_v8, %v3445_v62  ;;  %v3521_v4 = vsel %vm3480_vm2, %v3436_v17, %v3438_v63  ;;  %v3518_v36 = vsel %vm3480_vm2, %v3441_v60, %v3443_v8  ;;  %v9518_v40 = vld [vmem:[%s13346_s5 + $0x8] sm:$0xff]  }
 0x398   :  { %v3447_v38 = vrot.slane %v13594_v59, 2  ;;  %v3515_v17 = vsel %vm3480_vm2, %v3442_v24, %v3444_v34  ;;  %v3517_v54 = vsel %vm3480_vm2, %v3440_v10, %v3442_v24  ;;  %v3448_v59 = vrot.slane %v13599_v6, 2  ;;  %v9520_v56 = vld [vmem:[%s13346_s5 + $0x88] sm:$0xff]   ;;  %v9529_v24 = vld [vmem:[%s13346_s5 + $0x60] sm:$0xff]  }
 0x399   :  { %v3451_v8 = vrot.slane %v13598_v12, 2  ;;  %v3452_v41 = vrot.slane %v13603_v32, 2  ;;  %v3450_v12 = vrot.slane %v13600_v22, 2  ;;  %v3455_v11 = vrot.slane %v13602_v47, 2 }
 0x39a   :  { %v3456_v50 = vrot.slane %v13607_v23, 2  ;;  %v3454_v47 = vrot.slane %v13604_v2, 2  ;;  %v3459_v22 = vrot.slane %v13606_v30, 2  ;;  %v3458_v30 = vrot.slane %v13608_v57, 2  ;;  %v13613_v57 = vld [vmem:[#allocation10_spill] sm:$0xff] }
 0x39b   :  { %5536 = vmatmul.mubr.bf16.vlgmr.msra.gmra.mrb[128].mxu0 %v12092_v29  ;;  %5729 = vmatmul.mubr.bf16.vlgmr.msra.gmra.mrb[128].mxu1 %v12092_v29  ;;  %v3550_v29 = vpack.c.bf16 %v3532_v51, %v3534_v14  ;;  %v3504_v14 = vsel %vm3480_vm2, %v3455_v11, %v3457_v18  ;;  %v13612_v2 = vrot.slane %v11868_v52, 2  ;;  %v13614_v52 = vld [vmem:[#allocation11_spill] sm:$0xff] }
 0x39c   :  { %5545 = vmatprep.mubr.bf16.mxu0 %v3548_v49  ;;  %5738 = vmatprep.mubr.bf16.mxu1 %v3548_v49  ;;  %v3449_v49 = vrot.slane %v13597_v35, 2  ;;  %v3514_v35 = vsel %vm3480_vm2, %v3445_v62, %v3447_v38  ;;  %v3513_v62 = vsel %vm3480_vm2, %v3444_v34, %v3446_v9  ;;  %v3503_v5 = vsel %vm3480_vm2, %v3454_v47, %v3456_v50  ;;  %v9527_v34 = vld [vmem:[%s13346_s5 + $0xd8] sm:$0xff]  }
 0x39d   :  { %8581 = vmatpush3.bf16.msra.mxu0 %v9514_v31  ;;  %8609 = vmatpush3.bf16.msra.mxu1 %v9516_v42  ;;  %v3520_v31 = vsel %vm3480_vm2, %v3439_v44, %v3441_v60  ;;  %v3519_v42 = vsel %vm3480_vm2, %v3438_v63, %v3440_v10  ;;  %v3558_v44 = vpack.c.bf16 %v3516_v27, %v3518_v36  ;;  %v3453_v63 = vrot.slane %v13601_v3, 2  ;;  %v9522_v27 = vld [vmem:[%s13346_s5 + $0x10] sm:$0xff]   ;;  %v9525_v36 = vld [vmem:[%s13346_s5 + $0x58] sm:$0xff]  }
 0x39e   :  { %v3556_v61 = vpack.c.bf16 %v3520_v31, %v3522_v21  ;;  %v3555_v55 = vpack.c.bf16 %v3519_v42, %v3521_v4  ;;  %v3512_v45 = vsel %vm3480_vm2, %v3447_v38, %v3449_v49  ;;  %v3557_v60 = vpack.c.bf16 %v3515_v17, %v3517_v54  ;;  %v9519_v31 = vld [vmem:[%s13346_s5 + $0xc8] sm:$0xff]   ;;  %v13619_v21 = vld [vmem:[#allocation16_spill] sm:$0xff]  ;;  %v13620_v42 = vld [vmem:[#allocation17_spill] sm:$0xff] }
 0x39f   :  { %v3560_v48 = vpack.c.bf16 %v3512_v45, %v3514_v35  ;;  %v3511_v10 = vsel %vm3480_vm2, %v3446_v9, %v3448_v59  ;;  %v3508_v20 = vsel %vm3480_vm2, %v3451_v8, %v3453_v63  ;;  %v3510_v51 = vsel %vm3480_vm2, %v3449_v49, %v3451_v8  ;;  %8610 = vmatprep.subr.bf16.mxu1 %v9519_v31  ;;  %v9523_v4 = vld [vmem:[%s13346_s5 + $0xd0] sm:$0xff]   ;;  %v9528_v49 = vld [vmem:[%s13346_s5 + $0x98] sm:$0xff]   ;;  %v9530_v38 = vld [vmem:[%s13346_s5 + $0x20] sm:$0xff]  }
 0x3a0   :  { %v3559_v6 = vpack.c.bf16 %v3511_v10, %v3513_v62  ;;  %v3562_v3 = vpack.c.bf16 %v3508_v20, %v3510_v51  ;;  %v3506_v39 = vsel %vm3480_vm2, %v3453_v63, %v3455_v11  ;;  %v3502_v43 = vsel %vm3480_vm2, %v3457_v18, %v3459_v22  ;;  %v9531_v17 = vld [vmem:[%s13346_s5 + $0xe0] sm:$0xff]   ;;  %v9533_v54 = vld [vmem:[%s13346_s5 + $0x68] sm:$0xff]   ;;  %v9538_v63 = vld [vmem:[%s13346_s5 + $0xf0] sm:$0xff]  }
 0x3a1   :  { %v3564_v53 = vpack.c.bf16 %v3504_v14, %v3506_v39  ;;  %v3501_v19 = vsel %vm3480_vm2, %v3456_v50, %v3458_v30  ;;  %8611 = vmatpush3.bf16.msra.mxu1 %v9520_v56  ;;  %v9532_v45 = vld [vmem:[%s13346_s5 + $0xa0] sm:$0xff]   ;;  %v9535_v35 = vld [vmem:[%s13346_s5 + $0x28] sm:$0xff]   ;;  %v9539_v9 = vld [vmem:[%s13346_s5 + $0x30] sm:$0xff]   ;;  %v13622_v18 = vsub.s32 2, %v13465_v1  ;;  %v13623_v11 = vsub.s32 1, %v13465_v1 }
 0x3a2   :  { %8612 = vmatprep.subr.bf16.mxu1 %v9523_v4  ;;  %v9540_v8 = vld [vmem:[%s13346_s5 + $0xb0] sm:$0xff]   ;;  %v9541_v10 = vld [vmem:[%s13346_s5 + $0x78] sm:$0xff]   ;;  %v6017_v51 = vld [vmem:[%s13347_s4] sm:$0xf]  ;;  %v13624_v14 = vsub.s32 3, %v13465_v1 }
 0x3a3   :  { %5546 = vmatmul.mubr.bf16.gmra.mrb[132].mxu0 %v3547_v58  ;;  %5739 = vmatmul.mubr.bf16.gmra.mrb[132].mxu1 %v3547_v58  ;;  %v3507_v58 = vsel %vm3480_vm2, %v3450_v12, %v3452_v41  ;;  %v9542_v20 = vld [vmem:[%s13346_s5 + $0xf8] sm:$0xff]   ;;  %v9546_v50 = vld [vmem:[%s13346_s5 + $0x1c0] sm:$0xff]  }
 0x3a4   :  { %5555 = vmatprep.mubr.bf16.mxu0 %v3550_v29  ;;  %5748 = vmatprep.mubr.bf16.mxu1 %v3550_v29  ;;  %v3509_v29 = vsel %vm3480_vm2, %v3448_v59, %v3450_v12  ;;  %v9537_v59 = vld [vmem:[%s13346_s5 + $0x70] sm:$0xff]   ;;  %v9543_v62 = vld [vmem:[%s13346_s5 + $0x38] sm:$0xff]   ;;  %v12716_v12 = vrot.slane %v6017_v51, %v13622_v18 }
 0x3a5   :  { %v3561_v32 = vpack.c.bf16 %v3507_v58, %v3509_v29  ;;  %v12720_v58 = vrot.slane %v6017_v51, %v13623_v11  ;;  %v12724_v29 = vrot.slane %v6017_v51, %v13624_v14 }
 0x3ab   :  { %5556 = vmatmul.mubr.bf16.gmra.mrb[136].mxu0 %v3549_v16  ;;  %5749 = vmatmul.mubr.bf16.gmra.mrb[136].mxu1 %v3549_v16  ;;  %v13611_v16 = vrot.slane %v11883_v7, 2  ;;  %v3499_v7 = vsel %vm3480_vm2, %v3458_v30, %v13612_v2 }
 0x3ac   :  { %5565 = vmatprep.mubr.bf16.mxu0 %v3552_v25  ;;  %5758 = vmatprep.mubr.bf16.mxu1 %v3552_v25  ;;  %v3505_v25 = vsel %vm3480_vm2, %v3452_v41, %v3454_v47 }
 0x3ad   :  { %v3500_v13 = vsel %vm3480_vm2, %v3459_v22, %v13611_v16  ;;  %v3563_v23 = vpack.c.bf16 %v3503_v5, %v3505_v25 }
 0x3ae   :  { %v3566_v26 = vpack.c.bf16 %v3500_v13, %v3502_v43 }
 0x3b3   :  { %5566 = vmatmul.mubr.bf16.gmra.mrb[140].mxu0 %v3551_v33  ;;  %5759 = vmatmul.mubr.bf16.gmra.mrb[140].mxu1 %v3551_v33  ;;  %v3565_v33 = vpack.c.bf16 %v3499_v7, %v3501_v19 }
 0x3b4   :  { %5575 = vmatprep.mubr.bf16.mxu0 %v3554_v15  ;;  %5768 = vmatprep.mubr.bf16.mxu1 %v3554_v15  ;;  %v13616_v15 = vld [vmem:[#allocation13_spill] sm:$0xff] }
 0x3bb   :  { %5576 = vmatmul.mubr.bf16.gmra.mrb[144].mxu0 %v3553_v28  ;;  %5769 = vmatmul.mubr.bf16.gmra.mrb[144].mxu1 %v3553_v28  ;;  %v13618_v28 = vld [vmem:[#allocation15_spill] sm:$0xff] }
 0x3bc   :  { %5585 = vmatprep.mubr.bf16.mxu0 %v3556_v61  ;;  %5778 = vmatprep.mubr.bf16.mxu1 %v3556_v61  ;;  %v9521_v61 = vld [vmem:[%s13346_s5 + $0x50] sm:$0xff]  }
 0x3c3   :  { %5586 = vmatmul.mubr.bf16.gmra.mrb[148].mxu0 %v3555_v55  ;;  %5779 = vmatmul.mubr.bf16.gmra.mrb[148].mxu1 %v3555_v55  ;;  %v9524_v55 = vld [vmem:[%s13346_s5 + $0x90] sm:$0xff]  }
 0x3c4   :  { %5595 = vmatprep.mubr.bf16.mxu0 %v3558_v44  ;;  %5788 = vmatprep.mubr.bf16.mxu1 %v3558_v44  ;;  %v9526_v44 = vld [vmem:[%s13346_s5 + $0x18] sm:$0xff]  }
 0x3c5   :  { %8613 = vmatpush3.bf16.msra.mxu1 %v9524_v55 }
 0x3c6   :  { %8614 = vmatprep.subr.bf16.mxu1 %v9527_v34 }
 0x3c9   :  { %8615 = vmatpush3.bf16.msra.mxu1 %v9528_v49 }
 0x3ca   :  { %8616 = vmatprep.subr.bf16.mxu1 %v9531_v17 }
 0x3cb   :  { %5596 = vmatmul.mubr.bf16.gmra.mrb[152].mxu0 %v3557_v60  ;;  %5789 = vmatmul.mubr.bf16.gmra.mrb[152].mxu1 %v3557_v60  ;;  %v9534_v60 = vld [vmem:[%s13346_s5 + $0xe8] sm:$0xff]  }
 0x3cc   :  { %5605 = vmatprep.mubr.bf16.mxu0 %v3560_v48  ;;  %5798 = vmatprep.mubr.bf16.mxu1 %v3560_v48  ;;  %v9536_v48 = vld [vmem:[%s13346_s5 + $0xa8] sm:$0xff]  }
 0x3cd   :  { %8617 = vmatpush3.bf16.msra.mxu1 %v9532_v45 }
 0x3ce   :  { %8618 = vmatprep.subr.bf16.mxu1 %v9534_v60 }
 0x3d1   :  { %8619 = vmatpush3.bf16.msra.mxu1 %v9536_v48 }
 0x3d2   :  { %8620 = vmatprep.subr.bf16.mxu1 %v9538_v63 }
 0x3d3   :  { %5606 = vmatmul.mubr.bf16.gmra.mrb[156].mxu0 %v3559_v6  ;;  %5799 = vmatmul.mubr.bf16.gmra.mrb[156].mxu1 %v3559_v6  ;;  %v9544_v6 = vld [vmem:[%s13346_s5 + $0xb8] sm:$0xff]  }
 0x3d4   :  { %5615 = vmatprep.mubr.bf16.mxu0 %v3562_v3  ;;  %5808 = vmatprep.mubr.bf16.mxu1 %v3562_v3  ;;  %v13621_v3 = vsub.s32 0, %v13465_v1 }
 0x3d5   :  { %8621 = vmatpush3.bf16.msra.mxu1 %v9540_v8 }
 0x3d6   :  { %8622 = vmatprep.subr.bf16.mxu1 %v9542_v20  ;;  %v12712_v41 = vrot.slane %v6017_v51, %v13621_v3 }
 0x3d9   :  { %8623 = vmatpush3.bf16.msra.mxu1 %v9544_v6 }
 0x3da   :  { %8664 = vmatprep.subr.bf16.mxu1 %v9546_v50 }
 0x3db   :  { %5616 = vmatmul.mubr.bf16.gmra.mrb[160].mxu0 %v3561_v32  ;;  %5809 = vmatmul.mubr.bf16.gmra.mrb[160].mxu1 %v3561_v32 }
 0x3dc   :  { %5625 = vmatprep.mubr.bf16.mxu0 %v3564_v53  ;;  %5818 = vmatprep.mubr.bf16.mxu1 %v3564_v53  ;;  %v9545_v53 = vld [vmem:[%s13346_s5 + $0x140] sm:$0xff]  }
 0x3e3   :  { %5626 = vmatmul.mubr.bf16.gmra.mrb[164].mxu0 %v3563_v23  ;;  %5819 = vmatmul.mubr.bf16.gmra.mrb[164].mxu1 %v3563_v23 }
 0x3e4   :  { %5635 = vmatprep.mubr.bf16.mxu0 %v3566_v26  ;;  %5828 = vmatprep.mubr.bf16.mxu1 %v3566_v26 }
 0x3eb   :  { %5636 = vmatmul.mubr.bf16.gmra.mrb[168].mxu0 %v3565_v33  ;;  %5829 = vmatmul.mubr.bf16.gmra.mrb[168].mxu1 %v3565_v33 }
 0x3ec   :  { %5645 = vmatprep.mubr.bf16.mxu0 %v12186_v0  ;;  %5838 = vmatprep.mubr.bf16.mxu1 %v12186_v0  ;;  %v9517_v0 = vld [vmem:[%s13346_s5 + $0x48] sm:$0xff]  }
 0x3ed   :  { %8582 = vmatprep.subr.bf16.mxu0 %v9517_v0 }
 0x3ee   :  { %8583 = vmatpush3.bf16.msra.mxu0 %v9518_v40  ;;  %v9599_v40 = vmov 1966171168  }
 0x3ef   :  { %8584 = vmatprep.subr.bf16.mxu0 %v9521_v61  ;;  %v6432_v31 = vunpack.c.l.s4 %v9599_v40 }
 0x3f1   :  { %v6433_v17 = vunpack.c.0.s8 %v6432_v31 }
 0x3f2   :  { %8585 = vmatpush3.bf16.msra.mxu0 %v9522_v27 }
 0x3f3   :  { %5646 = vmatmul.mubr.bf16.gmra.mrb[172].mxu0 %v12195_v46  ;;  %5839 = vmatmul.mubr.bf16.gmra.mrb[172].mxu1 %v12195_v46  ;;  %v13617_v46 = vld [vmem:[#allocation14_spill] sm:$0xff] }
 0x3f4   :  { %5655 = vmatprep.mubr.bf16.mxu0 %v13613_v57  ;;  %5848 = vmatprep.mubr.bf16.mxu1 %v13613_v57 }
 0x3f5   :  { %8586 = vmatprep.subr.bf16.mxu0 %v9525_v36 }
 0x3f6   :  { %8587 = vmatpush3.bf16.msra.mxu0 %v9526_v44 }
 0x3f7   :  { %8588 = vmatprep.subr.bf16.mxu0 %v9529_v24 }
 0x3fa   :  { %8589 = vmatpush3.bf16.msra.mxu0 %v9530_v38 }
 0x3fb   :  { %5656 = vmatmul.mubr.bf16.gmra.mrb[176].mxu0 %v13614_v52  ;;  %5849 = vmatmul.mubr.bf16.gmra.mrb[176].mxu1 %v13614_v52 }
 0x3fc   :  { %5665 = vmatprep.mubr.bf16.mxu0 %v13615_v37  ;;  %5858 = vmatprep.mubr.bf16.mxu1 %v13615_v37 }
 0x3fd   :  { %8590 = vmatprep.subr.bf16.mxu0 %v9533_v54 }
 0x3fe   :  { %8591 = vmatpush3.bf16.msra.mxu0 %v9535_v35 }
 0x3ff   :  { %8592 = vmatprep.subr.bf16.mxu0 %v9537_v59 }
 0x402   :  { %8593 = vmatpush3.bf16.msra.mxu0 %v9539_v9 }
 0x403   :  { %5666 = vmatmul.mubr.bf16.gmra.mrb[180].mxu0 %v13616_v15  ;;  %5859 = vmatmul.mubr.bf16.gmra.mrb[180].mxu1 %v13616_v15 }
 0x404   :  { %5675 = vmatprep.mubr.bf16.mxu0 %v13617_v46  ;;  %5868 = vmatprep.mubr.bf16.mxu1 %v13617_v46 }
 0x405   :  { %8594 = vmatprep.subr.bf16.mxu0 %v9541_v10 }
 0x406   :  { %8595 = vmatpush3.bf16.msra.mxu0 %v9543_v62 }
 0x407   :  { %8636 = vmatprep.subr.bf16.mxu0 %v9545_v53 }
 0x40b   :  { %5676 = vmatmul.mubr.bf16.gmra.mrb[184].mxu0 %v13618_v28  ;;  %5869 = vmatmul.mubr.bf16.gmra.mrb[184].mxu1 %v13618_v28 }
 0x40c   :  { %5685 = vmatprep.mubr.bf16.mxu0 %v13619_v21  ;;  %5878 = vmatprep.mubr.bf16.mxu1 %v13619_v21 }
 0x413   :  { %5686 = vmatmul.mubr.bf16.gmra.mrb[188].mxu0 %v13620_v42  ;;  %5879 = vmatmul.mubr.bf16.gmra.mrb[188].mxu1 %v13620_v42 }
 0x46e   :  { %v5537_v32 = vpop.f32.mrb[128].mxu0  ;;  %v5730_v39 = vpop.f32.mrb[128].mxu1 }
 0x46f   :  { %v6039_v47 = vadd.f32 %v12712_v41, %v5537_v32  ;;  %v6041_v22 = vadd.f32 %v12716_v12, %v5730_v39  ;;  %v5539_v5 = vpop.f32.mrb[129].mxu0  ;;  %v5732_v16 = vpop.f32.mrb[129].mxu1  ;;  %v12753_v32 = vsub.s32 %v6433_v17, %v13465_v1 }
 0x470   :  { %v6040_v13 = vadd.f32 %v12720_v58, %v5539_v5  ;;  %v6042_v25 = vadd.f32 %v12724_v29, %v5732_v16  ;;  %v5541_v23 = vpop.f32.mrb[130].mxu0  ;;  %v5734_v43 = vpop.f32.mrb[130].mxu1 }
 0x471   :  { %v6167_v26 = vmax.f32 %v6039_v47, 0.0  ;;  %v6169_v30 = vmax.f32 %v6041_v22, 0.0  ;;  %v6043_v2 = vadd.f32 %v12712_v41, %v5541_v23  ;;  %v6045_v7 = vadd.f32 %v12716_v12, %v5734_v43  ;;  %v5543_v19 = vpop.f32.mrb[131].mxu0  ;;  %v5736_v33 = vpop.f32.mrb[131].mxu1 }
 0x472   :  { %v6168_v57 = vmax.f32 %v6040_v13, 0.0  ;;  %v6170_v52 = vmax.f32 %v6042_v25, 0.0  ;;  %v6044_v37 = vadd.f32 %v12720_v58, %v5543_v19  ;;  %v6046_v0 = vadd.f32 %v12724_v29, %v5736_v33 }
 0x473   :  { %v6171_v15 = vmax.f32 %v6043_v2, 0.0  ;;  %v6173_v46 = vmax.f32 %v6045_v7, 0.0 }
 0x474   :  { %v6295_v56 = vmax.f32 %v6167_v26, %v6168_v57  ;;  %v6327_v28 = vmax.f32 %v6169_v30, %v6170_v52  ;;  %v6172_v21 = vmax.f32 %v6044_v37, 0.0  ;;  %v6174_v61 = vmax.f32 %v6046_v0, 0.0 }
 0x476   :  { %v12740_v42 = vmax.f32 %v6295_v56, %v6327_v28  ;;  %v6296_v27 = vmax.f32 %v6171_v15, %v6172_v21  ;;  %v6328_v4 = vmax.f32 %v6173_v46, %v6174_v61  ;;  %v5547_v55 = vpop.f32.mrb[132].mxu0  ;;  %v5740_v36 = vpop.f32.mrb[132].mxu1 }
 0x477   :  { %v6047_v44 = vadd.f32 %v12712_v41, %v5547_v55  ;;  %v6049_v34 = vadd.f32 %v12716_v12, %v5740_v36  ;;  %v5549_v49 = vpop.f32.mrb[133].mxu0  ;;  %v5742_v24 = vpop.f32.mrb[133].mxu1 }
 0x478   :  { %v6360_v38 = vmax.f32 %v6296_v27, %v6328_v4  ;;  %v6048_v45 = vadd.f32 %v12720_v58, %v5549_v49  ;;  %v6050_v54 = vadd.f32 %v12724_v29, %v5742_v24  ;;  %v5551_v60 = vpop.f32.mrb[134].mxu0  ;;  %v5744_v35 = vpop.f32.mrb[134].mxu1 }
 0x479   :  { %v6175_v48 = vmax.f32 %v6047_v44, 0.0  ;;  %v6177_v59 = vmax.f32 %v6049_v34, 0.0  ;;  %v6051_v63 = vadd.f32 %v12712_v41, %v5551_v60  ;;  %v6053_v9 = vadd.f32 %v12716_v12, %v5744_v35  ;;  %v5553_v8 = vpop.f32.mrb[135].mxu0  ;;  %v5746_v10 = vpop.f32.mrb[135].mxu1 }
 0x47a   :  { %v6423_v20 = vcombine.low %v12740_v42, %v6360_v38  ;;  %v6424_v62 = vcombine.high %v12740_v42, %v6360_v38  ;;  %v6176_v6 = vmax.f32 %v6048_v45, 0.0  ;;  %v6178_v51 = vmax.f32 %v6050_v54, 0.0 }
 0x47b   :  { %v6179_v3 = vmax.f32 %v6051_v63, 0.0  ;;  %v6181_v18 = vmax.f32 %v6053_v9, 0.0  ;;  %v6052_v11 = vadd.f32 %v12720_v58, %v5553_v8  ;;  %v6054_v14 = vadd.f32 %v12724_v29, %v5746_v10 }
 0x47c   :  { %v6297_v39 = vmax.f32 %v6175_v48, %v6176_v6  ;;  %v6329_v53 = vmax.f32 %v6177_v59, %v6178_v51  ;;  %v12758_v2 = vrot.slane %v6423_v20, %v12753_v32  ;;  %v12767_v34 = vrot.slane %v6424_v62, %v12753_v32 }
 0x47d   :  { %v6180_v50 = vmax.f32 %v6052_v11, 0.0  ;;  %v6182_v47 = vmax.f32 %v6054_v14, 0.0 }
 0x47e   :  { %v6361_v22 = vmax.f32 %v6297_v39, %v6329_v53  ;;  %v5557_v5 = vpop.f32.mrb[136].mxu0  ;;  %v5750_v16 = vpop.f32.mrb[136].mxu1 }
 0x47f   :  { %v6298_v13 = vmax.f32 %v6179_v3, %v6180_v50  ;;  %v6330_v25 = vmax.f32 %v6181_v18, %v6182_v47  ;;  %v6055_v23 = vadd.f32 %v12712_v41, %v5557_v5  ;;  %v6057_v43 = vadd.f32 %v12716_v12, %v5750_v16  ;;  %v5559_v26 = vpop.f32.mrb[137].mxu0  ;;  %v5752_v30 = vpop.f32.mrb[137].mxu1 }
 0x480   :  { %v6056_v1 = vadd.f32 %v12720_v58, %v5559_v26  ;;  %v6058_v7 = vadd.f32 %v12724_v29, %v5752_v30  ;;  %v5561_v19 = vpop.f32.mrb[138].mxu0  ;;  %v5754_v33 = vpop.f32.mrb[138].mxu1 }
 0x481   :  { %v6362_v57 = vmax.f32 %v6298_v13, %v6330_v25  ;;  %v6183_v52 = vmax.f32 %v6055_v23, 0.0  ;;  %v6185_v37 = vmax.f32 %v6057_v43, 0.0  ;;  %v6059_v0 = vadd.f32 %v12712_v41, %v5561_v19  ;;  %v5563_v15 = vpop.f32.mrb[139].mxu0  ;;  %v5756_v46 = vpop.f32.mrb[139].mxu1 }
 0x482   :  { %v6184_v40 = vmax.f32 %v6056_v1, 0.0  ;;  %v6186_v31 = vmax.f32 %v6058_v7, 0.0  ;;  %v6061_v56 = vadd.f32 %v12716_v12, %v5754_v33  ;;  %v6060_v28 = vadd.f32 %v12720_v58, %v5563_v15 }
 0x483   :  { %v6425_v21 = vcombine.low %v6361_v22, %v6362_v57  ;;  %v6426_v61 = vcombine.high %v6361_v22, %v6362_v57  ;;  %v6187_v42 = vmax.f32 %v6059_v0, 0.0  ;;  %v6062_v27 = vadd.f32 %v12724_v29, %v5756_v46 }
 0x484   :  { %v6299_v4 = vmax.f32 %v6183_v52, %v6184_v40  ;;  %v6331_v55 = vmax.f32 %v6185_v37, %v6186_v31  ;;  %v6189_v36 = vmax.f32 %v6061_v56, 0.0  ;;  %v6188_v44 = vmax.f32 %v6060_v28, 0.0 }
 0x485   :  { %v12770_v49 = vrot.slane %v6425_v21, %v12753_v32  ;;  %v12773_v24 = vrot.slane %v6426_v61, %v12753_v32  ;;  %v6190_v38 = vmax.f32 %v6062_v27, 0.0 }
 0x486   :  { %v12775_v17 = vmax.f32 %v6299_v4, %v6331_v55  ;;  %v6300_v45 = vmax.f32 %v6187_v42, %v6188_v44  ;;  %v5567_v54 = vpop.f32.mrb[140].mxu0  ;;  %v5760_v60 = vpop.f32.mrb[140].mxu1 }
 0x487   :  { %v6487_v35 = vcombine.low %v12758_v2, %v12770_v49  ;;  %v6489_v48 = vcombine.low %v12767_v34, %v12773_v24  ;;  %v6332_v59 = vmax.f32 %v6189_v36, %v6190_v38  ;;  %v6063_v63 = vadd.f32 %v12712_v41, %v5567_v54  ;;  %v5569_v9 = vpop.f32.mrb[141].mxu0  ;;  %v5762_v8 = vpop.f32.mrb[141].mxu1 }
 0x488   :  { %v6065_v10 = vadd.f32 %v12716_v12, %v5760_v60  ;;  %v6064_v20 = vadd.f32 %v12720_v58, %v5569_v9  ;;  %v6066_v62 = vadd.f32 %v12724_v29, %v5762_v8  ;;  %v5571_v6 = vpop.f32.mrb[142].mxu0  ;;  %v5764_v51 = vpop.f32.mrb[142].mxu1  ;;  %v6488_v3 = vcombine.high %v12758_v2, %v12770_v49 }
 0x489   :  { %v6364_v18 = vmax.f32 %v6300_v45, %v6332_v59  ;;  %v6191_v11 = vmax.f32 %v6063_v63, 0.0  ;;  %v5573_v14 = vpop.f32.mrb[143].mxu0  ;;  %v5766_v39 = vpop.f32.mrb[143].mxu1  ;;  %v6067_v22 = vadd.f32 %v12712_v41, %v5571_v6  ;;  %v6069_v13 = vadd.f32 %v12716_v12, %v5764_v51 }
 0x48a   :  { %v6193_v53 = vmax.f32 %v6065_v10, 0.0  ;;  %v6192_v50 = vmax.f32 %v6064_v20, 0.0  ;;  %v6194_v47 = vmax.f32 %v6066_v62, 0.0  ;;  %v6068_v25 = vadd.f32 %v12720_v58, %v5573_v14 }
 0x48b   :  { %v6427_v5 = vcombine.low %v12775_v17, %v6364_v18  ;;  %v6428_v16 = vcombine.high %v12775_v17, %v6364_v18  ;;  %v6195_v26 = vmax.f32 %v6067_v22, 0.0  ;;  %v6070_v30 = vadd.f32 %v12724_v29, %v5766_v39 }
 0x48c   :  { %v6301_v23 = vmax.f32 %v6191_v11, %v6192_v50  ;;  %v6333_v43 = vmax.f32 %v6193_v53, %v6194_v47  ;;  %v6197_v2 = vmax.f32 %v6069_v13, 0.0  ;;  %v6196_v1 = vmax.f32 %v6068_v25, 0.0 }
 0x48d   :  { %v6198_v19 = vmax.f32 %v6070_v30, 0.0  ;;  %v6490_v52 = vcombine.high %v12767_v34, %v12773_v24  ;;  %v12798_v31 = vrot.slane %v6487_v35, %v12753_v32  ;;  %v12806_v60 = vrot.slane %v6489_v48, %v12753_v32 }
 0x48e   :  { %v6365_v7 = vmax.f32 %v6301_v23, %v6333_v43  ;;  %v5577_v33 = vpop.f32.mrb[144].mxu0  ;;  %v5770_v57 = vpop.f32.mrb[144].mxu1  ;;  %v6302_v37 = vmax.f32 %v6195_v26, %v6196_v1  ;;  %v6465_v62 = vrot.slane %v6427_v5, %v12753_v32  ;;  %v12811_v6 = vrot.slane %v6428_v16, %v12753_v32 }
 0x48f   :  { %v6071_v0 = vadd.f32 %v12712_v41, %v5577_v33  ;;  %v6073_v15 = vadd.f32 %v12716_v12, %v5770_v57  ;;  %v5579_v46 = vpop.f32.mrb[145].mxu0  ;;  %v5772_v40 = vpop.f32.mrb[145].mxu1  ;;  %v6334_v56 = vmax.f32 %v6197_v2, %v6198_v19  ;;  %v12818_v50 = vrot.slane %v6488_v3, %v12753_v32 }
 0x490   :  { %v6072_v28 = vadd.f32 %v12720_v58, %v5579_v46  ;;  %v6074_v21 = vadd.f32 %v12724_v29, %v5772_v40  ;;  %v5581_v61 = vpop.f32.mrb[146].mxu0  ;;  %v5774_v42 = vpop.f32.mrb[146].mxu1 }
 0x491   :  { %v6199_v27 = vmax.f32 %v6071_v0, 0.0  ;;  %v6201_v4 = vmax.f32 %v6073_v15, 0.0  ;;  %v6075_v55 = vadd.f32 %v12712_v41, %v5581_v61  ;;  %v6077_v36 = vadd.f32 %v12716_v12, %v5774_v42  ;;  %v5583_v44 = vpop.f32.mrb[147].mxu0  ;;  %v5776_v49 = vpop.f32.mrb[147].mxu1 }
 0x492   :  { %v6366_v38 = vmax.f32 %v6302_v37, %v6334_v56  ;;  %v6200_v17 = vmax.f32 %v6072_v28, 0.0  ;;  %v6202_v45 = vmax.f32 %v6074_v21, 0.0  ;;  %v6076_v54 = vadd.f32 %v12720_v58, %v5583_v44 }
 0x493   :  { %v6203_v35 = vmax.f32 %v6075_v55, 0.0  ;;  %v6205_v59 = vmax.f32 %v6077_v36, 0.0  ;;  %v6078_v63 = vadd.f32 %v12724_v29, %v5776_v49 }
 0x494   :  { %v6429_v9 = vcombine.low %v6365_v7, %v6366_v38  ;;  %v6430_v8 = vcombine.high %v6365_v7, %v6366_v38  ;;  %v6303_v10 = vmax.f32 %v6199_v27, %v6200_v17  ;;  %v6335_v20 = vmax.f32 %v6201_v4, %v6202_v45 }
 0x495   :  { %v6204_v51 = vmax.f32 %v6076_v54, 0.0  ;;  %v6206_v18 = vmax.f32 %v6078_v63, 0.0 }
 0x496   :  { %v6479_v11 = vrot.slane %v6429_v9, %v12753_v32  ;;  %v12815_v48 = vrot.slane %v6430_v8, %v12753_v32  ;;  %v6367_v14 = vmax.f32 %v6303_v10, %v6335_v20  ;;  %v5587_v39 = vpop.f32.mrb[148].mxu0  ;;  %v5780_v53 = vpop.f32.mrb[148].mxu1 }
 0x497   :  { %v6304_v47 = vmax.f32 %v6203_v35, %v6204_v51  ;;  %v6336_v22 = vmax.f32 %v6205_v59, %v6206_v18  ;;  %v6079_v5 = vadd.f32 %v12712_v41, %v5587_v39  ;;  %v6081_v16 = vadd.f32 %v12716_v12, %v5780_v53  ;;  %v5589_v13 = vpop.f32.mrb[149].mxu0  ;;  %v5782_v25 = vpop.f32.mrb[149].mxu1 }
 0x498   :  { %v6491_v23 = vcombine.low %v6465_v62, %v6479_v11  ;;  %v6493_v43 = vcombine.low %v12811_v6, %v12815_v48  ;;  %v6080_v26 = vadd.f32 %v12720_v58, %v5589_v13  ;;  %v6082_v30 = vadd.f32 %v12724_v29, %v5782_v25  ;;  %v5591_v2 = vpop.f32.mrb[150].mxu0  ;;  %v5784_v1 = vpop.f32.mrb[150].mxu1 }
 0x499   :  { %v6368_v3 = vmax.f32 %v6304_v47, %v6336_v22  ;;  %v6207_v7 = vmax.f32 %v6079_v5, 0.0  ;;  %v6209_v19 = vmax.f32 %v6081_v16, 0.0  ;;  %v6083_v33 = vadd.f32 %v12712_v41, %v5591_v2  ;;  %v5593_v57 = vpop.f32.mrb[151].mxu0  ;;  %v5786_v37 = vpop.f32.mrb[151].mxu1 }
 0x49a   :  { %v12828_v0 = vrot.slane %v6491_v23, %v12753_v32  ;;  %v12831_v15 = vrot.slane %v6493_v43, %v12753_v32  ;;  %v6208_v46 = vmax.f32 %v6080_v26, 0.0  ;;  %v6210_v40 = vmax.f32 %v6082_v30, 0.0 }
 0x49b   :  { %v6559_v56 = vcombine.low %v6367_v14, %v6368_v3  ;;  %v6560_v28 = vcombine.high %v6367_v14, %v6368_v3  ;;  %v6211_v21 = vmax.f32 %v6083_v33, 0.0  ;;  %v6085_v61 = vadd.f32 %v12716_v12, %v5784_v1 }
 0x49c   :  { %v6305_v42 = vmax.f32 %v6207_v7, %v6208_v46  ;;  %v6337_v27 = vmax.f32 %v6209_v19, %v6210_v40  ;;  %v6084_v4 = vadd.f32 %v12720_v58, %v5593_v57  ;;  %v6086_v55 = vadd.f32 %v12724_v29, %v5786_v37 }
 0x49d   :  { %v12837_v36 = vrot.slane %v6559_v56, %v12753_v32  ;;  %v12840_v44 = vrot.slane %v6560_v28, %v12753_v32  ;;  %v6213_v49 = vmax.f32 %v6085_v61, 0.0  ;;  %v6492_v38 = vcombine.high %v6465_v62, %v6479_v11 }
 0x49e   :  { %v6369_v17 = vmax.f32 %v6305_v42, %v6337_v27  ;;  %v6212_v45 = vmax.f32 %v6084_v4, 0.0  ;;  %v6214_v54 = vmax.f32 %v6086_v55, 0.0  ;;  %v5597_v35 = vpop.f32.mrb[152].mxu0  ;;  %v5790_v59 = vpop.f32.mrb[152].mxu1  ;;  %v6551_v63 = vcombine.low %v12798_v31, %v12828_v0 }
 0x49f   :  { %v6087_v9 = vadd.f32 %v12712_v41, %v5597_v35  ;;  %v6089_v8 = vadd.f32 %v12716_v12, %v5790_v59  ;;  %v5599_v10 = vpop.f32.mrb[153].mxu0  ;;  %v5792_v20 = vpop.f32.mrb[153].mxu1  ;;  %v12847_v51 = vrot.slane %v6492_v38, %v12753_v32  ;;  %v6552_v62 = vcombine.high %v12798_v31, %v12828_v0  ;;  %v9549_v31 = vld [vmem:[%s13346_s5 + $0x148] sm:$0xff]  }
 0x4a0   :  { %v6306_v18 = vmax.f32 %v6211_v21, %v6212_v45  ;;  %v6338_v11 = vmax.f32 %v6213_v49, %v6214_v54  ;;  %v6088_v14 = vadd.f32 %v12720_v58, %v5599_v10  ;;  %v6090_v39 = vadd.f32 %v12724_v29, %v5792_v20  ;;  %v5601_v53 = vpop.f32.mrb[154].mxu0  ;;  %v5794_v47 = vpop.f32.mrb[154].mxu1  ;;  %v9550_v0 = vld [vmem:[%s13346_s5 + $0x1c8] sm:$0xff]  }
 0x4a1   :  { %v6215_v22 = vmax.f32 %v6087_v9, 0.0  ;;  %v6217_v5 = vmax.f32 %v6089_v8, 0.0  ;;  %v6091_v16 = vadd.f32 %v12712_v41, %v5601_v53  ;;  %v6093_v13 = vadd.f32 %v12716_v12, %v5794_v47  ;;  %v5603_v25 = vpop.f32.mrb[155].mxu0  ;;  %v5796_v23 = vpop.f32.mrb[155].mxu1 }
 0x4a2   :  { %v6370_v43 = vmax.f32 %v6306_v18, %v6338_v11  ;;  %v6216_v26 = vmax.f32 %v6088_v14, 0.0  ;;  %v6218_v30 = vmax.f32 %v6090_v39, 0.0  ;;  %v6092_v2 = vadd.f32 %v12720_v58, %v5603_v25 }
 0x4a3   :  { %v6219_v1 = vmax.f32 %v6091_v16, 0.0  ;;  %v6221_v3 = vmax.f32 %v6093_v13, 0.0  ;;  %v6094_v7 = vadd.f32 %v12724_v29, %v5796_v23  ;;  %v6555_v19 = vcombine.low %v12818_v50, %v12847_v51 }
 0x4a4   :  { %v6561_v33 = vcombine.low %v6369_v17, %v6370_v43  ;;  %v6562_v57 = vcombine.high %v6369_v17, %v6370_v43  ;;  %v6307_v37 = vmax.f32 %v6215_v22, %v6216_v26  ;;  %v6339_v46 = vmax.f32 %v6217_v5, %v6218_v30 }
 0x4a5   :  { %v6220_v40 = vmax.f32 %v6092_v2, 0.0  ;;  %v6222_v56 = vmax.f32 %v6094_v7, 0.0  ;;  %v6556_v28 = vcombine.high %v12818_v50, %v12847_v51  ;;  %v6494_v21 = vcombine.high %v12811_v6, %v12815_v48 }
 0x4a6   :  { %v12864_v61 = vrot.slane %v6561_v33, %v12753_v32  ;;  %v12867_v42 = vrot.slane %v6562_v57, %v12753_v32  ;;  %v12869_v27 = vmax.f32 %v6307_v37, %v6339_v46  ;;  %v5607_v4 = vpop.f32.mrb[156].mxu0  ;;  %v5800_v55 = vpop.f32.mrb[156].mxu1  ;;  %v6553_v49 = vcombine.low %v12806_v60, %v12831_v15 }
 0x4a7   :  { %v6308_v38 = vmax.f32 %v6219_v1, %v6220_v40  ;;  %v6340_v17 = vmax.f32 %v6221_v3, %v6222_v56  ;;  %v6095_v45 = vadd.f32 %v12712_v41, %v5607_v4  ;;  %v6097_v54 = vadd.f32 %v12716_v12, %v5800_v55  ;;  %v5609_v6 = vpop.f32.mrb[157].mxu0  ;;  %v5802_v48 = vpop.f32.mrb[157].mxu1 }
 0x4a8   :  { %v6623_v35 = vcombine.low %v12837_v36, %v12864_v61  ;;  %v6625_v59 = vcombine.low %v12840_v44, %v12867_v42  ;;  %v6096_v9 = vadd.f32 %v12720_v58, %v5609_v6  ;;  %v6098_v8 = vadd.f32 %v12724_v29, %v5802_v48  ;;  %v5611_v10 = vpop.f32.mrb[158].mxu0  ;;  %v5804_v20 = vpop.f32.mrb[158].mxu1 }
 0x4a9   :  { %v6372_v18 = vmax.f32 %v6308_v38, %v6340_v17  ;;  %v6223_v11 = vmax.f32 %v6095_v45, 0.0  ;;  %v6225_v14 = vmax.f32 %v6097_v54, 0.0  ;;  %v6099_v39 = vadd.f32 %v12712_v41, %v5611_v10  ;;  %v5613_v53 = vpop.f32.mrb[159].mxu0  ;;  %v5806_v47 = vpop.f32.mrb[159].mxu1 }
 0x4aa   :  { %v6224_v22 = vmax.f32 %v6096_v9, 0.0  ;;  %v6226_v5 = vmax.f32 %v6098_v8, 0.0  ;;  %v6101_v23 = vadd.f32 %v12716_v12, %v5804_v20  ;;  %v6100_v30 = vadd.f32 %v12720_v58, %v5613_v53 }
 0x4ab   :  { %v6563_v16 = vcombine.low %v12869_v27, %v6372_v18  ;;  %v6564_v13 = vcombine.high %v12869_v27, %v6372_v18  ;;  %v6227_v25 = vmax.f32 %v6099_v39, 0.0  ;;  %v6102_v2 = vadd.f32 %v12724_v29, %v5806_v47 }
 0x4ac   :  { %v6309_v43 = vmax.f32 %v6223_v11, %v6224_v22  ;;  %v6341_v26 = vmax.f32 %v6225_v14, %v6226_v5  ;;  %v12888_v1 = vrot.slane %v6623_v35, %v12753_v32  ;;  %v6229_v3 = vmax.f32 %v6101_v23, 0.0 }
 0x4ad   :  { %v6624_v7 = vcombine.high %v12837_v36, %v12864_v61  ;;  %v12896_v33 = vrot.slane %v6490_v52, %v12753_v32  ;;  %v12899_v57 = vrot.slane %v6563_v16, %v12753_v32  ;;  %v6228_v46 = vmax.f32 %v6100_v30, 0.0 }
 0x4ae   :  { %v6373_v37 = vmax.f32 %v6309_v43, %v6341_v26  ;;  %v6230_v40 = vmax.f32 %v6102_v2, 0.0  ;;  %v5617_v56 = vpop.f32.mrb[160].mxu0  ;;  %v5810_v27 = vpop.f32.mrb[160].mxu1  ;;  %v12904_v45 = vrot.slane %v6494_v21, %v12753_v32  ;;  %v6626_v34 = vcombine.high %v12840_v44, %v12867_v42 }
 0x4af   :  { %v6103_v4 = vadd.f32 %v12712_v41, %v5617_v56  ;;  %v6105_v55 = vadd.f32 %v12716_v12, %v5810_v27  ;;  %v5619_v38 = vpop.f32.mrb[161].mxu0  ;;  %v5812_v17 = vpop.f32.mrb[161].mxu1  ;;  %v6310_v24 = vmax.f32 %v6227_v25, %v6228_v46  ;;  %v12917_v30 = vrot.slane %v6564_v13, %v12753_v32 }
 0x4b0   :  { %v6342_v52 = vmax.f32 %v6229_v3, %v6230_v40  ;;  %v6104_v54 = vadd.f32 %v12720_v58, %v5619_v38  ;;  %v6106_v6 = vadd.f32 %v12724_v29, %v5812_v17  ;;  %v5621_v48 = vpop.f32.mrb[162].mxu0  ;;  %v5814_v35 = vpop.f32.mrb[162].mxu1  ;;  %v6557_v16 = vcombine.low %v12896_v33, %v12904_v45 }
 0x4b1   :  { %v6231_v9 = vmax.f32 %v6103_v4, 0.0  ;;  %v6233_v8 = vmax.f32 %v6105_v55, 0.0  ;;  %v6107_v10 = vadd.f32 %v12712_v41, %v5621_v48  ;;  %v6109_v20 = vadd.f32 %v12716_v12, %v5814_v35  ;;  %v5623_v18 = vpop.f32.mrb[163].mxu0  ;;  %v5816_v21 = vpop.f32.mrb[163].mxu1 }
 0x4b2   :  { %v6374_v11 = vmax.f32 %v6310_v24, %v6342_v52  ;;  %v6232_v14 = vmax.f32 %v6104_v54, 0.0  ;;  %v6234_v39 = vmax.f32 %v6106_v6, 0.0  ;;  %v6108_v53 = vadd.f32 %v12720_v58, %v5623_v18 }
 0x4b3   :  { %v6235_v47 = vmax.f32 %v6107_v10, 0.0  ;;  %v6237_v22 = vmax.f32 %v6109_v20, 0.0  ;;  %v6110_v5 = vadd.f32 %v12724_v29, %v5816_v21  ;;  %v6558_v46 = vcombine.high %v12896_v33, %v12904_v45 }
 0x4b4   :  { %v6565_v25 = vcombine.low %v6373_v37, %v6374_v11  ;;  %v6566_v23 = vcombine.high %v6373_v37, %v6374_v11  ;;  %v6311_v43 = vmax.f32 %v6231_v9, %v6232_v14  ;;  %v6343_v26 = vmax.f32 %v6233_v8, %v6234_v39 }
 0x4b5   :  { %v6236_v2 = vmax.f32 %v6108_v53, 0.0  ;;  %v6238_v3 = vmax.f32 %v6110_v5, 0.0  ;;  %v6554_v37 = vcombine.high %v12806_v60, %v12831_v15  ;;  %v12943_v53 = vrot.slane %v6625_v59, %v12753_v32 }
 0x4b6   :  { %v6615_v40 = vrot.slane %v6565_v25, %v12753_v32  ;;  %v12923_v56 = vrot.slane %v6566_v23, %v12753_v32  ;;  %v12925_v27 = vmax.f32 %v6311_v43, %v6343_v26  ;;  %v5627_v4 = vpop.f32.mrb[164].mxu0  ;;  %v5820_v55 = vpop.f32.mrb[164].mxu1 }
 0x4b7   :  { %v6312_v38 = vmax.f32 %v6235_v47, %v6236_v2  ;;  %v6344_v13 = vmax.f32 %v6237_v22, %v6238_v3  ;;  %v6111_v17 = vadd.f32 %v12712_v41, %v5627_v4  ;;  %v6113_v24 = vadd.f32 %v12716_v12, %v5820_v55  ;;  %v5629_v52 = vpop.f32.mrb[165].mxu0  ;;  %v5822_v54 = vpop.f32.mrb[165].mxu1 }
 0x4b8   :  { %v6627_v6 = vcombine.low %v12899_v57, %v6615_v40  ;;  %v6629_v48 = vcombine.low %v12917_v30, %v12923_v56  ;;  %v6112_v35 = vadd.f32 %v12720_v58, %v5629_v52  ;;  %v6114_v9 = vadd.f32 %v12724_v29, %v5822_v54  ;;  %v5631_v8 = vpop.f32.mrb[166].mxu0  ;;  %v5824_v10 = vpop.f32.mrb[166].mxu1 }
 0x4b9   :  { %v12936_v20 = vmax.f32 %v6312_v38, %v6344_v13  ;;  %v6239_v18 = vmax.f32 %v6111_v17, 0.0  ;;  %v6241_v21 = vmax.f32 %v6113_v24, 0.0  ;;  %v6115_v11 = vadd.f32 %v12712_v41, %v5631_v8  ;;  %v5633_v14 = vpop.f32.mrb[167].mxu0  ;;  %v5826_v39 = vpop.f32.mrb[167].mxu1 }
 0x4ba   :  { %v6665_v47 = vrot.slane %v6627_v6, %v12753_v32  ;;  %v6240_v22 = vmax.f32 %v6112_v35, 0.0  ;;  %v6242_v5 = vmax.f32 %v6114_v9, 0.0  ;;  %v6117_v26 = vadd.f32 %v12716_v12, %v5824_v10 }
 0x4bb   :  { %v6695_v25 = vcombine.low %v12925_v27, %v12936_v20  ;;  %v6696_v23 = vcombine.high %v12925_v27, %v12936_v20  ;;  %v6243_v43 = vmax.f32 %v6115_v11, 0.0  ;;  %v6116_v4 = vadd.f32 %v12720_v58, %v5633_v14 }
 0x4bc   :  { %v6313_v2 = vmax.f32 %v6239_v18, %v6240_v22  ;;  %v6345_v3 = vmax.f32 %v6241_v21, %v6242_v5  ;;  %v6118_v59 = vadd.f32 %v12724_v29, %v5826_v39  ;;  %v6245_v55 = vmax.f32 %v6117_v26, 0.0 }
 0x4bd   :  { %v6628_v38 = vcombine.high %v12899_v57, %v6615_v40  ;;  %v6651_v13 = vrot.slane %v6624_v7, %v12753_v32  ;;  %v12962_v17 = vrot.slane %v6626_v34, %v12753_v32  ;;  %v6244_v52 = vmax.f32 %v6116_v4, 0.0 }
 0x4be   :  { %v12964_v24 = vmax.f32 %v6313_v2, %v6345_v3  ;;  %v6246_v54 = vmax.f32 %v6118_v59, 0.0  ;;  %v5637_v6 = vpop.f32.mrb[168].mxu0  ;;  %v5830_v35 = vpop.f32.mrb[168].mxu1  ;;  %v6687_v9 = vcombine.low %v12888_v1, %v6665_v47  ;;  %v6688_v44 = vcombine.high %v12888_v1, %v6665_v47 }
 0x4bf   :  { %v6119_v57 = vadd.f32 %v12712_v41, %v5637_v6  ;;  %v6121_v40 = vadd.f32 %v12716_v12, %v5830_v35  ;;  %v6679_v36 = vrot.slane %v6628_v38, %v12753_v32  ;;  %v5639_v61 = vpop.f32.mrb[169].mxu0  ;;  %v5832_v7 = vpop.f32.mrb[169].mxu1  ;;  %v6314_v42 = vmax.f32 %v6243_v43, %v6244_v52  ;;  %v9547_v38 = vld [vmem:[%s13346_s5 + $0x100] sm:$0xff]  }
 0x4c0   :  { %v6346_v34 = vmax.f32 %v6245_v55, %v6246_v54  ;;  %v6120_v8 = vadd.f32 %v12720_v58, %v5639_v61  ;;  %v6122_v10 = vadd.f32 %v12724_v29, %v5832_v7  ;;  %v5641_v18 = vpop.f32.mrb[170].mxu0  ;;  %v5834_v21 = vpop.f32.mrb[170].mxu1  ;;  %v6999_v1 = vpack.c.bf16 %v6687_v9, %v6551_v63  ;;  %v9548_v63 = vld [vmem:[%s13346_s5 + $0x180] sm:$0xff]  }
 0x4c1   :  { %v6247_v11 = vmax.f32 %v6119_v57, 0.0  ;;  %v6249_v14 = vmax.f32 %v6121_v40, 0.0  ;;  %v6691_v39 = vcombine.low %v6651_v13, %v6679_v36  ;;  %v6692_v22 = vcombine.high %v6651_v13, %v6679_v36  ;;  %v5643_v5 = vpop.f32.mrb[171].mxu0  ;;  %v5836_v26 = vpop.f32.mrb[171].mxu1  ;;  %v9551_v36 = vld [vmem:[%s13346_s5 + $0x108] sm:$0xff]  }
 0x4c2   :  { %v12973_v2 = vmax.f32 %v6314_v42, %v6346_v34  ;;  %v6248_v3 = vmax.f32 %v6120_v8, 0.0  ;;  %v6250_v4 = vmax.f32 %v6122_v10, 0.0  ;;  %v7001_v59 = vpack.c.bf16 %v6688_v44, %v6552_v62  ;;  %v9552_v8 = vld [vmem:[%s13346_s5 + $0x188] sm:$0xff]  }
 0x4c3   :  { %v7000_v47 = vpack.c.bf16 %v6691_v39, %v6555_v19  ;;  %v7002_v43 = vpack.c.bf16 %v6692_v22, %v6556_v28  ;;  %v6123_v55 = vadd.f32 %v12712_v41, %v5641_v18  ;;  %v6125_v13 = vadd.f32 %v12716_v12, %v5834_v21  ;;  %v9553_v39 = vld [vmem:[%s13346_s5 + $0x150] sm:$0xff]  }
 0x4c4   :  { %v6697_v19 = vcombine.low %v12964_v24, %v12973_v2  ;;  %v6698_v50 = vcombine.high %v12964_v24, %v12973_v2  ;;  %v6315_v51 = vmax.f32 %v6247_v11, %v6248_v3  ;;  %v6347_v28 = vmax.f32 %v6249_v14, %v6250_v4  ;;  %v9554_v22 = vld [vmem:[%s13346_s5 + $0x1d0] sm:$0xff]  }
 0x4c5   :  { %7566 = vmatprep.mubr.bf16.mxu0 %v7000_v47  ;;  %7615 = vmatprep.mubr.bf16.mxu1 %v7002_v43  ;;  %v6251_v62 = vmax.f32 %v6123_v55, 0.0  ;;  %v6124_v52 = vadd.f32 %v12720_v58, %v5643_v5  ;;  %v6126_v54 = vadd.f32 %v12724_v29, %v5836_v26  ;;  %v13008_v6 = vrot.slane %v6695_v25, %v12753_v32 }
 0x4c6   :  { %v13011_v35 = vrot.slane %v6697_v19, %v12753_v32  ;;  %v13013_v9 = vmax.f32 %v6315_v51, %v6347_v28  ;;  %7567 = vmatmul.mubr.bf16.vlgmr.msra.gmra.mrb[192].mxu0 %v6999_v1  ;;  %7616 = vmatmul.mubr.bf16.vlgmr.msra.gmra.mrb[192].mxu1 %v7001_v59  ;;  %v5647_v57 = vpop.f32.mrb[172].mxu0  ;;  %v5840_v40 = vpop.f32.mrb[172].mxu1  ;;  %v6253_v61 = vmax.f32 %v6125_v13, 0.0 }
 0x4c7   :  { %v6252_v7 = vmax.f32 %v6124_v52, 0.0  ;;  %v6254_v44 = vmax.f32 %v6126_v54, 0.0  ;;  %v6127_v42 = vadd.f32 %v12712_v41, %v5647_v57  ;;  %v5649_v25 = vpop.f32.mrb[173].mxu0  ;;  %v5842_v34 = vpop.f32.mrb[173].mxu1  ;;  %8637 = vmatpush3.bf16.msra.mxu0 %v9547_v38  ;;  %8665 = vmatpush3.bf16.msra.mxu1 %v9548_v63  ;;  %v6129_v10 = vadd.f32 %v12716_v12, %v5840_v40  ;;  %v9556_v52 = vld [vmem:[%s13346_s5 + $0x190] sm:$0xff]  }
 0x4c8   :  { %v6128_v18 = vadd.f32 %v12720_v58, %v5649_v25  ;;  %v6130_v21 = vadd.f32 %v12724_v29, %v5842_v34  ;;  %v5651_v11 = vpop.f32.mrb[174].mxu0  ;;  %v5844_v14 = vpop.f32.mrb[174].mxu1  ;;  %8638 = vmatprep.subr.bf16.mxu0 %v9549_v31  ;;  %8666 = vmatprep.subr.bf16.mxu1 %v9550_v0  ;;  %v9555_v31 = vld [vmem:[%s13346_s5 + $0x110] sm:$0xff]   ;;  %v6760_v54 = vcombine.high %v13008_v6, %v13011_v35 }
 0x4c9   :  { %v6316_v5 = vmax.f32 %v6251_v62, %v6252_v7  ;;  %v6348_v26 = vmax.f32 %v6253_v61, %v6254_v44  ;;  %v6255_v3 = vmax.f32 %v6127_v42, 0.0  ;;  %v6131_v4 = vadd.f32 %v12712_v41, %v5651_v11  ;;  %v5653_v1 = vpop.f32.mrb[175].mxu0  ;;  %v5846_v47 = vpop.f32.mrb[175].mxu1  ;;  %v9557_v7 = vld [vmem:[%s13346_s5 + $0x158] sm:$0xff]  }
 0x4ca   :  { %v6257_v43 = vmax.f32 %v6129_v10, 0.0  ;;  %v6256_v59 = vmax.f32 %v6128_v18, 0.0  ;;  %v6258_v55 = vmax.f32 %v6130_v21, 0.0  ;;  %v6133_v38 = vadd.f32 %v12716_v12, %v5844_v14  ;;  %v9558_v44 = vld [vmem:[%s13346_s5 + $0x1d8] sm:$0xff]  }
 0x4cb   :  { %v13033_v63 = vmax.f32 %v6316_v5, %v6348_v26  ;;  %v6259_v19 = vmax.f32 %v6131_v4, 0.0  ;;  %v6132_v51 = vadd.f32 %v12720_v58, %v5653_v1  ;;  %v6134_v28 = vadd.f32 %v12724_v29, %v5846_v47  ;;  %8639 = vmatpush3.bf16.msra.mxu0 %v9551_v36  ;;  %8667 = vmatpush3.bf16.msra.mxu1 %v9552_v8 }
 0x4cc   :  { %v6317_v0 = vmax.f32 %v6255_v3, %v6256_v59  ;;  %v6349_v62 = vmax.f32 %v6257_v43, %v6258_v55  ;;  %v6261_v13 = vmax.f32 %v6133_v38, 0.0  ;;  %8640 = vmatprep.subr.bf16.mxu0 %v9553_v39  ;;  %8668 = vmatprep.subr.bf16.mxu1 %v9554_v22  ;;  %v13059_v42 = vrot.slane %v6629_v48, %v12753_v32  ;;  %v9559_v22 = vld [vmem:[%s13346_s5 + $0x118] sm:$0xff]   ;;  %v9561_v55 = vld [vmem:[%s13346_s5 + $0x160] sm:$0xff]  }
 0x4cd   :  { %v6699_v57 = vcombine.low %v13013_v9, %v13033_v63  ;;  %v6700_v40 = vcombine.high %v13013_v9, %v13033_v63  ;;  %v6260_v36 = vmax.f32 %v6132_v51, 0.0  ;;  %v6262_v61 = vmax.f32 %v6134_v28, 0.0  ;;  %v9560_v3 = vld [vmem:[%s13346_s5 + $0x198] sm:$0xff]   ;;  %v9562_v38 = vld [vmem:[%s13346_s5 + $0x1e0] sm:$0xff]  }
 0x4ce   :  { %v6381_v25 = vmax.f32 %v6317_v0, %v6349_v62  ;;  %v5657_v34 = vpop.f32.mrb[176].mxu0  ;;  %v5850_v8 = vpop.f32.mrb[176].mxu1  ;;  %v6759_v10 = vcombine.low %v13008_v6, %v13011_v35  ;;  %v6630_v18 = vcombine.high %v12917_v30, %v12923_v56  ;;  %v13069_v21 = vrot.slane %v6698_v50, %v12753_v32 }
 0x4cf   :  { %v6318_v11 = vmax.f32 %v6259_v19, %v6260_v36  ;;  %v6350_v14 = vmax.f32 %v6261_v13, %v6262_v61  ;;  %v5659_v39 = vpop.f32.mrb[177].mxu0  ;;  %v5852_v48 = vpop.f32.mrb[177].mxu1  ;;  %8641 = vmatpush3.bf16.msra.mxu0 %v9555_v31  ;;  %v13075_v6 = vrot.slane %v6760_v54, %v12753_v32  ;;  %v6135_v35 = vadd.f32 %v12712_v41, %v5657_v34  ;;  %v9563_v54 = vld [vmem:[%s13346_s5 + $0x120] sm:$0xff]  }
 0x4d0   :  { %v6137_v5 = vadd.f32 %v12716_v12, %v5850_v8  ;;  %v6136_v24 = vadd.f32 %v12720_v58, %v5659_v39  ;;  %v6138_v2 = vadd.f32 %v12724_v29, %v5852_v48  ;;  %v5661_v50 = vpop.f32.mrb[178].mxu0  ;;  %v5854_v26 = vpop.f32.mrb[178].mxu1  ;;  %8669 = vmatpush3.bf16.msra.mxu1 %v9556_v52  ;;  %8642 = vmatprep.subr.bf16.mxu0 %v9557_v7  ;;  %v9564_v34 = vld [vmem:[%s13346_s5 + $0x1a0] sm:$0xff]   ;;  %v9566_v39 = vld [vmem:[%s13346_s5 + $0x1e8] sm:$0xff]  }
 0x4d1   :  { %v6382_v4 = vmax.f32 %v6318_v11, %v6350_v14  ;;  %v6139_v1 = vadd.f32 %v12712_v41, %v5661_v50  ;;  %v6141_v47 = vadd.f32 %v12716_v12, %v5854_v26  ;;  %v5663_v43 = vpop.f32.mrb[179].mxu0  ;;  %v5856_v59 = vpop.f32.mrb[179].mxu1  ;;  %8670 = vmatprep.subr.bf16.mxu1 %v9558_v44  ;;  %v6263_v19 = vmax.f32 %v6135_v35, 0.0  ;;  %v9565_v14 = vld [vmem:[%s13346_s5 + $0x168] sm:$0xff]  }
 0x4d2   :  { %v6265_v51 = vmax.f32 %v6137_v5, 0.0  ;;  %v6264_v28 = vmax.f32 %v6136_v24, 0.0  ;;  %v6266_v31 = vmax.f32 %v6138_v2, 0.0  ;;  %v6140_v7 = vadd.f32 %v12720_v58, %v5663_v43 }
 0x4d3   :  { %v6701_v0 = vcombine.low %v6381_v25, %v6382_v4  ;;  %v6702_v62 = vcombine.high %v6381_v25, %v6382_v4  ;;  %v6267_v13 = vmax.f32 %v6139_v1, 0.0  ;;  %v6269_v52 = vmax.f32 %v6141_v47, 0.0  ;;  %8643 = vmatpush3.bf16.msra.mxu0 %v9559_v22  ;;  %v9567_v4 = vld [vmem:[%s13346_s5 + $0x128] sm:$0xff]  }
 0x4d4   :  { %v6319_v36 = vmax.f32 %v6263_v19, %v6264_v28  ;;  %v6351_v61 = vmax.f32 %v6265_v51, %v6266_v31  ;;  %v6142_v44 = vadd.f32 %v12724_v29, %v5856_v59  ;;  %8671 = vmatpush3.bf16.msra.mxu1 %v9560_v3  ;;  %v13101_v25 = vrot.slane %v6699_v57, %v12753_v32  ;;  %v9568_v51 = vld [vmem:[%s13346_s5 + $0x1a8] sm:$0xff]  }
 0x4d5   :  { %v13104_v8 = vrot.slane %v6701_v0, %v12753_v32  ;;  %v13107_v11 = vrot.slane %v6702_v62, %v12753_v32  ;;  %8644 = vmatprep.subr.bf16.mxu0 %v9561_v55  ;;  %8672 = vmatprep.subr.bf16.mxu1 %v9562_v38  ;;  %v6268_v57 = vmax.f32 %v6140_v7, 0.0  ;;  %v13118_v24 = vrot.slane %v6759_v10, %v12753_v32 }
 0x4d6   :  { %v13115_v48 = vmax.f32 %v6319_v36, %v6351_v61  ;;  %v6270_v22 = vmax.f32 %v6142_v44, 0.0  ;;  %v5667_v35 = vpop.f32.mrb[180].mxu0  ;;  %v5860_v5 = vpop.f32.mrb[180].mxu1  ;;  %v9570_v36 = vld [vmem:[%s13346_s5 + $0x1f0] sm:$0xff]   ;;  %v6690_v20 = vcombine.high %v12943_v53, %v13059_v42 }
 0x4d7   :  { %v6143_v2 = vadd.f32 %v12712_v41, %v5667_v35  ;;  %v6145_v50 = vadd.f32 %v12716_v12, %v5860_v5  ;;  %v5669_v26 = vpop.f32.mrb[181].mxu0  ;;  %v5862_v3 = vpop.f32.mrb[181].mxu1  ;;  %8645 = vmatpush3.bf16.msra.mxu0 %v9563_v54  ;;  %v6764_v1 = vcombine.high %v13101_v25, %v13104_v8  ;;  %v6763_v47 = vcombine.low %v13101_v25, %v13104_v8 }
 0x4d8   :  { %v6320_v43 = vmax.f32 %v6267_v13, %v6268_v57  ;;  %v6352_v10 = vmax.f32 %v6269_v52, %v6270_v22  ;;  %v6144_v59 = vadd.f32 %v12720_v58, %v5669_v26  ;;  %v6146_v55 = vadd.f32 %v12724_v29, %v5862_v3  ;;  %v5671_v38 = vpop.f32.mrb[182].mxu0  ;;  %v5864_v19 = vpop.f32.mrb[182].mxu1  ;;  %8673 = vmatpush3.bf16.msra.mxu1 %v9564_v34  ;;  %v9569_v52 = vld [vmem:[%s13346_s5 + $0x170] sm:$0xff]  }
 0x4d9   :  { %v6271_v28 = vmax.f32 %v6143_v2, 0.0  ;;  %v6273_v31 = vmax.f32 %v6145_v50, 0.0  ;;  %v6147_v0 = vadd.f32 %v12712_v41, %v5671_v38  ;;  %v6149_v62 = vadd.f32 %v12716_v12, %v5864_v19  ;;  %v5673_v54 = vpop.f32.mrb[183].mxu0  ;;  %v5866_v13 = vpop.f32.mrb[183].mxu1  ;;  %8646 = vmatprep.subr.bf16.mxu0 %v9565_v14  ;;  %8674 = vmatprep.subr.bf16.mxu1 %v9566_v39  ;;  %v9571_v39 = vld [vmem:[%s13346_s5 + $0x130] sm:$0xff]  }
 0x4da   :  { %v13142_v61 = vmax.f32 %v6320_v43, %v6352_v10  ;;  %v6272_v7 = vmax.f32 %v6144_v59, 0.0  ;;  %v6274_v44 = vmax.f32 %v6146_v55, 0.0  ;;  %v6148_v34 = vadd.f32 %v12720_v58, %v5673_v54  ;;  %v9572_v50 = vld [vmem:[%s13346_s5 + $0x1b0] sm:$0xff]   ;;  %v9573_v43 = vld [vmem:[%s13346_s5 + $0x178] sm:$0xff]  }
 0x4db   :  { %v6275_v25 = vmax.f32 %v6147_v0, 0.0  ;;  %v6277_v8 = vmax.f32 %v6149_v62, 0.0  ;;  %v6150_v57 = vadd.f32 %v12724_v29, %v5866_v13  ;;  %8647 = vmatpush3.bf16.msra.mxu0 %v9567_v4  ;;  %v13147_v14 = vrot.slane %v6764_v1, %v12753_v32  ;;  %v9574_v10 = vld [vmem:[%s13346_s5 + $0x1f8] sm:$0xff]  }
 0x4dc   :  { %v6831_v22 = vcombine.low %v13115_v48, %v13142_v61  ;;  %v6832_v35 = vcombine.high %v13115_v48, %v13142_v61  ;;  %v6321_v5 = vmax.f32 %v6271_v28, %v6272_v7  ;;  %v6353_v2 = vmax.f32 %v6273_v31, %v6274_v44  ;;  %8675 = vmatpush3.bf16.msra.mxu1 %v9568_v51 }
 0x4dd   :  { %v6276_v26 = vmax.f32 %v6148_v34, 0.0  ;;  %v6278_v3 = vmax.f32 %v6150_v57, 0.0  ;;  %v6827_v4 = vcombine.low %v13075_v6, %v13147_v14  ;;  %v6828_v1 = vcombine.high %v13075_v6, %v13147_v14  ;;  %8648 = vmatprep.subr.bf16.mxu0 %v9569_v52  ;;  %8676 = vmatprep.subr.bf16.mxu1 %v9570_v36  ;;  %v9576_v34 = vld [vmem:[%s13346_s5 + $0x1b8] sm:$0xff]   ;;  %v9577_v6 = vld [vmem:[%s13348_s7] sm:$0xff]   ;;  %v9579_v14 = vld [vmem:[%s13348_s7 + $0x10] sm:$0xff]  }
 0x4de   :  { %v13170_v59 = vrot.slane %v6831_v22, %v12753_v32  ;;  %v6385_v55 = vmax.f32 %v6321_v5, %v6353_v2  ;;  %v5677_v38 = vpop.f32.mrb[184].mxu0  ;;  %v5870_v19 = vpop.f32.mrb[184].mxu1  ;;  %v13173_v51 = vrot.slane %v6763_v47, %v12753_v32  ;;  %v13179_v28 = vrot.slane %v6630_v18, %v12753_v32  ;;  %v9575_v47 = vld [vmem:[%s13346_s5 + $0x138] sm:$0xff]  }
 0x4df   :  { %v6322_v31 = vmax.f32 %v6275_v25, %v6276_v26  ;;  %v6354_v0 = vmax.f32 %v6277_v8, %v6278_v3  ;;  %v6151_v62 = vadd.f32 %v12712_v41, %v5677_v38  ;;  %v6153_v54 = vadd.f32 %v12716_v12, %v5870_v19  ;;  %v5679_v13 = vpop.f32.mrb[185].mxu0  ;;  %v5872_v52 = vpop.f32.mrb[185].mxu1  ;;  %8649 = vmatpush3.bf16.msra.mxu0 %v9571_v39 }
 0x4e0   :  { %v6152_v36 = vadd.f32 %v12720_v58, %v5679_v13  ;;  %v6154_v7 = vadd.f32 %v12724_v29, %v5872_v52  ;;  %v5681_v30 = vpop.f32.mrb[186].mxu0  ;;  %v5874_v56 = vpop.f32.mrb[186].mxu1  ;;  %v6823_v18 = vcombine.low %v13118_v24, %v13173_v51  ;;  %v6824_v44 = vcombine.high %v13118_v24, %v13173_v51  ;;  %8677 = vmatpush3.bf16.msra.mxu1 %v9572_v50  ;;  %v9578_v24 = vld [vmem:[%s13348_s7 + $0x8] sm:$0xff]  }
 0x4e1   :  { %v6386_v25 = vmax.f32 %v6322_v31, %v6354_v0  ;;  %v6279_v8 = vmax.f32 %v6151_v62, 0.0  ;;  %v6281_v57 = vmax.f32 %v6153_v54, 0.0  ;;  %v6155_v39 = vadd.f32 %v12712_v41, %v5681_v30  ;;  %v5683_v22 = vpop.f32.mrb[187].mxu0  ;;  %v5876_v5 = vpop.f32.mrb[187].mxu1  ;;  %8650 = vmatprep.subr.bf16.mxu0 %v9573_v43  ;;  %8678 = vmatprep.subr.bf16.mxu1 %v9574_v10 }
 0x4e2   :  { %v6280_v2 = vmax.f32 %v6152_v36, 0.0  ;;  %v6282_v26 = vmax.f32 %v6154_v7, 0.0  ;;  %v6157_v3 = vadd.f32 %v12716_v12, %v5874_v56  ;;  %v6156_v38 = vadd.f32 %v12720_v58, %v5683_v22 }
 0x4e3   :  { %v6833_v50 = vcombine.low %v6385_v55, %v6386_v25  ;;  %v6834_v19 = vcombine.high %v6385_v55, %v6386_v25  ;;  %v6283_v13 = vmax.f32 %v6155_v39, 0.0  ;;  %v6158_v52 = vadd.f32 %v12724_v29, %v5876_v5  ;;  %8651 = vmatpush3.bf16.msra.mxu0 %v9575_v47 }
 0x4e4   :  { %v6323_v31 = vmax.f32 %v6279_v8, %v6280_v2  ;;  %v6355_v0 = vmax.f32 %v6281_v57, %v6282_v26  ;;  %v6285_v62 = vmax.f32 %v6157_v3, 0.0  ;;  %v6284_v54 = vmax.f32 %v6156_v38, 0.0  ;;  %8679 = vmatpush3.bf16.msra.mxu1 %v9576_v34  ;;  %8698 = vmatprep.subr.bf16.mxu0 %v9577_v6 }
 0x4e5   :  { %v13200_v43 = vrot.slane %v6833_v50, %v12753_v32  ;;  %v13203_v10 = vrot.slane %v6834_v19, %v12753_v32  ;;  %v6286_v36 = vmax.f32 %v6158_v52, 0.0  ;;  %v6693_v7 = vcombine.low %v12962_v17, %v13179_v28 }
 0x4e6   :  { %v13207_v55 = vmax.f32 %v6323_v31, %v6355_v0  ;;  %v6324_v30 = vmax.f32 %v6283_v13, %v6284_v54  ;;  %v5687_v56 = vpop.f32.mrb[188].mxu0  ;;  %v5880_v47 = vpop.f32.mrb[188].mxu1  ;;  %v6694_v25 = vcombine.high %v12962_v17, %v13179_v28  ;;  %v6689_v34 = vcombine.low %v12943_v53, %v13059_v42 }
 0x4e7   :  { %v6356_v8 = vmax.f32 %v6285_v62, %v6286_v36  ;;  %v6159_v57 = vadd.f32 %v12712_v41, %v5687_v56  ;;  %v6161_v39 = vadd.f32 %v12716_v12, %v5880_v47  ;;  %v5689_v22 = vpop.f32.mrb[189].mxu0  ;;  %v5882_v5 = vpop.f32.mrb[189].mxu1  ;;  %v6896_v2 = vcombine.high %v13170_v59, %v13200_v43 }
 0x4e8   :  { %v6160_v26 = vadd.f32 %v12720_v58, %v5689_v22  ;;  %v6162_v3 = vadd.f32 %v12724_v29, %v5882_v5  ;;  %v5691_v38 = vpop.f32.mrb[190].mxu0  ;;  %v5884_v50 = vpop.f32.mrb[190].mxu1  ;;  %v6895_v17 = vcombine.low %v13170_v59, %v13200_v43  ;;  %v13224_v28 = vpack.c.bf16 %v6693_v7, %v6557_v16 }
 0x4e9   :  { %v6388_v19 = vmax.f32 %v6324_v30, %v6356_v8  ;;  %v6287_v13 = vmax.f32 %v6159_v57, 0.0  ;;  %v6289_v52 = vmax.f32 %v6161_v39, 0.0  ;;  %v6163_v31 = vadd.f32 %v12712_v41, %v5691_v38  ;;  %v5693_v0 = vpop.f32.mrb[191].mxu0  ;;  %v5886_v62 = vpop.f32.mrb[191].mxu1 }
 0x4ea   :  { %v6288_v54 = vmax.f32 %v6160_v26, 0.0  ;;  %v6290_v36 = vmax.f32 %v6162_v3, 0.0  ;;  %v6165_v56 = vadd.f32 %v12716_v12, %v5884_v50  ;;  %v6164_v47 = vadd.f32 %v12720_v58, %v5693_v0 }
 0x4eb   :  { %v6835_v59 = vcombine.low %v13207_v55, %v6388_v19  ;;  %v6836_v43 = vcombine.high %v13207_v55, %v6388_v19  ;;  %v6291_v22 = vmax.f32 %v6163_v31, 0.0  ;;  %v6166_v16 = vadd.f32 %v12724_v29, %v5886_v62 }
 0x4ec   :  { %v6325_v7 = vmax.f32 %v6287_v13, %v6288_v54  ;;  %v6357_v30 = vmax.f32 %v6289_v52, %v6290_v36  ;;  %v6293_v8 = vmax.f32 %v6165_v56, 0.0  ;;  %v6292_v57 = vmax.f32 %v6164_v47, 0.0 }
 0x4ed   :  { %v6716_v41 = vrot.slane %v6696_v23, %v12753_v32  ;;  %v6744_v12 = vrot.slane %v6700_v40, %v12753_v32  ;;  %v6294_v58 = vmax.f32 %v6166_v16, 0.0  ;;  %v6852_v29 = vrot.slane %v6832_v35, %v12753_v32 }
 0x4ee   :  { %v6389_v55 = vmax.f32 %v6325_v7, %v6357_v30  ;;  %v6326_v39 = vmax.f32 %v6291_v22, %v6292_v57  ;;  %v7006_v5 = vpack.c.bf16 %v6694_v25, %v6558_v46  ;;  %v7003_v27 = vpack.c.bf16 %v6689_v34, %v6553_v49 }
 0x4ef   :  { %v6358_v26 = vmax.f32 %v6293_v8, %v6294_v58  ;;  %v6762_v23 = vcombine.high %v6716_v41, %v13069_v21  ;;  %v6766_v9 = vcombine.high %v6744_v12, %v13107_v11  ;;  %v6898_v63 = vcombine.high %v6852_v29, %v13203_v10 }
 0x4f0   :  { %v6761_v40 = vcombine.low %v6716_v41, %v13069_v21  ;;  %v6765_v48 = vcombine.low %v6744_v12, %v13107_v11  ;;  %v7005_v45 = vpack.c.bf16 %v6690_v20, %v6554_v37  ;;  %v6897_v49 = vcombine.low %v6852_v29, %v13203_v10 }
 0x4f1   :  { %v6390_v33 = vmax.f32 %v6326_v39, %v6358_v26  ;;  %v6794_v46 = vrot.slane %v6762_v23, %v12753_v32  ;;  %v6822_v53 = vrot.slane %v6766_v9, %v12753_v32  ;;  %v6873_v38 = vrot.slane %v6835_v59, %v12753_v32 }
 0x4f2   :  { %v6780_v42 = vrot.slane %v6761_v40, %v12753_v32  ;;  %v6808_v61 = vrot.slane %v6765_v48, %v12753_v32  ;;  %v6880_v60 = vrot.slane %v6836_v43, %v12753_v32  ;;  %v6923_v52 = vrot.slane %v6896_v2, %v12753_v32 }
 0x4f3   :  { %v6837_v35 = vcombine.low %v6389_v55, %v6390_v33  ;;  %v6838_v25 = vcombine.high %v6389_v55, %v6390_v33  ;;  %v6829_v21 = vcombine.low %v6794_v46, %v6822_v53  ;;  %v6830_v34 = vcombine.high %v6794_v46, %v6822_v53 }
 0x4f4   :  { %v6825_v11 = vcombine.low %v6780_v42, %v6808_v61  ;;  %v6826_v3 = vcombine.high %v6780_v42, %v6808_v61  ;;  %v6909_v31 = vrot.slane %v6895_v17, %v12753_v32  ;;  %v6930_v56 = vrot.slane %v6898_v63, %v12753_v32 }
 0x4f5   :  { %v6887_v15 = vrot.slane %v6837_v35, %v12753_v32  ;;  %v6894_v37 = vrot.slane %v6838_v25, %v12753_v32  ;;  %v6916_v47 = vrot.slane %v6897_v49, %v12753_v32 }
 0x4f7   :  { %v6900_v10 = vcombine.high %v6873_v38, %v6887_v15  ;;  %v6899_v50 = vcombine.low %v6873_v38, %v6887_v15  ;;  %v6902_v19 = vcombine.high %v6880_v60, %v6894_v37  ;;  %v6901_v13 = vcombine.low %v6880_v60, %v6894_v37 }
 0x4f9   :  { %v6951_v0 = vrot.slane %v6900_v10, %v12753_v32  ;;  %v6937_v62 = vrot.slane %v6899_v50, %v12753_v32  ;;  %v6958_v54 = vrot.slane %v6902_v19, %v12753_v32  ;;  %v6944_v36 = vrot.slane %v6901_v13, %v12753_v32 }
 0x4fb   :  { %v6963_v59 = vcombine.low %v6923_v52, %v6951_v0  ;;  %v6964_v43 = vcombine.high %v6923_v52, %v6951_v0  ;;  %v6959_v22 = vcombine.low %v6909_v31, %v6937_v62  ;;  %v6960_v16 = vcombine.high %v6909_v31, %v6937_v62 }
 0x4fc   :  { %v6965_v7 = vcombine.low %v6930_v56, %v6958_v54  ;;  %v6966_v2 = vcombine.high %v6930_v56, %v6958_v54  ;;  %v6961_v30 = vcombine.low %v6916_v47, %v6944_v36  ;;  %v6962_v17 = vcombine.high %v6916_v47, %v6944_v36 }
 0x4fd   :  { %v7008_v8 = vpack.c.bf16 %v6963_v59, %v6827_v4  ;;  %v7010_v57 = vpack.c.bf16 %v6964_v43, %v6828_v1  ;;  %v7007_v32 = vpack.c.bf16 %v6959_v22, %v6823_v18  ;;  %v7009_v41 = vpack.c.bf16 %v6960_v16, %v6824_v44  ;;  %v9580_v4 = vld [vmem:[%s13348_s7 + $0x18] ss:$0 sps:$4 sm:$0x11]   ;;  %v8508_v44 = vld [vmem:[%s13349_s6] ss:$0 sm:$0xff] }
 0x4fe   :  { %v7012_v12 = vpack.c.bf16 %v6965_v7, %v6829_v21  ;;  %v7014_v58 = vpack.c.bf16 %v6966_v2, %v6830_v34  ;;  %v7011_v29 = vpack.c.bf16 %v6961_v30, %v6825_v11  ;;  %v7013_v55 = vpack.c.bf16 %v6962_v17, %v6826_v3 }
 0x4ff   :  { %7574 = vmatprep.mubr.bf16.mxu0 %v7008_v8  ;;  %7623 = vmatprep.mubr.bf16.mxu1 %v7010_v57  ;;  %v7780_v1 = vsel %vm7778_vm3, %v9580_v4, 0 }
 0x500   :  { %7575 = vmatmul.mubr.bf16.gmra.mrb[196].mxu0 %v7007_v32  ;;  %7624 = vmatmul.mubr.bf16.gmra.mrb[196].mxu1 %v7009_v41 }
 0x501   :  { %7664 = vmatprep.mubr.bf16.mxu0 %v13224_v28  ;;  %7713 = vmatprep.mubr.bf16.mxu1 %v7006_v5 }
 0x508   :  { %7665 = vmatmul.mubr.bf16.vlgmr.msra.gmra.mrb[200].mxu0 %v7003_v27  ;;  %7714 = vmatmul.mubr.bf16.vlgmr.msra.gmra.mrb[200].mxu1 %v7005_v45 }
 0x509   :  { %7672 = vmatprep.mubr.bf16.mxu0 %v7012_v12  ;;  %7721 = vmatprep.mubr.bf16.mxu1 %v7014_v58 }
 0x50a   :  { %8699 = vmatpush3.bf16.msra.mxu0 %v9577_v6 }
 0x50b   :  { %8700 = vmatprep.subr.bf16.mxu0 %v9578_v24 }
 0x50e   :  { %8701 = vmatpush3.bf16.msra.mxu0 %v9578_v24 }
 0x50f   :  { %8702 = vmatprep.subr.bf16.mxu0 %v9579_v14 }
 0x510   :  { %7673 = vmatmul.mubr.bf16.gmra.mrb[204].mxu0 %v7011_v29  ;;  %7722 = vmatmul.mubr.bf16.gmra.mrb[204].mxu1 %v7013_v55 }
 0x512   :  { %8703 = vmatpush3.bf16.msra.mxu0 %v9579_v14 }
 0x513   :  { %9222 = vmatprep.subr.msk.bf16.mxu0 %vm7778_vm3, %v9580_v4 }
 0x516   :  { %8705 = vmatpush3.bf16.msra.mxu0 %v7780_v1 }
 0x599   :  { %v8596_v51 = vpop.f32.mrb[192].mxu0  ;;  %v8624_v18 = vpop.f32.mrb[192].mxu1 }
 0x59a   :  { %v8597_v28 = vpop.f32.mrb[193].mxu0  ;;  %v8625_v39 = vpop.f32.mrb[193].mxu1 }
 0x59b   :  { %v8598_v5 = vadd.f32 %v8597_v28, %v8596_v51  ;;  %v8626_v26 = vadd.f32 %v8625_v39, %v8624_v18  ;;  %v8599_v27 = vpop.f32.mrb[194].mxu0  ;;  %v8627_v20 = vpop.f32.mrb[194].mxu1 }
 0x59c   :  { %v8600_v23 = vpop.f32.mrb[195].mxu0  ;;  %v8628_v9 = vpop.f32.mrb[195].mxu1 }
 0x59d   :  { %v7569_v63 = vadd.f32 %v8598_v5, %v8508_v44  ;;  %v8601_v40 = vadd.f32 %v8600_v23, %v8599_v27  ;;  %v8629_v48 = vadd.f32 %v8628_v9, %v8627_v20  ;;  %v8573_v27 = vld [vmem:[%s13350_s8] ss:$0 sm:$0xff] }
 0x59f   :  { %v7618_v33 = vadd.f32 %v8626_v26, %v7569_v63  ;;  %v7572_v45 = vadd.f32 %v8601_v40, %v8508_v44 }
 0x5a1   :  { %v7621_v49 = vadd.f32 %v8629_v48, %v7572_v45 }
 0x5d3   :  { %v8602_v46 = vpop.f32.mrb[196].mxu0  ;;  %v8630_v53 = vpop.f32.mrb[196].mxu1 }
 0x5d4   :  { %v8603_v42 = vpop.f32.mrb[197].mxu0  ;;  %v8631_v61 = vpop.f32.mrb[197].mxu1 }
 0x5d5   :  { %v8604_v35 = vadd.f32 %v8603_v42, %v8602_v46  ;;  %v8632_v25 = vadd.f32 %v8631_v61, %v8630_v53  ;;  %v8605_v21 = vpop.f32.mrb[198].mxu0  ;;  %v8633_v34 = vpop.f32.mrb[198].mxu1 }
 0x5d6   :  { %v8606_v11 = vpop.f32.mrb[199].mxu0  ;;  %v8634_v3 = vpop.f32.mrb[199].mxu1 }
 0x5d7   :  { %v7577_v38 = vadd.f32 %v8604_v35, %v8508_v44  ;;  %v8607_v60 = vadd.f32 %v8606_v11, %v8605_v21  ;;  %v8635_v15 = vadd.f32 %v8634_v3, %v8633_v34 }
 0x5d9   :  { %v7626_v37 = vadd.f32 %v8632_v25, %v7577_v38  ;;  %v7580_v10 = vadd.f32 %v8607_v60, %v8508_v44 }
 0x5db   :  { %v7629_v50 = vadd.f32 %v8635_v15, %v7580_v10  ;;  %v8652_v19 = vpop.f32.mrb[200].mxu0  ;;  %v8680_v13 = vpop.f32.mrb[200].mxu1 }
 0x5dc   :  { %v8653_v52 = vpop.f32.mrb[201].mxu0  ;;  %v8681_v31 = vpop.f32.mrb[201].mxu1 }
 0x5dd   :  { %v8654_v0 = vadd.f32 %v8653_v52, %v8652_v19  ;;  %v8682_v62 = vadd.f32 %v8681_v31, %v8680_v13  ;;  %v8655_v54 = vpop.f32.mrb[202].mxu0  ;;  %v8683_v36 = vpop.f32.mrb[202].mxu1 }
 0x5de   :  { %v8656_v56 = vpop.f32.mrb[203].mxu0  ;;  %v8684_v47 = vpop.f32.mrb[203].mxu1 }
 0x5df   :  { %v7667_v59 = vadd.f32 %v8654_v0, %v7618_v33  ;;  %v8657_v43 = vadd.f32 %v8656_v56, %v8655_v54  ;;  %v8685_v22 = vadd.f32 %v8684_v47, %v8683_v36 }
 0x5e1   :  { %v7716_v16 = vadd.f32 %v8682_v62, %v7667_v59  ;;  %v7670_v7 = vadd.f32 %v8657_v43, %v7621_v49 }
 0x5e3   :  { %v7719_v2 = vadd.f32 %v8685_v22, %v7670_v7  ;;  %v8658_v30 = vpop.f32.mrb[204].mxu0  ;;  %v8686_v17 = vpop.f32.mrb[204].mxu1  ;;  %v7730_v32 = vmax.f32 %v7716_v16, 0.0 }
 0x5e4   :  { %v8659_v8 = vpop.f32.mrb[205].mxu0  ;;  %v8687_v57 = vpop.f32.mrb[205].mxu1 }
 0x5e5   :  { %v7731_v41 = vmax.f32 %v7719_v2, 0.0  ;;  %v8660_v12 = vadd.f32 %v8659_v8, %v8658_v30  ;;  %v8688_v58 = vadd.f32 %v8687_v57, %v8686_v17  ;;  %v8661_v29 = vpop.f32.mrb[206].mxu0  ;;  %v8689_v55 = vpop.f32.mrb[206].mxu1 }
 0x5e6   :  { %v8662_v6 = vpop.f32.mrb[207].mxu0  ;;  %v8690_v24 = vpop.f32.mrb[207].mxu1 }
 0x5e7   :  { %v7734_v14 = vpack.c.bf16 %v7731_v41, %v7730_v32  ;;  %v7675_v4 = vadd.f32 %v8660_v12, %v7626_v37  ;;  %v8663_v1 = vadd.f32 %v8662_v6, %v8661_v29  ;;  %v8691_v51 = vadd.f32 %v8690_v24, %v8689_v55 }
 0x5e9   :  { %v7724_v18 = vadd.f32 %v8688_v58, %v7675_v4  ;;  %v7678_v44 = vadd.f32 %v8663_v1, %v7629_v50  ;;  %8706 = vmatprep.mubr.msk.bf16.mxu0 %vm7771_vm4, %v7734_v14 }
 0x5eb   :  { %v7727_v28 = vadd.f32 %v8691_v51, %v7678_v44  ;;  %v7732_v39 = vmax.f32 %v7724_v18, 0.0 }
 0x5ed   :  { %v7733_v5 = vmax.f32 %v7727_v28, 0.0 }
 0x5ef   :  { %v7735_v26 = vpack.c.bf16 %v7733_v5, %v7732_v39 }
 0x5f1   :  { %8707 = vmatmul.mubr.msk.bf16.vlgmr.msra.gmra.mrb[208].mxu0 %vm7771_vm4, %v7735_v26 }
 0x6c4   :  { %v8708_v20 = vpop.f32.mrb[208].mxu0 }
 0x6c5   :  { %v13308_v23 = vadd.f32 %v8708_v20, %v8573_v27  ;;  %v7816_v9 = vpop.f32.mrb[209].mxu0 }
 0x6c6   :  { %v7817_v63 = vadd.f32 %v8573_v27, %v7816_v9  ;;  %v8709_v40 = vpop.f32.mrb[210].mxu0 }
 0x6c7   :  { %v13310_v48 = vadd.f32 %v8709_v40, %v8573_v27  ;;  %v7819_v33 = vpop.f32.mrb[211].mxu0  ;;  %v7838_v45 = vsel %vm7831_vm5, %v13308_v23, -inf }
 0x6c8   :  { %v7820_v49 = vadd.f32 %v8573_v27, %v7819_v33  ;;  %7839 = vmax.xlane.f32.xlu1 %v7838_v45  ;;  %v7832_v46 = vsel %vm7831_vm5, %v7817_v63, -inf }
 0x6c9   :  { %7833 = vmax.xlane.f32.xlu0 %v7832_v46  ;;  %v7841_v53 = vsel %vm7831_vm5, %v13310_v48, -inf }
 0x6ca   :  { %v7835_v42 = vsel %vm7831_vm5, %v7820_v49, -inf }
 0x6cc   :  { %7842 = vmax.xlane.f32.xlu1 %v7841_v53 }
 0x6cd   :  { %7836 = vmax.xlane.f32.xlu0 %v7835_v42 }
 0x755   :  { %v7840_v61 = vpop.xlane.xlu1 %7839 }
 0x756   :  { %v7846_v35 = vsub.f32 %v13308_v23, %v7840_v61  ;;  %v7834_v25 = vpop.xlane.xlu0 %7833 }
 0x757   :  { %v7844_v21 = vsub.f32 %v7817_v63, %v7834_v25 }
 0x758   :  { %v7852_v34 = vmul.f32 1.442695, %v7846_v35 }
 0x759   :  { %v7848_v11 = vmul.f32 1.442695, %v7844_v21  ;;  %v7843_v3 = vpop.xlane.xlu1 %7842 }
 0x75a   :  { %v7847_v38 = vsub.f32 %v13310_v48, %v7843_v3  ;;  %v7837_v60 = vpop.xlane.xlu0 %7836 }
 0x75b   :  { %9581 = vpow2.f32 %v7848_v11  ;;  %v7845_v15 = vsub.f32 %v7820_v49, %v7837_v60 }
 0x75c   :  { %9583 = vpow2.f32 %v7852_v34  ;;  %v7854_v37 = vmul.f32 1.442695, %v7847_v38 }
 0x75d   :  { %v7850_v10 = vmul.f32 1.442695, %v7845_v15 }
 0x75f   :  { %9585 = vpow2.f32 %v7850_v10 }
 0x760   :  { %9587 = vpow2.f32 %v7854_v37 }
 0x765   :  { %v9582_v50 = vpop.eup %9581 }
 0x766   :  { %v7856_v19 = vsel %vm7831_vm5, %v9582_v50, 0.0  ;;  %v9584_v13 = vpop.eup %9583 }
 0x767   :  { %7857 = vadd.xlane.f32.xlu0 %v7856_v19  ;;  %v7862_v31 = vsel %vm7831_vm5, %v9584_v13, 0.0 }
 0x769   :  { %v9586_v52 = vpop.eup %9585 }
 0x76a   :  { %v7859_v0 = vsel %vm7831_vm5, %v9586_v52, 0.0  ;;  %v9588_v62 = vpop.eup %9587 }
 0x76b   :  { %7863 = vadd.xlane.f32.xlu0 %v7862_v31  ;;  %7860 = vadd.xlane.f32.xlu1 %v7859_v0  ;;  %v7865_v54 = vsel %vm7831_vm5, %v9588_v62, 0.0 }
 0x76f   :  { %7866 = vadd.xlane.f32.xlu1 %v7865_v54 }
 0x7f4   :  { %v7858_v36 = vpop.xlane.xlu0 %7857 }
 0x7f5   :  { %9589 = vlog2.f32 %v7858_v36 }
 0x7f8   :  { %v7861_v56 = vpop.xlane.xlu1 %7860  ;;  %v7864_v47 = vpop.xlane.xlu0 %7863 }
 0x7f9   :  { %9591 = vlog2.f32 %v7861_v56 }
 0x7fa   :  { %9593 = vlog2.f32 %v7864_v47 }
 0x7fc   :  { %v7867_v59 = vpop.xlane.xlu1 %7866 }
 0x7fd   :  { %9595 = vlog2.f32 %v7867_v59 }
 0x7ff   :  { %v9590_v43 = vpop.eup %9589 }
 0x800   :  { %v7869_v22 = vmul.f32 0.6931472, %v9590_v43 }
 0x802   :  { %v7876_v16 = vadd.f32 %v7869_v22, %v7834_v25 }
 0x803   :  { %v9592_v7 = vpop.eup %9591 }
 0x804   :  { %v9594_v2 = vpop.eup %9593  ;;  %v7880_v30 = vsub.f32 %v7817_v63, %v7876_v16  ;;  %v7871_v17 = vmul.f32 0.6931472, %v9592_v7 }
 0x805   :  { %v7873_v8 = vmul.f32 0.6931472, %v9594_v2 }
 0x806   :  { %7884 = vst.msk [vmem:[%s13351_s9] sm:$0xff] %vm7831_vm5, %v7880_v30  ;;  %v7877_v57 = vadd.f32 %v7871_v17, %v7837_v60 }
 0x807   :  { %v9596_v32 = vpop.eup %9595  ;;  %v7878_v41 = vadd.f32 %v7873_v8, %v7840_v61 }
 0x808   :  { %v7881_v12 = vsub.f32 %v7820_v49, %v7877_v57  ;;  %v7875_v58 = vmul.f32 0.6931472, %v9596_v32 }
 0x809   :  { %v7882_v29 = vsub.f32 %v13308_v23, %v7878_v41 }
 0x80a   :  { %7885 = vst.msk [vmem:[%s13351_s9 + $0x8] sm:$0xff] %vm7831_vm5, %v7881_v12  ;;  %v7879_v55 = vadd.f32 %v7875_v58, %v7843_v3 }
 0x80b   :  { %7886 = vst.msk [vmem:[%s13351_s9 + $0x10] sm:$0xff] %vm7831_vm5, %v7882_v29 }
 0x80c   :  { %v7883_v6 = vsub.f32 %v13310_v48, %v7879_v55 }
 0x80e   :  { %7887 = vst.msk [vmem:[%s13351_s9 + $0x18] sm:$0xff] %vm7831_vm5, %v7883_v6 }

</bundles_post_ra>
